<compile_context>
chip_gen: v7x
topology: tpu7x:2x2x1
jax: 0.10.0
libtpu: 0.0.40
codegen_flags: <defaults>
</compile_context>

<pallas_src>
import jax
import jax.numpy as jnp
from jax.experimental import pallas as pl
from jax.experimental.pallas import tpu as pltpu

# ----------------------------- configuration --------------------------------
IMG_SHAPE = (1, 16, 16)          # (C, H, W) -> prod = 256
IMG_FLAT = 1 * 16 * 16
Z_DIM = 100                      # latent_dim
Z_PAD = 128                      # K dim padded to a full lane tile
BATCH = 256                      # one full 256-row tile -> single grid step
TB = 256                         # batch tile (rows per grid step)
NEG_SLOPE = 0.2                  # LeakyReLU(0.2)
BN_EPS = 0.8                     # nn.BatchNorm1d(out_feat, 0.8) -> eps = 0.8


# ------------------------------- kernel -------------------------------------
def generator_kernel(z_ref, w1, b1, w2, b2, w3, b3, w4, b4, w5, b5, img_ref):
    """One batch tile [TB, Z_PAD] -> [TB, IMG_FLAT].

    Weights are bf16 (BN folded), biases f32.  Matmuls run on the MXU with f32
    accumulation; inter-layer activations are carried in bf16 to halve the
    VMEM store/load traffic of the wide intermediates.
    """

    def linear(x_bf16, w_ref, b_ref):
        return jnp.dot(x_bf16, w_ref[...],
                       preferred_element_type=jnp.float32) + b_ref[...]

    def leaky_bf16(x_f32):
        # LeakyReLU(0.2) computed in f32, stored/carried as bf16.
        return jnp.where(x_f32 > 0, x_f32, NEG_SLOPE * x_f32).astype(jnp.bfloat16)

    z = z_ref[...].astype(jnp.bfloat16)
    h = leaky_bf16(linear(z, w1, b1))              # 128 -> 128   (no BN)
    h = leaky_bf16(linear(h, w2, b2))              # 128 -> 256   (BN folded)
    h = leaky_bf16(linear(h, w3, b3))              # 256 -> 512   (BN folded)
    h = leaky_bf16(linear(h, w4, b4))              # 512 -> 1024  (BN folded)
    out = jnp.tanh(linear(h, w5, b5))              # 1024 -> IMG_FLAT, Tanh
    img_ref[...] = out.astype(img_ref.dtype)


# --------------------------- parameter setup ---------------------------------
def init_params(key):
    """PyTorch-style init: Linear U(+-1/sqrt(fan_in)); BN gamma=1, beta=0,
    running_mean=0, running_var=1. Weights stored as (in, out)."""

    def linear(k, fin, fout):
        k1, k2 = jax.random.split(k)
        bound = 1.0 / (fin ** 0.5)
        w = jax.random.uniform(k1, (fin, fout), jnp.float32, -bound, bound)
        b = jax.random.uniform(k2, (1, fout), jnp.float32, -bound, bound)
        return w, b

    def bn(fout):
        return (jnp.ones((1, fout), jnp.float32),    # gamma
                jnp.zeros((1, fout), jnp.float32),   # beta
                jnp.zeros((1, fout), jnp.float32),   # running_mean
                jnp.ones((1, fout), jnp.float32))    # running_var

    keys = jax.random.split(key, 5)
    layers = []
    w, b = linear(keys[0], Z_DIM, 128)
    layers.append((w, b, None))                                  # block 1 (no BN)
    for k, (fin, fout) in zip(keys[1:4], [(128, 256), (256, 512), (512, 1024)]):
        w, b = linear(k, fin, fout)
        layers.append((w, b, bn(fout)))                          # blocks 2-4
    w, b = linear(keys[4], 1024, IMG_FLAT)
    layers.append((w, b, None))                                  # final Linear
    return layers


def prepare_params(layers):
    """Fold eval-mode BN into the preceding Linear, zero-pad the first layer's
    K dim to Z_PAD, cast weights to bf16 (biases stay f32)."""
    flat = []
    for idx, (w, b, bn_params) in enumerate(layers):
        if bn_params is not None:
            gamma, beta, mean, var = bn_params
            inv = gamma * jax.lax.rsqrt(var + BN_EPS)            # [1, out]
            w = w * inv
            b = (b - mean) * inv + beta
        if idx == 0 and w.shape[0] < Z_PAD:
            # Zero rows 100..127: any junk in the padded z columns is nulled.
            w = jnp.pad(w, ((0, Z_PAD - w.shape[0]), (0, 0)))
        flat.append(w.astype(jnp.bfloat16))
        flat.append(b.astype(jnp.float32))
    return flat


# ------------------------------ wrapper --------------------------------------
def generator_forward(z, flat_params, *, tb=TB, out_dtype=jnp.float32):
    batch, zdim = z.shape
    if zdim < Z_PAD:
        # Fallback for callers handing in (B, 100); fast path is width Z_PAD.
        z = jnp.pad(z, ((0, 0), (0, Z_PAD - zdim)))
    pad_rows = (-batch) % tb
    if pad_rows:
        z = jnp.pad(z, ((0, pad_rows), (0, 0)))
    pb = batch + pad_rows
    n_tiles = pb // tb

    in_specs = [pl.BlockSpec((tb, Z_PAD), lambda i: (i, 0))]
    for p in flat_params:
        # Full-extent weight/bias blocks; constant block index -> VMEM-resident.
        in_specs.append(pl.BlockSpec(p.shape, lambda i: (0, 0)))

    weight_shapes = [flat_params[j].shape for j in range(0, len(flat_params), 2)]
    flops = 2 * pb * sum(k * n for (k, n) in weight_shapes)
    bytes_accessed = (z.size * z.dtype.itemsize
                      + sum(int(p.size) * p.dtype.itemsize for p in flat_params)
                      + pb * IMG_FLAT * jnp.dtype(out_dtype).itemsize)
    cost = pl.CostEstimate(flops=int(flops),
                           transcendentals=int(pb * IMG_FLAT),   # tanh
                           bytes_accessed=int(bytes_accessed))

    img_flat = pl.pallas_call(
        generator_kernel,
        out_shape=jax.ShapeDtypeStruct((pb, IMG_FLAT), out_dtype),
        grid=(n_tiles,),
        in_specs=in_specs,
        out_specs=pl.BlockSpec((tb, IMG_FLAT), lambda i: (i, 0)),
        compiler_params=pltpu.CompilerParams(
            dimension_semantics=("parallel",),        # v7x: tiles split over 2 TCs
            vmem_limit_bytes=16 * 1024 * 1024),       # footprint ~7 MiB
        cost_estimate=cost,
    )(z, *flat_params)

    img_flat = img_flat[:batch]
    # PyTorch: gen_out.view(B, *img_shape)
    return img_flat.reshape(batch, *IMG_SHAPE)


# ----------------------------- pure-JAX reference ----------------------------
def generator_reference(z, flat_params):
    """f32-activation reference using the same folded (bf16) weights."""
    if z.shape[1] < Z_PAD:
        z = jnp.pad(z, ((0, 0), (0, Z_PAD - z.shape[1])))
    h = z.astype(jnp.float32)
    params = [(flat_params[i].astype(jnp.float32), flat_params[i + 1])
              for i in range(0, len(flat_params), 2)]
    for w, b in params[:-1]:
        h = h @ w + b
        h = jnp.where(h > 0, h, NEG_SLOPE * h)
    w, b = params[-1]
    out = jnp.tanh(h @ w + b)
    return out.reshape(z.shape[0], *IMG_SHAPE)


# -------------------------------- main ----------------------------------------
if __name__ == "__main__":
    key = jax.random.PRNGKey(0)
    k_z, k_p = jax.random.split(key)
    # z generated directly at the padded width (avoids a host-side pad copy);
    # only z[:, :Z_DIM] is the "latent" -- the tail columns multiply the
    # zero-padded rows of W1 and cannot affect the output.
    z = jax.random.normal(k_z, (BATCH, Z_PAD), jnp.float32)
    flat_params = prepare_params(init_params(k_p))

    img = generator_forward(z, flat_params)
    jax.block_until_ready(img)

    assert img.shape == (BATCH, *IMG_SHAPE)
    assert bool(jnp.all(jnp.isfinite(img)))
    assert bool(jnp.all((img >= -1.0) & (img <= 1.0)))            # Tanh range

    ref = generator_reference(z, flat_params)
    max_diff = float(jnp.max(jnp.abs(img.astype(jnp.float32) - ref)))
    assert max_diff < 3e-2, f"mismatch vs reference: {max_diff}"  # bf16 tolerance

    print("KERNEL_OK")
</pallas_src>

<mosaic_0001>
module attributes {stable_mosaic.version = 11 : i64} {
  func.func @generator_kernel(%arg0: i32, %arg1: memref<256x128xf32, #tpu.memory_space<vmem>>, %arg2: memref<128x128xbf16, #tpu.memory_space<vmem>>, %arg3: memref<1x128xf32, #tpu.memory_space<vmem>>, %arg4: memref<128x256xbf16, #tpu.memory_space<vmem>>, %arg5: memref<1x256xf32, #tpu.memory_space<vmem>>, %arg6: memref<256x512xbf16, #tpu.memory_space<vmem>>, %arg7: memref<1x512xf32, #tpu.memory_space<vmem>>, %arg8: memref<512x1024xbf16, #tpu.memory_space<vmem>>, %arg9: memref<1x1024xf32, #tpu.memory_space<vmem>>, %arg10: memref<1024x256xbf16, #tpu.memory_space<vmem>>, %arg11: memref<1x256xf32, #tpu.memory_space<vmem>>, %arg12: memref<256x256xf32, #tpu.memory_space<vmem>>) attributes {dimension_semantics = [#tpu.dimension_semantics<parallel>], iteration_bounds = array<i64: 1>, scalar_prefetch = 0 : i64, scratch_operands = 0 : i64, tpu.core_type = #tpu.core_type<tc>, window_params = [{transform_indices = @transform_0, window_bounds = array<i64: 256, 128>}, {pipeline_mode = #tpu.pipeline_mode<synchronous>, transform_indices = @transform_1, window_bounds = array<i64: 128, 128>}, {pipeline_mode = #tpu.pipeline_mode<synchronous>, transform_indices = @transform_2, window_bounds = array<i64: 1, 128>}, {pipeline_mode = #tpu.pipeline_mode<synchronous>, transform_indices = @transform_3, window_bounds = array<i64: 128, 256>}, {pipeline_mode = #tpu.pipeline_mode<synchronous>, transform_indices = @transform_4, window_bounds = array<i64: 1, 256>}, {pipeline_mode = #tpu.pipeline_mode<synchronous>, transform_indices = @transform_5, window_bounds = array<i64: 256, 512>}, {pipeline_mode = #tpu.pipeline_mode<synchronous>, transform_indices = @transform_6, window_bounds = array<i64: 1, 512>}, {pipeline_mode = #tpu.pipeline_mode<synchronous>, transform_indices = @transform_7, window_bounds = array<i64: 512, 1024>}, {pipeline_mode = #tpu.pipeline_mode<synchronous>, transform_indices = @transform_8, window_bounds = array<i64: 1, 1024>}, {pipeline_mode = #tpu.pipeline_mode<synchronous>, transform_indices = @transform_9, window_bounds = array<i64: 1024, 256>}, {pipeline_mode = #tpu.pipeline_mode<synchronous>, transform_indices = @transform_10, window_bounds = array<i64: 1, 256>}, {transform_indices = @transform_11, window_bounds = array<i64: 256, 256>}]} {
    %c0 = arith.constant 0 : index
    %c0_0 = arith.constant 0 : index
    %0 = vector.load %arg1[%c0, %c0_0] : memref<256x128xf32, #tpu.memory_space<vmem>>, vector<256x128xf32>
    %1 = arith.truncf %0 : vector<256x128xf32> to vector<256x128xbf16>
    %c0_1 = arith.constant 0 : index
    %c0_2 = arith.constant 0 : index
    %2 = vector.load %arg2[%c0_1, %c0_2] : memref<128x128xbf16, #tpu.memory_space<vmem>>, vector<128x128xbf16>
    %cst = arith.constant dense<0.000000e+00> : vector<256x128xf32>
    %3 = tpu.matmul %1, %2, %cst {dimension_numbers = #tpu.dot_dimension_numbers<[1], [0], [0], [1], [0, 0, 1, 1], [], []>} : vector<256x128xbf16>, vector<128x128xbf16>, vector<256x128xf32> -> vector<256x128xf32>
    %c0_3 = arith.constant 0 : index
    %c0_4 = arith.constant 0 : index
    %4 = vector.load %arg3[%c0_3, %c0_4] : memref<1x128xf32, #tpu.memory_space<vmem>>, vector<1x128xf32>
    %5 = vector.broadcast %4 : vector<1x128xf32> to vector<256x128xf32>
    %6 = arith.addf %3, %5 : vector<256x128xf32>
    %cst_5 = arith.constant 0.000000e+00 : f32
    %7 = vector.broadcast %cst_5 : f32 to vector<256x128xf32>
    %8 = arith.cmpf ogt, %6, %7 : vector<256x128xf32>
    %cst_6 = arith.constant 2.000000e-01 : f32
    %9 = vector.broadcast %cst_6 : f32 to vector<256x128xf32>
    %10 = arith.mulf %9, %6 : vector<256x128xf32>
    %11 = arith.select %8, %6, %10 : vector<256x128xi1>, vector<256x128xf32>
    %12 = arith.truncf %11 : vector<256x128xf32> to vector<256x128xbf16>
    %c0_7 = arith.constant 0 : index
    %c0_8 = arith.constant 0 : index
    %13 = vector.load %arg4[%c0_7, %c0_8] : memref<128x256xbf16, #tpu.memory_space<vmem>>, vector<128x256xbf16>
    %cst_9 = arith.constant dense<0.000000e+00> : vector<256x256xf32>
    %14 = tpu.matmul %12, %13, %cst_9 {dimension_numbers = #tpu.dot_dimension_numbers<[1], [0], [0], [1], [0, 0, 1, 1], [], []>} : vector<256x128xbf16>, vector<128x256xbf16>, vector<256x256xf32> -> vector<256x256xf32>
    %c0_10 = arith.constant 0 : index
    %c0_11 = arith.constant 0 : index
    %15 = vector.load %arg5[%c0_10, %c0_11] : memref<1x256xf32, #tpu.memory_space<vmem>>, vector<1x256xf32>
    %16 = vector.broadcast %15 : vector<1x256xf32> to vector<256x256xf32>
    %17 = arith.addf %14, %16 : vector<256x256xf32>
    %cst_12 = arith.constant 0.000000e+00 : f32
    %18 = vector.broadcast %cst_12 : f32 to vector<256x256xf32>
    %19 = arith.cmpf ogt, %17, %18 : vector<256x256xf32>
    %cst_13 = arith.constant 2.000000e-01 : f32
    %20 = vector.broadcast %cst_13 : f32 to vector<256x256xf32>
    %21 = arith.mulf %20, %17 : vector<256x256xf32>
    %22 = arith.select %19, %17, %21 : vector<256x256xi1>, vector<256x256xf32>
    %23 = arith.truncf %22 : vector<256x256xf32> to vector<256x256xbf16>
    %c0_14 = arith.constant 0 : index
    %c0_15 = arith.constant 0 : index
    %24 = vector.load %arg6[%c0_14, %c0_15] : memref<256x512xbf16, #tpu.memory_space<vmem>>, vector<256x512xbf16>
    %cst_16 = arith.constant dense<0.000000e+00> : vector<256x512xf32>
    %25 = tpu.matmul %23, %24, %cst_16 {dimension_numbers = #tpu.dot_dimension_numbers<[1], [0], [0], [1], [0, 0, 1, 1], [], []>} : vector<256x256xbf16>, vector<256x512xbf16>, vector<256x512xf32> -> vector<256x512xf32>
    %c0_17 = arith.constant 0 : index
    %c0_18 = arith.constant 0 : index
    %26 = vector.load %arg7[%c0_17, %c0_18] : memref<1x512xf32, #tpu.memory_space<vmem>>, vector<1x512xf32>
    %27 = vector.broadcast %26 : vector<1x512xf32> to vector<256x512xf32>
    %28 = arith.addf %25, %27 : vector<256x512xf32>
    %cst_19 = arith.constant 0.000000e+00 : f32
    %29 = vector.broadcast %cst_19 : f32 to vector<256x512xf32>
    %30 = arith.cmpf ogt, %28, %29 : vector<256x512xf32>
    %cst_20 = arith.constant 2.000000e-01 : f32
    %31 = vector.broadcast %cst_20 : f32 to vector<256x512xf32>
    %32 = arith.mulf %31, %28 : vector<256x512xf32>
    %33 = arith.select %30, %28, %32 : vector<256x512xi1>, vector<256x512xf32>
    %34 = arith.truncf %33 : vector<256x512xf32> to vector<256x512xbf16>
    %c0_21 = arith.constant 0 : index
    %c0_22 = arith.constant 0 : index
    %35 = vector.load %arg8[%c0_21, %c0_22] : memref<512x1024xbf16, #tpu.memory_space<vmem>>, vector<512x1024xbf16>
    %cst_23 = arith.constant dense<0.000000e+00> : vector<256x1024xf32>
    %36 = tpu.matmul %34, %35, %cst_23 {dimension_numbers = #tpu.dot_dimension_numbers<[1], [0], [0], [1], [0, 0, 1, 1], [], []>} : vector<256x512xbf16>, vector<512x1024xbf16>, vector<256x1024xf32> -> vector<256x1024xf32>
    %c0_24 = arith.constant 0 : index
    %c0_25 = arith.constant 0 : index
    %37 = vector.load %arg9[%c0_24, %c0_25] : memref<1x1024xf32, #tpu.memory_space<vmem>>, vector<1x1024xf32>
    %38 = vector.broadcast %37 : vector<1x1024xf32> to vector<256x1024xf32>
    %39 = arith.addf %36, %38 : vector<256x1024xf32>
    %cst_26 = arith.constant 0.000000e+00 : f32
    %40 = vector.broadcast %cst_26 : f32 to vector<256x1024xf32>
    %41 = arith.cmpf ogt, %39, %40 : vector<256x1024xf32>
    %cst_27 = arith.constant 2.000000e-01 : f32
    %42 = vector.broadcast %cst_27 : f32 to vector<256x1024xf32>
    %43 = arith.mulf %42, %39 : vector<256x1024xf32>
    %44 = arith.select %41, %39, %43 : vector<256x1024xi1>, vector<256x1024xf32>
    %45 = arith.truncf %44 : vector<256x1024xf32> to vector<256x1024xbf16>
    %c0_28 = arith.constant 0 : index
    %c0_29 = arith.constant 0 : index
    %46 = vector.load %arg10[%c0_28, %c0_29] : memref<1024x256xbf16, #tpu.memory_space<vmem>>, vector<1024x256xbf16>
    %cst_30 = arith.constant dense<0.000000e+00> : vector<256x256xf32>
    %47 = tpu.matmul %45, %46, %cst_30 {dimension_numbers = #tpu.dot_dimension_numbers<[1], [0], [0], [1], [0, 0, 1, 1], [], []>} : vector<256x1024xbf16>, vector<1024x256xbf16>, vector<256x256xf32> -> vector<256x256xf32>
    %c0_31 = arith.constant 0 : index
    %c0_32 = arith.constant 0 : index
    %48 = vector.load %arg11[%c0_31, %c0_32] : memref<1x256xf32, #tpu.memory_space<vmem>>, vector<1x256xf32>
    %49 = vector.broadcast %48 : vector<1x256xf32> to vector<256x256xf32>
    %50 = arith.addf %47, %49 : vector<256x256xf32>
    %51 = math.tanh %50 : vector<256x256xf32>
    %c0_33 = arith.constant 0 : index
    %c0_34 = arith.constant 0 : index
    %52 = vector.load %arg12[%c0_33, %c0_34] : memref<256x256xf32, #tpu.memory_space<vmem>>, vector<256x256xf32>
    tpu.vector_store %arg12[%c0_33, %c0_34], %51 {strides = array<i32>} : memref<256x256xf32, #tpu.memory_space<vmem>>, vector<256x256xf32>,
    return
  }
  func.func @transform_0(%arg0: i32) -> (i32, i32) {
    %c0_i32 = arith.constant 0 : i32
    %c0_i32_0 = arith.constant 0 : i32
    return %arg0, %c0_i32 : i32, i32
  }
  func.func @transform_1(%arg0: i32) -> (i32, i32) {
    %c0_i32 = arith.constant 0 : i32
    %c0_i32_0 = arith.constant 0 : i32
    %c0_i32_1 = arith.constant 0 : i32
    return %c0_i32, %c0_i32_0 : i32, i32
  }
  func.func @transform_2(%arg0: i32) -> (i32, i32) {
    %c0_i32 = arith.constant 0 : i32
    %c0_i32_0 = arith.constant 0 : i32
    %c0_i32_1 = arith.constant 0 : i32
    return %c0_i32, %c0_i32_0 : i32, i32
  }
  func.func @transform_3(%arg0: i32) -> (i32, i32) {
    %c0_i32 = arith.constant 0 : i32
    %c0_i32_0 = arith.constant 0 : i32
    %c0_i32_1 = arith.constant 0 : i32
    return %c0_i32, %c0_i32_0 : i32, i32
  }
  func.func @transform_4(%arg0: i32) -> (i32, i32) {
    %c0_i32 = arith.constant 0 : i32
    %c0_i32_0 = arith.constant 0 : i32
    %c0_i32_1 = arith.constant 0 : i32
    return %c0_i32, %c0_i32_0 : i32, i32
  }
  func.func @transform_5(%arg0: i32) -> (i32, i32) {
    %c0_i32 = arith.constant 0 : i32
    %c0_i32_0 = arith.constant 0 : i32
    %c0_i32_1 = arith.constant 0 : i32
    return %c0_i32, %c0_i32_0 : i32, i32
  }
  func.func @transform_6(%arg0: i32) -> (i32, i32) {
    %c0_i32 = arith.constant 0 : i32
    %c0_i32_0 = arith.constant 0 : i32
    %c0_i32_1 = arith.constant 0 : i32
    return %c0_i32, %c0_i32_0 : i32, i32
  }
  func.func @transform_7(%arg0: i32) -> (i32, i32) {
    %c0_i32 = arith.constant 0 : i32
    %c0_i32_0 = arith.constant 0 : i32
    %c0_i32_1 = arith.constant 0 : i32
    return %c0_i32, %c0_i32_0 : i32, i32
  }
  func.func @transform_8(%arg0: i32) -> (i32, i32) {
    %c0_i32 = arith.constant 0 : i32
    %c0_i32_0 = arith.constant 0 : i32
    %c0_i32_1 = arith.constant 0 : i32
    return %c0_i32, %c0_i32_0 : i32, i32
  }
  func.func @transform_9(%arg0: i32) -> (i32, i32) {
    %c0_i32 = arith.constant 0 : i32
    %c0_i32_0 = arith.constant 0 : i32
    %c0_i32_1 = arith.constant 0 : i32
    return %c0_i32, %c0_i32_0 : i32, i32
  }
  func.func @transform_10(%arg0: i32) -> (i32, i32) {
    %c0_i32 = arith.constant 0 : i32
    %c0_i32_0 = arith.constant 0 : i32
    %c0_i32_1 = arith.constant 0 : i32
    return %c0_i32, %c0_i32_0 : i32, i32
  }
  func.func @transform_11(%arg0: i32) -> (i32, i32) {
    %c0_i32 = arith.constant 0 : i32
    %c0_i32_0 = arith.constant 0 : i32
    return %arg0, %c0_i32 : i32, i32
  }
}

</mosaic_0001>

<bundles_post_ra>
// kernel: tpu_custom_call.1
= control target key start
LH: loop header
LB: loop body
LE: loop exit
PB: predicated region body
PF: predicated region fallthrough
CT: control target
= control target key end

     0   :  { %16 = vsyncpa [#allocation3], 0  ;;  %s13742_s0 = inlined_call_operand.hbm [shape: f32[256,128], index: 0, kind: input, shape index: {}]   ;;  %s13743_s1 = inlined_call_operand.hbm [shape: bf16[128,128], index: 1, kind: input, shape index: {}]   ;;  %s13744_s2 = inlined_call_operand.vmem [shape: f32[1,128], index: 2, kind: input, shape index: {}]   ;;  %s13745_s3 = inlined_call_operand.hbm [shape: bf16[128,256], index: 3, kind: input, shape index: {}]   ;;  %s13746_s4 = inlined_call_operand.vmem [shape: f32[1,256], index: 4, kind: input, shape index: {}]   ;;  %s13747_s5 = inlined_call_operand.hbm [shape: bf16[256,512], index: 5, kind: input, shape index: {}]   ;;  %s13748_s6 = inlined_call_operand.vmem [shape: f32[1,512], index: 6, kind: input, shape index: {}]   ;;  %s13749_s7 = inlined_call_operand.hbm [shape: bf16[512,1024], index: 7, kind: input, shape index: {}]   ;;  %s13750_s8 = inlined_call_operand.vmem [shape: f32[1,1024], index: 8, kind: input, shape index: {}]   ;;  %s13751_s9 = inlined_call_operand.hbm [shape: bf16[1024,256], index: 9, kind: input, shape index: {}]   ;;  %s13752_s10 = inlined_call_operand.vmem [shape: f32[1,256], index: 10, kind: input, shape index: {}]   ;;  %s13753_s11 = inlined_call_operand.hbm [shape: f32[256,256], index: 11, kind: output, shape index: {}]  }
   0x1   :  { %17 = vsyncpa [#allocation6], 0 }
   0x2   :  { %18 = vsyncpa [#allocation9], 0 }
   0x3   :  { %19 = vsyncpa [#allocation12], 0 }
   0x4   :  { %20 = vsyncpa [#allocation4], 0  ;;  %s10004_s17 = smov [#allocation5]   ;;  %s9840_s21 = scalar_lea.hbm %s13743_s1, 1024 }
   0x5   :  { %s38_s18 = sshll.u32 %s10004_s17, 4  ;;  %p9841_p0 = scmp.ne.s32.totalorder %s13743_s1, %s9840_s21  ;;  %s39_s18 = int_to_ptr.vmem [resolvable:$true] %s38_s18 }
   0x6   :  { %p9844_p1 = scmp.lt.u32.totalorder %s9840_s21, %s13743_s1 }
   0x8   :  { %p9846_p2 = pnand %p9844_p1, %p9841_p0 }
   0xa   :  { %9849 = shalt.err (!%p9846_p2)
}
   0xb   :  { %s9850_s26 = scalar_lea.vmem %s39_s18, 1024  ;;  %p9855_p4 = scmp.lt.s32.totalorder %s39_s18, %s39_s18 }
   0xc   :  { %p9851_p3 = scmp.ne.s32.totalorder %s39_s18, %s9850_s26  ;;  %p9856_p5 = scmp.lt.s32.totalorder %s9850_s26, %s9850_s26 }
   0xe   :  { %p9857_p6 = por %p9856_p5, %p9855_p4 }
  0x10   :  { %p9858_p7 = pnand %p9857_p6, %p9851_p3 }
  0x12   :  { %9861 = shalt.err (!%p9858_p7)
}
  0x13   :  { %s10005_s27 = smov 64   ;;  %s10006_s28 = smov 4  }
  0x14   :  { %44 = dma.hbm_to_vmem [thread:$0]  %s13743_s1, 1024, %s39_s18, [#allocation6], %s10005_s27, %s10005_s27, %s10006_s28  }
  0x15   :  { %s10007_s12 = smov [#allocation8]   ;;  %s9862_s16 = scalar_lea.hbm %s13747_s5, 8192 }
  0x16   :  { %s66_s13 = sshll.u32 %s10007_s12, 4  ;;  %p9863_p8 = scmp.ne.s32.totalorder %s13747_s5, %s9862_s16  ;;  %s67_s13 = int_to_ptr.vmem [resolvable:$true] %s66_s13 }
  0x17   :  { %p9866_p9 = scmp.lt.u32.totalorder %s9862_s16, %s13747_s5 }
  0x19   :  { %p9868_p10 = pnand %p9866_p9, %p9863_p8 }
  0x1b   :  { %9871 = shalt.err (!%p9868_p10)
}
  0x1c   :  { %s9872_s22 = scalar_lea.vmem %s67_s13, 8192  ;;  %p9877_p12 = scmp.lt.s32.totalorder %s67_s13, %s67_s13 }
  0x1d   :  { %p9873_p11 = scmp.ne.s32.totalorder %s67_s13, %s9872_s22  ;;  %p9878_p13 = scmp.lt.s32.totalorder %s9872_s22, %s9872_s22 }
  0x1f   :  { %p9879_p0 = por %p9878_p13, %p9877_p12 }
  0x21   :  { %p9880_p1 = pnand %p9879_p0, %p9873_p11 }
  0x23   :  { %9883 = shalt.err (!%p9880_p1)
}
  0x24   :  { %s10008_s1 = smov 256   ;;  %s10009_s18 = smov 16  }
  0x25   :  { %72 = dma.hbm_to_vmem [thread:$0]  %s13747_s5, 8192, %s67_s13, [#allocation9], %s10008_s1, %s10008_s1, %s10009_s18  }
  0x26   :  { %s10010_s25 = smov [#allocation2]   ;;  %s9884_s29 = scalar_lea.hbm %s13742_s0, 4096 }
  0x27   :  { %s26_s26 = sshll.u32 %s10010_s25, 4  ;;  %p9885_p2 = scmp.ne.s32.totalorder %s13742_s0, %s9884_s29  ;;  %s27_s26 = int_to_ptr.vmem [resolvable:$true] %s26_s26 }
  0x28   :  { %p9888_p3 = scmp.lt.u32.totalorder %s9884_s29, %s13742_s0 }
  0x2a   :  { %p9890_p4 = pnand %p9888_p3, %p9885_p2 }
  0x2c   :  { %9893 = shalt.err (!%p9890_p4)
}
  0x2d   :  { %s9894_s16 = scalar_lea.vmem %s27_s26, 4096  ;;  %p9899_p6 = scmp.lt.s32.totalorder %s27_s26, %s27_s26 }
  0x2e   :  { %p9895_p5 = scmp.ne.s32.totalorder %s27_s26, %s9894_s16  ;;  %p9900_p7 = scmp.lt.s32.totalorder %s9894_s16, %s9894_s16 }
  0x30   :  { %p9901_p8 = por %p9900_p7, %p9899_p6 }
  0x32   :  { %p9902_p9 = pnand %p9901_p8, %p9895_p5 }
  0x34   :  { %9905 = shalt.err (!%p9902_p9)
}
  0x35   :  { %s10011_s5 = smov 128   ;;  %s10012_s13 = smov 8  }
  0x36   :  { %32 = dma.hbm_to_vmem [thread:$0]  %s13742_s0, 4096, %s27_s26, [#allocation3], %s10011_s5, %s10011_s5, %s10012_s13  }
  0x37   :  { %s10013_s20 = smov [#allocation7]   ;;  %s10014_s22 = smov [#allocation10]  }
  0x38   :  { %s52_s21 = sshll.u32 %s10013_s20, 4  ;;  %s80_s23 = sshll.u32 %s10014_s22, 4  ;;  %s53_s21 = int_to_ptr.vmem [resolvable:$true] %s52_s21  ;;  %s81_s23 = int_to_ptr.vmem [resolvable:$true] %s80_s23 }
  0x39   :  { %s9906_s27 = scalar_lea.hbm %s13745_s3, 2048 }
  0x3a   :  { %p9907_p10 = scmp.ne.s32.totalorder %s13745_s3, %s9906_s27  ;;  %p9910_p11 = scmp.lt.u32.totalorder %s9906_s27, %s13745_s3 }
  0x3c   :  { %p9912_p12 = pnand %p9910_p11, %p9907_p10 }
  0x3e   :  { %9915 = shalt.err (!%p9912_p12)
}
  0x3f   :  { %s9916_s0 = scalar_lea.vmem %s53_s21, 2048  ;;  %p9921_p0 = scmp.lt.s32.totalorder %s53_s21, %s53_s21 }
  0x40   :  { %p9917_p13 = scmp.ne.s32.totalorder %s53_s21, %s9916_s0  ;;  %p9922_p1 = scmp.lt.s32.totalorder %s9916_s0, %s9916_s0 }
  0x42   :  { %p9923_p2 = por %p9922_p1, %p9921_p0 }
  0x44   :  { %p9924_p3 = pnand %p9923_p2, %p9917_p13 }
  0x46   :  { %9927 = shalt.err (!%p9924_p3)
}
  0x47   :  { %58 = dma.hbm_to_vmem [thread:$0]  %s13745_s3, 2048, %s53_s21, [#allocation6], %s10011_s5, %s10011_s5, %s10012_s13  }
  0x48   :  { %s9928_s17 = scalar_lea.hbm %s13749_s7, 32768 }
  0x49   :  { %p9929_p4 = scmp.ne.s32.totalorder %s13749_s7, %s9928_s17  ;;  %p9932_p5 = scmp.lt.u32.totalorder %s9928_s17, %s13749_s7 }
  0x4b   :  { %p9934_p6 = pnand %p9932_p5, %p9929_p4 }
  0x4d   :  { %9937 = shalt.err (!%p9934_p6)
}
  0x4e   :  { %s9938_s25 = scalar_lea.vmem %s81_s23, 32768  ;;  %p9943_p8 = scmp.lt.s32.totalorder %s81_s23, %s81_s23 }
  0x4f   :  { %p9939_p7 = scmp.ne.s32.totalorder %s81_s23, %s9938_s25  ;;  %p9944_p9 = scmp.lt.s32.totalorder %s9938_s25, %s9938_s25 }
  0x51   :  { %p9945_p10 = por %p9944_p9, %p9943_p8 }
  0x53   :  { %p9946_p11 = pnand %p9945_p10, %p9939_p7 }
  0x55   :  { %9949 = shalt.err (!%p9946_p11)
}
  0x56   :  { %s10015_s3 = smov 512   ;;  %s10016_s21 = smov 32  }
  0x57   :  { %86 = dma.hbm_to_vmem [thread:$0]  %s13749_s7, 32768, %s81_s23, [#allocation9], %s10015_s3, %s10015_s3, %s10016_s21  }
  0x58   :  { %s10017_s29 = smov [#allocation11]   ;;  %s9950_s26 = scalar_lea.hbm %s13751_s9, 16384 }
  0x59   :  { %s94_s30 = sshll.u32 %s10017_s29, 4  ;;  %p9951_p12 = scmp.ne.s32.totalorder %s13751_s9, %s9950_s26  ;;  %s95_s30 = int_to_ptr.vmem [resolvable:$true] %s94_s30 }
  0x5a   :  { %p9954_p13 = scmp.lt.u32.totalorder %s9950_s26, %s13751_s9 }
  0x5c   :  { %p9956_p0 = pnand %p9954_p13, %p9951_p12 }
  0x5e   :  { %9959 = shalt.err (!%p9956_p0)
}
  0x5f   :  { %s9960_s19 = scalar_lea.vmem %s95_s30, 16384  ;;  %p9965_p2 = scmp.lt.s32.totalorder %s95_s30, %s95_s30 }
  0x60   :  { %p9961_p1 = scmp.ne.s32.totalorder %s95_s30, %s9960_s19  ;;  %p9966_p3 = scmp.lt.s32.totalorder %s9960_s19, %s9960_s19 }
  0x62   :  { %p9967_p4 = por %p9966_p3, %p9965_p2 }
  0x64   :  { %p9968_p5 = pnand %p9967_p4, %p9961_p1 }
  0x66   :  { %9971 = shalt.err (!%p9968_p5)
}
  0x67   :  { %100 = dma.hbm_to_vmem [thread:$0]  %s13751_s9, 16384, %s95_s30, [#allocation12], %s10011_s5, %s10011_s5, %s10012_s13  }
  0x68   :  { %9994 = dma.done.wait [#allocation3], 4096  }
  0x69   :  { %9995 = vsyncadd [#allocation3], 4294963200 }
  0x6a   :  { %9996 = dma.done.wait [#allocation6], 3072  }
  0x6b   :  { %9997 = vsyncadd [#allocation6], 4294964224 }
  0x6c   :  { %9998 = dma.done.wait [#allocation9], 40960  }
  0x6d   :  { %9999 = vsyncadd [#allocation9], 4294926336 }
  0x6e   :  { %10000 = dma.done.wait [#allocation12], 16384  }
  0x6f   :  { %10001 = vsyncadd [#allocation12], 4294950912  ;;  %v9358_v0 = vld [vmem:[#allocation5] sm:$0xff]   ;;  %v9359_v1 = vld [vmem:[#allocation5 + $0x8] sm:$0xff]  }
  0x70   :  { %8494 = vmatprep.subr.bf16.mxu0 %v9358_v0  ;;  %v9360_v2 = vld [vmem:[#allocation5 + $0x10] sm:$0xff]   ;;  %v9361_v3 = vld [vmem:[#allocation5 + $0x18] sm:$0xff]   ;;  %v122_v4 = vld [vmem:[#allocation2] sm:$0xff] }
  0x71   :  { %8495 = vmatpush3.bf16.msra.mxu0 %v9358_v0  ;;  %v123_v5 = vld [vmem:[#allocation2 + $0x8] sm:$0xff]  ;;  %v9362_v7 = vld [vmem:[#allocation5 + $0x20] sm:$0xff]   ;;  %v9364_v9 = vld [vmem:[#allocation5 + $0x30] sm:$0xff]  }
  0x72   :  { %8496 = vmatprep.subr.bf16.mxu0 %v9359_v1  ;;  %v154_v6 = vpack.c.bf16 %v123_v5, %v122_v4  ;;  %v9363_v8 = vld [vmem:[#allocation5 + $0x28] sm:$0xff]   ;;  %v9369_v12 = vld [vmem:[#allocation7 + $0x14] ss:$8 sps:$4 sm:$0xff]   ;;  %v9371_v13 = vld [vmem:[#allocation7 + $0x10] ss:$8 sps:$4 sm:$0xff]  }
  0x73   :  { %v9366_v10 = vld [vmem:[#allocation7 + $0x4] ss:$8 sps:$4 sm:$0xff]   ;;  %v9368_v11 = vld [vmem:[#allocation7] ss:$8 sps:$4 sm:$0xff]   ;;  %v9365_v15 = vld [vmem:[#allocation5 + $0x38] sm:$0xff]  }
  0x74   :  { %8510 = vmatprep.mubr.bf16.mxu0 %v154_v6  ;;  %622 = vmatprep.subr.bf16.mxu1 %v9366_v10  ;;  %v9372_v14 = vld [vmem:[#allocation7 + $0x24] ss:$8 sps:$4 sm:$0xff]   ;;  %v124_v16 = vld [vmem:[#allocation2 + $0x10] sm:$0xff]  ;;  %v125_v17 = vld [vmem:[#allocation2 + $0x18] sm:$0xff] }
  0x75   :  { %8497 = vmatpush3.bf16.msra.mxu0 %v9359_v1  ;;  %623 = vmatpush1.bf16.msra.mxu1 %v9368_v11  ;;  %v9374_v18 = vld [vmem:[#allocation7 + $0x20] ss:$8 sps:$4 sm:$0xff]   ;;  %v9375_v21 = vld [vmem:[#allocation7 + $0x34] ss:$8 sps:$4 sm:$0xff]   ;;  %v9377_v22 = vld [vmem:[#allocation7 + $0x30] ss:$8 sps:$4 sm:$0xff]   ;;  %v155_v24 = vpack.c.bf16 %v125_v17, %v124_v16 }
  0x76   :  { %8498 = vmatprep.subr.bf16.mxu0 %v9360_v2  ;;  %624 = vmatprep.subr.bf16.mxu1 %v9369_v12  ;;  %v126_v19 = vld [vmem:[#allocation2 + $0x20] sm:$0xff]  ;;  %v127_v20 = vld [vmem:[#allocation2 + $0x28] sm:$0xff]  ;;  %v128_v27 = vld [vmem:[#allocation2 + $0x30] sm:$0xff] }
  0x77   :  { %v9378_v23 = vld [vmem:[#allocation7 + $0x44] ss:$8 sps:$4 sm:$0xff]   ;;  %v156_v25 = vpack.c.bf16 %v127_v20, %v126_v19  ;;  %v9380_v26 = vld [vmem:[#allocation7 + $0x40] ss:$8 sps:$4 sm:$0xff]   ;;  %v129_v28 = vld [vmem:[#allocation2 + $0x38] sm:$0xff] }
  0x78   :  { %v9381_v29 = vld [vmem:[#allocation7 + $0x54] ss:$8 sps:$4 sm:$0xff]   ;;  %v130_v30 = vld [vmem:[#allocation2 + $0x40] sm:$0xff]  ;;  %v131_v31 = vld [vmem:[#allocation2 + $0x48] sm:$0xff]  ;;  %v157_v32 = vpack.c.bf16 %v129_v28, %v128_v27 }
  0x79   :  { %8499 = vmatpush3.bf16.msra.mxu0 %v9360_v2  ;;  %625 = vmatpush1.bf16.msra.mxu1 %v9371_v13  ;;  %v158_v33 = vpack.c.bf16 %v131_v31, %v130_v30  ;;  %v132_v34 = vld [vmem:[#allocation2 + $0x50] sm:$0xff]  ;;  %v133_v35 = vld [vmem:[#allocation2 + $0x58] sm:$0xff]  ;;  %v134_v36 = vld [vmem:[#allocation2 + $0x60] sm:$0xff] }
  0x7a   :  { %8500 = vmatprep.subr.bf16.mxu0 %v9361_v3  ;;  %626 = vmatprep.subr.bf16.mxu1 %v9372_v14  ;;  %v135_v37 = vld [vmem:[#allocation2 + $0x68] sm:$0xff]  ;;  %v159_v38 = vpack.c.bf16 %v133_v35, %v132_v34  ;;  %v136_v40 = vld [vmem:[#allocation2 + $0x70] sm:$0xff]  ;;  %v137_v41 = vld [vmem:[#allocation2 + $0x78] sm:$0xff] }
  0x7b   :  { %v160_v39 = vpack.c.bf16 %v135_v37, %v134_v36  ;;  %v138_v42 = vld [vmem:[#allocation2 + $0x80] sm:$0xff]  ;;  %v139_v43 = vld [vmem:[#allocation2 + $0x88] sm:$0xff]  ;;  %v161_v44 = vpack.c.bf16 %v137_v41, %v136_v40  ;;  %v140_v46 = vld [vmem:[#allocation2 + $0x90] sm:$0xff] }
  0x7c   :  { %v162_v45 = vpack.c.bf16 %v139_v43, %v138_v42  ;;  %v141_v47 = vld [vmem:[#allocation2 + $0x98] sm:$0xff]  ;;  %v142_v48 = vld [vmem:[#allocation2 + $0xa0] sm:$0xff]  ;;  %v143_v49 = vld [vmem:[#allocation2 + $0xa8] sm:$0xff] }
  0x7d   :  { %8501 = vmatpush3.bf16.msra.mxu0 %v9361_v3  ;;  %627 = vmatpush1.bf16.msra.mxu1 %v9374_v18  ;;  %v163_v50 = vpack.c.bf16 %v141_v47, %v140_v46  ;;  %v164_v51 = vpack.c.bf16 %v143_v49, %v142_v48  ;;  %v144_v52 = vld [vmem:[#allocation2 + $0xb0] sm:$0xff]  ;;  %v145_v53 = vld [vmem:[#allocation2 + $0xb8] sm:$0xff]  ;;  %v146_v54 = vld [vmem:[#allocation2 + $0xc0] sm:$0xff] }
  0x7e   :  { %8502 = vmatprep.subr.bf16.mxu0 %v9362_v7  ;;  %628 = vmatprep.subr.bf16.mxu1 %v9375_v21  ;;  %v147_v55 = vld [vmem:[#allocation2 + $0xc8] sm:$0xff]  ;;  %v165_v56 = vpack.c.bf16 %v145_v53, %v144_v52  ;;  %v148_v58 = vld [vmem:[#allocation2 + $0xd0] sm:$0xff]  ;;  %v149_v59 = vld [vmem:[#allocation2 + $0xd8] sm:$0xff] }
  0x7f   :  { %v166_v57 = vpack.c.bf16 %v147_v55, %v146_v54  ;;  %v150_v60 = vld [vmem:[#allocation2 + $0xe0] sm:$0xff]  ;;  %v151_v61 = vld [vmem:[#allocation2 + $0xe8] sm:$0xff]  ;;  %v167_v62 = vpack.c.bf16 %v149_v59, %v148_v58  ;;  %v152_v0 = vld [vmem:[#allocation2 + $0xf0] sm:$0xff] }
  0x80   :  { %v168_v63 = vpack.c.bf16 %v151_v61, %v150_v60  ;;  %v153_v1 = vld [vmem:[#allocation2 + $0xf8] sm:$0xff]  ;;  %v9384_v4 = vld [vmem:[#allocation7 + $0x64] ss:$8 sps:$4 sm:$0xff]   ;;  %v9386_v5 = vld [vmem:[#allocation7 + $0x60] ss:$8 sps:$4 sm:$0xff]  }
  0x81   :  { %8503 = vmatpush3.bf16.msra.mxu0 %v9362_v7  ;;  %629 = vmatpush1.bf16.msra.mxu1 %v9377_v22  ;;  %v169_v2 = vpack.c.bf16 %v153_v1, %v152_v0  ;;  %v9383_v3 = vld [vmem:[#allocation7 + $0x50] ss:$8 sps:$4 sm:$0xff]   ;;  %v9387_v6 = vld [vmem:[#allocation7 + $0x74] ss:$8 sps:$4 sm:$0xff]   ;;  %v10168_v10 = vld [vmem:[%s13744_s2] ss:$0 sm:$0xff] }
  0x82   :  { %8504 = vmatprep.subr.bf16.mxu0 %v9363_v8  ;;  %630 = vmatprep.subr.bf16.mxu1 %v9378_v23  ;;  %v9389_v7 = vld [vmem:[#allocation7 + $0x70] ss:$8 sps:$4 sm:$0xff]   ;;  %v9401_v55 = vld [vmem:[#allocation8 + $0x64] ss:$16 sps:$4 sm:$0xff]  }
  0x83   :  { %v9393_v41 = vld [vmem:[#allocation8 + $0x20] ss:$16 sps:$4 sm:$0xff]  }
  0x85   :  { %8505 = vmatpush3.bf16.msra.mxu0 %v9363_v8  ;;  %631 = vmatpush1.bf16.msra.mxu1 %v9380_v26  ;;  %v10018_v8 = vmov 0  }
  0x86   :  { %8506 = vmatprep.subr.bf16.mxu0 %v9364_v9  ;;  %632 = vmatprep.subr.bf16.mxu1 %v9381_v29  ;;  %v9390_v29 = vld [vmem:[#allocation8] ss:$16 sps:$4 sm:$0xff]  }
  0x87   :  { %654 = vmatprep.mubr.bf16.mxu1 %v10018_v8 }
  0x89   :  { %8507 = vmatpush3.bf16.msra.mxu0 %v9364_v9  ;;  %633 = vmatpush1.bf16.msra.mxu1 %v9383_v3  ;;  %v9392_v9 = vld [vmem:[#allocation8 + $0x4] ss:$16 sps:$4 sm:$0xff]  }
  0x8a   :  { %8508 = vmatprep.subr.bf16.mxu0 %v9365_v15  ;;  %634 = vmatprep.subr.bf16.mxu1 %v9384_v4 }
  0x8d   :  { %8509 = vmatpush3.bf16.msra.mxu0 %v9365_v15  ;;  %635 = vmatpush1.bf16.msra.mxu1 %v9386_v5 }
  0x8e   :  { %636 = vmatprep.subr.bf16.mxu1 %v9387_v6 }
  0x90   :  { %8511 = vmatmul.mubr.bf16.vlgmr.msra.gmra.mrb[0].mxu0 %v155_v24 }
  0x91   :  { %8514 = vmatprep.mubr.bf16.mxu0 %v156_v25  ;;  %637 = vmatpush1.bf16.msra.mxu1 %v9389_v7 }
  0x92   :  { %1445 = vmatprep.subr.bf16.mxu1 %v9392_v9 }
  0x98   :  { %8515 = vmatmul.mubr.bf16.gmra.mrb[4].mxu0 %v157_v32 }
  0x99   :  { %8518 = vmatprep.mubr.bf16.mxu0 %v158_v33  ;;  %v9395_v33 = vld [vmem:[#allocation8 + $0x24] ss:$16 sps:$4 sm:$0xff]  }
  0xa0   :  { %8519 = vmatmul.mubr.bf16.gmra.mrb[8].mxu0 %v159_v38 }
  0xa1   :  { %8522 = vmatprep.mubr.bf16.mxu0 %v160_v39 }
  0xa8   :  { %8523 = vmatmul.mubr.bf16.gmra.mrb[12].mxu0 %v161_v44  ;;  %v9398_v44 = vld [vmem:[#allocation8 + $0x44] ss:$16 sps:$4 sm:$0xff]  }
  0xa9   :  { %8526 = vmatprep.mubr.bf16.mxu0 %v162_v45 }
  0xb0   :  { %8527 = vmatmul.mubr.bf16.gmra.mrb[16].mxu0 %v163_v50 }
  0xb1   :  { %8530 = vmatprep.mubr.bf16.mxu0 %v164_v51  ;;  %v9396_v51 = vld [vmem:[#allocation8 + $0x40] ss:$16 sps:$4 sm:$0xff]  }
  0xb8   :  { %8531 = vmatmul.mubr.bf16.gmra.mrb[20].mxu0 %v165_v56 }
  0xb9   :  { %8534 = vmatprep.mubr.bf16.mxu0 %v166_v57 }
  0xc0   :  { %8535 = vmatmul.mubr.bf16.gmra.mrb[24].mxu0 %v167_v62 }
  0xc1   :  { %8538 = vmatprep.mubr.bf16.mxu0 %v168_v63  ;;  %v9399_v63 = vld [vmem:[#allocation8 + $0x60] ss:$16 sps:$4 sm:$0xff]  }
  0xc8   :  { %8539 = vmatmul.mubr.bf16.gmra.mrb[28].mxu0 %v169_v2  ;;  %v9404_v2 = vld [vmem:[#allocation8 + $0x84] ss:$16 sps:$4 sm:$0xff]  }
 0x163   :  { %v8512_v11 = vpop.f32.mrb[0].mxu0 }
 0x164   :  { %v284_v12 = vadd.f32 %v8512_v11, %v10168_v10  ;;  %v275_v13 = vpop.f32.mrb[1].mxu0  ;;  %v9402_v11 = vld [vmem:[#allocation8 + $0x80] ss:$16 sps:$4 sm:$0xff]  }
 0x165   :  { %v276_v14 = vadd.f32 %v10168_v10, %v275_v13  ;;  %v8513_v15 = vpop.f32.mrb[2].mxu0 }
 0x166   :  { %v436_v16 = vmul.f32 0.2, %v284_v12  ;;  %v287_v17 = vadd.f32 %v8513_v15, %v10168_v10  ;;  %v278_v18 = vpop.f32.mrb[3].mxu0  ;;  %vm404_vm0 = vcmp.gt.f32.partialorder %v284_v12, 0.0  ;;  %v9407_v15 = vld [vmem:[#allocation8 + $0xa4] ss:$16 sps:$4 sm:$0xff]  }
 0x167   :  { %v434_v19 = vmul.f32 0.2, %v276_v14  ;;  %v279_v20 = vadd.f32 %v10168_v10, %v278_v18  ;;  %vm402_vm1 = vcmp.gt.f32.partialorder %v276_v14, 0.0 }
 0x168   :  { %vm405_vm2 = vcmp.gt.f32.partialorder %v287_v17, 0.0  ;;  %v437_v21 = vmul.f32 0.2, %v287_v17  ;;  %v468_v23 = vsel %vm404_vm0, %v284_v12, %v436_v16 }
 0x169   :  { %vm403_vm3 = vcmp.gt.f32.partialorder %v279_v20, 0.0  ;;  %v435_v22 = vmul.f32 0.2, %v279_v20  ;;  %v466_v26 = vsel %vm402_vm1, %v276_v14, %v434_v19 }
 0x16a   :  { %v469_v24 = vsel %vm405_vm2, %v287_v17, %v437_v21 }
 0x16b   :  { %v8516_v25 = vpop.f32.mrb[4].mxu0  ;;  %v467_v27 = vsel %vm403_vm3, %v279_v20, %v435_v22  ;;  %v499_v28 = vpack.c.bf16 %v469_v24, %v468_v23  ;;  %v9405_v23 = vld [vmem:[#allocation8 + $0xa0] ss:$16 sps:$4 sm:$0xff]  }
 0x16c   :  { %v300_v30 = vadd.f32 %v8516_v25, %v10168_v10  ;;  %v498_v31 = vpack.c.bf16 %v467_v27, %v466_v26  ;;  %v291_v32 = vpop.f32.mrb[5].mxu0  ;;  %v9410_v26 = vld [vmem:[#allocation8 + $0xc4] ss:$16 sps:$4 sm:$0xff]  }
 0x16d   :  { %v292_v34 = vadd.f32 %v10168_v10, %v291_v32  ;;  %v8517_v35 = vpop.f32.mrb[6].mxu0 }
 0x16e   :  { %vm408_vm4 = vcmp.gt.f32.partialorder %v300_v30, 0.0  ;;  %v440_v36 = vmul.f32 0.2, %v300_v30  ;;  %655 = vmatmul.mubr.bf16.vlgmr.msra.gmra.mrb[0].mxu1 %v498_v31  ;;  %v303_v37 = vadd.f32 %v8517_v35, %v10168_v10  ;;  %v294_v38 = vpop.f32.mrb[7].mxu0 }
 0x16f   :  { %vm406_vm5 = vcmp.gt.f32.partialorder %v292_v34, 0.0  ;;  %v438_v39 = vmul.f32 0.2, %v292_v34  ;;  %v295_v40 = vadd.f32 %v10168_v10, %v294_v38  ;;  %664 = vmatprep.mubr.bf16.mxu1 %v10018_v8  ;;  %1446 = vmatpush1.bf16.msra.mxu1 %v9390_v29 }
 0x170   :  { %vm409_vm6 = vcmp.gt.f32.partialorder %v303_v37, 0.0  ;;  %v441_v42 = vmul.f32 0.2, %v303_v37  ;;  %v10179_v43 = vsel %vm408_vm4, %v300_v30, %v440_v36  ;;  %1447 = vmatprep.subr.bf16.mxu1 %v9395_v33  ;;  %v9408_v33 = vld [vmem:[#allocation8 + $0xc0] ss:$16 sps:$4 sm:$0xff]  }
 0x171   :  { %vm407_vm7 = vcmp.gt.f32.partialorder %v295_v40, 0.0  ;;  %v439_v45 = vmul.f32 0.2, %v295_v40  ;;  %v470_v46 = vsel %vm406_vm5, %v292_v34, %v438_v39 }
 0x172   :  { %v10181_v47 = vsel %vm409_vm6, %v303_v37, %v441_v42  ;;  %v9413_v37 = vld [vmem:[#allocation8 + $0xe4] ss:$16 sps:$4 sm:$0xff]  }
 0x173   :  { %v8520_v48 = vpop.f32.mrb[8].mxu0  ;;  %v471_v49 = vsel %vm407_vm7, %v295_v40, %v439_v45  ;;  %v501_v50 = vpack.c.bf16 %v10181_v47, %v10179_v43  ;;  %1448 = vmatpush1.bf16.msra.mxu1 %v9393_v41  ;;  %v9416_v43 = vld [vmem:[#allocation8 + $0x104] ss:$16 sps:$4 sm:$0xff]  }
 0x174   :  { %v316_v52 = vadd.f32 %v8520_v48, %v10168_v10  ;;  %v500_v53 = vpack.c.bf16 %v471_v49, %v470_v46  ;;  %v307_v54 = vpop.f32.mrb[9].mxu0  ;;  %1449 = vmatprep.subr.bf16.mxu1 %v9398_v44  ;;  %v9411_v46 = vld [vmem:[#allocation8 + $0xe0] ss:$16 sps:$4 sm:$0xff]  }
 0x175   :  { %v308_v56 = vadd.f32 %v10168_v10, %v307_v54  ;;  %v8521_v57 = vpop.f32.mrb[10].mxu0 }
 0x176   :  { %665 = vmatmul.mubr.bf16.gmra.mrb[4].mxu1 %v499_v28  ;;  %vm412_vm8 = vcmp.gt.f32.partialorder %v316_v52, 0.0  ;;  %v444_v58 = vmul.f32 0.2, %v316_v52  ;;  %v319_v59 = vadd.f32 %v8521_v57, %v10168_v10  ;;  %v310_v60 = vpop.f32.mrb[11].mxu0 }
 0x177   :  { %674 = vmatprep.mubr.bf16.mxu1 %v10018_v8  ;;  %vm410_vm9 = vcmp.gt.f32.partialorder %v308_v56, 0.0  ;;  %v442_v61 = vmul.f32 0.2, %v308_v56  ;;  %v311_v62 = vadd.f32 %v10168_v10, %v310_v60  ;;  %1450 = vmatpush1.bf16.msra.mxu1 %v9396_v51 }
 0x178   :  { %vm413_vm10 = vcmp.gt.f32.partialorder %v319_v59, 0.0  ;;  %v445_v0 = vmul.f32 0.2, %v319_v59  ;;  %v10190_v1 = vsel %vm412_vm8, %v316_v52, %v444_v58  ;;  %1451 = vmatprep.subr.bf16.mxu1 %v9401_v55  ;;  %v9414_v55 = vld [vmem:[#allocation8 + $0x100] ss:$16 sps:$4 sm:$0xff]  }
 0x179   :  { %vm411_vm11 = vcmp.gt.f32.partialorder %v311_v62, 0.0  ;;  %v443_v3 = vmul.f32 0.2, %v311_v62  ;;  %v10192_v4 = vsel %vm410_vm9, %v308_v56, %v442_v61 }
 0x17a   :  { %v10194_v5 = vsel %vm413_vm10, %v319_v59, %v445_v0  ;;  %v9419_v59 = vld [vmem:[#allocation8 + $0x124] ss:$16 sps:$4 sm:$0xff]  }
 0x17b   :  { %v8524_v6 = vpop.f32.mrb[12].mxu0  ;;  %v10196_v7 = vsel %vm411_vm11, %v311_v62, %v443_v3  ;;  %v503_v9 = vpack.c.bf16 %v10194_v5, %v10190_v1  ;;  %1452 = vmatpush1.bf16.msra.mxu1 %v9399_v63  ;;  %v9428_v1 = vld [vmem:[#allocation8 + $0x184] ss:$16 sps:$4 sm:$0xff]  }
 0x17c   :  { %v332_v12 = vadd.f32 %v8524_v6, %v10168_v10  ;;  %v502_v13 = vpack.c.bf16 %v10196_v7, %v10192_v4  ;;  %v323_v14 = vpop.f32.mrb[13].mxu0  ;;  %1453 = vmatprep.subr.bf16.mxu1 %v9404_v2  ;;  %v9417_v6 = vld [vmem:[#allocation8 + $0x120] ss:$16 sps:$4 sm:$0xff]   ;;  %v9422_v4 = vld [vmem:[#allocation8 + $0x144] ss:$16 sps:$4 sm:$0xff]  }
 0x17d   :  { %v324_v16 = vadd.f32 %v10168_v10, %v323_v14  ;;  %v8525_v17 = vpop.f32.mrb[14].mxu0 }
 0x17e   :  { %675 = vmatmul.mubr.bf16.gmra.mrb[8].mxu1 %v500_v53  ;;  %vm416_vm12 = vcmp.gt.f32.partialorder %v332_v12, 0.0  ;;  %v448_v18 = vmul.f32 0.2, %v332_v12  ;;  %v335_v19 = vadd.f32 %v8525_v17, %v10168_v10  ;;  %v326_v20 = vpop.f32.mrb[15].mxu0 }
 0x17f   :  { %684 = vmatprep.mubr.bf16.mxu1 %v10018_v8  ;;  %vm414_vm13 = vcmp.gt.f32.partialorder %v324_v16, 0.0  ;;  %v446_v21 = vmul.f32 0.2, %v324_v16  ;;  %v327_v22 = vadd.f32 %v10168_v10, %v326_v20  ;;  %1454 = vmatpush1.bf16.msra.mxu1 %v9402_v11 }
 0x180   :  { %vm417_vm14 = vcmp.gt.f32.partialorder %v335_v19, 0.0  ;;  %v449_v24 = vmul.f32 0.2, %v335_v19  ;;  %v10207_v25 = vsel %vm416_vm12, %v332_v12, %v448_v18  ;;  %1455 = vmatprep.subr.bf16.mxu1 %v9407_v15  ;;  %v9420_v18 = vld [vmem:[#allocation8 + $0x140] ss:$16 sps:$4 sm:$0xff]  }
 0x181   :  { %vm415_vm15 = vcmp.gt.f32.partialorder %v327_v22, 0.0  ;;  %v447_v27 = vmul.f32 0.2, %v327_v22  ;;  %v10209_v28 = vsel %vm414_vm13, %v324_v16, %v446_v21 }
 0x182   :  { %v10211_v29 = vsel %vm417_vm14, %v335_v19, %v449_v24 }
 0x183   :  { %v8528_v30 = vpop.f32.mrb[16].mxu0  ;;  %v10213_v31 = vsel %vm415_vm15, %v327_v22, %v447_v27  ;;  %v505_v32 = vpack.c.bf16 %v10211_v29, %v10207_v25  ;;  %1456 = vmatpush1.bf16.msra.mxu1 %v9405_v23  ;;  %v9425_v22 = vld [vmem:[#allocation8 + $0x164] ss:$16 sps:$4 sm:$0xff]   ;;  %v9435_v25 = vld [vmem:[#allocation8 + $0x1e0] ss:$16 sps:$4 sm:$0xff]  }
 0x184   :  { %v348_v34 = vadd.f32 %v8528_v30, %v10168_v10  ;;  %v504_v35 = vpack.c.bf16 %v10213_v31, %v10209_v28  ;;  %v339_v36 = vpop.f32.mrb[17].mxu0  ;;  %1457 = vmatprep.subr.bf16.mxu1 %v9410_v26  ;;  %v9440_v29 = vld [vmem:[#allocation8 + $0xc] ss:$16 sps:$4 sm:$0xff]  }
 0x185   :  { %v340_v38 = vadd.f32 %v10168_v10, %v339_v36  ;;  %v8529_v39 = vpop.f32.mrb[18].mxu0  ;;  %v9423_v36 = vld [vmem:[#allocation8 + $0x160] ss:$16 sps:$4 sm:$0xff]  }
 0x186   :  { %685 = vmatmul.mubr.bf16.gmra.mrb[12].mxu1 %v501_v50  ;;  %vm420_vm0 = vcmp.gt.f32.partialorder %v348_v34, 0.0  ;;  %v452_v40 = vmul.f32 0.2, %v348_v34  ;;  %v351_v41 = vadd.f32 %v8529_v39, %v10168_v10  ;;  %v342_v42 = vpop.f32.mrb[19].mxu0 }
 0x187   :  { %694 = vmatprep.mubr.bf16.mxu1 %v10018_v8  ;;  %vm418_vm1 = vcmp.gt.f32.partialorder %v340_v38, 0.0  ;;  %v450_v44 = vmul.f32 0.2, %v340_v38  ;;  %v343_v45 = vadd.f32 %v10168_v10, %v342_v42  ;;  %1458 = vmatpush1.bf16.msra.mxu1 %v9408_v33 }
 0x188   :  { %vm421_vm2 = vcmp.gt.f32.partialorder %v351_v41, 0.0  ;;  %v453_v48 = vmul.f32 0.2, %v351_v41  ;;  %v10227_v49 = vsel %vm420_vm0, %v348_v34, %v452_v40  ;;  %1459 = vmatprep.subr.bf16.mxu1 %v9413_v37 }
 0x189   :  { %vm419_vm3 = vcmp.gt.f32.partialorder %v343_v45, 0.0  ;;  %v451_v47 = vmul.f32 0.2, %v343_v45  ;;  %v10229_v50 = vsel %vm418_vm1, %v340_v38, %v450_v44  ;;  %v9426_v44 = vld [vmem:[#allocation8 + $0x180] ss:$16 sps:$4 sm:$0xff]  }
 0x18a   :  { %v10231_v51 = vsel %vm421_vm2, %v351_v41, %v453_v48 }
 0x18b   :  { %v8532_v52 = vpop.f32.mrb[20].mxu0  ;;  %v10233_v53 = vsel %vm419_vm3, %v343_v45, %v451_v47  ;;  %v507_v54 = vpack.c.bf16 %v10231_v51, %v10227_v49  ;;  %1460 = vmatpush1.bf16.msra.mxu1 %v9411_v46  ;;  %v530_v51 = vld [vmem:[%s13746_s4] sm:$0x3] }
 0x18c   :  { %v364_v56 = vadd.f32 %v8532_v52, %v10168_v10  ;;  %v506_v57 = vpack.c.bf16 %v10233_v53, %v10229_v50  ;;  %v355_v58 = vpop.f32.mrb[21].mxu0  ;;  %1461 = vmatprep.subr.bf16.mxu1 %v9416_v43  ;;  %v9431_v43 = vld [vmem:[#allocation8 + $0x1a4] ss:$16 sps:$4 sm:$0xff]  }
 0x18d   :  { %v356_v60 = vadd.f32 %v10168_v10, %v355_v58  ;;  %v8533_v61 = vpop.f32.mrb[22].mxu0 }
 0x18e   :  { %695 = vmatmul.mubr.bf16.gmra.mrb[16].mxu1 %v502_v13  ;;  %vm424_vm4 = vcmp.gt.f32.partialorder %v364_v56, 0.0  ;;  %v456_v62 = vmul.f32 0.2, %v364_v56  ;;  %v367_v63 = vadd.f32 %v8533_v61, %v10168_v10  ;;  %v358_v0 = vpop.f32.mrb[23].mxu0  ;;  %v9429_v61 = vld [vmem:[#allocation8 + $0x1a0] ss:$16 sps:$4 sm:$0xff]  }
 0x18f   :  { %704 = vmatprep.mubr.bf16.mxu1 %v10018_v8  ;;  %vm422_vm5 = vcmp.gt.f32.partialorder %v356_v60, 0.0  ;;  %v454_v2 = vmul.f32 0.2, %v356_v60  ;;  %v359_v3 = vadd.f32 %v10168_v10, %v358_v0  ;;  %1462 = vmatpush1.bf16.msra.mxu1 %v9414_v55  ;;  %v9434_v0 = vld [vmem:[#allocation8 + $0x1c4] ss:$16 sps:$4 sm:$0xff]  }
 0x190   :  { %vm425_vm6 = vcmp.gt.f32.partialorder %v367_v63, 0.0  ;;  %v457_v11 = vmul.f32 0.2, %v367_v63  ;;  %v10247_v12 = vsel %vm424_vm4, %v364_v56, %v456_v62  ;;  %1463 = vmatprep.subr.bf16.mxu1 %v9419_v59 }
 0x191   :  { %vm423_vm7 = vcmp.gt.f32.partialorder %v359_v3, 0.0  ;;  %v455_v7 = vmul.f32 0.2, %v359_v3  ;;  %v10249_v13 = vsel %vm422_vm5, %v356_v60, %v454_v2 }
 0x192   :  { %v10251_v14 = vsel %vm425_vm6, %v367_v63, %v457_v11 }
 0x193   :  { %v8536_v15 = vpop.f32.mrb[24].mxu0  ;;  %v10253_v16 = vsel %vm423_vm7, %v359_v3, %v455_v7  ;;  %v509_v17 = vpack.c.bf16 %v10251_v14, %v10247_v12  ;;  %1464 = vmatpush1.bf16.msra.mxu1 %v9417_v6  ;;  %v9432_v6 = vld [vmem:[#allocation8 + $0x1c0] ss:$16 sps:$4 sm:$0xff]  }
 0x194   :  { %v380_v19 = vadd.f32 %v8536_v15, %v10168_v10  ;;  %v508_v20 = vpack.c.bf16 %v10253_v16, %v10249_v13  ;;  %v371_v21 = vpop.f32.mrb[25].mxu0  ;;  %1465 = vmatprep.subr.bf16.mxu1 %v9422_v4 }
 0x195   :  { %v372_v23 = vadd.f32 %v10168_v10, %v371_v21  ;;  %v8537_v24 = vpop.f32.mrb[26].mxu0 }
 0x196   :  { %705 = vmatmul.mubr.bf16.gmra.mrb[20].mxu1 %v503_v9  ;;  %vm428_vm8 = vcmp.gt.f32.partialorder %v380_v19, 0.0  ;;  %v460_v26 = vmul.f32 0.2, %v380_v19  ;;  %v383_v27 = vadd.f32 %v8537_v24, %v10168_v10  ;;  %v374_v30 = vpop.f32.mrb[27].mxu0 }
 0x197   :  { %714 = vmatprep.mubr.bf16.mxu1 %v10018_v8  ;;  %vm426_vm9 = vcmp.gt.f32.partialorder %v372_v23, 0.0  ;;  %v458_v33 = vmul.f32 0.2, %v372_v23  ;;  %v375_v34 = vadd.f32 %v10168_v10, %v374_v30  ;;  %1466 = vmatpush1.bf16.msra.mxu1 %v9420_v18 }
 0x198   :  { %vm429_vm10 = vcmp.gt.f32.partialorder %v383_v27, 0.0  ;;  %v461_v37 = vmul.f32 0.2, %v383_v27  ;;  %v10267_v38 = vsel %vm428_vm8, %v380_v19, %v460_v26  ;;  %1467 = vmatprep.subr.bf16.mxu1 %v9425_v22 }
 0x199   :  { %vm427_vm11 = vcmp.gt.f32.partialorder %v375_v34, 0.0  ;;  %v459_v5 = vmul.f32 0.2, %v375_v34  ;;  %v490_v9 = vsel %vm426_vm9, %v372_v23, %v458_v33 }
 0x19a   :  { %v493_v39 = vsel %vm429_vm10, %v383_v27, %v461_v37 }
 0x19b   :  { %v8540_v40 = vpop.f32.mrb[28].mxu0  ;;  %v491_v41 = vsel %vm427_vm11, %v375_v34, %v459_v5  ;;  %v511_v42 = vpack.c.bf16 %v493_v39, %v10267_v38  ;;  %1468 = vmatpush1.bf16.msra.mxu1 %v9423_v36  ;;  %v9438_v36 = vld [vmem:[#allocation8 + $0x8] ss:$16 sps:$4 sm:$0xff]  }
 0x19c   :  { %v396_v45 = vadd.f32 %v8540_v40, %v10168_v10  ;;  %v510_v46 = vpack.c.bf16 %v491_v41, %v490_v9  ;;  %v387_v48 = vpop.f32.mrb[29].mxu0  ;;  %1469 = vmatprep.subr.bf16.mxu1 %v9428_v1  ;;  %v9443_v1 = vld [vmem:[#allocation8 + $0x2c] ss:$16 sps:$4 sm:$0xff]  }
 0x19d   :  { %v388_v47 = vadd.f32 %v10168_v10, %v387_v48  ;;  %v8541_v52 = vpop.f32.mrb[30].mxu0 }
 0x19e   :  { %715 = vmatmul.mubr.bf16.gmra.mrb[24].mxu1 %v504_v35  ;;  %vm432_vm12 = vcmp.gt.f32.partialorder %v396_v45, 0.0  ;;  %v464_v55 = vmul.f32 0.2, %v396_v45  ;;  %v399_v56 = vadd.f32 %v8541_v52, %v10168_v10  ;;  %v390_v58 = vpop.f32.mrb[31].mxu0 }
 0x19f   :  { %724 = vmatprep.mubr.bf16.mxu1 %v10018_v8  ;;  %vm430_vm13 = vcmp.gt.f32.partialorder %v388_v47, 0.0  ;;  %v462_v59 = vmul.f32 0.2, %v388_v47  ;;  %v391_v60 = vadd.f32 %v10168_v10, %v390_v58  ;;  %1470 = vmatpush1.bf16.msra.mxu1 %v9426_v44  ;;  %v9437_v10 = vld [vmem:[#allocation8 + $0x1e4] ss:$16 sps:$4 sm:$0xff]  }
 0x1a0   :  { %vm433_vm14 = vcmp.gt.f32.partialorder %v399_v56, 0.0  ;;  %v465_v62 = vmul.f32 0.2, %v399_v56  ;;  %v496_v63 = vsel %vm432_vm12, %v396_v45, %v464_v55  ;;  %1471 = vmatprep.subr.bf16.mxu1 %v9431_v43 }
 0x1a1   :  { %vm431_vm15 = vcmp.gt.f32.partialorder %v391_v60, 0.0  ;;  %v463_v28 = vmul.f32 0.2, %v391_v60  ;;  %v494_v31 = vsel %vm430_vm13, %v388_v47, %v462_v59 }
 0x1a2   :  { %v497_v35 = vsel %vm433_vm14, %v399_v56, %v465_v62 }
 0x1a3   :  { %v495_v2 = vsel %vm431_vm15, %v391_v60, %v463_v28  ;;  %v513_v3 = vpack.c.bf16 %v497_v35, %v496_v63  ;;  %1472 = vmatpush1.bf16.msra.mxu1 %v9429_v61  ;;  %v9444_v61 = vld [vmem:[#allocation8 + $0x48] ss:$16 sps:$4 sm:$0xff]  }
 0x1a4   :  { %v512_v11 = vpack.c.bf16 %v495_v2, %v494_v31  ;;  %1473 = vmatprep.subr.bf16.mxu1 %v9434_v0  ;;  %v9449_v0 = vld [vmem:[#allocation8 + $0x6c] ss:$16 sps:$4 sm:$0xff]  }
 0x1a6   :  { %725 = vmatmul.mubr.bf16.gmra.mrb[28].mxu1 %v505_v32  ;;  %v532_v32 = vlaneseq }
 0x1a7   :  { %734 = vmatprep.mubr.bf16.mxu1 %v10018_v8  ;;  %1474 = vmatpush1.bf16.msra.mxu1 %v9432_v6 }
 0x1a8   :  { %1475 = vmatprep.subr.bf16.mxu1 %v9437_v10  ;;  %v10301_v49 = vshrl.u32 %v532_v32, 7 }
 0x1aa   :  { %14002 = vst [vmem:[#allocation19_spill] sm:$0xff] %v10301_v49  ;;  %v10304_v50 = vsub.s32 0, %v10301_v49  ;;  %v10310_v53 = vsub.s32 1, %v10301_v49 }
 0x1ab   :  { %1476 = vmatpush1.bf16.msra.mxu1 %v9435_v25  ;;  %v9452_v25 = vld [vmem:[#allocation8 + $0x8c] ss:$16 sps:$4 sm:$0xff]  }
 0x1ac   :  { %1638 = vmatprep.subr.bf16.mxu1 %v9440_v29  ;;  %14003 = vst [vmem:[#allocation20_spill] sm:$0xff] %v10304_v50  ;;  %14004 = vst [vmem:[#allocation21_spill] sm:$0xff] %v10310_v53 }
 0x1ae   :  { %735 = vmatmul.mubr.bf16.gmra.mrb[32].mxu1 %v506_v57  ;;  %v10316_v57 = vrot.slane %v530_v51, %v10310_v53 }
 0x1af   :  { %744 = vmatprep.mubr.bf16.mxu1 %v10018_v8 }
 0x1b6   :  { %745 = vmatmul.mubr.bf16.gmra.mrb[36].mxu1 %v507_v54  ;;  %v10313_v54 = vrot.slane %v530_v51, %v10304_v50 }
 0x1b7   :  { %754 = vmatprep.mubr.bf16.mxu1 %v10018_v8 }
 0x1be   :  { %755 = vmatmul.mubr.bf16.gmra.mrb[40].mxu1 %v508_v20 }
 0x1bf   :  { %764 = vmatprep.mubr.bf16.mxu1 %v10018_v8 }
 0x1c6   :  { %765 = vmatmul.mubr.bf16.gmra.mrb[44].mxu1 %v509_v17 }
 0x1c7   :  { %774 = vmatprep.mubr.bf16.mxu1 %v10018_v8 }
 0x1ce   :  { %775 = vmatmul.mubr.bf16.gmra.mrb[48].mxu1 %v510_v46  ;;  %v9446_v46 = vld [vmem:[#allocation8 + $0x4c] ss:$16 sps:$4 sm:$0xff]  }
 0x1cf   :  { %784 = vmatprep.mubr.bf16.mxu1 %v10018_v8 }
 0x1d6   :  { %785 = vmatmul.mubr.bf16.gmra.mrb[52].mxu1 %v511_v42  ;;  %v9441_v42 = vld [vmem:[#allocation8 + $0x28] ss:$16 sps:$4 sm:$0xff]  }
 0x1d7   :  { %794 = vmatprep.mubr.bf16.mxu1 %v10018_v8 }
 0x1de   :  { %795 = vmatmul.mubr.bf16.gmra.mrb[56].mxu1 %v512_v11  ;;  %v9447_v11 = vld [vmem:[#allocation8 + $0x68] ss:$16 sps:$4 sm:$0xff]  }
 0x1df   :  { %804 = vmatprep.mubr.bf16.mxu1 %v10018_v8 }
 0x1e6   :  { %805 = vmatmul.mubr.bf16.gmra.mrb[60].mxu1 %v513_v3 }
 0x241   :  { %v656_v8 = vpop.f32.mrb[0].mxu1 }
 0x242   :  { %v657_v12 = vadd.f32 %v656_v8, %v10313_v54  ;;  %v658_v4 = vpop.f32.mrb[1].mxu1 }
 0x243   :  { %v659_v7 = vadd.f32 %v658_v4, %v10316_v57  ;;  %v660_v13 = vpop.f32.mrb[2].mxu1 }
 0x244   :  { %v879_v14 = vmul.f32 0.2, %v657_v12  ;;  %v661_v15 = vadd.f32 %v660_v13, %v10313_v54  ;;  %v662_v16 = vpop.f32.mrb[3].mxu1  ;;  %vm815_vm0 = vcmp.gt.f32.partialorder %v657_v12, 0.0 }
 0x245   :  { %v663_v17 = vadd.f32 %v662_v16, %v10316_v57  ;;  %v880_v18 = vmul.f32 0.2, %v659_v7  ;;  %vm816_vm2 = vcmp.gt.f32.partialorder %v659_v7, 0.0 }
 0x246   :  { %vm817_vm1 = vcmp.gt.f32.partialorder %v661_v15, 0.0  ;;  %v881_v19 = vmul.f32 0.2, %v661_v15  ;;  %v943_v21 = vsel %vm815_vm0, %v657_v12, %v879_v14 }
 0x247   :  { %vm818_vm3 = vcmp.gt.f32.partialorder %v663_v17, 0.0  ;;  %v882_v20 = vmul.f32 0.2, %v663_v17  ;;  %v944_v26 = vsel %vm816_vm2, %v659_v7, %v880_v18  ;;  %v9455_v18 = vld [vmem:[#allocation8 + $0xac] ss:$16 sps:$4 sm:$0xff]  }
 0x248   :  { %v945_v22 = vsel %vm817_vm1, %v661_v15, %v881_v19  ;;  %v9450_v15 = vld [vmem:[#allocation8 + $0x88] ss:$16 sps:$4 sm:$0xff]  }
 0x249   :  { %v10322_v23 = vpack.c.bf16 %v945_v22, %v943_v21  ;;  %v666_v24 = vpop.f32.mrb[4].mxu1  ;;  %v946_v27 = vsel %vm818_vm3, %v663_v17, %v882_v20 }
 0x24a   :  { %v667_v30 = vadd.f32 %v666_v24, %v10313_v54  ;;  %v668_v33 = vpop.f32.mrb[5].mxu1  ;;  %v10325_v34 = vpack.c.bf16 %v946_v27, %v944_v26  ;;  %v9453_v27 = vld [vmem:[#allocation8 + $0xa8] ss:$16 sps:$4 sm:$0xff]  }
 0x24b   :  { %v669_v37 = vadd.f32 %v668_v33, %v10316_v57  ;;  %v670_v38 = vpop.f32.mrb[6].mxu1  ;;  %v9458_v33 = vld [vmem:[#allocation8 + $0xcc] ss:$16 sps:$4 sm:$0xff]  }
 0x24c   :  { %v671_v5 = vadd.f32 %v670_v38, %v10313_v54  ;;  %v672_v9 = vpop.f32.mrb[7].mxu1  ;;  %1477 = vmatprep.mubr.bf16.mxu1 %v10325_v34  ;;  %v883_v39 = vmul.f32 0.2, %v667_v30  ;;  %vm819_vm4 = vcmp.gt.f32.partialorder %v667_v30, 0.0 }
 0x24d   :  { %v673_v40 = vadd.f32 %v672_v9, %v10316_v57  ;;  %1478 = vmatmul.mubr.bf16.vlgmr.msra.gmra.mrb[64].mxu1 %v10322_v23  ;;  %v884_v41 = vmul.f32 0.2, %v669_v37  ;;  %vm820_vm5 = vcmp.gt.f32.partialorder %v669_v37, 0.0 }
 0x24e   :  { %1639 = vmatpush1.bf16.msra.mxu1 %v9438_v36  ;;  %vm821_vm6 = vcmp.gt.f32.partialorder %v671_v5, 0.0  ;;  %v885_v44 = vmul.f32 0.2, %v671_v5  ;;  %v947_v48 = vsel %vm819_vm4, %v667_v30, %v883_v39 }
 0x24f   :  { %vm822_vm7 = vcmp.gt.f32.partialorder %v673_v40, 0.0  ;;  %v886_v45 = vmul.f32 0.2, %v673_v40  ;;  %1640 = vmatprep.subr.bf16.mxu1 %v9443_v1  ;;  %v948_v52 = vsel %vm820_vm5, %v669_v37, %v884_v41 }
 0x250   :  { %v949_v43 = vsel %vm821_vm6, %v671_v5, %v885_v44 }
 0x251   :  { %v676_v47 = vpop.f32.mrb[8].mxu1  ;;  %v950_v55 = vsel %vm822_vm7, %v673_v40, %v886_v45  ;;  %v10332_v56 = vpack.c.bf16 %v949_v43, %v947_v48 }
 0x252   :  { %v677_v58 = vadd.f32 %v676_v47, %v10313_v54  ;;  %v678_v59 = vpop.f32.mrb[9].mxu1  ;;  %v10335_v60 = vpack.c.bf16 %v950_v55, %v948_v52  ;;  %1641 = vmatpush1.bf16.msra.mxu1 %v9441_v42  ;;  %v9456_v42 = vld [vmem:[#allocation8 + $0xc8] ss:$16 sps:$4 sm:$0xff]  }
 0x253   :  { %v679_v62 = vadd.f32 %v678_v59, %v10316_v57  ;;  %v680_v63 = vpop.f32.mrb[10].mxu1  ;;  %1642 = vmatprep.subr.bf16.mxu1 %v9446_v46  ;;  %v9461_v46 = vld [vmem:[#allocation8 + $0xec] ss:$16 sps:$4 sm:$0xff]  }
 0x254   :  { %v681_v28 = vadd.f32 %v680_v63, %v10313_v54  ;;  %v682_v31 = vpop.f32.mrb[11].mxu1  ;;  %1487 = vmatprep.mubr.bf16.mxu1 %v10335_v60  ;;  %v887_v35 = vmul.f32 0.2, %v677_v58  ;;  %vm823_vm8 = vcmp.gt.f32.partialorder %v677_v58, 0.0 }
 0x255   :  { %v683_v2 = vadd.f32 %v682_v31, %v10316_v57  ;;  %1488 = vmatmul.mubr.bf16.gmra.mrb[68].mxu1 %v10332_v56  ;;  %v888_v3 = vmul.f32 0.2, %v679_v62  ;;  %vm824_vm9 = vcmp.gt.f32.partialorder %v679_v62, 0.0 }
 0x256   :  { %vm825_vm10 = vcmp.gt.f32.partialorder %v681_v28, 0.0  ;;  %v889_v6 = vmul.f32 0.2, %v681_v28  ;;  %1643 = vmatpush1.bf16.msra.mxu1 %v9444_v61  ;;  %v951_v29 = vsel %vm823_vm8, %v677_v58, %v887_v35  ;;  %v9459_v58 = vld [vmem:[#allocation8 + $0xe8] ss:$16 sps:$4 sm:$0xff]   ;;  %v2279_v61 = vld [vmem:[#allocation10] sm:$0xff] }
 0x257   :  { %vm826_vm11 = vcmp.gt.f32.partialorder %v683_v2, 0.0  ;;  %v890_v10 = vmul.f32 0.2, %v683_v2  ;;  %1644 = vmatprep.subr.bf16.mxu1 %v9449_v0  ;;  %v952_v8 = vsel %vm824_vm9, %v679_v62, %v888_v3  ;;  %v2283_v62 = vld [vmem:[#allocation10 + $0x20] sm:$0xff]  ;;  %v9464_v0 = vld [vmem:[#allocation8 + $0x10c] ss:$16 sps:$4 sm:$0xff]  }
 0x258   :  { %v953_v32 = vsel %vm825_vm10, %v681_v28, %v889_v6  ;;  %v8086_v28 = vcombine.low %v2279_v61, %v2283_v62 }
 0x259   :  { %v686_v51 = vpop.f32.mrb[12].mxu1  ;;  %v954_v12 = vsel %vm826_vm11, %v683_v2, %v890_v10  ;;  %v10342_v4 = vpack.c.bf16 %v953_v32, %v951_v29  ;;  %v8087_v2 = vcombine.high %v2279_v61, %v2283_v62  ;;  %v9471_v62 = vld [vmem:[#allocation8 + $0x168] ss:$16 sps:$4 sm:$0xff]  }
 0x25a   :  { %v687_v7 = vadd.f32 %v686_v51, %v10313_v54  ;;  %v688_v13 = vpop.f32.mrb[13].mxu1  ;;  %v10345_v14 = vpack.c.bf16 %v954_v12, %v952_v8  ;;  %1645 = vmatpush1.bf16.msra.mxu1 %v9447_v11  ;;  %v9462_v51 = vld [vmem:[#allocation8 + $0x108] ss:$16 sps:$4 sm:$0xff]  }
 0x25b   :  { %v689_v16 = vadd.f32 %v688_v13, %v10316_v57  ;;  %v690_v17 = vpop.f32.mrb[14].mxu1  ;;  %1646 = vmatprep.subr.bf16.mxu1 %v9452_v25  ;;  %3857 = vmatprep.subr.bf16.mxu0 %v8087_v2 }
 0x25c   :  { %v691_v19 = vadd.f32 %v690_v17, %v10313_v54  ;;  %v692_v20 = vpop.f32.mrb[15].mxu1  ;;  %1497 = vmatprep.mubr.bf16.mxu1 %v10345_v14  ;;  %v891_v21 = vmul.f32 0.2, %v687_v7  ;;  %vm827_vm12 = vcmp.gt.f32.partialorder %v687_v7, 0.0  ;;  %3858 = vmatpush1.bf16.msra.mxu0 %v8086_v28  ;;  %v9465_v17 = vld [vmem:[#allocation8 + $0x128] ss:$16 sps:$4 sm:$0xff]  }
 0x25d   :  { %v693_v22 = vadd.f32 %v692_v20, %v10316_v57  ;;  %1498 = vmatmul.mubr.bf16.gmra.mrb[72].mxu1 %v10342_v4  ;;  %v892_v24 = vmul.f32 0.2, %v689_v16  ;;  %vm828_vm13 = vcmp.gt.f32.partialorder %v689_v16, 0.0  ;;  %v2287_v20 = vld [vmem:[#allocation10 + $0x40] sm:$0xff] }
 0x25e   :  { %vm829_vm14 = vcmp.gt.f32.partialorder %v691_v19, 0.0  ;;  %v893_v26 = vmul.f32 0.2, %v691_v19  ;;  %1647 = vmatpush1.bf16.msra.mxu1 %v9450_v15  ;;  %v955_v36 = vsel %vm827_vm12, %v687_v7, %v891_v21  ;;  %v9467_v7 = vld [vmem:[#allocation8 + $0x12c] ss:$16 sps:$4 sm:$0xff]   ;;  %v2291_v21 = vld [vmem:[#allocation10 + $0x60] sm:$0xff] }
 0x25f   :  { %vm830_vm15 = vcmp.gt.f32.partialorder %v693_v22, 0.0  ;;  %v894_v30 = vmul.f32 0.2, %v693_v22  ;;  %1648 = vmatprep.subr.bf16.mxu1 %v9455_v18  ;;  %v956_v1 = vsel %vm828_vm13, %v689_v16, %v892_v24  ;;  %v8094_v24 = vcombine.low %v2287_v20, %v2291_v21  ;;  %v2303_v28 = vld [vmem:[#allocation10 + $0xc0] sm:$0xff] }
 0x260   :  { %v957_v37 = vsel %vm829_vm14, %v691_v19, %v893_v26  ;;  %v2295_v26 = vld [vmem:[#allocation10 + $0x80] sm:$0xff] }
 0x261   :  { %v696_v38 = vpop.f32.mrb[16].mxu1  ;;  %v958_v5 = vsel %vm830_vm15, %v693_v22, %v894_v30  ;;  %v10352_v9 = vpack.c.bf16 %v957_v37, %v955_v36  ;;  %v8095_v36 = vcombine.high %v2287_v20, %v2291_v21  ;;  %v9474_v20 = vld [vmem:[#allocation8 + $0x188] ss:$16 sps:$4 sm:$0xff]  }
 0x262   :  { %v697_v39 = vadd.f32 %v696_v38, %v10313_v54  ;;  %v698_v40 = vpop.f32.mrb[17].mxu1  ;;  %v10355_v41 = vpack.c.bf16 %v958_v5, %v956_v1  ;;  %1649 = vmatpush1.bf16.msra.mxu1 %v9453_v27  ;;  %v2299_v27 = vld [vmem:[#allocation10 + $0xa0] sm:$0xff] }
 0x263   :  { %v699_v44 = vadd.f32 %v698_v40, %v10316_v57  ;;  %v700_v45 = vpop.f32.mrb[18].mxu1  ;;  %1650 = vmatprep.subr.bf16.mxu1 %v9458_v33  ;;  %v9470_v33 = vld [vmem:[#allocation8 + $0x14c] ss:$16 sps:$4 sm:$0xff]   ;;  %v8103_v1 = vcombine.high %v2295_v26, %v2299_v27  ;;  %3859 = vmatprep.subr.bf16.mxu0 %v8095_v36  ;;  %v9477_v36 = vld [vmem:[#allocation8 + $0x1a8] ss:$16 sps:$4 sm:$0xff]  }
 0x264   :  { %v701_v48 = vadd.f32 %v700_v45, %v10313_v54  ;;  %v702_v43 = vpop.f32.mrb[19].mxu1  ;;  %1507 = vmatprep.mubr.bf16.mxu1 %v10355_v41  ;;  %v895_v47 = vmul.f32 0.2, %v697_v39  ;;  %vm831_vm0 = vcmp.gt.f32.partialorder %v697_v39, 0.0  ;;  %3860 = vmatpush1.bf16.msra.mxu0 %v8094_v24 }
 0x265   :  { %v703_v52 = vadd.f32 %v702_v43, %v10316_v57  ;;  %1508 = vmatmul.mubr.bf16.gmra.mrb[76].mxu1 %v10352_v9  ;;  %v896_v55 = vmul.f32 0.2, %v699_v44  ;;  %vm832_vm1 = vcmp.gt.f32.partialorder %v699_v44, 0.0  ;;  %v8102_v43 = vcombine.low %v2295_v26, %v2299_v27  ;;  %3861 = vmatprep.subr.bf16.mxu0 %v8103_v1  ;;  %v9479_v26 = vld [vmem:[#allocation8 + $0x1ac] ss:$16 sps:$4 sm:$0xff]   ;;  %v2319_v1 = vld [vmem:[#allocation10 + $0x140] sm:$0xff] }
 0x266   :  { %vm833_vm2 = vcmp.gt.f32.partialorder %v701_v48, 0.0  ;;  %v897_v59 = vmul.f32 0.2, %v701_v48  ;;  %1651 = vmatpush1.bf16.msra.mxu1 %v9456_v42  ;;  %v959_v31 = vsel %vm831_vm0, %v697_v39, %v895_v47 }
 0x267   :  { %vm834_vm3 = vcmp.gt.f32.partialorder %v703_v52, 0.0  ;;  %v898_v63 = vmul.f32 0.2, %v703_v52  ;;  %1652 = vmatprep.subr.bf16.mxu1 %v9461_v46  ;;  %v960_v6 = vsel %vm832_vm1, %v699_v44, %v896_v55  ;;  %v9473_v55 = vld [vmem:[#allocation8 + $0x16c] ss:$16 sps:$4 sm:$0xff]  }
 0x268   :  { %v961_v35 = vsel %vm833_vm2, %v701_v48, %v897_v59  ;;  %v9468_v48 = vld [vmem:[#allocation8 + $0x148] ss:$16 sps:$4 sm:$0xff]   ;;  %3862 = vmatpush1.bf16.msra.mxu0 %v8102_v43  ;;  %v9482_v43 = vld [vmem:[#allocation8 + $0x1cc] ss:$16 sps:$4 sm:$0xff]  }
 0x269   :  { %v706_v3 = vpop.f32.mrb[20].mxu1  ;;  %v962_v11 = vsel %vm834_vm3, %v703_v52, %v898_v63  ;;  %v10362_v10 = vpack.c.bf16 %v961_v35, %v959_v31  ;;  %v2307_v31 = vld [vmem:[#allocation10 + $0xe0] sm:$0xff] }
 0x26a   :  { %v707_v25 = vadd.f32 %v706_v3, %v10313_v54  ;;  %v708_v29 = vpop.f32.mrb[21].mxu1  ;;  %v10365_v32 = vpack.c.bf16 %v962_v11, %v960_v6  ;;  %1653 = vmatpush1.bf16.msra.mxu1 %v9459_v58  ;;  %v8110_v2 = vcombine.low %v2303_v28, %v2307_v31  ;;  %v2311_v3 = vld [vmem:[#allocation10 + $0x100] sm:$0xff] }
 0x26b   :  { %v709_v8 = vadd.f32 %v708_v29, %v10316_v57  ;;  %v710_v12 = vpop.f32.mrb[22].mxu1  ;;  %1654 = vmatprep.subr.bf16.mxu1 %v9464_v0  ;;  %v2315_v6 = vld [vmem:[#allocation10 + $0x120] sm:$0xff]  ;;  %v8111_v29 = vcombine.high %v2303_v28, %v2307_v31 }
 0x26c   :  { %v711_v13 = vadd.f32 %v710_v12, %v10313_v54  ;;  %v712_v15 = vpop.f32.mrb[23].mxu1  ;;  %1517 = vmatprep.mubr.bf16.mxu1 %v10365_v32  ;;  %v899_v16 = vmul.f32 0.2, %v707_v25  ;;  %vm835_vm4 = vcmp.gt.f32.partialorder %v707_v25, 0.0  ;;  %v8119_v12 = vcombine.high %v2311_v3, %v2315_v6 }
 0x26d   :  { %v713_v18 = vadd.f32 %v712_v15, %v10316_v57  ;;  %1518 = vmatmul.mubr.bf16.gmra.mrb[80].mxu1 %v10362_v10  ;;  %v900_v19 = vmul.f32 0.2, %v709_v8  ;;  %vm836_vm5 = vcmp.gt.f32.partialorder %v709_v8, 0.0  ;;  %3863 = vmatprep.subr.bf16.mxu0 %v8111_v29  ;;  %v8118_v21 = vcombine.low %v2311_v3, %v2315_v6 }
 0x26e   :  { %vm837_vm6 = vcmp.gt.f32.partialorder %v711_v13, 0.0  ;;  %v901_v22 = vmul.f32 0.2, %v711_v13  ;;  %1655 = vmatpush1.bf16.msra.mxu1 %v9462_v51  ;;  %v963_v37 = vsel %vm835_vm4, %v707_v25, %v899_v16  ;;  %v9476_v25 = vld [vmem:[#allocation8 + $0x18c] ss:$16 sps:$4 sm:$0xff]   ;;  %3864 = vmatpush1.bf16.msra.mxu0 %v8110_v2 }
 0x26f   :  { %vm838_vm7 = vcmp.gt.f32.partialorder %v713_v18, 0.0  ;;  %v902_v30 = vmul.f32 0.2, %v713_v18  ;;  %1656 = vmatprep.subr.bf16.mxu1 %v9467_v7  ;;  %v964_v39 = vsel %vm836_vm5, %v709_v8, %v900_v19  ;;  %3865 = vmatprep.subr.bf16.mxu0 %v8119_v12 }
 0x270   :  { %v965_v38 = vsel %vm837_vm6, %v711_v13, %v901_v22 }
 0x271   :  { %v716_v5 = vpop.f32.mrb[24].mxu1  ;;  %v966_v40 = vsel %vm838_vm7, %v713_v18, %v902_v30  ;;  %v10373_v42 = vpack.c.bf16 %v965_v38, %v963_v37 }
 0x272   :  { %v717_v44 = vadd.f32 %v716_v5, %v10313_v54  ;;  %v718_v45 = vpop.f32.mrb[25].mxu1  ;;  %v10376_v46 = vpack.c.bf16 %v966_v40, %v964_v39  ;;  %1657 = vmatpush1.bf16.msra.mxu1 %v9465_v17  ;;  %v2323_v5 = vld [vmem:[#allocation10 + $0x160] sm:$0xff]  ;;  %3866 = vmatpush1.bf16.msra.mxu0 %v8118_v21 }
 0x273   :  { %v719_v47 = vadd.f32 %v718_v45, %v10316_v57  ;;  %v720_v52 = vpop.f32.mrb[26].mxu1  ;;  %1658 = vmatprep.subr.bf16.mxu1 %v9470_v33  ;;  %v8126_v40 = vcombine.low %v2319_v1, %v2323_v5  ;;  %v2331_v45 = vld [vmem:[#allocation10 + $0x1a0] sm:$0xff] }
 0x274   :  { %v721_v58 = vadd.f32 %v720_v52, %v10313_v54  ;;  %v722_v59 = vpop.f32.mrb[27].mxu1  ;;  %1527 = vmatprep.mubr.bf16.mxu1 %v10376_v46  ;;  %v903_v61 = vmul.f32 0.2, %v717_v44  ;;  %vm839_vm8 = vcmp.gt.f32.partialorder %v717_v44, 0.0  ;;  %v2347_v21 = vld [vmem:[#allocation10 + $0x220] sm:$0xff] }
 0x275   :  { %v723_v63 = vadd.f32 %v722_v59, %v10316_v57  ;;  %1528 = vmatmul.mubr.bf16.gmra.mrb[84].mxu1 %v10373_v42  ;;  %v904_v0 = vmul.f32 0.2, %v719_v47  ;;  %vm840_vm9 = vcmp.gt.f32.partialorder %v719_v47, 0.0 }
 0x276   :  { %vm841_vm10 = vcmp.gt.f32.partialorder %v721_v58, 0.0  ;;  %v905_v35 = vmul.f32 0.2, %v721_v58  ;;  %1659 = vmatpush1.bf16.msra.mxu1 %v9468_v48  ;;  %v967_v51 = vsel %vm839_vm8, %v717_v44, %v903_v61  ;;  %v2327_v44 = vld [vmem:[#allocation10 + $0x180] sm:$0xff] }
 0x277   :  { %vm842_vm11 = vcmp.gt.f32.partialorder %v723_v63, 0.0  ;;  %v906_v11 = vmul.f32 0.2, %v723_v63  ;;  %1660 = vmatprep.subr.bf16.mxu1 %v9473_v55  ;;  %v968_v13 = vsel %vm840_vm9, %v719_v47, %v904_v0  ;;  %v8127_v47 = vcombine.high %v2319_v1, %v2323_v5 }
 0x278   :  { %v969_v8 = vsel %vm841_vm10, %v721_v58, %v905_v35  ;;  %v8135_v58 = vcombine.high %v2327_v44, %v2331_v45  ;;  %v9480_v35 = vld [vmem:[#allocation8 + $0x1c8] ss:$16 sps:$4 sm:$0xff]   ;;  %v8134_v2 = vcombine.low %v2327_v44, %v2331_v45 }
 0x279   :  { %v726_v7 = vpop.f32.mrb[28].mxu1  ;;  %v970_v15 = vsel %vm842_vm11, %v723_v63, %v906_v11  ;;  %v10385_v16 = vpack.c.bf16 %v969_v8, %v967_v51  ;;  %3867 = vmatprep.subr.bf16.mxu0 %v8127_v47  ;;  %v9485_v11 = vld [vmem:[#allocation8 + $0x1ec] ss:$16 sps:$4 sm:$0xff]   ;;  %v9483_v8 = vld [vmem:[#allocation8 + $0x1e8] ss:$16 sps:$4 sm:$0xff]  }
 0x27a   :  { %v727_v17 = vadd.f32 %v726_v7, %v10313_v54  ;;  %v728_v18 = vpop.f32.mrb[29].mxu1  ;;  %v10388_v19 = vpack.c.bf16 %v970_v15, %v968_v13  ;;  %1661 = vmatpush1.bf16.msra.mxu1 %v9471_v62  ;;  %3868 = vmatpush1.bf16.msra.mxu0 %v8126_v40  ;;  %v2335_v13 = vld [vmem:[#allocation10 + $0x1c0] sm:$0xff]  ;;  %v10413_v44 = vld [vmem:[#allocation10 + $0x8] sm:$0xff] }
 0x27b   :  { %v729_v22 = vadd.f32 %v728_v18, %v10316_v57  ;;  %v730_v24 = vpop.f32.mrb[30].mxu1  ;;  %1662 = vmatprep.subr.bf16.mxu1 %v9476_v25  ;;  %3869 = vmatprep.subr.bf16.mxu0 %v8135_v58  ;;  %v2339_v15 = vld [vmem:[#allocation10 + $0x1e0] sm:$0xff]  ;;  %v10415_v45 = vld [vmem:[#allocation10 + $0x28] sm:$0xff] }
 0x27c   :  { %v731_v27 = vadd.f32 %v730_v24, %v10313_v54  ;;  %v732_v30 = vpop.f32.mrb[31].mxu1  ;;  %1537 = vmatprep.mubr.bf16.mxu1 %v10388_v19  ;;  %v907_v33 = vmul.f32 0.2, %v727_v17  ;;  %vm843_vm12 = vcmp.gt.f32.partialorder %v727_v17, 0.0  ;;  %v8142_v18 = vcombine.low %v2335_v13, %v2339_v15 }
 0x27d   :  { %v733_v37 = vadd.f32 %v732_v30, %v10316_v57  ;;  %1538 = vmatmul.mubr.bf16.gmra.mrb[88].mxu1 %v10385_v16  ;;  %v908_v38 = vmul.f32 0.2, %v729_v22  ;;  %vm844_vm13 = vcmp.gt.f32.partialorder %v729_v22, 0.0  ;;  %v8143_v24 = vcombine.high %v2335_v13, %v2339_v15 }
 0x27e   :  { %vm845_vm14 = vcmp.gt.f32.partialorder %v731_v27, 0.0  ;;  %v909_v39 = vmul.f32 0.2, %v731_v27  ;;  %1663 = vmatpush1.bf16.msra.mxu1 %v9474_v20  ;;  %v971_v52 = vsel %vm843_vm12, %v727_v17, %v907_v33  ;;  %3870 = vmatpush1.bf16.msra.mxu0 %v8134_v2  ;;  %v2343_v20 = vld [vmem:[#allocation10 + $0x200] sm:$0xff]  ;;  %v8089_v47 = vcombine.high %v10413_v44, %v10415_v45 }
 0x27f   :  { %vm846_vm15 = vcmp.gt.f32.partialorder %v733_v37, 0.0  ;;  %v910_v48 = vmul.f32 0.2, %v733_v37  ;;  %1664 = vmatprep.subr.bf16.mxu1 %v9479_v26  ;;  %v972_v61 = vsel %vm844_vm13, %v729_v22, %v908_v38  ;;  %v8151_v30 = vcombine.high %v2343_v20, %v2347_v21  ;;  %3871 = vmatprep.subr.bf16.mxu0 %v8143_v24 }
 0x280   :  { %v973_v55 = vsel %vm845_vm14, %v731_v27, %v909_v39  ;;  %v8150_v40 = vcombine.low %v2343_v20, %v2347_v21 }
 0x281   :  { %v736_v59 = vpop.f32.mrb[32].mxu1  ;;  %v974_v62 = vsel %vm846_vm15, %v733_v37, %v910_v48  ;;  %v10397_v63 = vpack.c.bf16 %v973_v55, %v971_v52 }
 0x282   :  { %v737_v0 = vadd.f32 %v736_v59, %v10313_v54  ;;  %v738_v28 = vpop.f32.mrb[33].mxu1  ;;  %v10400_v31 = vpack.c.bf16 %v974_v62, %v972_v61  ;;  %1665 = vmatpush1.bf16.msra.mxu1 %v9477_v36  ;;  %3872 = vmatpush1.bf16.msra.mxu0 %v8142_v18  ;;  %v8088_v59 = vcombine.low %v10413_v44, %v10415_v45  ;;  %v2320_v44 = vld [vmem:[#allocation10 + $0x148] sm:$0xff] }
 0x283   :  { %v739_v3 = vadd.f32 %v738_v28, %v10316_v57  ;;  %v740_v6 = vpop.f32.mrb[34].mxu1  ;;  %1666 = vmatprep.subr.bf16.mxu1 %v9482_v43  ;;  %3873 = vmatprep.subr.bf16.mxu0 %v8151_v30  ;;  %v2355_v28 = vld [vmem:[#allocation10 + $0x260] sm:$0xff]  ;;  %v2324_v45 = vld [vmem:[#allocation10 + $0x168] sm:$0xff] }
 0x284   :  { %v741_v25 = vadd.f32 %v740_v6, %v10313_v54  ;;  %v742_v29 = vpop.f32.mrb[35].mxu1  ;;  %1547 = vmatprep.mubr.bf16.mxu1 %v10400_v31  ;;  %v911_v51 = vmul.f32 0.2, %v737_v0  ;;  %vm847_vm0 = vcmp.gt.f32.partialorder %v737_v0, 0.0 }
 0x285   :  { %v743_v12 = vadd.f32 %v742_v29, %v10316_v57  ;;  %1548 = vmatmul.mubr.bf16.gmra.mrb[92].mxu1 %v10397_v63  ;;  %v912_v7 = vmul.f32 0.2, %v739_v3  ;;  %vm848_vm1 = vcmp.gt.f32.partialorder %v739_v3, 0.0 }
 0x286   :  { %vm849_vm2 = vcmp.gt.f32.partialorder %v741_v25, 0.0  ;;  %v913_v17 = vmul.f32 0.2, %v741_v25  ;;  %1667 = vmatpush1.bf16.msra.mxu1 %v9480_v35  ;;  %v975_v26 = vsel %vm847_vm0, %v737_v0, %v911_v51  ;;  %v2351_v0 = vld [vmem:[#allocation10 + $0x240] sm:$0xff]  ;;  %3874 = vmatpush1.bf16.msra.mxu0 %v8150_v40 }
 0x287   :  { %vm850_vm3 = vcmp.gt.f32.partialorder %v743_v12, 0.0  ;;  %v914_v22 = vmul.f32 0.2, %v743_v12  ;;  %1668 = vmatprep.subr.bf16.mxu1 %v9485_v11  ;;  %v976_v36 = vsel %vm848_vm1, %v739_v3, %v912_v7  ;;  %v8158_v2 = vcombine.low %v2351_v0, %v2355_v28  ;;  %v2359_v3 = vld [vmem:[#allocation10 + $0x280] sm:$0xff] }
 0x288   :  { %v977_v27 = vsel %vm849_vm2, %v741_v25, %v913_v17  ;;  %v8159_v11 = vcombine.high %v2351_v0, %v2355_v28  ;;  %v2363_v25 = vld [vmem:[#allocation10 + $0x2a0] sm:$0xff] }
 0x289   :  { %v746_v33 = vpop.f32.mrb[36].mxu1  ;;  %v978_v37 = vsel %vm850_vm3, %v743_v12, %v914_v22  ;;  %v10408_v38 = vpack.c.bf16 %v977_v27, %v975_v26  ;;  %v8167_v15 = vcombine.high %v2359_v3, %v2363_v25  ;;  %v8166_v21 = vcombine.low %v2359_v3, %v2363_v25 }
 0x28a   :  { %v747_v1 = vadd.f32 %v746_v33, %v10313_v54  ;;  %v748_v5 = vpop.f32.mrb[37].mxu1  ;;  %v10411_v39 = vpack.c.bf16 %v978_v37, %v976_v36  ;;  %1669 = vmatpush1.bf16.msra.mxu1 %v9483_v8  ;;  %3875 = vmatprep.subr.bf16.mxu0 %v8159_v11  ;;  %v2367_v37 = vld [vmem:[#allocation10 + $0x2c0] sm:$0xff] }
 0x28b   :  { %v749_v48 = vadd.f32 %v748_v5, %v10316_v57  ;;  %v750_v43 = vpop.f32.mrb[38].mxu1  ;;  %4243 = vmatprep.subr.bf16.mxu1 %v8089_v47  ;;  %3876 = vmatpush1.bf16.msra.mxu0 %v8158_v2 }
 0x28c   :  { %v751_v52 = vadd.f32 %v750_v43, %v10313_v54  ;;  %v752_v55 = vpop.f32.mrb[39].mxu1  ;;  %1557 = vmatprep.mubr.bf16.mxu1 %v10411_v39  ;;  %v915_v58 = vmul.f32 0.2, %v747_v1  ;;  %vm851_vm4 = vcmp.gt.f32.partialorder %v747_v1, 0.0  ;;  %3877 = vmatprep.subr.bf16.mxu0 %v8167_v15 }
 0x28d   :  { %v753_v61 = vadd.f32 %v752_v55, %v10316_v57  ;;  %1558 = vmatmul.mubr.bf16.gmra.mrb[96].mxu1 %v10408_v38  ;;  %v916_v62 = vmul.f32 0.2, %v749_v48  ;;  %vm852_vm5 = vcmp.gt.f32.partialorder %v749_v48, 0.0 }
 0x28e   :  { %vm853_vm6 = vcmp.gt.f32.partialorder %v751_v52, 0.0  ;;  %v917_v35 = vmul.f32 0.2, %v751_v52  ;;  %v979_v29 = vsel %vm851_vm4, %v747_v1, %v915_v58  ;;  %v2371_v1 = vld [vmem:[#allocation10 + $0x2e0] sm:$0xff] }
 0x28f   :  { %vm854_vm7 = vcmp.gt.f32.partialorder %v753_v61, 0.0  ;;  %v918_v6 = vmul.f32 0.2, %v753_v61  ;;  %v980_v12 = vsel %vm852_vm5, %v749_v48, %v916_v62  ;;  %3878 = vmatpush1.bf16.msra.mxu0 %v8166_v21  ;;  %v8174_v40 = vcombine.low %v2367_v37, %v2371_v1  ;;  %v2375_v48 = vld [vmem:[#allocation10 + $0x300] sm:$0xff] }
 0x290   :  { %v981_v51 = vsel %vm853_vm6, %v751_v52, %v917_v35  ;;  %v8175_v47 = vcombine.high %v2367_v37, %v2371_v1  ;;  %v2379_v52 = vld [vmem:[#allocation10 + $0x320] sm:$0xff] }
 0x291   :  { %v756_v8 = vpop.f32.mrb[40].mxu1  ;;  %v982_v7 = vsel %vm854_vm7, %v753_v61, %v918_v6  ;;  %v10426_v13 = vpack.c.bf16 %v981_v51, %v979_v29  ;;  %v8183_v35 = vcombine.high %v2375_v48, %v2379_v52  ;;  %v8182_v11 = vcombine.low %v2375_v48, %v2379_v52 }
 0x292   :  { %v757_v17 = vadd.f32 %v756_v8, %v10313_v54  ;;  %v758_v18 = vpop.f32.mrb[41].mxu1  ;;  %v10429_v20 = vpack.c.bf16 %v982_v7, %v980_v12  ;;  %3879 = vmatprep.subr.bf16.mxu0 %v8175_v47 }
 0x293   :  { %v759_v22 = vadd.f32 %v758_v18, %v10316_v57  ;;  %v760_v24 = vpop.f32.mrb[42].mxu1  ;;  %3880 = vmatpush1.bf16.msra.mxu0 %v8174_v40  ;;  %v2387_v18 = vld [vmem:[#allocation10 + $0x360] sm:$0xff] }
 0x294   :  { %v761_v26 = vadd.f32 %v760_v24, %v10313_v54  ;;  %v762_v27 = vpop.f32.mrb[43].mxu1  ;;  %1567 = vmatprep.mubr.bf16.mxu1 %v10429_v20  ;;  %v919_v30 = vmul.f32 0.2, %v757_v17  ;;  %vm855_vm8 = vcmp.gt.f32.partialorder %v757_v17, 0.0  ;;  %3881 = vmatprep.subr.bf16.mxu0 %v8183_v35  ;;  %v2395_v40 = vld [vmem:[#allocation10 + $0x3a0] sm:$0xff] }
 0x295   :  { %v763_v33 = vadd.f32 %v762_v27, %v10316_v57  ;;  %1568 = vmatmul.mubr.bf16.gmra.mrb[100].mxu1 %v10426_v13  ;;  %v920_v36 = vmul.f32 0.2, %v759_v22  ;;  %vm856_vm9 = vcmp.gt.f32.partialorder %v759_v22, 0.0 }
 0x296   :  { %vm857_vm10 = vcmp.gt.f32.partialorder %v761_v26, 0.0  ;;  %v921_v5 = vmul.f32 0.2, %v761_v26  ;;  %v983_v55 = vsel %vm855_vm8, %v757_v17, %v919_v30  ;;  %v2383_v17 = vld [vmem:[#allocation10 + $0x340] sm:$0xff] }
 0x297   :  { %vm858_vm11 = vcmp.gt.f32.partialorder %v763_v33, 0.0  ;;  %v922_v43 = vmul.f32 0.2, %v763_v33  ;;  %v984_v62 = vsel %vm856_vm9, %v759_v22, %v920_v36  ;;  %3882 = vmatpush1.bf16.msra.mxu0 %v8182_v11  ;;  %v8190_v22 = vcombine.low %v2383_v17, %v2387_v18  ;;  %v2399_v11 = vld [vmem:[#allocation10 + $0x3c0] sm:$0xff] }
 0x298   :  { %v985_v58 = vsel %vm857_vm10, %v761_v26, %v921_v5  ;;  %v8191_v26 = vcombine.high %v2383_v17, %v2387_v18  ;;  %v2391_v5 = vld [vmem:[#allocation10 + $0x380] sm:$0xff] }
 0x299   :  { %v766_v61 = vpop.f32.mrb[44].mxu1  ;;  %v986_v0 = vsel %vm858_vm11, %v763_v33, %v922_v43  ;;  %v10436_v28 = vpack.c.bf16 %v985_v58, %v983_v55  ;;  %v8199_v52 = vcombine.high %v2391_v5, %v2395_v40 }
 0x29a   :  { %v767_v2 = vadd.f32 %v766_v61, %v10313_v54  ;;  %v768_v3 = vpop.f32.mrb[45].mxu1  ;;  %v10439_v6 = vpack.c.bf16 %v986_v0, %v984_v62  ;;  %3883 = vmatprep.subr.bf16.mxu0 %v8191_v26  ;;  %v8198_v61 = vcombine.low %v2391_v5, %v2395_v40 }
 0x29b   :  { %v769_v25 = vadd.f32 %v768_v3, %v10316_v57  ;;  %v770_v29 = vpop.f32.mrb[46].mxu1  ;;  %3884 = vmatpush1.bf16.msra.mxu0 %v8190_v22 }
 0x29c   :  { %v771_v51 = vadd.f32 %v770_v29, %v10313_v54  ;;  %v772_v8 = vpop.f32.mrb[47].mxu1  ;;  %1577 = vmatprep.mubr.bf16.mxu1 %v10439_v6  ;;  %v923_v12 = vmul.f32 0.2, %v767_v2  ;;  %vm859_vm12 = vcmp.gt.f32.partialorder %v767_v2, 0.0  ;;  %3885 = vmatprep.subr.bf16.mxu0 %v8199_v52 }
 0x29d   :  { %v773_v7 = vadd.f32 %v772_v8, %v10316_v57  ;;  %1578 = vmatmul.mubr.bf16.gmra.mrb[104].mxu1 %v10436_v28  ;;  %v924_v15 = vmul.f32 0.2, %v769_v25  ;;  %vm860_vm13 = vcmp.gt.f32.partialorder %v769_v25, 0.0 }
 0x29e   :  { %vm861_vm14 = vcmp.gt.f32.partialorder %v771_v51, 0.0  ;;  %v925_v21 = vmul.f32 0.2, %v771_v51  ;;  %v987_v27 = vsel %vm859_vm12, %v767_v2, %v923_v12 }
 0x29f   :  { %vm862_vm15 = vcmp.gt.f32.partialorder %v773_v7, 0.0  ;;  %v926_v24 = vmul.f32 0.2, %v773_v7  ;;  %v988_v36 = vsel %vm860_vm13, %v769_v25, %v924_v15  ;;  %v2403_v25 = vld [vmem:[#allocation10 + $0x3e0] sm:$0xff]  ;;  %3886 = vmatpush1.bf16.msra.mxu0 %v8198_v61 }
 0x2a0   :  { %v989_v30 = vsel %vm861_vm14, %v771_v51, %v925_v21  ;;  %v8207_v51 = vcombine.high %v2399_v11, %v2403_v25  ;;  %v8206_v12 = vcombine.low %v2399_v11, %v2403_v25 }
 0x2a1   :  { %v776_v33 = vpop.f32.mrb[48].mxu1  ;;  %v990_v37 = vsel %vm862_vm15, %v773_v7, %v926_v24  ;;  %v10446_v1 = vpack.c.bf16 %v989_v30, %v987_v27 }
 0x2a2   :  { %v777_v48 = vadd.f32 %v776_v33, %v10313_v54  ;;  %v778_v43 = vpop.f32.mrb[49].mxu1  ;;  %v10449_v47 = vpack.c.bf16 %v990_v37, %v988_v36  ;;  %3887 = vmatprep.subr.bf16.mxu0 %v8207_v51 }
 0x2a3   :  { %v779_v55 = vadd.f32 %v778_v43, %v10316_v57  ;;  %v780_v58 = vpop.f32.mrb[50].mxu1  ;;  %3888 = vmatpush1.bf16.msra.mxu0 %v8206_v12 }
 0x2a4   :  { %v781_v62 = vadd.f32 %v780_v58, %v10313_v54  ;;  %v782_v0 = vpop.f32.mrb[51].mxu1  ;;  %1587 = vmatprep.mubr.bf16.mxu1 %v10449_v47  ;;  %v927_v35 = vmul.f32 0.2, %v777_v48  ;;  %vm863_vm0 = vcmp.gt.f32.partialorder %v777_v48, 0.0 }
 0x2a5   :  { %v783_v2 = vadd.f32 %v782_v0, %v10316_v57  ;;  %1588 = vmatmul.mubr.bf16.gmra.mrb[108].mxu1 %v10446_v1  ;;  %v928_v3 = vmul.f32 0.2, %v779_v55  ;;  %vm864_vm1 = vcmp.gt.f32.partialorder %v779_v55, 0.0  ;;  %v10468_v0 = vld [vmem:[#allocation10 + $0x420] sm:$0xff] }
 0x2a6   :  { %vm865_vm2 = vcmp.gt.f32.partialorder %v781_v62, 0.0  ;;  %v929_v29 = vmul.f32 0.2, %v781_v62  ;;  %v991_v7 = vsel %vm863_vm0, %v777_v48, %v927_v35 }
 0x2a7   :  { %vm866_vm3 = vcmp.gt.f32.partialorder %v783_v2, 0.0  ;;  %v930_v8 = vmul.f32 0.2, %v783_v2  ;;  %v992_v18 = vsel %vm864_vm1, %v779_v55, %v928_v3 }
 0x2a8   :  { %v993_v15 = vsel %vm865_vm2, %v781_v62, %v929_v29  ;;  %v10466_v62 = vld [vmem:[#allocation10 + $0x400] sm:$0xff] }
 0x2a9   :  { %v786_v17 = vpop.f32.mrb[52].mxu1  ;;  %v994_v21 = vsel %vm866_vm3, %v783_v2, %v930_v8  ;;  %v10456_v22 = vpack.c.bf16 %v993_v15, %v991_v7  ;;  %v8214_v11 = vcombine.low %v10466_v62, %v10468_v0  ;;  %v8215_v25 = vcombine.high %v10466_v62, %v10468_v0 }
 0x2aa   :  { %v787_v24 = vadd.f32 %v786_v17, %v10313_v54  ;;  %v788_v26 = vpop.f32.mrb[53].mxu1  ;;  %v10459_v27 = vpack.c.bf16 %v994_v21, %v992_v18 }
 0x2ab   :  { %v789_v30 = vadd.f32 %v788_v26, %v10316_v57  ;;  %v790_v33 = vpop.f32.mrb[54].mxu1  ;;  %4050 = vmatprep.subr.bf16.mxu0 %v8215_v25 }
 0x2ac   :  { %v791_v36 = vadd.f32 %v790_v33, %v10313_v54  ;;  %v792_v37 = vpop.f32.mrb[55].mxu1  ;;  %1597 = vmatprep.mubr.bf16.mxu1 %v10459_v27  ;;  %v931_v5 = vmul.f32 0.2, %v787_v24  ;;  %vm867_vm5 = vcmp.gt.f32.partialorder %v787_v24, 0.0 }
 0x2ad   :  { %v793_v40 = vadd.f32 %v792_v37, %v10316_v57  ;;  %1598 = vmatmul.mubr.bf16.gmra.mrb[112].mxu1 %v10456_v22  ;;  %vm868_vm4 = vcmp.gt.f32.partialorder %v789_v30, 0.0  ;;  %v932_v48 = vmul.f32 0.2, %v789_v30 }
 0x2ae   :  { %vm869_vm6 = vcmp.gt.f32.partialorder %v791_v36, 0.0  ;;  %v933_v43 = vmul.f32 0.2, %v791_v36  ;;  %v995_v58 = vsel %vm867_vm5, %v787_v24, %v931_v5 }
 0x2af   :  { %vm870_vm7 = vcmp.gt.f32.partialorder %v793_v40, 0.0  ;;  %v934_v52 = vmul.f32 0.2, %v793_v40  ;;  %v996_v55 = vsel %vm868_vm4, %v789_v30, %v932_v48 }
 0x2b0   :  { %v997_v61 = vsel %vm869_vm6, %v791_v36, %v933_v43 }
 0x2b1   :  { %v796_v35 = vpop.f32.mrb[56].mxu1  ;;  %v998_v2 = vsel %vm870_vm7, %v793_v40, %v934_v52  ;;  %v10470_v3 = vpack.c.bf16 %v997_v61, %v995_v58 }
 0x2b2   :  { %v797_v29 = vadd.f32 %v796_v35, %v10313_v54  ;;  %v798_v51 = vpop.f32.mrb[57].mxu1  ;;  %v10477_v8 = vpack.c.bf16 %v998_v2, %v996_v55 }
 0x2b3   :  { %v799_v12 = vadd.f32 %v798_v51, %v10316_v57  ;;  %v800_v7 = vpop.f32.mrb[58].mxu1 }
 0x2b4   :  { %v801_v15 = vadd.f32 %v800_v7, %v10313_v54  ;;  %v802_v17 = vpop.f32.mrb[59].mxu1  ;;  %1607 = vmatprep.mubr.bf16.mxu1 %v10477_v8  ;;  %v935_v18 = vmul.f32 0.2, %v797_v29  ;;  %vm871_vm8 = vcmp.gt.f32.partialorder %v797_v29, 0.0 }
 0x2b5   :  { %v803_v21 = vadd.f32 %v802_v17, %v10316_v57  ;;  %1608 = vmatmul.mubr.bf16.gmra.mrb[116].mxu1 %v10470_v3  ;;  %v936_v24 = vmul.f32 0.2, %v799_v12  ;;  %vm872_vm9 = vcmp.gt.f32.partialorder %v799_v12, 0.0 }
 0x2b6   :  { %vm873_vm10 = vcmp.gt.f32.partialorder %v801_v15, 0.0  ;;  %v937_v26 = vmul.f32 0.2, %v801_v15  ;;  %v999_v33 = vsel %vm871_vm8, %v797_v29, %v935_v18 }
 0x2b7   :  { %vm874_vm11 = vcmp.gt.f32.partialorder %v803_v21, 0.0  ;;  %v938_v30 = vmul.f32 0.2, %v803_v21  ;;  %v1000_v5 = vsel %vm872_vm9, %v799_v12, %v936_v24 }
 0x2b8   :  { %v1001_v36 = vsel %vm873_vm10, %v801_v15, %v937_v26  ;;  %v2292_v26 = vld [vmem:[#allocation10 + $0x68] sm:$0xff] }
 0x2b9   :  { %v806_v37 = vpop.f32.mrb[60].mxu1  ;;  %v1002_v40 = vsel %vm874_vm11, %v803_v21, %v938_v30  ;;  %v10484_v48 = vpack.c.bf16 %v1001_v36, %v999_v33  ;;  %v2296_v33 = vld [vmem:[#allocation10 + $0x88] sm:$0xff] }
 0x2ba   :  { %v807_v43 = vadd.f32 %v806_v37, %v10313_v54  ;;  %v808_v52 = vpop.f32.mrb[61].mxu1  ;;  %v10487_v55 = vpack.c.bf16 %v1002_v40, %v1000_v5  ;;  %v2300_v36 = vld [vmem:[#allocation10 + $0xa8] sm:$0xff] }
 0x2bb   :  { %v809_v58 = vadd.f32 %v808_v52, %v10316_v57  ;;  %v810_v61 = vpop.f32.mrb[62].mxu1  ;;  %v8105_v5 = vcombine.high %v2296_v33, %v2300_v36  ;;  %v2304_v40 = vld [vmem:[#allocation10 + $0xc8] sm:$0xff] }
 0x2bc   :  { %v811_v35 = vadd.f32 %v810_v61, %v10313_v54  ;;  %v812_v2 = vpop.f32.mrb[63].mxu1  ;;  %1617 = vmatprep.mubr.bf16.mxu1 %v10487_v55  ;;  %v939_v25 = vmul.f32 0.2, %v807_v43  ;;  %vm875_vm12 = vcmp.gt.f32.partialorder %v807_v43, 0.0  ;;  %v2316_v61 = vld [vmem:[#allocation10 + $0x128] sm:$0xff] }
 0x2bd   :  { %v813_v29 = vadd.f32 %v812_v2, %v10316_v57  ;;  %1618 = vmatmul.mubr.bf16.gmra.mrb[120].mxu1 %v10484_v48  ;;  %v940_v51 = vmul.f32 0.2, %v809_v58  ;;  %vm876_vm13 = vcmp.gt.f32.partialorder %v809_v58, 0.0  ;;  %v2288_v57 = vld [vmem:[#allocation10 + $0x48] sm:$0xff] }
 0x2be   :  { %vm877_vm14 = vcmp.gt.f32.partialorder %v811_v35, 0.0  ;;  %v941_v12 = vmul.f32 0.2, %v811_v35  ;;  %v1003_v15 = vsel %vm875_vm12, %v807_v43, %v939_v25  ;;  %v8097_v30 = vcombine.high %v2288_v57, %v2292_v26  ;;  %v2308_v43 = vld [vmem:[#allocation10 + $0xe8] sm:$0xff] }
 0x2bf   :  { %vm878_vm15 = vcmp.gt.f32.partialorder %v813_v29, 0.0  ;;  %v942_v7 = vmul.f32 0.2, %v813_v29  ;;  %v1004_v18 = vsel %vm876_vm13, %v809_v58, %v940_v51  ;;  %v8096_v37 = vcombine.low %v2288_v57, %v2292_v26  ;;  %v2312_v58 = vld [vmem:[#allocation10 + $0x108] sm:$0xff] }
 0x2c0   :  { %v1005_v17 = vsel %vm877_vm14, %v811_v35, %v941_v12  ;;  %v8113_v52 = vcombine.high %v2304_v40, %v2308_v43  ;;  %v8129_v35 = vcombine.high %v2320_v44, %v2324_v45  ;;  %v2328_v2 = vld [vmem:[#allocation10 + $0x188] sm:$0xff] }
 0x2c1   :  { %v1006_v21 = vsel %vm878_vm15, %v813_v29, %v942_v7  ;;  %v10494_v54 = vpack.c.bf16 %v1005_v17, %v1003_v15  ;;  %v2332_v25 = vld [vmem:[#allocation10 + $0x1a8] sm:$0xff] }
 0x2c2   :  { %v10496_v24 = vpack.c.bf16 %v1006_v21, %v1004_v18  ;;  %v2336_v29 = vld [vmem:[#allocation10 + $0x1c8] sm:$0xff]  ;;  %v8136_v12 = vcombine.low %v2328_v2, %v2332_v25 }
 0x2c3   :  { %v2340_v51 = vld [vmem:[#allocation10 + $0x1e8] sm:$0xff] }
 0x2c4   :  { %1627 = vmatprep.mubr.bf16.mxu1 %v10496_v24  ;;  %v8145_v7 = vcombine.high %v2336_v29, %v2340_v51  ;;  %v2344_v15 = vld [vmem:[#allocation10 + $0x208] sm:$0xff] }
 0x2c5   :  { %1628 = vmatmul.mubr.bf16.gmra.mrb[124].mxu1 %v10494_v54  ;;  %v2348_v17 = vld [vmem:[#allocation10 + $0x228] sm:$0xff] }
 0x2c6   :  { %1670 = vmatprep.mubr.bf16.mxu1 %v10325_v34  ;;  %v8104_v34 = vcombine.low %v2296_v33, %v2300_v36  ;;  %v2352_v18 = vld [vmem:[#allocation10 + $0x248] sm:$0xff]  ;;  %v8152_v57 = vcombine.low %v2344_v15, %v2348_v17 }
 0x2c7   :  { %v2356_v21 = vld [vmem:[#allocation10 + $0x268] sm:$0xff] }
 0x2c8   :  { %v8161_v26 = vcombine.high %v2352_v18, %v2356_v21  ;;  %v2364_v33 = vld [vmem:[#allocation10 + $0x2a8] sm:$0xff] }
 0x2c9   :  { %v2368_v36 = vld [vmem:[#allocation10 + $0x2c8] sm:$0xff] }
 0x2cd   :  { %1671 = vmatmul.mubr.bf16.vlgmr.msra.gmra.mrb[128].mxu1 %v10322_v23  ;;  %v8112_v23 = vcombine.low %v2304_v40, %v2308_v43  ;;  %v2376_v43 = vld [vmem:[#allocation10 + $0x308] sm:$0xff] }
 0x2ce   :  { %1680 = vmatprep.mubr.bf16.mxu1 %v10335_v60  ;;  %4244 = vmatpush1.bf16.msra.mxu1 %v8088_v59  ;;  %v8121_v60 = vcombine.high %v2312_v58, %v2316_v61  ;;  %v8120_v59 = vcombine.low %v2312_v58, %v2316_v61  ;;  %v2388_v58 = vld [vmem:[#allocation10 + $0x368] sm:$0xff] }
 0x2cf   :  { %4245 = vmatprep.subr.bf16.mxu1 %v8097_v30  ;;  %v2360_v30 = vld [vmem:[#allocation10 + $0x288] sm:$0xff] }
 0x2d2   :  { %4246 = vmatpush1.bf16.msra.mxu1 %v8096_v37  ;;  %v2372_v37 = vld [vmem:[#allocation10 + $0x2e8] sm:$0xff] }
 0x2d3   :  { %4247 = vmatprep.subr.bf16.mxu1 %v8105_v5  ;;  %v8168_v5 = vcombine.low %v2360_v30, %v2364_v33  ;;  %v8177_v40 = vcombine.high %v2368_v36, %v2372_v37 }
 0x2d5   :  { %1681 = vmatmul.mubr.bf16.gmra.mrb[132].mxu1 %v10332_v56  ;;  %v8128_v56 = vcombine.low %v2320_v44, %v2324_v45  ;;  %v2396_v44 = vld [vmem:[#allocation10 + $0x3a8] sm:$0xff] }
 0x2d6   :  { %1690 = vmatprep.mubr.bf16.mxu1 %v10345_v14  ;;  %4248 = vmatpush1.bf16.msra.mxu1 %v8104_v34  ;;  %v8137_v14 = vcombine.high %v2328_v2, %v2332_v25  ;;  %v2380_v34 = vld [vmem:[#allocation10 + $0x328] sm:$0xff] }
 0x2d7   :  { %4249 = vmatprep.subr.bf16.mxu1 %v8113_v52  ;;  %v2384_v52 = vld [vmem:[#allocation10 + $0x348] sm:$0xff]  ;;  %v8184_v61 = vcombine.low %v2376_v43, %v2380_v34 }
 0x2d8   :  { %v2400_v45 = vld [vmem:[#allocation10 + $0x3c8] sm:$0xff] }
 0x2da   :  { %4250 = vmatpush1.bf16.msra.mxu1 %v8112_v23  ;;  %v8193_v23 = vcombine.high %v2384_v52, %v2388_v58 }
 0x2db   :  { %4251 = vmatprep.subr.bf16.mxu1 %v8121_v60  ;;  %v2392_v60 = vld [vmem:[#allocation10 + $0x388] sm:$0xff] }
 0x2dd   :  { %1691 = vmatmul.mubr.bf16.gmra.mrb[136].mxu1 %v10342_v4  ;;  %v8144_v4 = vcombine.low %v2336_v29, %v2340_v51 }
 0x2de   :  { %1700 = vmatprep.mubr.bf16.mxu1 %v10355_v41  ;;  %4252 = vmatpush1.bf16.msra.mxu1 %v8120_v59  ;;  %v8153_v41 = vcombine.high %v2344_v15, %v2348_v17  ;;  %v2404_v59 = vld [vmem:[#allocation10 + $0x3e8] sm:$0xff] }
 0x2df   :  { %4253 = vmatprep.subr.bf16.mxu1 %v8129_v35  ;;  %v8200_v35 = vcombine.low %v2392_v60, %v2396_v44  ;;  %v8209_v2 = vcombine.high %v2400_v45, %v2404_v59  ;;  %v8208_v25 = vcombine.low %v2400_v45, %v2404_v59  ;;  %v2431_v45 = vld [vmem:[#allocation10 + $0x4c0] sm:$0xff] }
 0x2e0   :  { %v2435_v59 = vld [vmem:[#allocation10 + $0x4e0] sm:$0xff] }
 0x2e2   :  { %4254 = vmatpush1.bf16.msra.mxu1 %v8128_v56 }
 0x2e3   :  { %4255 = vmatprep.subr.bf16.mxu1 %v8137_v14 }
 0x2e5   :  { %1701 = vmatmul.mubr.bf16.gmra.mrb[140].mxu1 %v10352_v9  ;;  %v8160_v9 = vcombine.low %v2352_v18, %v2356_v21  ;;  %v2415_v21 = vld [vmem:[#allocation10 + $0x440] sm:$0xff] }
 0x2e6   :  { %1710 = vmatprep.mubr.bf16.mxu1 %v10365_v32  ;;  %4256 = vmatpush1.bf16.msra.mxu1 %v8136_v12  ;;  %v8169_v32 = vcombine.high %v2360_v30, %v2364_v33 }
 0x2e7   :  { %4257 = vmatprep.subr.bf16.mxu1 %v8145_v7 }
 0x2ea   :  { %4258 = vmatpush1.bf16.msra.mxu1 %v8144_v4 }
 0x2eb   :  { %4259 = vmatprep.subr.bf16.mxu1 %v8153_v41 }
 0x2ed   :  { %1711 = vmatmul.mubr.bf16.gmra.mrb[144].mxu1 %v10362_v10  ;;  %v8176_v10 = vcombine.low %v2368_v36, %v2372_v37 }
 0x2ee   :  { %1720 = vmatprep.mubr.bf16.mxu1 %v10376_v46  ;;  %4260 = vmatpush1.bf16.msra.mxu1 %v8152_v57  ;;  %v8185_v46 = vcombine.high %v2376_v43, %v2380_v34  ;;  %v2419_v57 = vld [vmem:[#allocation10 + $0x460] sm:$0xff] }
 0x2ef   :  { %4261 = vmatprep.subr.bf16.mxu1 %v8161_v26 }
 0x2f2   :  { %4262 = vmatpush1.bf16.msra.mxu1 %v8160_v9 }
 0x2f3   :  { %4263 = vmatprep.subr.bf16.mxu1 %v8169_v32 }
 0x2f5   :  { %1721 = vmatmul.mubr.bf16.gmra.mrb[148].mxu1 %v10373_v42  ;;  %v8192_v42 = vcombine.low %v2384_v52, %v2388_v58 }
 0x2f6   :  { %1730 = vmatprep.mubr.bf16.mxu1 %v10388_v19  ;;  %4264 = vmatpush1.bf16.msra.mxu1 %v8168_v5  ;;  %v8201_v19 = vcombine.high %v2392_v60, %v2396_v44 }
 0x2f7   :  { %4265 = vmatprep.subr.bf16.mxu1 %v8177_v40  ;;  %v8223_v40 = vcombine.high %v2415_v21, %v2419_v57 }
 0x2fa   :  { %4266 = vmatpush1.bf16.msra.mxu1 %v8176_v10  ;;  %v2423_v10 = vld [vmem:[#allocation10 + $0x480] sm:$0xff] }
 0x2fb   :  { %4267 = vmatprep.subr.bf16.mxu1 %v8185_v46  ;;  %v2427_v46 = vld [vmem:[#allocation10 + $0x4a0] sm:$0xff] }
 0x2fc   :  { %v8231_v44 = vcombine.high %v2423_v10, %v2427_v46 }
 0x2fd   :  { %1731 = vmatmul.mubr.bf16.gmra.mrb[152].mxu1 %v10385_v16  ;;  %v10520_v16 = vld [vmem:[#allocation10 + $0x408] sm:$0xff] }
 0x2fe   :  { %1740 = vmatprep.mubr.bf16.mxu1 %v10400_v31  ;;  %4268 = vmatpush1.bf16.msra.mxu1 %v8184_v61  ;;  %v10522_v31 = vld [vmem:[#allocation10 + $0x428] sm:$0xff] }
 0x2ff   :  { %4269 = vmatprep.subr.bf16.mxu1 %v8193_v23  ;;  %v8217_v56 = vcombine.high %v10520_v16, %v10522_v31  ;;  %v8216_v14 = vcombine.low %v10520_v16, %v10522_v31  ;;  %v8222_v23 = vcombine.low %v2415_v21, %v2419_v57 }
 0x302   :  { %4270 = vmatpush1.bf16.msra.mxu1 %v8192_v42 }
 0x303   :  { %4271 = vmatprep.subr.bf16.mxu1 %v8201_v19 }
 0x305   :  { %1741 = vmatmul.mubr.bf16.gmra.mrb[156].mxu1 %v10397_v63  ;;  %v1103_v63 = vld [vmem:[%s13748_s6] sm:$0xf] }
 0x306   :  { %1750 = vmatprep.mubr.bf16.mxu1 %v10411_v39  ;;  %4272 = vmatpush1.bf16.msra.mxu1 %v8200_v35  ;;  %v10537_v39 = vrot.slane %v1103_v63, %v10304_v50 }
 0x307   :  { %4273 = vmatprep.subr.bf16.mxu1 %v8209_v2 }
 0x30a   :  { %4274 = vmatpush1.bf16.msra.mxu1 %v8208_v25 }
 0x30b   :  { %4436 = vmatprep.subr.bf16.mxu1 %v8217_v56 }
 0x30d   :  { %1751 = vmatmul.mubr.bf16.gmra.mrb[160].mxu1 %v10408_v38  ;;  %v10541_v38 = vrot.slane %v1103_v63, %v10310_v53  ;;  %v10569_v63 = vld [vmem:[#allocation10 + $0x10] sm:$0xff] }
 0x30e   :  { %1760 = vmatprep.mubr.bf16.mxu1 %v10429_v20 }
 0x315   :  { %1761 = vmatmul.mubr.bf16.gmra.mrb[164].mxu1 %v10426_v13 }
 0x316   :  { %1770 = vmatprep.mubr.bf16.mxu1 %v10439_v6 }
 0x31d   :  { %1771 = vmatmul.mubr.bf16.gmra.mrb[168].mxu1 %v10436_v28 }
 0x31e   :  { %1780 = vmatprep.mubr.bf16.mxu1 %v10449_v47 }
 0x320   :  { %v1479_v29 = vpop.f32.mrb[64].mxu1 }
 0x321   :  { %v1480_v20 = vadd.f32 %v1479_v29, %v10537_v39  ;;  %v1481_v13 = vpop.f32.mrb[65].mxu1 }
 0x322   :  { %v1482_v6 = vadd.f32 %v1481_v13, %v10541_v38  ;;  %v1483_v51 = vpop.f32.mrb[66].mxu1  ;;  %v8239_v13 = vcombine.high %v2431_v45, %v2435_v59 }
 0x323   :  { %v1959_v12 = vmul.f32 0.2, %v1480_v20  ;;  %v1484_v7 = vadd.f32 %v1483_v51, %v10537_v39  ;;  %v1485_v15 = vpop.f32.mrb[67].mxu1  ;;  %vm1831_vm0 = vcmp.gt.f32.partialorder %v1480_v20, 0.0 }
 0x324   :  { %v1960_v28 = vmul.f32 0.2, %v1482_v6  ;;  %v1486_v17 = vadd.f32 %v1485_v15, %v10541_v38  ;;  %vm1832_vm1 = vcmp.gt.f32.partialorder %v1482_v6, 0.0  ;;  %v2439_v15 = vld [vmem:[#allocation10 + $0x500] sm:$0xff] }
 0x325   :  { %vm1835_vm2 = vcmp.gt.f32.partialorder %v1484_v7, 0.0  ;;  %v1963_v47 = vmul.f32 0.2, %v1484_v7  ;;  %1781 = vmatmul.mubr.bf16.gmra.mrb[172].mxu1 %v10446_v1  ;;  %v2087_v41 = vsel %vm1831_vm0, %v1480_v20, %v1959_v12 }
 0x326   :  { %vm1836_vm3 = vcmp.gt.f32.partialorder %v1486_v17, 0.0  ;;  %v1964_v4 = vmul.f32 0.2, %v1486_v17  ;;  %1790 = vmatprep.mubr.bf16.mxu1 %v10459_v27  ;;  %v2088_v26 = vsel %vm1832_vm1, %v1482_v6, %v1960_v28  ;;  %v2443_v28 = vld [vmem:[#allocation10 + $0x520] sm:$0xff] }
 0x327   :  { %v2091_v18 = vsel %vm1835_vm2, %v1484_v7, %v1963_v47  ;;  %v8247_v21 = vcombine.high %v2439_v15, %v2443_v28 }
 0x328   :  { %v10549_v30 = vpack.c.bf16 %v2091_v18, %v2087_v41  ;;  %v2092_v33 = vsel %vm1836_vm3, %v1486_v17, %v1964_v4  ;;  %v1489_v9 = vpop.f32.mrb[68].mxu1  ;;  %v8238_v41 = vcombine.low %v2431_v45, %v2435_v59 }
 0x329   :  { %v1490_v32 = vadd.f32 %v1489_v9, %v10537_v39  ;;  %v1491_v36 = vpop.f32.mrb[69].mxu1  ;;  %v10552_v37 = vpack.c.bf16 %v2092_v33, %v2088_v26  ;;  %v2447_v33 = vld [vmem:[#allocation10 + $0x540] sm:$0xff] }
 0x32a   :  { %v1492_v1 = vadd.f32 %v1491_v36, %v10541_v38  ;;  %v1493_v5 = vpop.f32.mrb[70].mxu1  ;;  %v2451_v9 = vld [vmem:[#allocation10 + $0x560] sm:$0xff] }
 0x32b   :  { %v1967_v43 = vmul.f32 0.2, %v1490_v32  ;;  %v1494_v27 = vadd.f32 %v1493_v5, %v10537_v39  ;;  %v1495_v34 = vpop.f32.mrb[71].mxu1  ;;  %3889 = vmatprep.mubr.bf16.mxu0 %v10552_v37  ;;  %vm1839_vm4 = vcmp.gt.f32.partialorder %v1490_v32, 0.0 }
 0x32c   :  { %v1968_v52 = vmul.f32 0.2, %v1492_v1  ;;  %v1496_v58 = vadd.f32 %v1495_v34, %v10541_v38  ;;  %3890 = vmatmul.mubr.bf16.vlgmr.msra.gmra.mrb[32].mxu0 %v10549_v30  ;;  %vm1840_vm5 = vcmp.gt.f32.partialorder %v1492_v1, 0.0 }
 0x32d   :  { %vm1843_vm6 = vcmp.gt.f32.partialorder %v1494_v27, 0.0  ;;  %v1971_v61 = vmul.f32 0.2, %v1494_v27  ;;  %4051 = vmatpush1.bf16.msra.mxu0 %v8214_v11  ;;  %1791 = vmatmul.mubr.bf16.gmra.mrb[176].mxu1 %v10456_v22  ;;  %v2095_v42 = vsel %vm1839_vm4, %v1490_v32, %v1967_v43  ;;  %v8230_v11 = vcombine.low %v2423_v10, %v2427_v46 }
 0x32e   :  { %vm1844_vm7 = vcmp.gt.f32.partialorder %v1496_v58, 0.0  ;;  %v1972_v60 = vmul.f32 0.2, %v1496_v58  ;;  %1800 = vmatprep.mubr.bf16.mxu1 %v10477_v8  ;;  %4052 = vmatprep.subr.bf16.mxu0 %v8223_v40  ;;  %v2096_v35 = vsel %vm1840_vm5, %v1492_v1, %v1968_v52  ;;  %v10571_v8 = vld [vmem:[#allocation10 + $0x30] sm:$0xff]  ;;  %v8255_v10 = vcombine.high %v2447_v33, %v2451_v9 }
 0x32f   :  { %v2099_v19 = vsel %vm1843_vm6, %v1494_v27, %v1971_v61  ;;  %v8246_v27 = vcombine.low %v2439_v15, %v2443_v28  ;;  %v2455_v61 = vld [vmem:[#allocation10 + $0x580] sm:$0xff] }
 0x330   :  { %v2100_v2 = vsel %vm1844_vm7, %v1496_v58, %v1972_v60  ;;  %v1499_v25 = vpop.f32.mrb[72].mxu1  ;;  %v10564_v56 = vpack.c.bf16 %v2099_v19, %v2095_v42  ;;  %v8254_v19 = vcombine.low %v2447_v33, %v2451_v9 }
 0x331   :  { %v1500_v62 = vadd.f32 %v1499_v25, %v10537_v39  ;;  %v1501_v0 = vpop.f32.mrb[73].mxu1  ;;  %v10567_v22 = vpack.c.bf16 %v2100_v2, %v2096_v35  ;;  %4053 = vmatpush1.bf16.msra.mxu0 %v8222_v23  ;;  %v2459_v23 = vld [vmem:[#allocation10 + $0x5a0] sm:$0xff] }
 0x332   :  { %v1502_v29 = vadd.f32 %v1501_v0, %v10541_v38  ;;  %v1503_v20 = vpop.f32.mrb[74].mxu1  ;;  %4054 = vmatprep.subr.bf16.mxu0 %v8231_v44  ;;  %v8263_v59 = vcombine.high %v2455_v61, %v2459_v23  ;;  %v2463_v25 = vld [vmem:[#allocation10 + $0x5c0] sm:$0xff] }
 0x333   :  { %v1975_v51 = vmul.f32 0.2, %v1500_v62  ;;  %v1504_v12 = vadd.f32 %v1503_v20, %v10537_v39  ;;  %v1505_v7 = vpop.f32.mrb[75].mxu1  ;;  %3899 = vmatprep.mubr.bf16.mxu0 %v10567_v22  ;;  %vm1847_vm8 = vcmp.gt.f32.partialorder %v1500_v62, 0.0 }
 0x334   :  { %v1976_v17 = vmul.f32 0.2, %v1502_v29  ;;  %v1506_v47 = vadd.f32 %v1505_v7, %v10541_v38  ;;  %3900 = vmatmul.mubr.bf16.gmra.mrb[36].mxu0 %v10564_v56  ;;  %vm1848_vm9 = vcmp.gt.f32.partialorder %v1502_v29, 0.0 }
 0x335   :  { %vm1851_vm10 = vcmp.gt.f32.partialorder %v1504_v12, 0.0  ;;  %v1979_v4 = vmul.f32 0.2, %v1504_v12  ;;  %1801 = vmatmul.mubr.bf16.gmra.mrb[180].mxu1 %v10470_v3  ;;  %4055 = vmatpush1.bf16.msra.mxu0 %v8230_v11  ;;  %v2103_v57 = vsel %vm1847_vm8, %v1500_v62, %v1975_v51  ;;  %v2467_v62 = vld [vmem:[#allocation10 + $0x5e0] sm:$0xff] }
 0x336   :  { %vm1852_vm11 = vcmp.gt.f32.partialorder %v1506_v47, 0.0  ;;  %v1980_v18 = vmul.f32 0.2, %v1506_v47  ;;  %1810 = vmatprep.mubr.bf16.mxu1 %v10487_v55  ;;  %4056 = vmatprep.subr.bf16.mxu0 %v8239_v13  ;;  %v2104_v32 = vsel %vm1848_vm9, %v1502_v29, %v1976_v17  ;;  %v8271_v15 = vcombine.high %v2463_v25, %v2467_v62 }
 0x337   :  { %v2107_v26 = vsel %vm1851_vm10, %v1504_v12, %v1979_v4  ;;  %v8262_v12 = vcombine.low %v2455_v61, %v2459_v23  ;;  %v2471_v4 = vld [vmem:[#allocation10 + $0x600] sm:$0xff]  ;;  %v2420_v61 = vld [vmem:[#allocation10 + $0x468] sm:$0xff] }
 0x338   :  { %v2108_v36 = vsel %vm1852_vm11, %v1506_v47, %v1980_v18  ;;  %v1509_v1 = vpop.f32.mrb[76].mxu1  ;;  %v10582_v5 = vpack.c.bf16 %v2107_v26, %v2103_v57  ;;  %v8270_v26 = vcombine.low %v2463_v25, %v2467_v62 }
 0x339   :  { %v1510_v40 = vadd.f32 %v1509_v1, %v10537_v39  ;;  %v1511_v3 = vpop.f32.mrb[77].mxu1  ;;  %v10585_v43 = vpack.c.bf16 %v2108_v36, %v2104_v32  ;;  %4057 = vmatpush1.bf16.msra.mxu0 %v8238_v41  ;;  %v2475_v41 = vld [vmem:[#allocation10 + $0x620] sm:$0xff] }
 0x33a   :  { %v1512_v55 = vadd.f32 %v1511_v3, %v10541_v38  ;;  %v1513_v34 = vpop.f32.mrb[78].mxu1  ;;  %4058 = vmatprep.subr.bf16.mxu0 %v8247_v21  ;;  %v8279_v9 = vcombine.high %v2471_v4, %v2475_v41  ;;  %v2479_v1 = vld [vmem:[#allocation10 + $0x640] sm:$0xff] }
 0x33b   :  { %v1983_v46 = vmul.f32 0.2, %v1510_v40  ;;  %v1514_v52 = vadd.f32 %v1513_v34, %v10537_v39  ;;  %v1515_v58 = vpop.f32.mrb[79].mxu1  ;;  %3909 = vmatprep.mubr.bf16.mxu0 %v10585_v43  ;;  %vm1855_vm12 = vcmp.gt.f32.partialorder %v1510_v40, 0.0 }
 0x33c   :  { %v1984_v60 = vmul.f32 0.2, %v1512_v55  ;;  %v1516_v44 = vadd.f32 %v1515_v58, %v10541_v38  ;;  %3910 = vmatmul.mubr.bf16.gmra.mrb[40].mxu0 %v10582_v5  ;;  %vm1856_vm13 = vcmp.gt.f32.partialorder %v1512_v55, 0.0  ;;  %v2416_v58 = vld [vmem:[#allocation10 + $0x448] sm:$0xff] }
 0x33d   :  { %vm1859_vm14 = vcmp.gt.f32.partialorder %v1514_v52, 0.0  ;;  %v1987_v42 = vmul.f32 0.2, %v1514_v52  ;;  %1811 = vmatmul.mubr.bf16.gmra.mrb[184].mxu1 %v10484_v48  ;;  %4059 = vmatpush1.bf16.msra.mxu0 %v8246_v27  ;;  %v2111_v35 = vsel %vm1855_vm12, %v1510_v40, %v1983_v46  ;;  %v2483_v40 = vld [vmem:[#allocation10 + $0x660] sm:$0xff]  ;;  %v8225_v62 = vcombine.high %v2416_v58, %v2420_v61 }
 0x33e   :  { %vm1860_vm15 = vcmp.gt.f32.partialorder %v1516_v44, 0.0  ;;  %v1988_v45 = vmul.f32 0.2, %v1516_v44  ;;  %1820 = vmatprep.mubr.bf16.mxu1 %v10496_v24  ;;  %4060 = vmatprep.subr.bf16.mxu0 %v8255_v10  ;;  %v2112_v0 = vsel %vm1856_vm13, %v1512_v55, %v1984_v60 }
 0x33f   :  { %v2115_v2 = vsel %vm1859_vm14, %v1514_v52, %v1987_v42  ;;  %v8278_v52 = vcombine.low %v2471_v4, %v2475_v41 }
 0x340   :  { %v2116_v11 = vsel %vm1860_vm15, %v1516_v44, %v1988_v45  ;;  %v1519_v29 = vpop.f32.mrb[80].mxu1  ;;  %v10594_v20 = vpack.c.bf16 %v2115_v2, %v2111_v35  ;;  %v8287_v44 = vcombine.high %v2479_v1, %v2483_v40  ;;  %v2491_v35 = vld [vmem:[#allocation10 + $0x6a0] sm:$0xff] }
 0x341   :  { %v1520_v13 = vadd.f32 %v1519_v29, %v10537_v39  ;;  %v1521_v48 = vpop.f32.mrb[81].mxu1  ;;  %v10597_v51 = vpack.c.bf16 %v2116_v11, %v2112_v0  ;;  %4061 = vmatpush1.bf16.msra.mxu0 %v8254_v19  ;;  %v8286_v11 = vcombine.low %v2479_v1, %v2483_v40  ;;  %v2424_v29 = vld [vmem:[#allocation10 + $0x488] sm:$0xff] }
 0x342   :  { %v1522_v24 = vadd.f32 %v1521_v48, %v10541_v38  ;;  %v1523_v7 = vpop.f32.mrb[82].mxu1  ;;  %4062 = vmatprep.subr.bf16.mxu0 %v8263_v59  ;;  %v2487_v59 = vld [vmem:[#allocation10 + $0x680] sm:$0xff] }
 0x343   :  { %v1991_v28 = vmul.f32 0.2, %v1520_v13  ;;  %v1524_v17 = vadd.f32 %v1523_v7, %v10537_v39  ;;  %v1525_v47 = vpop.f32.mrb[83].mxu1  ;;  %3919 = vmatprep.mubr.bf16.mxu0 %v10597_v51  ;;  %vm1863_vm0 = vcmp.gt.f32.partialorder %v1520_v13, 0.0 }
 0x344   :  { %v1992_v18 = vmul.f32 0.2, %v1522_v24  ;;  %v1526_v21 = vadd.f32 %v1525_v47, %v10541_v38  ;;  %3920 = vmatmul.mubr.bf16.gmra.mrb[44].mxu0 %v10594_v20  ;;  %vm1864_vm1 = vcmp.gt.f32.partialorder %v1522_v24, 0.0 }
 0x345   :  { %vm1867_vm2 = vcmp.gt.f32.partialorder %v1524_v17, 0.0  ;;  %v1995_v57 = vmul.f32 0.2, %v1524_v17  ;;  %1821 = vmatmul.mubr.bf16.gmra.mrb[188].mxu1 %v10494_v54  ;;  %4063 = vmatpush1.bf16.msra.mxu0 %v8262_v12  ;;  %v2119_v32 = vsel %vm1863_vm0, %v1520_v13, %v1991_v28  ;;  %v2428_v13 = vld [vmem:[#allocation10 + $0x4a8] sm:$0xff]  ;;  %v8295_v12 = vcombine.high %v2487_v59, %v2491_v35  ;;  %v2499_v28 = vld [vmem:[#allocation10 + $0x6e0] sm:$0xff] }
 0x346   :  { %vm1868_vm3 = vcmp.gt.f32.partialorder %v1526_v21, 0.0  ;;  %v1996_v33 = vmul.f32 0.2, %v1526_v21  ;;  %4275 = vmatprep.mubr.bf16.mxu1 %v10552_v37  ;;  %4064 = vmatprep.subr.bf16.mxu0 %v8271_v15  ;;  %v2120_v3 = vsel %vm1864_vm1, %v1522_v24, %v1992_v18  ;;  %v10619_v15 = vld [vmem:[#allocation10 + $0x6c0] sm:$0xff] }
 0x347   :  { %v2123_v36 = vsel %vm1867_vm2, %v1524_v17, %v1995_v57  ;;  %v8224_v17 = vcombine.low %v2416_v58, %v2420_v61 }
 0x348   :  { %v2124_v27 = vsel %vm1868_vm3, %v1526_v21, %v1996_v33  ;;  %v1529_v55 = vpop.f32.mrb[84].mxu1  ;;  %v10606_v34 = vpack.c.bf16 %v2123_v36, %v2119_v32  ;;  %v8233_v21 = vcombine.high %v2424_v29, %v2428_v13  ;;  %v2432_v32 = vld [vmem:[#allocation10 + $0x4c8] sm:$0xff] }
 0x349   :  { %v1530_v10 = vadd.f32 %v1529_v55, %v10537_v39  ;;  %v1531_v54 = vpop.f32.mrb[85].mxu1  ;;  %v10609_v46 = vpack.c.bf16 %v2124_v27, %v2120_v3  ;;  %4065 = vmatpush1.bf16.msra.mxu0 %v8270_v26  ;;  %v2436_v36 = vld [vmem:[#allocation10 + $0x4e8] sm:$0xff]  ;;  %v10634_v27 = vld [vmem:[#allocation10 + $0x700] sm:$0xff] }
 0x34a   :  { %v1532_v23 = vadd.f32 %v1531_v54, %v10541_v38  ;;  %v1533_v60 = vpop.f32.mrb[86].mxu1  ;;  %4066 = vmatprep.subr.bf16.mxu0 %v8279_v9  ;;  %v8294_v9 = vcombine.low %v2487_v59, %v2491_v35  ;;  %v10636_v55 = vld [vmem:[#allocation10 + $0x720] sm:$0xff]  ;;  %v8241_v58 = vcombine.high %v2432_v32, %v2436_v36 }
 0x34b   :  { %v1999_v42 = vmul.f32 0.2, %v1530_v10  ;;  %v1534_v19 = vadd.f32 %v1533_v60, %v10537_v39  ;;  %v1535_v45 = vpop.f32.mrb[87].mxu1  ;;  %3929 = vmatprep.mubr.bf16.mxu0 %v10609_v46  ;;  %vm1871_vm4 = vcmp.gt.f32.partialorder %v1530_v10, 0.0  ;;  %v2440_v60 = vld [vmem:[#allocation10 + $0x508] sm:$0xff]  ;;  %v10646_v35 = vld [vmem:[#allocation10 + $0x740] sm:$0xff] }
 0x34c   :  { %v2000_v2 = vmul.f32 0.2, %v1532_v23  ;;  %v1536_v25 = vadd.f32 %v1535_v45, %v10541_v38  ;;  %3930 = vmatmul.mubr.bf16.gmra.mrb[48].mxu0 %v10606_v34  ;;  %vm1872_vm5 = vcmp.gt.f32.partialorder %v1532_v23, 0.0 }
 0x34d   :  { %vm1875_vm6 = vcmp.gt.f32.partialorder %v1534_v19, 0.0  ;;  %v2003_v0 = vmul.f32 0.2, %v1534_v19  ;;  %4276 = vmatmul.mubr.bf16.vlgmr.msra.gmra.mrb[192].mxu1 %v10549_v30  ;;  %4067 = vmatpush1.bf16.msra.mxu0 %v8278_v52  ;;  %v2127_v24 = vsel %vm1871_vm4, %v1530_v10, %v1999_v42  ;;  %v8232_v10 = vcombine.low %v2424_v29, %v2428_v13 }
 0x34e   :  { %vm1876_vm7 = vcmp.gt.f32.partialorder %v1536_v25, 0.0  ;;  %v2004_v48 = vmul.f32 0.2, %v1536_v25  ;;  %4285 = vmatprep.mubr.bf16.mxu1 %v10567_v22  ;;  %4068 = vmatprep.subr.bf16.mxu0 %v8287_v44  ;;  %v2128_v47 = vsel %vm1872_vm5, %v1532_v23, %v2000_v2  ;;  %v8302_v23 = vcombine.low %v10619_v15, %v2499_v28  ;;  %v2444_v44 = vld [vmem:[#allocation10 + $0x528] sm:$0xff]  ;;  %v2515_v2 = vld [vmem:[#allocation10 + $0x760] sm:$0xff] }
 0x34f   :  { %v2131_v7 = vsel %vm1875_vm6, %v1534_v19, %v2003_v0  ;;  %4437 = vmatpush1.bf16.msra.mxu1 %v8216_v14  ;;  %v8303_v14 = vcombine.high %v10619_v15, %v2499_v28  ;;  %v8311_v19 = vcombine.high %v10634_v27, %v10636_v55  ;;  %v8249_v13 = vcombine.high %v2440_v60, %v2444_v44  ;;  %v2448_v15 = vld [vmem:[#allocation10 + $0x548] sm:$0xff] }
 0x350   :  { %v2132_v4 = vsel %vm1876_vm7, %v1536_v25, %v2004_v48  ;;  %v1539_v41 = vpop.f32.mrb[88].mxu1  ;;  %v10625_v18 = vpack.c.bf16 %v2131_v7, %v2127_v24  ;;  %4438 = vmatprep.subr.bf16.mxu1 %v8225_v62  ;;  %v8240_v25 = vcombine.low %v2432_v32, %v2436_v36  ;;  %v8310_v7 = vcombine.low %v10634_v27, %v10636_v55  ;;  %v2452_v28 = vld [vmem:[#allocation10 + $0x568] sm:$0xff] }
 0x351   :  { %v1540_v57 = vadd.f32 %v1539_v41, %v10537_v39  ;;  %v1541_v26 = vpop.f32.mrb[89].mxu1  ;;  %v10628_v33 = vpack.c.bf16 %v2132_v4, %v2128_v47  ;;  %4069 = vmatpush1.bf16.msra.mxu0 %v8286_v11  ;;  %v8319_v4 = vcombine.high %v10646_v35, %v2515_v2  ;;  %v8248_v32 = vcombine.low %v2440_v60, %v2444_v44 }
 0x352   :  { %v1542_v16 = vadd.f32 %v1541_v26, %v10541_v38  ;;  %v1543_v31 = vpop.f32.mrb[90].mxu1  ;;  %4070 = vmatprep.subr.bf16.mxu0 %v8295_v12  ;;  %v2519_v26 = vld [vmem:[#allocation10 + $0x780] sm:$0xff] }
 0x353   :  { %v2007_v1 = vmul.f32 0.2, %v1540_v57  ;;  %v1544_v40 = vadd.f32 %v1543_v31, %v10537_v39  ;;  %v1545_v3 = vpop.f32.mrb[91].mxu1  ;;  %3939 = vmatprep.mubr.bf16.mxu0 %v10628_v33  ;;  %4439 = vmatpush1.bf16.msra.mxu1 %v8224_v17  ;;  %vm1879_vm8 = vcmp.gt.f32.partialorder %v1540_v57, 0.0  ;;  %v8257_v31 = vcombine.high %v2448_v15, %v2452_v28 }
 0x354   :  { %v2008_v54 = vmul.f32 0.2, %v1542_v16  ;;  %v1546_v52 = vadd.f32 %v1545_v3, %v10541_v38  ;;  %3940 = vmatmul.mubr.bf16.gmra.mrb[52].mxu0 %v10625_v18  ;;  %4440 = vmatprep.subr.bf16.mxu1 %v8233_v21  ;;  %vm1880_vm9 = vcmp.gt.f32.partialorder %v1542_v16, 0.0  ;;  %v2460_v3 = vld [vmem:[#allocation10 + $0x5a8] sm:$0xff] }
 0x355   :  { %vm1883_vm10 = vcmp.gt.f32.partialorder %v1544_v40, 0.0  ;;  %v2011_v61 = vmul.f32 0.2, %v1544_v40  ;;  %4286 = vmatmul.mubr.bf16.gmra.mrb[196].mxu1 %v10564_v56  ;;  %4071 = vmatpush1.bf16.msra.mxu0 %v8294_v9  ;;  %v2135_v45 = vsel %vm1879_vm8, %v1540_v57, %v2007_v1  ;;  %v2523_v9 = vld [vmem:[#allocation10 + $0x7a0] sm:$0xff]  ;;  %v8318_v1 = vcombine.low %v10646_v35, %v2515_v2 }
 0x356   :  { %vm1884_vm11 = vcmp.gt.f32.partialorder %v1546_v52, 0.0  ;;  %v2012_v42 = vmul.f32 0.2, %v1546_v52  ;;  %4295 = vmatprep.mubr.bf16.mxu1 %v10585_v43  ;;  %4072 = vmatprep.subr.bf16.mxu0 %v8303_v14  ;;  %v2136_v62 = vsel %vm1880_vm9, %v1542_v16, %v2008_v54  ;;  %v8327_v55 = vcombine.high %v2519_v26, %v2523_v9 }
 0x357   :  { %v2139_v59 = vsel %vm1883_vm10, %v1544_v40, %v2011_v61  ;;  %4441 = vmatpush1.bf16.msra.mxu1 %v8232_v10  ;;  %v2456_v40 = vld [vmem:[#allocation10 + $0x588] sm:$0xff]  ;;  %v2531_v61 = vld [vmem:[#allocation10 + $0x7e0] sm:$0xff]  ;;  %v8326_v2 = vcombine.low %v2519_v26, %v2523_v9  ;;  %v8091_v9 = vcombine.high %v10569_v63, %v10571_v8 }
 0x358   :  { %v2140_v0 = vsel %vm1884_vm11, %v1546_v52, %v2012_v42  ;;  %v1549_v11 = vpop.f32.mrb[92].mxu1  ;;  %v10649_v29 = vpack.c.bf16 %v2139_v59, %v2135_v45  ;;  %4442 = vmatprep.subr.bf16.mxu1 %v8241_v58  ;;  %v8256_v52 = vcombine.low %v2448_v15, %v2452_v28  ;;  %v2527_v58 = vld [vmem:[#allocation10 + $0x7c0] sm:$0xff]  ;;  %v8264_v15 = vcombine.low %v2456_v40, %v2460_v3 }
 0x359   :  { %v1550_v48 = vadd.f32 %v1549_v11, %v10537_v39  ;;  %v1551_v12 = vpop.f32.mrb[93].mxu1  ;;  %v10652_v24 = vpack.c.bf16 %v2140_v0, %v2136_v62  ;;  %4073 = vmatpush1.bf16.msra.mxu0 %v8302_v23  ;;  %v2468_v62 = vld [vmem:[#allocation10 + $0x5e8] sm:$0xff] }
 0x35a   :  { %v1552_v17 = vadd.f32 %v1551_v12, %v10541_v38  ;;  %v1553_v47 = vpop.f32.mrb[94].mxu1  ;;  %4074 = vmatprep.subr.bf16.mxu0 %v8311_v19  ;;  %v8265_v19 = vcombine.high %v2456_v40, %v2460_v3 }
 0x35b   :  { %v2015_v41 = vmul.f32 0.2, %v1550_v48  ;;  %v1554_v21 = vadd.f32 %v1553_v47, %v10537_v39  ;;  %v1555_v57 = vpop.f32.mrb[95].mxu1  ;;  %3949 = vmatprep.mubr.bf16.mxu0 %v10652_v24  ;;  %4443 = vmatpush1.bf16.msra.mxu1 %v8240_v25  ;;  %vm1887_vm12 = vcmp.gt.f32.partialorder %v1550_v48, 0.0  ;;  %v2464_v25 = vld [vmem:[#allocation10 + $0x5c8] sm:$0xff] }
 0x35c   :  { %v2016_v36 = vmul.f32 0.2, %v1552_v17  ;;  %v1556_v16 = vadd.f32 %v1555_v57, %v10541_v38  ;;  %3950 = vmatmul.mubr.bf16.gmra.mrb[56].mxu0 %v10649_v29  ;;  %4444 = vmatprep.subr.bf16.mxu1 %v8249_v13  ;;  %vm1888_vm13 = vcmp.gt.f32.partialorder %v1552_v17, 0.0  ;;  %v8335_v13 = vcombine.high %v2527_v58, %v2531_v61  ;;  %v2476_v57 = vld [vmem:[#allocation10 + $0x628] sm:$0xff] }
 0x35d   :  { %vm1891_vm14 = vcmp.gt.f32.partialorder %v1554_v21, 0.0  ;;  %v2019_v14 = vmul.f32 0.2, %v1554_v21  ;;  %4296 = vmatmul.mubr.bf16.gmra.mrb[200].mxu1 %v10582_v5  ;;  %4075 = vmatpush1.bf16.msra.mxu0 %v8310_v7  ;;  %v2143_v10 = vsel %vm1887_vm12, %v1550_v48, %v2015_v41  ;;  %v8273_v47 = vcombine.high %v2464_v25, %v2468_v62 }
 0x35e   :  { %vm1892_vm15 = vcmp.gt.f32.partialorder %v1556_v16, 0.0  ;;  %v2020_v27 = vmul.f32 0.2, %v1556_v16  ;;  %4305 = vmatprep.mubr.bf16.mxu1 %v10597_v51  ;;  %4076 = vmatprep.subr.bf16.mxu0 %v8319_v4  ;;  %v2144_v23 = vsel %vm1888_vm13, %v1552_v17, %v2016_v36  ;;  %v8334_v41 = vcombine.low %v2527_v58, %v2531_v61 }
 0x35f   :  { %v2147_v54 = vsel %vm1891_vm14, %v1554_v21, %v2019_v14  ;;  %4445 = vmatpush1.bf16.msra.mxu1 %v8248_v32  ;;  %v2472_v21 = vld [vmem:[#allocation10 + $0x608] sm:$0xff] }
 0x360   :  { %v2148_v60 = vsel %vm1892_vm15, %v1556_v16, %v2020_v27  ;;  %v1559_v44 = vpop.f32.mrb[96].mxu1  ;;  %v10667_v42 = vpack.c.bf16 %v2147_v54, %v2143_v10  ;;  %4446 = vmatprep.subr.bf16.mxu1 %v8257_v31  ;;  %v8272_v16 = vcombine.low %v2464_v25, %v2468_v62  ;;  %v8281_v3 = vcombine.high %v2472_v21, %v2476_v57  ;;  %v2480_v54 = vld [vmem:[#allocation10 + $0x648] sm:$0xff] }
 0x361   :  { %v1560_v45 = vadd.f32 %v1559_v44, %v10537_v39  ;;  %v1561_v59 = vpop.f32.mrb[97].mxu1  ;;  %v10670_v35 = vpack.c.bf16 %v2148_v60, %v2144_v23  ;;  %4077 = vmatpush1.bf16.msra.mxu0 %v8318_v1  ;;  %v2488_v62 = vld [vmem:[#allocation10 + $0x688] sm:$0xff] }
 0x362   :  { %v1562_v0 = vadd.f32 %v1561_v59, %v10541_v38  ;;  %v1563_v11 = vpop.f32.mrb[98].mxu1  ;;  %4078 = vmatprep.subr.bf16.mxu0 %v8327_v55 }
 0x363   :  { %v2023_v48 = vmul.f32 0.2, %v1560_v45  ;;  %v1564_v12 = vadd.f32 %v1563_v11, %v10537_v39  ;;  %v1565_v7 = vpop.f32.mrb[99].mxu1  ;;  %3959 = vmatprep.mubr.bf16.mxu0 %v10670_v35  ;;  %4447 = vmatpush1.bf16.msra.mxu1 %v8256_v52  ;;  %vm1895_vm0 = vcmp.gt.f32.partialorder %v1560_v45, 0.0  ;;  %v2484_v52 = vld [vmem:[#allocation10 + $0x668] sm:$0xff] }
 0x364   :  { %v2024_v28 = vmul.f32 0.2, %v1562_v0  ;;  %v1566_v17 = vadd.f32 %v1565_v7, %v10541_v38  ;;  %3960 = vmatmul.mubr.bf16.gmra.mrb[60].mxu0 %v10667_v42  ;;  %4448 = vmatprep.subr.bf16.mxu1 %v8265_v19  ;;  %vm1896_vm1 = vcmp.gt.f32.partialorder %v1562_v0, 0.0  ;;  %v8280_v19 = vcombine.low %v2472_v21, %v2476_v57  ;;  %v2496_v57 = vld [vmem:[#allocation10 + $0x6c8] sm:$0xff] }
 0x365   :  { %vm1899_vm2 = vcmp.gt.f32.partialorder %v1564_v12, 0.0  ;;  %v2027_v4 = vmul.f32 0.2, %v1564_v12  ;;  %4306 = vmatmul.mubr.bf16.gmra.mrb[204].mxu1 %v10594_v20  ;;  %4079 = vmatpush1.bf16.msra.mxu0 %v8326_v2  ;;  %v2151_v32 = vsel %vm1895_vm0, %v1560_v45, %v2023_v48  ;;  %v8289_v2 = vcombine.high %v2480_v54, %v2484_v52 }
 0x366   :  { %vm1900_vm3 = vcmp.gt.f32.partialorder %v1566_v17, 0.0  ;;  %v2028_v26 = vmul.f32 0.2, %v1566_v17  ;;  %4315 = vmatprep.mubr.bf16.mxu1 %v10609_v46  ;;  %4080 = vmatprep.subr.bf16.mxu0 %v8335_v13  ;;  %v2152_v31 = vsel %vm1896_vm1, %v1562_v0, %v2024_v28  ;;  %v2492_v0 = vld [vmem:[#allocation10 + $0x6a8] sm:$0xff] }
 0x367   :  { %v2155_v36 = vsel %vm1899_vm2, %v1564_v12, %v2027_v4  ;;  %4449 = vmatpush1.bf16.msra.mxu1 %v8264_v15  ;;  %v8288_v12 = vcombine.low %v2480_v54, %v2484_v52  ;;  %v2504_v54 = vld [vmem:[#allocation10 + $0x708] sm:$0xff] }
 0x368   :  { %v2156_v14 = vsel %vm1900_vm3, %v1566_v17, %v2028_v26  ;;  %v1569_v1 = vpop.f32.mrb[100].mxu1  ;;  %v10683_v40 = vpack.c.bf16 %v2155_v36, %v2151_v32  ;;  %4450 = vmatprep.subr.bf16.mxu1 %v8273_v47  ;;  %v8297_v47 = vcombine.high %v2488_v62, %v2492_v0  ;;  %v2500_v26 = vld [vmem:[#allocation10 + $0x6e8] sm:$0xff] }
 0x369   :  { %v1570_v27 = vadd.f32 %v1569_v1, %v10537_v39  ;;  %v1571_v55 = vpop.f32.mrb[101].mxu1  ;;  %v10686_v10 = vpack.c.bf16 %v2156_v14, %v2152_v31  ;;  %4081 = vmatpush1.bf16.msra.mxu0 %v8334_v41  ;;  %v8296_v14 = vcombine.low %v2488_v62, %v2492_v0  ;;  %v2508_v52 = vld [vmem:[#allocation10 + $0x728] sm:$0xff] }
 0x36a   :  { %v1572_v58 = vadd.f32 %v1571_v55, %v10541_v38  ;;  %v1573_v61 = vpop.f32.mrb[102].mxu1  ;;  %4629 = vmatprep.subr.bf16.mxu0 %v8091_v9 }
 0x36b   :  { %v2031_v23 = vmul.f32 0.2, %v1570_v27  ;;  %v1574_v60 = vadd.f32 %v1573_v61, %v10537_v39  ;;  %v1575_v44 = vpop.f32.mrb[103].mxu1  ;;  %3969 = vmatprep.mubr.bf16.mxu0 %v10686_v10  ;;  %4451 = vmatpush1.bf16.msra.mxu1 %v8272_v16  ;;  %vm1903_vm4 = vcmp.gt.f32.partialorder %v1570_v27, 0.0 }
 0x36c   :  { %v2032_v45 = vmul.f32 0.2, %v1572_v58  ;;  %v1576_v59 = vadd.f32 %v1575_v44, %v10541_v38  ;;  %3970 = vmatmul.mubr.bf16.gmra.mrb[64].mxu0 %v10683_v40  ;;  %4452 = vmatprep.subr.bf16.mxu1 %v8281_v3  ;;  %vm1904_vm5 = vcmp.gt.f32.partialorder %v1572_v58, 0.0 }
 0x36d   :  { %vm1907_vm6 = vcmp.gt.f32.partialorder %v1574_v60, 0.0  ;;  %v2035_v25 = vmul.f32 0.2, %v1574_v60  ;;  %4316 = vmatmul.mubr.bf16.gmra.mrb[208].mxu1 %v10606_v34  ;;  %v2159_v13 = vsel %vm1903_vm4, %v1570_v27, %v2031_v23  ;;  %v8305_v27 = vcombine.high %v2496_v57, %v2500_v26 }
 0x36e   :  { %vm1908_vm7 = vcmp.gt.f32.partialorder %v1576_v59, 0.0  ;;  %v2036_v11 = vmul.f32 0.2, %v1576_v59  ;;  %4325 = vmatprep.mubr.bf16.mxu1 %v10628_v33  ;;  %v2160_v7 = vsel %vm1904_vm5, %v1572_v58, %v2032_v45 }
 0x36f   :  { %v2163_v48 = vsel %vm1907_vm6, %v1574_v60, %v2035_v25  ;;  %4453 = vmatpush1.bf16.msra.mxu1 %v8280_v19  ;;  %v8304_v60 = vcombine.low %v2496_v57, %v2500_v26 }
 0x370   :  { %v2164_v15 = vsel %vm1908_vm7, %v1576_v59, %v2036_v11  ;;  %v1579_v28 = vpop.f32.mrb[104].mxu1  ;;  %v10695_v17 = vpack.c.bf16 %v2163_v48, %v2159_v13  ;;  %4454 = vmatprep.subr.bf16.mxu1 %v8289_v2  ;;  %v8313_v2 = vcombine.high %v2504_v54, %v2508_v52  ;;  %v2512_v11 = vld [vmem:[#allocation10 + $0x748] sm:$0xff] }
 0x371   :  { %v1580_v4 = vadd.f32 %v1579_v28, %v10537_v39  ;;  %v1581_v41 = vpop.f32.mrb[105].mxu1  ;;  %v10698_v21 = vpack.c.bf16 %v2164_v15, %v2160_v7  ;;  %v2516_v13 = vld [vmem:[#allocation10 + $0x768] sm:$0xff] }
 0x372   :  { %v1582_v9 = vadd.f32 %v1581_v41, %v10541_v38  ;;  %v1583_v32 = vpop.f32.mrb[106].mxu1  ;;  %v8321_v57 = vcombine.high %v2512_v11, %v2516_v13 }
 0x373   :  { %v2039_v36 = vmul.f32 0.2, %v1580_v4  ;;  %v1584_v16 = vadd.f32 %v1583_v32, %v10537_v39  ;;  %v1585_v31 = vpop.f32.mrb[107].mxu1  ;;  %3979 = vmatprep.mubr.bf16.mxu0 %v10698_v21  ;;  %4455 = vmatpush1.bf16.msra.mxu1 %v8288_v12  ;;  %vm1911_vm8 = vcmp.gt.f32.partialorder %v1580_v4, 0.0  ;;  %v2524_v32 = vld [vmem:[#allocation10 + $0x7a8] sm:$0xff] }
 0x374   :  { %v2040_v1 = vmul.f32 0.2, %v1582_v9  ;;  %v1586_v3 = vadd.f32 %v1585_v31, %v10541_v38  ;;  %3980 = vmatmul.mubr.bf16.gmra.mrb[68].mxu0 %v10695_v17  ;;  %4456 = vmatprep.subr.bf16.mxu1 %v8297_v47  ;;  %vm1912_vm9 = vcmp.gt.f32.partialorder %v1582_v9, 0.0  ;;  %v8312_v47 = vcombine.low %v2504_v54, %v2508_v52 }
 0x375   :  { %vm1915_vm10 = vcmp.gt.f32.partialorder %v1584_v16, 0.0  ;;  %v2043_v55 = vmul.f32 0.2, %v1584_v16  ;;  %4326 = vmatmul.mubr.bf16.gmra.mrb[212].mxu1 %v10625_v18  ;;  %v2167_v61 = vsel %vm1911_vm8, %v1580_v4, %v2039_v36 }
 0x376   :  { %vm1916_vm11 = vcmp.gt.f32.partialorder %v1586_v3, 0.0  ;;  %v2044_v58 = vmul.f32 0.2, %v1586_v3  ;;  %4335 = vmatprep.mubr.bf16.mxu1 %v10652_v24  ;;  %v2168_v44 = vsel %vm1912_vm9, %v1582_v9, %v2040_v1  ;;  %v2520_v9 = vld [vmem:[#allocation10 + $0x788] sm:$0xff] }
 0x377   :  { %v2171_v23 = vsel %vm1915_vm10, %v1584_v16, %v2043_v55  ;;  %4457 = vmatpush1.bf16.msra.mxu1 %v8296_v14  ;;  %v8320_v14 = vcombine.low %v2512_v11, %v2516_v13  ;;  %v8329_v54 = vcombine.high %v2520_v9, %v2524_v32 }
 0x378   :  { %v2172_v19 = vsel %vm1916_vm11, %v1586_v3, %v2044_v58  ;;  %v1589_v45 = vpop.f32.mrb[108].mxu1  ;;  %v10707_v59 = vpack.c.bf16 %v2171_v23, %v2167_v61  ;;  %4458 = vmatprep.subr.bf16.mxu1 %v8305_v27  ;;  %v2528_v23 = vld [vmem:[#allocation10 + $0x7c8] sm:$0xff] }
 0x379   :  { %v1590_v25 = vadd.f32 %v1589_v45, %v10537_v39  ;;  %v1591_v62 = vpop.f32.mrb[109].mxu1  ;;  %v10710_v0 = vpack.c.bf16 %v2172_v19, %v2168_v44 }
 0x37a   :  { %14005 = vst [vmem:[#allocation22_spill] sm:$0xff] %v10707_v59  ;;  %v1592_v48 = vadd.f32 %v1591_v62, %v10541_v38  ;;  %v1593_v12 = vpop.f32.mrb[110].mxu1  ;;  %v8328_v62 = vcombine.low %v2520_v9, %v2524_v32 }
 0x37b   :  { %v2047_v7 = vmul.f32 0.2, %v1590_v25  ;;  %v1594_v15 = vadd.f32 %v1593_v12, %v10537_v39  ;;  %v1595_v28 = vpop.f32.mrb[111].mxu1  ;;  %3989 = vmatprep.mubr.bf16.mxu0 %v10710_v0  ;;  %4459 = vmatpush1.bf16.msra.mxu1 %v8304_v60  ;;  %vm1919_vm12 = vcmp.gt.f32.partialorder %v1590_v25, 0.0  ;;  %v2532_v60 = vld [vmem:[#allocation10 + $0x7e8] sm:$0xff] }
 0x37c   :  { %v2048_v4 = vmul.f32 0.2, %v1592_v48  ;;  %v1596_v41 = vadd.f32 %v1595_v28, %v10541_v38  ;;  %3990 = vmatmul.mubr.bf16.gmra.mrb[72].mxu0 %v10707_v59  ;;  %4460 = vmatprep.subr.bf16.mxu1 %v8313_v2  ;;  %vm1920_vm13 = vcmp.gt.f32.partialorder %v1592_v48, 0.0 }
 0x37d   :  { %vm1923_vm14 = vcmp.gt.f32.partialorder %v1594_v15, 0.0  ;;  %v2051_v26 = vmul.f32 0.2, %v1594_v15  ;;  %4336 = vmatmul.mubr.bf16.gmra.mrb[216].mxu1 %v10649_v29  ;;  %v2175_v16 = vsel %vm1919_vm12, %v1590_v25, %v2047_v7 }
 0x37e   :  { %vm1924_vm15 = vcmp.gt.f32.partialorder %v1596_v41, 0.0  ;;  %v2052_v36 = vmul.f32 0.2, %v1596_v41  ;;  %4345 = vmatprep.mubr.bf16.mxu1 %v10670_v35  ;;  %v2176_v1 = vsel %vm1920_vm13, %v1592_v48, %v2048_v4  ;;  %v8337_v48 = vcombine.high %v2528_v23, %v2532_v60 }
 0x37f   :  { %v2179_v31 = vsel %vm1923_vm14, %v1594_v15, %v2051_v26  ;;  %4461 = vmatpush1.bf16.msra.mxu1 %v8312_v47  ;;  %v8336_v47 = vcombine.low %v2528_v23, %v2532_v60 }
 0x380   :  { %v2180_v3 = vsel %vm1924_vm15, %v1596_v41, %v2052_v36  ;;  %v1599_v27 = vpop.f32.mrb[112].mxu1  ;;  %v10719_v55 = vpack.c.bf16 %v2179_v31, %v2175_v16  ;;  %4462 = vmatprep.subr.bf16.mxu1 %v8321_v57 }
 0x381   :  { %v1600_v52 = vadd.f32 %v1599_v27, %v10537_v39  ;;  %v1601_v58 = vpop.f32.mrb[113].mxu1  ;;  %v10722_v61 = vpack.c.bf16 %v2180_v3, %v2176_v1  ;;  %v10739_v1 = vld [vmem:[#allocation10 + $0x38] sm:$0xff] }
 0x382   :  { %14006 = vst [vmem:[#allocation23_spill] sm:$0xff] %v10719_v55  ;;  %v1602_v44 = vadd.f32 %v1601_v58, %v10541_v38  ;;  %v1603_v19 = vpop.f32.mrb[114].mxu1 }
 0x383   :  { %14007 = vst [vmem:[#allocation24_spill] sm:$0xff] %v10722_v61  ;;  %v2055_v45 = vmul.f32 0.2, %v1600_v52  ;;  %v1604_v2 = vadd.f32 %v1603_v19, %v10537_v39  ;;  %v1605_v25 = vpop.f32.mrb[115].mxu1  ;;  %3999 = vmatprep.mubr.bf16.mxu0 %v10722_v61  ;;  %4463 = vmatpush1.bf16.msra.mxu1 %v8320_v14  ;;  %vm1927_vm0 = vcmp.gt.f32.partialorder %v1600_v52, 0.0  ;;  %v10737_v14 = vld [vmem:[#allocation10 + $0x18] sm:$0xff] }
 0x384   :  { %v2056_v11 = vmul.f32 0.2, %v1602_v44  ;;  %v1606_v13 = vadd.f32 %v1605_v25, %v10541_v38  ;;  %4000 = vmatmul.mubr.bf16.gmra.mrb[76].mxu0 %v10719_v55  ;;  %4464 = vmatprep.subr.bf16.mxu1 %v8329_v54  ;;  %vm1928_vm1 = vcmp.gt.f32.partialorder %v1602_v44, 0.0 }
 0x385   :  { %vm1931_vm2 = vcmp.gt.f32.partialorder %v1604_v2, 0.0  ;;  %v2059_v12 = vmul.f32 0.2, %v1604_v2  ;;  %4346 = vmatmul.mubr.bf16.gmra.mrb[220].mxu1 %v10667_v42  ;;  %v2183_v15 = vsel %vm1927_vm0, %v1600_v52, %v2055_v45  ;;  %v8093_v52 = vcombine.high %v10737_v14, %v10739_v1 }
 0x386   :  { %vm1932_vm3 = vcmp.gt.f32.partialorder %v1606_v13, 0.0  ;;  %v2060_v7 = vmul.f32 0.2, %v1606_v13  ;;  %4355 = vmatprep.mubr.bf16.mxu1 %v10686_v10  ;;  %v2184_v4 = vsel %vm1928_vm1, %v1602_v44, %v2056_v11 }
 0x387   :  { %v2187_v28 = vsel %vm1931_vm2, %v1604_v2, %v2059_v12  ;;  %4465 = vmatpush1.bf16.msra.mxu1 %v8328_v62 }
 0x388   :  { %v10731_v41 = vpack.c.bf16 %v2187_v28, %v2183_v15  ;;  %v2188_v57 = vsel %vm1932_vm3, %v1606_v13, %v2060_v7  ;;  %v1609_v26 = vpop.f32.mrb[116].mxu1  ;;  %4466 = vmatprep.subr.bf16.mxu1 %v8337_v48 }
 0x389   :  { %v10733_v9 = vpack.c.bf16 %v2188_v57, %v2184_v4  ;;  %v1610_v32 = vadd.f32 %v1609_v26, %v10537_v39  ;;  %v1611_v36 = vpop.f32.mrb[117].mxu1 }
 0x38a   :  { %14008 = vst [vmem:[#allocation25_spill] sm:$0xff] %v10731_v41  ;;  %v1612_v16 = vadd.f32 %v1611_v36, %v10541_v38  ;;  %v1613_v31 = vpop.f32.mrb[118].mxu1 }
 0x38b   :  { %14009 = vst [vmem:[#allocation26_spill] sm:$0xff] %v10733_v9  ;;  %v2063_v3 = vmul.f32 0.2, %v1610_v32  ;;  %v1614_v27 = vadd.f32 %v1613_v31, %v10537_v39  ;;  %v1615_v54 = vpop.f32.mrb[119].mxu1  ;;  %4009 = vmatprep.mubr.bf16.mxu0 %v10733_v9  ;;  %4467 = vmatpush1.bf16.msra.mxu1 %v8336_v47  ;;  %vm1935_vm4 = vcmp.gt.f32.partialorder %v1610_v32, 0.0 }
 0x38c   :  { %v2064_v58 = vmul.f32 0.2, %v1612_v16  ;;  %v1616_v23 = vadd.f32 %v1615_v54, %v10541_v38  ;;  %4010 = vmatmul.mubr.bf16.gmra.mrb[80].mxu0 %v10731_v41  ;;  %vm1936_vm5 = vcmp.gt.f32.partialorder %v1612_v16, 0.0  ;;  %5015 = vmatprep.subr.bf16.mxu1 %v8093_v52 }
 0x38d   :  { %vm1939_vm6 = vcmp.gt.f32.partialorder %v1614_v27, 0.0  ;;  %v2067_v44 = vmul.f32 0.2, %v1614_v27  ;;  %4356 = vmatmul.mubr.bf16.gmra.mrb[224].mxu1 %v10683_v40  ;;  %v2191_v45 = vsel %vm1935_vm4, %v1610_v32, %v2063_v3 }
 0x38e   :  { %vm1940_vm7 = vcmp.gt.f32.partialorder %v1616_v23, 0.0  ;;  %v2068_v19 = vmul.f32 0.2, %v1616_v23  ;;  %4365 = vmatprep.mubr.bf16.mxu1 %v10698_v21  ;;  %v2192_v25 = vsel %vm1936_vm5, %v1612_v16, %v2064_v58 }
 0x38f   :  { %v2195_v2 = vsel %vm1939_vm6, %v1614_v27, %v2067_v44 }
 0x390   :  { %v10751_v62 = vpack.c.bf16 %v2195_v2, %v2191_v45  ;;  %v2196_v11 = vsel %vm1940_vm7, %v1616_v23, %v2068_v19  ;;  %v1619_v13 = vpop.f32.mrb[120].mxu1  ;;  %v13754_v45 = vsub.s32 2, %v10301_v49 }
 0x391   :  { %v10753_v48 = vpack.c.bf16 %v2196_v11, %v2192_v25  ;;  %v1620_v12 = vadd.f32 %v1619_v13, %v10537_v39  ;;  %v1621_v7 = vpop.f32.mrb[121].mxu1  ;;  %v13755_v11 = vsub.s32 3, %v10301_v49  ;;  %v2309_v49 = vld [vmem:[#allocation10 + $0xf0] sm:$0xff] }
 0x392   :  { %14010 = vst [vmem:[#allocation27_spill] sm:$0xff] %v10751_v62  ;;  %v1622_v15 = vadd.f32 %v1621_v7, %v10541_v38  ;;  %v1623_v28 = vpop.f32.mrb[122].mxu1 }
 0x393   :  { %14011 = vst [vmem:[#allocation28_spill] sm:$0xff] %v10753_v48  ;;  %v2071_v47 = vmul.f32 0.2, %v1620_v12  ;;  %v1624_v4 = vadd.f32 %v1623_v28, %v10537_v39  ;;  %v1625_v57 = vpop.f32.mrb[123].mxu1  ;;  %4019 = vmatprep.mubr.bf16.mxu0 %v10753_v48  ;;  %vm1943_vm8 = vcmp.gt.f32.partialorder %v1620_v12, 0.0 }
 0x394   :  { %v2072_v26 = vmul.f32 0.2, %v1622_v15  ;;  %v1626_v32 = vadd.f32 %v1625_v57, %v10541_v38  ;;  %4020 = vmatmul.mubr.bf16.gmra.mrb[84].mxu0 %v10751_v62  ;;  %vm1944_vm9 = vcmp.gt.f32.partialorder %v1622_v15, 0.0 }
 0x395   :  { %vm1947_vm10 = vcmp.gt.f32.partialorder %v1624_v4, 0.0  ;;  %v2075_v36 = vmul.f32 0.2, %v1624_v4  ;;  %4366 = vmatmul.mubr.bf16.gmra.mrb[228].mxu1 %v10695_v17  ;;  %v2199_v31 = vsel %vm1943_vm8, %v1620_v12, %v2071_v47 }
 0x396   :  { %vm1948_vm11 = vcmp.gt.f32.partialorder %v1626_v32, 0.0  ;;  %v2076_v16 = vmul.f32 0.2, %v1626_v32  ;;  %4375 = vmatprep.mubr.bf16.mxu1 %v10710_v0  ;;  %v2200_v27 = vsel %vm1944_vm9, %v1622_v15, %v2072_v26 }
 0x397   :  { %v2203_v3 = vsel %vm1947_vm10, %v1624_v4, %v2075_v36  ;;  %v9806_v4 = vld [vmem:[%s13748_s6] sm:$0xf] }
 0x398   :  { %v10763_v54 = vpack.c.bf16 %v2203_v3, %v2199_v31  ;;  %v2204_v52 = vsel %vm1948_vm11, %v1626_v32, %v2076_v16  ;;  %v1629_v58 = vpop.f32.mrb[124].mxu1 }
 0x399   :  { %v10765_v23 = vpack.c.bf16 %v2204_v52, %v2200_v27  ;;  %v1630_v44 = vadd.f32 %v1629_v58, %v10537_v39  ;;  %v1631_v19 = vpop.f32.mrb[125].mxu1 }
 0x39a   :  { %14012 = vst [vmem:[#allocation29_spill] sm:$0xff] %v10763_v54  ;;  %v1632_v2 = vadd.f32 %v1631_v19, %v10541_v38  ;;  %v1633_v25 = vpop.f32.mrb[126].mxu1 }
 0x39b   :  { %14013 = vst [vmem:[#allocation30_spill] sm:$0xff] %v10765_v23  ;;  %v2079_v13 = vmul.f32 0.2, %v1630_v44  ;;  %v1634_v12 = vadd.f32 %v1633_v25, %v10537_v39  ;;  %v1635_v7 = vpop.f32.mrb[127].mxu1  ;;  %4029 = vmatprep.mubr.bf16.mxu0 %v10765_v23  ;;  %vm1951_vm12 = vcmp.gt.f32.partialorder %v1630_v44, 0.0  ;;  %v10781_v39 = vrot.slane %v9806_v4, %v13754_v45 }
 0x39c   :  { %v2080_v15 = vmul.f32 0.2, %v1632_v2  ;;  %v1636_v28 = vadd.f32 %v1635_v7, %v10541_v38  ;;  %4030 = vmatmul.mubr.bf16.gmra.mrb[88].mxu0 %v10763_v54  ;;  %vm1952_vm13 = vcmp.gt.f32.partialorder %v1632_v2, 0.0  ;;  %v10786_v38 = vrot.slane %v9806_v4, %v13755_v11 }
 0x39d   :  { %vm1955_vm14 = vcmp.gt.f32.partialorder %v1634_v12, 0.0  ;;  %v2083_v47 = vmul.f32 0.2, %v1634_v12  ;;  %4376 = vmatmul.mubr.bf16.gmra.mrb[232].mxu1 %v10707_v59  ;;  %v2207_v26 = vsel %vm1951_vm12, %v1630_v44, %v2079_v13  ;;  %v2310_v59 = vld [vmem:[#allocation10 + $0xf8] sm:$0xff] }
 0x39e   :  { %vm1956_vm15 = vcmp.gt.f32.partialorder %v1636_v28, 0.0  ;;  %v2084_v57 = vmul.f32 0.2, %v1636_v28  ;;  %4385 = vmatprep.mubr.bf16.mxu1 %v10722_v61  ;;  %v2208_v36 = vsel %vm1952_vm13, %v1632_v2, %v2080_v15  ;;  %v10800_v15 = vld [vmem:[#allocation10 + $0x410] sm:$0xff] }
 0x39f   :  { %v2211_v32 = vsel %vm1955_vm14, %v1634_v12, %v2083_v47 }
 0x3a0   :  { %v10788_v16 = vpack.c.bf16 %v2211_v32, %v2207_v26  ;;  %v2212_v31 = vsel %vm1956_vm15, %v1636_v28, %v2084_v57  ;;  %v1672_v3 = vpop.f32.mrb[128].mxu1  ;;  %v2289_v57 = vld [vmem:[#allocation10 + $0x50] sm:$0xff] }
 0x3a1   :  { %v10790_v27 = vpack.c.bf16 %v2212_v31, %v2208_v36  ;;  %v1673_v52 = vadd.f32 %v1672_v3, %v10781_v39  ;;  %v1674_v58 = vpop.f32.mrb[129].mxu1  ;;  %v2293_v26 = vld [vmem:[#allocation10 + $0x70] sm:$0xff] }
 0x3a2   :  { %14014 = vst [vmem:[#allocation31_spill] sm:$0xff] %v10788_v16  ;;  %v1675_v19 = vadd.f32 %v1674_v58, %v10786_v38  ;;  %v1676_v25 = vpop.f32.mrb[130].mxu1  ;;  %v10802_v32 = vld [vmem:[#allocation10 + $0x430] sm:$0xff] }
 0x3a3   :  { %14015 = vst [vmem:[#allocation32_spill] sm:$0xff] %v10790_v27  ;;  %v1961_v7 = vmul.f32 0.2, %v1673_v52  ;;  %v1677_v45 = vadd.f32 %v1676_v25, %v10781_v39  ;;  %v1678_v4 = vpop.f32.mrb[131].mxu1  ;;  %4039 = vmatprep.mubr.bf16.mxu0 %v10790_v27  ;;  %vm1833_vm0 = vcmp.gt.f32.partialorder %v1673_v52, 0.0  ;;  %v2305_v25 = vld [vmem:[#allocation10 + $0xd0] sm:$0xff] }
 0x3a4   :  { %v1962_v44 = vmul.f32 0.2, %v1675_v19  ;;  %v1679_v2 = vadd.f32 %v1678_v4, %v10786_v38  ;;  %4040 = vmatmul.mubr.bf16.gmra.mrb[92].mxu0 %v10788_v16  ;;  %vm1834_vm1 = vcmp.gt.f32.partialorder %v1675_v19, 0.0 }
 0x3a5   :  { %vm1837_vm2 = vcmp.gt.f32.partialorder %v1677_v45, 0.0  ;;  %v1965_v13 = vmul.f32 0.2, %v1677_v45  ;;  %4386 = vmatmul.mubr.bf16.gmra.mrb[236].mxu1 %v10719_v55  ;;  %v2089_v28 = vsel %vm1833_vm0, %v1673_v52, %v1961_v7  ;;  %v8099_v7 = vcombine.high %v2289_v57, %v2293_v26 }
 0x3a6   :  { %vm1838_vm3 = vcmp.gt.f32.partialorder %v1679_v2, 0.0  ;;  %v1966_v12 = vmul.f32 0.2, %v1679_v2  ;;  %4395 = vmatprep.mubr.bf16.mxu1 %v10733_v9  ;;  %v2090_v36 = vsel %vm1834_vm1, %v1675_v19, %v1962_v44  ;;  %v2297_v44 = vld [vmem:[#allocation10 + $0x90] sm:$0xff] }
 0x3a7   :  { %v2093_v47 = vsel %vm1837_vm2, %v1677_v45, %v1965_v13 }
 0x3a8   :  { %v10804_v31 = vpack.c.bf16 %v2093_v47, %v2089_v28  ;;  %v2094_v3 = vsel %vm1838_vm3, %v1679_v2, %v1966_v12  ;;  %v1682_v58 = vpop.f32.mrb[132].mxu1  ;;  %v2301_v2 = vld [vmem:[#allocation10 + $0xb0] sm:$0xff] }
 0x3a9   :  { %v10808_v4 = vpack.c.bf16 %v2094_v3, %v2090_v36  ;;  %v1683_v11 = vadd.f32 %v1682_v58, %v10781_v39  ;;  %v1684_v60 = vpop.f32.mrb[133].mxu1  ;;  %v8098_v36 = vcombine.low %v2289_v57, %v2293_v26  ;;  %v8107_v58 = vcombine.high %v2297_v44, %v2301_v2 }
 0x3aa   :  { %14016 = vst [vmem:[#allocation33_spill] sm:$0xff] %v10804_v31  ;;  %v1685_v52 = vadd.f32 %v1684_v60, %v10786_v38  ;;  %v1686_v45 = vpop.f32.mrb[134].mxu1  ;;  %v14018_v60 = vcombine.low %v10569_v63, %v10571_v8  ;;  %v8106_v26 = vcombine.low %v2297_v44, %v2301_v2  ;;  %v8114_v44 = vcombine.low %v2305_v25, %v2309_v49 }
 0x3ab   :  { %14017 = vst [vmem:[#allocation34_spill] sm:$0xff] %v10808_v4  ;;  %v1969_v13 = vmul.f32 0.2, %v1683_v11  ;;  %v1687_v6 = vadd.f32 %v1686_v45, %v10781_v39  ;;  %v1688_v19 = vpop.f32.mrb[135].mxu1  ;;  %4082 = vmatprep.mubr.bf16.mxu0 %v10808_v4  ;;  %vm1841_vm4 = vcmp.gt.f32.partialorder %v1683_v11, 0.0 }
 0x3ac   :  { %v1970_v12 = vmul.f32 0.2, %v1685_v52  ;;  %v1689_v28 = vadd.f32 %v1688_v19, %v10786_v38  ;;  %4083 = vmatmul.mubr.bf16.vlgmr.msra.gmra.mrb[32].mxu0 %v10804_v31  ;;  %vm1842_vm5 = vcmp.gt.f32.partialorder %v1685_v52, 0.0 }
 0x3ad   :  { %vm1845_vm6 = vcmp.gt.f32.partialorder %v1687_v6, 0.0  ;;  %v1973_v47 = vmul.f32 0.2, %v1687_v6  ;;  %4630 = vmatpush1.bf16.msra.mxu0 %v14018_v60  ;;  %4396 = vmatmul.mubr.bf16.gmra.mrb[240].mxu1 %v10731_v41  ;;  %v2097_v45 = vsel %vm1841_vm4, %v1683_v11, %v1969_v13  ;;  %v8115_v11 = vcombine.high %v2305_v25, %v2309_v49 }
 0x3ae   :  { %vm1846_vm7 = vcmp.gt.f32.partialorder %v1689_v28, 0.0  ;;  %v1974_v3 = vmul.f32 0.2, %v1689_v28  ;;  %4405 = vmatprep.mubr.bf16.mxu1 %v10753_v48  ;;  %4631 = vmatprep.subr.bf16.mxu0 %v8099_v7  ;;  %v2098_v9 = vsel %vm1842_vm5, %v1685_v52, %v1970_v12  ;;  %v2313_v12 = vld [vmem:[#allocation10 + $0x110] sm:$0xff]  ;;  %v14023_v41 = vcombine.low %v10737_v14, %v10739_v1 }
 0x3af   :  { %v2101_v19 = vsel %vm1845_vm6, %v1687_v6, %v1973_v47 }
 0x3b0   :  { %v10821_v55 = vpack.c.bf16 %v2101_v19, %v2097_v45  ;;  %v2102_v53 = vsel %vm1846_vm7, %v1689_v28, %v1974_v3  ;;  %v1692_v61 = vpop.f32.mrb[136].mxu1  ;;  %v2317_v28 = vld [vmem:[#allocation10 + $0x130] sm:$0xff] }
 0x3b1   :  { %v10823_v63 = vpack.c.bf16 %v2102_v53, %v2098_v9  ;;  %v1693_v8 = vadd.f32 %v1692_v61, %v10781_v39  ;;  %v1694_v57 = vpop.f32.mrb[137].mxu1  ;;  %4632 = vmatpush1.bf16.msra.mxu0 %v8098_v36  ;;  %v8123_v47 = vcombine.high %v2313_v12, %v2317_v28  ;;  %v2325_v45 = vld [vmem:[#allocation10 + $0x170] sm:$0xff]  ;;  %v8122_v25 = vcombine.low %v2313_v12, %v2317_v28 }
 0x3b2   :  { %v1695_v60 = vadd.f32 %v1694_v57, %v10786_v38  ;;  %v1696_v7 = vpop.f32.mrb[138].mxu1  ;;  %4633 = vmatprep.subr.bf16.mxu0 %v8107_v58  ;;  %v2321_v58 = vld [vmem:[#allocation10 + $0x150] sm:$0xff] }
 0x3b3   :  { %14019 = vst [vmem:[#allocation35_spill] sm:$0xff] %v10823_v63  ;;  %v1977_v6 = vmul.f32 0.2, %v1693_v8  ;;  %v1697_v13 = vadd.f32 %v1696_v7, %v10781_v39  ;;  %v1698_v52 = vpop.f32.mrb[139].mxu1  ;;  %4092 = vmatprep.mubr.bf16.mxu0 %v10823_v63  ;;  %vm1849_vm8 = vcmp.gt.f32.partialorder %v1693_v8, 0.0  ;;  %v8130_v28 = vcombine.low %v2321_v58, %v2325_v45 }
 0x3b4   :  { %v1978_v53 = vmul.f32 0.2, %v1695_v60  ;;  %v1699_v61 = vadd.f32 %v1698_v52, %v10786_v38  ;;  %4093 = vmatmul.mubr.bf16.gmra.mrb[36].mxu0 %v10821_v55  ;;  %vm1850_vm9 = vcmp.gt.f32.partialorder %v1695_v60, 0.0 }
 0x3b5   :  { %vm1853_vm10 = vcmp.gt.f32.partialorder %v1697_v13, 0.0  ;;  %v1981_v9 = vmul.f32 0.2, %v1697_v13  ;;  %4406 = vmatmul.mubr.bf16.gmra.mrb[244].mxu1 %v10751_v62  ;;  %4634 = vmatpush1.bf16.msra.mxu0 %v8106_v26  ;;  %v2105_v36 = vsel %vm1849_vm8, %v1693_v8, %v1977_v6  ;;  %v8131_v8 = vcombine.high %v2321_v58, %v2325_v45 }
 0x3b6   :  { %vm1854_vm11 = vcmp.gt.f32.partialorder %v1699_v61, 0.0  ;;  %v1982_v2 = vmul.f32 0.2, %v1699_v61  ;;  %4415 = vmatprep.mubr.bf16.mxu1 %v10765_v23  ;;  %4635 = vmatprep.subr.bf16.mxu0 %v8115_v11  ;;  %v2106_v19 = vsel %vm1850_vm9, %v1695_v60, %v1978_v53  ;;  %v2329_v53 = vld [vmem:[#allocation10 + $0x190] sm:$0xff] }
 0x3b7   :  { %v2109_v3 = vsel %vm1853_vm10, %v1697_v13, %v1981_v9 }
 0x3b8   :  { %v10833_v57 = vpack.c.bf16 %v2109_v3, %v2105_v36  ;;  %v2110_v7 = vsel %vm1854_vm11, %v1699_v61, %v1982_v2  ;;  %v1702_v52 = vpop.f32.mrb[140].mxu1  ;;  %v2333_v61 = vld [vmem:[#allocation10 + $0x1b0] sm:$0xff] }
 0x3b9   :  { %v10835_v48 = vpack.c.bf16 %v2110_v7, %v2106_v19  ;;  %v1703_v26 = vadd.f32 %v1702_v52, %v10781_v39  ;;  %v1704_v49 = vpop.f32.mrb[141].mxu1  ;;  %4636 = vmatpush1.bf16.msra.mxu0 %v8114_v44  ;;  %v2337_v19 = vld [vmem:[#allocation10 + $0x1d0] sm:$0xff]  ;;  %v8138_v45 = vcombine.low %v2329_v53, %v2333_v61 }
 0x3ba   :  { %14020 = vst [vmem:[#allocation36_spill] sm:$0xff] %v10833_v57  ;;  %v1705_v23 = vadd.f32 %v1704_v49, %v10786_v38  ;;  %v1706_v11 = vpop.f32.mrb[142].mxu1  ;;  %4637 = vmatprep.subr.bf16.mxu0 %v8123_v47  ;;  %v8139_v47 = vcombine.high %v2329_v53, %v2333_v61  ;;  %v2341_v7 = vld [vmem:[#allocation10 + $0x1f0] sm:$0xff] }
 0x3bb   :  { %14021 = vst [vmem:[#allocation37_spill] sm:$0xff] %v10835_v48  ;;  %v1985_v6 = vmul.f32 0.2, %v1703_v26  ;;  %v1707_v13 = vadd.f32 %v1706_v11, %v10781_v39  ;;  %v1708_v60 = vpop.f32.mrb[143].mxu1  ;;  %4102 = vmatprep.mubr.bf16.mxu0 %v10835_v48  ;;  %vm1857_vm12 = vcmp.gt.f32.partialorder %v1703_v26, 0.0  ;;  %v8146_v61 = vcombine.low %v2337_v19, %v2341_v7 }
 0x3bc   :  { %v1986_v9 = vmul.f32 0.2, %v1705_v23  ;;  %v1709_v2 = vadd.f32 %v1708_v60, %v10786_v38  ;;  %4103 = vmatmul.mubr.bf16.gmra.mrb[40].mxu0 %v10833_v57  ;;  %vm1858_vm13 = vcmp.gt.f32.partialorder %v1705_v23, 0.0 }
 0x3bd   :  { %vm1861_vm14 = vcmp.gt.f32.partialorder %v1707_v13, 0.0  ;;  %v1989_v12 = vmul.f32 0.2, %v1707_v13  ;;  %4416 = vmatmul.mubr.bf16.gmra.mrb[248].mxu1 %v10763_v54  ;;  %4638 = vmatpush1.bf16.msra.mxu0 %v8122_v25  ;;  %v2113_v36 = vsel %vm1857_vm12, %v1703_v26, %v1985_v6  ;;  %v8147_v26 = vcombine.high %v2337_v19, %v2341_v7 }
 0x3be   :  { %vm1862_vm15 = vcmp.gt.f32.partialorder %v1709_v2, 0.0  ;;  %v1990_v44 = vmul.f32 0.2, %v1709_v2  ;;  %4425 = vmatprep.mubr.bf16.mxu1 %v10790_v27  ;;  %4639 = vmatprep.subr.bf16.mxu0 %v8131_v8  ;;  %v2114_v52 = vsel %vm1858_vm13, %v1705_v23, %v1986_v9  ;;  %v2345_v9 = vld [vmem:[#allocation10 + $0x210] sm:$0xff] }
 0x3bf   :  { %v2117_v3 = vsel %vm1861_vm14, %v1707_v13, %v1989_v12 }
 0x3c0   :  { %v10845_v49 = vpack.c.bf16 %v2117_v3, %v2113_v36  ;;  %v2118_v11 = vsel %vm1862_vm15, %v1709_v2, %v1990_v44  ;;  %v1712_v60 = vpop.f32.mrb[144].mxu1  ;;  %v2349_v2 = vld [vmem:[#allocation10 + $0x230] sm:$0xff] }
 0x3c1   :  { %v10847_v62 = vpack.c.bf16 %v2118_v11, %v2114_v52  ;;  %v1713_v25 = vadd.f32 %v1712_v60, %v10781_v39  ;;  %v1714_v58 = vpop.f32.mrb[145].mxu1  ;;  %4640 = vmatpush1.bf16.msra.mxu0 %v8130_v28  ;;  %v2353_v52 = vld [vmem:[#allocation10 + $0x250] sm:$0xff]  ;;  %v8154_v7 = vcombine.low %v2345_v9, %v2349_v2 }
 0x3c2   :  { %v1715_v27 = vadd.f32 %v1714_v58, %v10786_v38  ;;  %v1716_v8 = vpop.f32.mrb[146].mxu1  ;;  %4641 = vmatprep.subr.bf16.mxu0 %v8139_v47  ;;  %v8155_v47 = vcombine.high %v2345_v9, %v2349_v2  ;;  %v2357_v11 = vld [vmem:[#allocation10 + $0x270] sm:$0xff] }
 0x3c3   :  { %14022 = vst [vmem:[#allocation38_spill] sm:$0xff] %v10847_v62  ;;  %v1993_v6 = vmul.f32 0.2, %v1713_v25  ;;  %v1717_v13 = vadd.f32 %v1716_v8, %v10781_v39  ;;  %v1718_v23 = vpop.f32.mrb[147].mxu1  ;;  %4112 = vmatprep.mubr.bf16.mxu0 %v10847_v62  ;;  %vm1865_vm0 = vcmp.gt.f32.partialorder %v1713_v25, 0.0 }
 0x3c4   :  { %v1994_v12 = vmul.f32 0.2, %v1715_v27  ;;  %v1719_v44 = vadd.f32 %v1718_v23, %v10786_v38  ;;  %4113 = vmatmul.mubr.bf16.gmra.mrb[44].mxu0 %v10845_v49  ;;  %vm1866_vm1 = vcmp.gt.f32.partialorder %v1715_v27, 0.0 }
 0x3c5   :  { %vm1869_vm2 = vcmp.gt.f32.partialorder %v1717_v13, 0.0  ;;  %v1997_v53 = vmul.f32 0.2, %v1717_v13  ;;  %4426 = vmatmul.mubr.bf16.gmra.mrb[252].mxu1 %v10788_v16  ;;  %4642 = vmatpush1.bf16.msra.mxu0 %v8138_v45  ;;  %v2121_v36 = vsel %vm1865_vm0, %v1713_v25, %v1993_v6  ;;  %v2290_v16 = vld [vmem:[#allocation10 + $0x58] sm:$0xff]  ;;  %v8163_v6 = vcombine.high %v2353_v52, %v2357_v11 }
 0x3c6   :  { %vm1870_vm3 = vcmp.gt.f32.partialorder %v1719_v44, 0.0  ;;  %v1998_v28 = vmul.f32 0.2, %v1719_v44  ;;  %4468 = vmatprep.mubr.bf16.mxu1 %v10808_v4  ;;  %4643 = vmatprep.subr.bf16.mxu0 %v8147_v26  ;;  %v2122_v60 = vsel %vm1866_vm1, %v1715_v27, %v1994_v12  ;;  %v2294_v4 = vld [vmem:[#allocation10 + $0x78] sm:$0xff] }
 0x3c7   :  { %v2125_v3 = vsel %vm1869_vm2, %v1717_v13, %v1997_v53  ;;  %v2365_v53 = vld [vmem:[#allocation10 + $0x2b0] sm:$0xff]  ;;  %v8101_v9 = vcombine.high %v2290_v16, %v2294_v4 }
 0x3c8   :  { %v10857_v58 = vpack.c.bf16 %v2125_v3, %v2121_v36  ;;  %v2126_v8 = vsel %vm1870_vm3, %v1719_v44, %v1998_v28  ;;  %v1722_v23 = vpop.f32.mrb[148].mxu1  ;;  %v2361_v44 = vld [vmem:[#allocation10 + $0x290] sm:$0xff]  ;;  %v2298_v36 = vld [vmem:[#allocation10 + $0x98] sm:$0xff] }
 0x3c9   :  { %v10859_v54 = vpack.c.bf16 %v2126_v8, %v2122_v60  ;;  %v1723_v45 = vadd.f32 %v1722_v23, %v10781_v39  ;;  %v1724_v19 = vpop.f32.mrb[149].mxu1  ;;  %4644 = vmatpush1.bf16.msra.mxu0 %v8146_v61  ;;  %v2302_v3 = vld [vmem:[#allocation10 + $0xb8] sm:$0xff]  ;;  %v8171_v8 = vcombine.high %v2361_v44, %v2365_v53 }
 0x3ca   :  { %v1725_v26 = vadd.f32 %v1724_v19, %v10786_v38  ;;  %v1726_v25 = vpop.f32.mrb[150].mxu1  ;;  %4645 = vmatprep.subr.bf16.mxu0 %v8155_v47  ;;  %v8162_v47 = vcombine.low %v2353_v52, %v2357_v11 }
 0x3cb   :  { %v2001_v13 = vmul.f32 0.2, %v1723_v45  ;;  %v1727_v27 = vadd.f32 %v1726_v25, %v10781_v39  ;;  %v1728_v12 = vpop.f32.mrb[151].mxu1  ;;  %4122 = vmatprep.mubr.bf16.mxu0 %v10859_v54  ;;  %vm1873_vm4 = vcmp.gt.f32.partialorder %v1723_v45, 0.0  ;;  %v10870_v25 = vld [vmem:[#allocation10 + $0x2d0] sm:$0xff] }
 0x3cc   :  { %v2002_v28 = vmul.f32 0.2, %v1725_v26  ;;  %v1729_v61 = vadd.f32 %v1728_v12, %v10786_v38  ;;  %4123 = vmatmul.mubr.bf16.gmra.mrb[48].mxu0 %v10857_v58  ;;  %vm1874_vm5 = vcmp.gt.f32.partialorder %v1725_v26, 0.0  ;;  %v2373_v12 = vld [vmem:[#allocation10 + $0x2f0] sm:$0xff] }
 0x3cd   :  { %vm1877_vm6 = vcmp.gt.f32.partialorder %v1727_v27, 0.0  ;;  %v2005_v2 = vmul.f32 0.2, %v1727_v27  ;;  %4469 = vmatmul.mubr.bf16.vlgmr.msra.gmra.mrb[192].mxu1 %v10804_v31  ;;  %4646 = vmatpush1.bf16.msra.mxu0 %v8154_v7  ;;  %v2129_v23 = vsel %vm1873_vm4, %v1723_v45, %v2001_v13  ;;  %v8100_v7 = vcombine.low %v2290_v16, %v2294_v4 }
 0x3ce   :  { %vm1878_vm7 = vcmp.gt.f32.partialorder %v1729_v61, 0.0  ;;  %v2006_v60 = vmul.f32 0.2, %v1729_v61  ;;  %4478 = vmatprep.mubr.bf16.mxu1 %v10823_v63  ;;  %4647 = vmatprep.subr.bf16.mxu0 %v8163_v6  ;;  %v2130_v52 = vsel %vm1874_vm5, %v1725_v26, %v2002_v28  ;;  %v8109_v6 = vcombine.high %v2298_v36, %v2302_v3 }
 0x3cf   :  { %v2133_v19 = vsel %vm1877_vm6, %v1727_v27, %v2005_v2  ;;  %5016 = vmatpush1.bf16.msra.mxu1 %v14023_v41  ;;  %v8170_v27 = vcombine.low %v2361_v44, %v2365_v53  ;;  %v2306_v2 = vld [vmem:[#allocation10 + $0xd8] sm:$0xff]  ;;  %v8179_v1 = vcombine.high %v10870_v25, %v2373_v12  ;;  %v8108_v44 = vcombine.low %v2298_v36, %v2302_v3 }
 0x3d0   :  { %v10876_v11 = vpack.c.bf16 %v2133_v19, %v2129_v23  ;;  %v2134_v31 = vsel %vm1878_vm7, %v1729_v61, %v2006_v60  ;;  %v1732_v50 = vpop.f32.mrb[152].mxu1  ;;  %5017 = vmatprep.subr.bf16.mxu1 %v8101_v9  ;;  %v8117_v61 = vcombine.high %v2306_v2, %v2310_v59  ;;  %v2314_v60 = vld [vmem:[#allocation10 + $0x118] sm:$0xff] }
 0x3d1   :  { %v10878_v63 = vpack.c.bf16 %v2134_v31, %v2130_v52  ;;  %v1733_v45 = vadd.f32 %v1732_v50, %v10781_v39  ;;  %v1734_v13 = vpop.f32.mrb[153].mxu1  ;;  %4648 = vmatpush1.bf16.msra.mxu0 %v8162_v47  ;;  %v10885_v31 = vld [vmem:[#allocation10 + $0x310] sm:$0xff]  ;;  %v8178_v47 = vcombine.low %v10870_v25, %v2373_v12 }
 0x3d2   :  { %14024 = vst [vmem:[#allocation39_spill] sm:$0xff] %v10876_v11  ;;  %v1735_v41 = vadd.f32 %v1734_v13, %v10786_v38  ;;  %v1736_v14 = vpop.f32.mrb[154].mxu1  ;;  %4649 = vmatprep.subr.bf16.mxu0 %v8171_v8  ;;  %v10887_v50 = vld [vmem:[#allocation10 + $0x330] sm:$0xff]  ;;  %v2318_v8 = vld [vmem:[#allocation10 + $0x138] sm:$0xff] }
 0x3d3   :  { %14025 = vst [vmem:[#allocation40_spill] sm:$0xff] %v10878_v63  ;;  %v2009_v16 = vmul.f32 0.2, %v1733_v45  ;;  %v1737_v4 = vadd.f32 %v1736_v14, %v10781_v39  ;;  %v1738_v26 = vpop.f32.mrb[155].mxu1  ;;  %4132 = vmatprep.mubr.bf16.mxu0 %v10878_v63  ;;  %5018 = vmatpush1.bf16.msra.mxu1 %v8100_v7  ;;  %vm1881_vm8 = vcmp.gt.f32.partialorder %v1733_v45, 0.0  ;;  %v8187_v3 = vcombine.high %v10885_v31, %v10887_v50  ;;  %v10897_v7 = vld [vmem:[#allocation10 + $0x350] sm:$0xff] }
 0x3d4   :  { %v2010_v53 = vmul.f32 0.2, %v1735_v41  ;;  %v1739_v28 = vadd.f32 %v1738_v26, %v10786_v38  ;;  %4133 = vmatmul.mubr.bf16.gmra.mrb[52].mxu0 %v10876_v11  ;;  %5019 = vmatprep.subr.bf16.mxu1 %v8109_v6  ;;  %vm1882_vm9 = vcmp.gt.f32.partialorder %v1735_v41, 0.0  ;;  %v2389_v52 = vld [vmem:[#allocation10 + $0x370] sm:$0xff]  ;;  %v8116_v6 = vcombine.low %v2306_v2, %v2310_v59 }
 0x3d5   :  { %vm1885_vm10 = vcmp.gt.f32.partialorder %v1737_v4, 0.0  ;;  %v2013_v9 = vmul.f32 0.2, %v1737_v4  ;;  %4479 = vmatmul.mubr.bf16.gmra.mrb[196].mxu1 %v10821_v55  ;;  %4650 = vmatpush1.bf16.msra.mxu0 %v8170_v27  ;;  %v2137_v23 = vsel %vm1881_vm8, %v1733_v45, %v2009_v16  ;;  %v8125_v14 = vcombine.high %v2314_v60, %v2318_v8  ;;  %v2322_v16 = vld [vmem:[#allocation10 + $0x158] sm:$0xff] }
 0x3d6   :  { %vm1886_vm11 = vcmp.gt.f32.partialorder %v1739_v28, 0.0  ;;  %v2014_v36 = vmul.f32 0.2, %v1739_v28  ;;  %4488 = vmatprep.mubr.bf16.mxu1 %v10835_v48  ;;  %4651 = vmatprep.subr.bf16.mxu0 %v8179_v1  ;;  %v2138_v25 = vsel %vm1882_vm9, %v1735_v41, %v2010_v53  ;;  %v8186_v45 = vcombine.low %v10885_v31, %v10887_v50 }
 0x3d7   :  { %v2141_v19 = vsel %vm1885_vm10, %v1737_v4, %v2013_v9  ;;  %5020 = vmatpush1.bf16.msra.mxu1 %v8108_v44  ;;  %v2326_v4 = vld [vmem:[#allocation10 + $0x178] sm:$0xff]  ;;  %v8195_v41 = vcombine.high %v10897_v7, %v2389_v52  ;;  %v2397_v9 = vld [vmem:[#allocation10 + $0x3b0] sm:$0xff] }
 0x3d8   :  { %v10900_v12 = vpack.c.bf16 %v2141_v19, %v2137_v23  ;;  %v2142_v13 = vsel %vm1886_vm11, %v1739_v28, %v2014_v36  ;;  %v1742_v27 = vpop.f32.mrb[156].mxu1  ;;  %5021 = vmatprep.subr.bf16.mxu1 %v8117_v61  ;;  %v2393_v61 = vld [vmem:[#allocation10 + $0x390] sm:$0xff]  ;;  %v2330_v23 = vld [vmem:[#allocation10 + $0x198] sm:$0xff] }
 0x3d9   :  { %v10902_v1 = vpack.c.bf16 %v2142_v13, %v2138_v25  ;;  %v1743_v26 = vadd.f32 %v1742_v27, %v10781_v39  ;;  %v1744_v48 = vpop.f32.mrb[157].mxu1  ;;  %4652 = vmatpush1.bf16.msra.mxu0 %v8178_v47  ;;  %v8124_v47 = vcombine.low %v2314_v60, %v2318_v8  ;;  %v2334_v19 = vld [vmem:[#allocation10 + $0x1b8] sm:$0xff]  ;;  %v8203_v8 = vcombine.high %v2393_v61, %v2397_v9  ;;  %v2401_v27 = vld [vmem:[#allocation10 + $0x3d0] sm:$0xff] }
 0x3da   :  { %14026 = vst [vmem:[#allocation41_spill] sm:$0xff] %v10900_v12  ;;  %v1745_v59 = vadd.f32 %v1744_v48, %v10786_v38  ;;  %v1746_v2 = vpop.f32.mrb[158].mxu1  ;;  %4653 = vmatprep.subr.bf16.mxu0 %v8187_v3  ;;  %v8133_v48 = vcombine.high %v2322_v16, %v2326_v4  ;;  %v8194_v3 = vcombine.low %v10897_v7, %v2389_v52 }
 0x3db   :  { %14027 = vst [vmem:[#allocation42_spill] sm:$0xff] %v10902_v1  ;;  %v2017_v44 = vmul.f32 0.2, %v1743_v26  ;;  %v1747_v53 = vadd.f32 %v1746_v2, %v10781_v39  ;;  %v1748_v28 = vpop.f32.mrb[159].mxu1  ;;  %4142 = vmatprep.mubr.bf16.mxu0 %v10902_v1  ;;  %5022 = vmatpush1.bf16.msra.mxu1 %v8116_v6  ;;  %vm1889_vm12 = vcmp.gt.f32.partialorder %v1743_v26, 0.0  ;;  %v8132_v13 = vcombine.low %v2322_v16, %v2326_v4 }
 0x3dc   :  { %v2018_v31 = vmul.f32 0.2, %v1745_v59  ;;  %v1749_v50 = vadd.f32 %v1748_v28, %v10786_v38  ;;  %4143 = vmatmul.mubr.bf16.gmra.mrb[56].mxu0 %v10900_v12  ;;  %5023 = vmatprep.subr.bf16.mxu1 %v8125_v14  ;;  %vm1890_vm13 = vcmp.gt.f32.partialorder %v1745_v59, 0.0  ;;  %v2405_v14 = vld [vmem:[#allocation10 + $0x3f0] sm:$0xff]  ;;  %v8141_v28 = vcombine.high %v2330_v23, %v2334_v19 }
 0x3dd   :  { %vm1893_vm14 = vcmp.gt.f32.partialorder %v1747_v53, 0.0  ;;  %v2021_v36 = vmul.f32 0.2, %v1747_v53  ;;  %4489 = vmatmul.mubr.bf16.gmra.mrb[200].mxu1 %v10833_v57  ;;  %4654 = vmatpush1.bf16.msra.mxu0 %v8186_v45  ;;  %v2145_v6 = vsel %vm1889_vm12, %v1743_v26, %v2017_v44  ;;  %v8202_v26 = vcombine.low %v2393_v61, %v2397_v9  ;;  %v2338_v44 = vld [vmem:[#allocation10 + $0x1d8] sm:$0xff] }
 0x3de   :  { %vm1894_vm15 = vcmp.gt.f32.partialorder %v1749_v50, 0.0  ;;  %v2022_v60 = vmul.f32 0.2, %v1749_v50  ;;  %4498 = vmatprep.mubr.bf16.mxu1 %v10847_v62  ;;  %4655 = vmatprep.subr.bf16.mxu0 %v8195_v41  ;;  %v2146_v2 = vsel %vm1890_vm13, %v1745_v59, %v2018_v31  ;;  %v8211_v59 = vcombine.high %v2401_v27, %v2405_v14 }
 0x3df   :  { %v2149_v25 = vsel %vm1893_vm14, %v1747_v53, %v2021_v36  ;;  %5024 = vmatpush1.bf16.msra.mxu1 %v8124_v47  ;;  %v2342_v53 = vld [vmem:[#allocation10 + $0x1f8] sm:$0xff]  ;;  %v8210_v9 = vcombine.low %v2401_v27, %v2405_v14 }
 0x3e0   :  { %v10918_v45 = vpack.c.bf16 %v2149_v25, %v2145_v6  ;;  %v2150_v7 = vsel %vm1894_vm15, %v1749_v50, %v2022_v60  ;;  %v1752_v52 = vpop.f32.mrb[160].mxu1  ;;  %5025 = vmatprep.subr.bf16.mxu1 %v8133_v48  ;;  %v8140_v48 = vcombine.low %v2330_v23, %v2334_v19  ;;  %v8149_v61 = vcombine.high %v2338_v44, %v2342_v53  ;;  %v2346_v60 = vld [vmem:[#allocation10 + $0x218] sm:$0xff] }
 0x3e1   :  { %v10920_v57 = vpack.c.bf16 %v2150_v7, %v2146_v2  ;;  %v1753_v41 = vadd.f32 %v1752_v52, %v10781_v39  ;;  %v1754_v62 = vpop.f32.mrb[161].mxu1  ;;  %4656 = vmatpush1.bf16.msra.mxu0 %v8194_v3  ;;  %v8219_v23 = vcombine.high %v10800_v15, %v10802_v32 }
 0x3e2   :  { %v1755_v16 = vadd.f32 %v1754_v62, %v10786_v38  ;;  %v1756_v4 = vpop.f32.mrb[162].mxu1  ;;  %4657 = vmatprep.subr.bf16.mxu0 %v8203_v8  ;;  %v2350_v8 = vld [vmem:[#allocation10 + $0x238] sm:$0xff] }
 0x3e3   :  { %14028 = vst [vmem:[#allocation43_spill] sm:$0xff] %v10920_v57  ;;  %v2025_v47 = vmul.f32 0.2, %v1753_v41  ;;  %v1757_v31 = vadd.f32 %v1756_v4, %v10781_v39  ;;  %v1758_v50 = vpop.f32.mrb[163].mxu1  ;;  %4152 = vmatprep.mubr.bf16.mxu0 %v10920_v57  ;;  %5026 = vmatpush1.bf16.msra.mxu1 %v8132_v13  ;;  %vm1897_vm0 = vcmp.gt.f32.partialorder %v1753_v41, 0.0  ;;  %v8148_v13 = vcombine.low %v2338_v44, %v2342_v53 }
 0x3e4   :  { %v2026_v36 = vmul.f32 0.2, %v1755_v16  ;;  %v1759_v3 = vadd.f32 %v1758_v50, %v10786_v38  ;;  %4153 = vmatmul.mubr.bf16.gmra.mrb[60].mxu0 %v10918_v45  ;;  %5027 = vmatprep.subr.bf16.mxu1 %v8141_v28  ;;  %vm1898_vm1 = vcmp.gt.f32.partialorder %v1755_v16, 0.0  ;;  %v8157_v52 = vcombine.high %v2346_v60, %v2350_v8  ;;  %v2358_v50 = vld [vmem:[#allocation10 + $0x278] sm:$0xff] }
 0x3e5   :  { %vm1901_vm2 = vcmp.gt.f32.partialorder %v1757_v31, 0.0  ;;  %v2029_v62 = vmul.f32 0.2, %v1757_v31  ;;  %4499 = vmatmul.mubr.bf16.gmra.mrb[204].mxu1 %v10845_v49  ;;  %4658 = vmatpush1.bf16.msra.mxu0 %v8202_v26  ;;  %v2153_v19 = vsel %vm1897_vm0, %v1753_v41, %v2025_v47 }
 0x3e6   :  { %vm1902_vm3 = vcmp.gt.f32.partialorder %v1759_v3, 0.0  ;;  %v2030_v6 = vmul.f32 0.2, %v1759_v3  ;;  %4508 = vmatprep.mubr.bf16.mxu1 %v10859_v54  ;;  %4659 = vmatprep.subr.bf16.mxu0 %v8211_v59  ;;  %v2154_v2 = vsel %vm1898_vm1, %v1755_v16, %v2026_v36  ;;  %v2354_v59 = vld [vmem:[#allocation10 + $0x258] sm:$0xff] }
 0x3e7   :  { %v2157_v25 = vsel %vm1901_vm2, %v1757_v31, %v2029_v62  ;;  %5028 = vmatpush1.bf16.msra.mxu1 %v8140_v48  ;;  %v8156_v31 = vcombine.low %v2346_v60, %v2350_v8  ;;  %v2362_v62 = vld [vmem:[#allocation10 + $0x298] sm:$0xff] }
 0x3e8   :  { %v10934_v7 = vpack.c.bf16 %v2157_v25, %v2153_v19  ;;  %v2158_v27 = vsel %vm1902_vm3, %v1759_v3, %v2030_v6  ;;  %v1762_v14 = vpop.f32.mrb[164].mxu1  ;;  %5029 = vmatprep.subr.bf16.mxu1 %v8149_v61  ;;  %v8165_v3 = vcombine.high %v2354_v59, %v2358_v50 }
 0x3e9   :  { %v10936_v28 = vpack.c.bf16 %v2158_v27, %v2154_v2  ;;  %v1763_v26 = vadd.f32 %v1762_v14, %v10781_v39  ;;  %v1764_v4 = vpop.f32.mrb[165].mxu1  ;;  %4660 = vmatpush1.bf16.msra.mxu0 %v8210_v9  ;;  %v2366_v9 = vld [vmem:[#allocation10 + $0x2b8] sm:$0xff] }
 0x3ea   :  { %14029 = vst [vmem:[#allocation44_spill] sm:$0xff] %v10934_v7  ;;  %v1765_v41 = vadd.f32 %v1764_v4, %v10786_v38  ;;  %v1766_v47 = vpop.f32.mrb[166].mxu1  ;;  %4822 = vmatprep.subr.bf16.mxu0 %v8219_v23  ;;  %v8164_v23 = vcombine.low %v2354_v59, %v2358_v50  ;;  %v8173_v27 = vcombine.high %v2362_v62, %v2366_v9 }
 0x3eb   :  { %14030 = vst [vmem:[#allocation45_spill] sm:$0xff] %v10936_v28  ;;  %v2033_v44 = vmul.f32 0.2, %v1763_v26  ;;  %v1767_v53 = vadd.f32 %v1766_v47, %v10781_v39  ;;  %v1768_v16 = vpop.f32.mrb[167].mxu1  ;;  %4162 = vmatprep.mubr.bf16.mxu0 %v10936_v28  ;;  %5030 = vmatpush1.bf16.msra.mxu1 %v8148_v13  ;;  %vm1905_vm4 = vcmp.gt.f32.partialorder %v1763_v26, 0.0  ;;  %v2370_v47 = vld [vmem:[#allocation10 + $0x2d8] sm:$0xff] }
 0x3ec   :  { %v2034_v48 = vmul.f32 0.2, %v1765_v41  ;;  %v1769_v36 = vadd.f32 %v1768_v16, %v10786_v38  ;;  %4163 = vmatmul.mubr.bf16.gmra.mrb[64].mxu0 %v10934_v7  ;;  %5031 = vmatprep.subr.bf16.mxu1 %v8157_v52  ;;  %vm1906_vm5 = vcmp.gt.f32.partialorder %v1765_v41, 0.0  ;;  %v2374_v16 = vld [vmem:[#allocation10 + $0x2f8] sm:$0xff] }
 0x3ed   :  { %vm1909_vm6 = vcmp.gt.f32.partialorder %v1767_v53, 0.0  ;;  %v2037_v61 = vmul.f32 0.2, %v1767_v53  ;;  %4509 = vmatmul.mubr.bf16.gmra.mrb[208].mxu1 %v10857_v58  ;;  %v2161_v60 = vsel %vm1905_vm4, %v1763_v26, %v2033_v44 }
 0x3ee   :  { %vm1910_vm7 = vcmp.gt.f32.partialorder %v1769_v36, 0.0  ;;  %v2038_v6 = vmul.f32 0.2, %v1769_v36  ;;  %4518 = vmatprep.mubr.bf16.mxu1 %v10878_v63  ;;  %v2162_v19 = vsel %vm1906_vm5, %v1765_v41, %v2034_v48  ;;  %v8172_v41 = vcombine.low %v2362_v62, %v2366_v9 }
 0x3ef   :  { %v2165_v8 = vsel %vm1909_vm6, %v1767_v53, %v2037_v61  ;;  %5032 = vmatpush1.bf16.msra.mxu1 %v8156_v31  ;;  %v8181_v48 = vcombine.high %v2370_v47, %v2374_v16  ;;  %v2382_v61 = vld [vmem:[#allocation10 + $0x338] sm:$0xff] }
 0x3f0   :  { %v10946_v25 = vpack.c.bf16 %v2165_v8, %v2161_v60  ;;  %v2166_v13 = vsel %vm1910_vm7, %v1769_v36, %v2038_v6  ;;  %v1772_v2 = vpop.f32.mrb[168].mxu1  ;;  %5033 = vmatprep.subr.bf16.mxu1 %v8165_v3  ;;  %v2378_v3 = vld [vmem:[#allocation10 + $0x318] sm:$0xff]  ;;  %v8180_v60 = vcombine.low %v2370_v47, %v2374_v16 }
 0x3f1   :  { %v10948_v14 = vpack.c.bf16 %v2166_v13, %v2162_v19  ;;  %v1773_v52 = vadd.f32 %v1772_v2, %v10781_v39  ;;  %v1774_v4 = vpop.f32.mrb[169].mxu1  ;;  %v8189_v2 = vcombine.high %v2378_v3, %v2382_v61  ;;  %v8188_v16 = vcombine.low %v2378_v3, %v2382_v61 }
 0x3f2   :  { %14031 = vst [vmem:[#allocation46_spill] sm:$0xff] %v10946_v25  ;;  %v1775_v63 = vadd.f32 %v1774_v4, %v10786_v38  ;;  %v1776_v26 = vpop.f32.mrb[170].mxu1 }
 0x3f3   :  { %14032 = vst [vmem:[#allocation47_spill] sm:$0xff] %v10948_v14  ;;  %v2041_v44 = vmul.f32 0.2, %v1773_v52  ;;  %v1777_v59 = vadd.f32 %v1776_v26, %v10781_v39  ;;  %v1778_v50 = vpop.f32.mrb[171].mxu1  ;;  %4172 = vmatprep.mubr.bf16.mxu0 %v10948_v14  ;;  %5034 = vmatpush1.bf16.msra.mxu1 %v8164_v23  ;;  %vm1913_vm8 = vcmp.gt.f32.partialorder %v1773_v52, 0.0 }
 0x3f4   :  { %v2042_v53 = vmul.f32 0.2, %v1775_v63  ;;  %v1779_v31 = vadd.f32 %v1778_v50, %v10786_v38  ;;  %4173 = vmatmul.mubr.bf16.gmra.mrb[68].mxu0 %v10946_v25  ;;  %5035 = vmatprep.subr.bf16.mxu1 %v8173_v27  ;;  %vm1914_vm9 = vcmp.gt.f32.partialorder %v1775_v63, 0.0  ;;  %v2386_v50 = vld [vmem:[#allocation10 + $0x358] sm:$0xff] }
 0x3f5   :  { %vm1917_vm10 = vcmp.gt.f32.partialorder %v1777_v59, 0.0  ;;  %v2045_v36 = vmul.f32 0.2, %v1777_v59  ;;  %4519 = vmatmul.mubr.bf16.gmra.mrb[212].mxu1 %v10876_v11  ;;  %v2169_v62 = vsel %vm1913_vm8, %v1773_v52, %v2041_v44  ;;  %v2390_v11 = vld [vmem:[#allocation10 + $0x378] sm:$0xff] }
 0x3f6   :  { %vm1918_vm11 = vcmp.gt.f32.partialorder %v1779_v31, 0.0  ;;  %v2046_v6 = vmul.f32 0.2, %v1779_v31  ;;  %4528 = vmatprep.mubr.bf16.mxu1 %v10902_v1  ;;  %v2170_v8 = vsel %vm1914_vm9, %v1775_v63, %v2042_v53  ;;  %v8197_v53 = vcombine.high %v2386_v50, %v2390_v11 }
 0x3f7   :  { %v2173_v9 = vsel %vm1917_vm10, %v1777_v59, %v2045_v36  ;;  %5036 = vmatpush1.bf16.msra.mxu1 %v8172_v41  ;;  %v2398_v36 = vld [vmem:[#allocation10 + $0x3b8] sm:$0xff] }
 0x3f8   :  { %v10958_v23 = vpack.c.bf16 %v2173_v9, %v2169_v62  ;;  %v2174_v19 = vsel %vm1918_vm11, %v1779_v31, %v2046_v6  ;;  %v1782_v13 = vpop.f32.mrb[172].mxu1  ;;  %5037 = vmatprep.subr.bf16.mxu1 %v8181_v48  ;;  %v2394_v48 = vld [vmem:[#allocation10 + $0x398] sm:$0xff]  ;;  %v8196_v62 = vcombine.low %v2386_v50, %v2390_v11 }
 0x3f9   :  { %v10960_v27 = vpack.c.bf16 %v2174_v19, %v2170_v8  ;;  %v1783_v4 = vadd.f32 %v1782_v13, %v10781_v39  ;;  %v1784_v26 = vpop.f32.mrb[173].mxu1  ;;  %v8205_v13 = vcombine.high %v2394_v48, %v2398_v36  ;;  %v8204_v50 = vcombine.low %v2394_v48, %v2398_v36 }
 0x3fa   :  { %14033 = vst [vmem:[#allocation48_spill] sm:$0xff] %v10958_v23  ;;  %v1785_v1 = vadd.f32 %v1784_v26, %v10786_v38  ;;  %v1786_v52 = vpop.f32.mrb[174].mxu1 }
 0x3fb   :  { %14034 = vst [vmem:[#allocation49_spill] sm:$0xff] %v10960_v27  ;;  %v2049_v44 = vmul.f32 0.2, %v1783_v4  ;;  %v1787_v47 = vadd.f32 %v1786_v52, %v10781_v39  ;;  %v1788_v63 = vpop.f32.mrb[175].mxu1  ;;  %4182 = vmatprep.mubr.bf16.mxu0 %v10960_v27  ;;  %5038 = vmatpush1.bf16.msra.mxu1 %v8180_v60  ;;  %vm1921_vm12 = vcmp.gt.f32.partialorder %v1783_v4, 0.0 }
 0x3fc   :  { %v2050_v59 = vmul.f32 0.2, %v1785_v1  ;;  %v1789_v41 = vadd.f32 %v1788_v63, %v10786_v38  ;;  %4183 = vmatmul.mubr.bf16.gmra.mrb[72].mxu0 %v10958_v23  ;;  %5039 = vmatprep.subr.bf16.mxu1 %v8189_v2  ;;  %vm1922_vm13 = vcmp.gt.f32.partialorder %v1785_v1, 0.0  ;;  %v2402_v63 = vld [vmem:[#allocation10 + $0x3d8] sm:$0xff] }
 0x3fd   :  { %vm1925_vm14 = vcmp.gt.f32.partialorder %v1787_v47, 0.0  ;;  %v2053_v31 = vmul.f32 0.2, %v1787_v47  ;;  %4529 = vmatmul.mubr.bf16.gmra.mrb[216].mxu1 %v10900_v12  ;;  %v2177_v3 = vsel %vm1921_vm12, %v1783_v4, %v2049_v44  ;;  %v2406_v12 = vld [vmem:[#allocation10 + $0x3f8] sm:$0xff] }
 0x3fe   :  { %vm1926_vm15 = vcmp.gt.f32.partialorder %v1789_v41, 0.0  ;;  %v2054_v6 = vmul.f32 0.2, %v1789_v41  ;;  %4538 = vmatprep.mubr.bf16.mxu1 %v10920_v57  ;;  %v2178_v9 = vsel %vm1922_vm13, %v1785_v1, %v2050_v59  ;;  %v8213_v59 = vcombine.high %v2402_v63, %v2406_v12 }
 0x3ff   :  { %v2181_v61 = vsel %vm1925_vm14, %v1787_v47, %v2053_v31  ;;  %5040 = vmatpush1.bf16.msra.mxu1 %v8188_v16  ;;  %v8212_v48 = vcombine.low %v2402_v63, %v2406_v12  ;;  %v10992_v12 = vld [vmem:[#allocation10 + $0x438] sm:$0xff] }
 0x400   :  { %v10970_v60 = vpack.c.bf16 %v2181_v61, %v2177_v3  ;;  %v2182_v8 = vsel %vm1926_vm15, %v1789_v41, %v2054_v6  ;;  %v1792_v19 = vpop.f32.mrb[176].mxu1  ;;  %5041 = vmatprep.subr.bf16.mxu1 %v8197_v53 }
 0x401   :  { %v10972_v2 = vpack.c.bf16 %v2182_v8, %v2178_v9  ;;  %v1793_v26 = vadd.f32 %v1792_v19, %v10781_v39  ;;  %v1794_v52 = vpop.f32.mrb[177].mxu1 }
 0x402   :  { %14035 = vst [vmem:[#allocation50_spill] sm:$0xff] %v10970_v60  ;;  %v1795_v57 = vadd.f32 %v1794_v52, %v10786_v38  ;;  %v1796_v4 = vpop.f32.mrb[178].mxu1 }
 0x403   :  { %14036 = vst [vmem:[#allocation51_spill] sm:$0xff] %v10972_v2  ;;  %v2057_v44 = vmul.f32 0.2, %v1793_v26  ;;  %v1797_v11 = vadd.f32 %v1796_v4, %v10781_v39  ;;  %v1798_v1 = vpop.f32.mrb[179].mxu1  ;;  %4192 = vmatprep.mubr.bf16.mxu0 %v10972_v2  ;;  %5042 = vmatpush1.bf16.msra.mxu1 %v8196_v62  ;;  %vm1929_vm0 = vcmp.gt.f32.partialorder %v1793_v26, 0.0 }
 0x404   :  { %v2058_v47 = vmul.f32 0.2, %v1795_v57  ;;  %v1799_v16 = vadd.f32 %v1798_v1, %v10786_v38  ;;  %4193 = vmatmul.mubr.bf16.gmra.mrb[76].mxu0 %v10970_v60  ;;  %5043 = vmatprep.subr.bf16.mxu1 %v8205_v13  ;;  %vm1930_vm1 = vcmp.gt.f32.partialorder %v1795_v57, 0.0 }
 0x405   :  { %vm1933_vm2 = vcmp.gt.f32.partialorder %v1797_v11, 0.0  ;;  %v2061_v41 = vmul.f32 0.2, %v1797_v11  ;;  %4539 = vmatmul.mubr.bf16.gmra.mrb[220].mxu1 %v10918_v45  ;;  %v2185_v31 = vsel %vm1929_vm0, %v1793_v26, %v2057_v44 }
 0x406   :  { %vm1934_vm3 = vcmp.gt.f32.partialorder %v1799_v16, 0.0  ;;  %v2062_v53 = vmul.f32 0.2, %v1799_v16  ;;  %4548 = vmatprep.mubr.bf16.mxu1 %v10936_v28  ;;  %v2186_v36 = vsel %vm1930_vm1, %v1795_v57, %v2058_v47  ;;  %v10990_v57 = vld [vmem:[#allocation10 + $0x418] sm:$0xff] }
 0x407   :  { %v2189_v6 = vsel %vm1933_vm2, %v1797_v11, %v2061_v41  ;;  %5044 = vmatpush1.bf16.msra.mxu1 %v8204_v50  ;;  %v8221_v1 = vcombine.high %v10990_v57, %v10992_v12 }
 0x408   :  { %v10982_v3 = vpack.c.bf16 %v2189_v6, %v2185_v31  ;;  %v2190_v61 = vsel %vm1934_vm3, %v1799_v16, %v2062_v53  ;;  %v1802_v62 = vpop.f32.mrb[180].mxu1  ;;  %5045 = vmatprep.subr.bf16.mxu1 %v8213_v59 }
 0x409   :  { %v10984_v9 = vpack.c.bf16 %v2190_v61, %v2186_v36  ;;  %v1803_v8 = vadd.f32 %v1802_v62, %v10781_v39  ;;  %v1804_v19 = vpop.f32.mrb[181].mxu1 }
 0x40a   :  { %14037 = vst [vmem:[#allocation52_spill] sm:$0xff] %v10982_v3  ;;  %v1805_v13 = vadd.f32 %v1804_v19, %v10786_v38  ;;  %v1806_v52 = vpop.f32.mrb[182].mxu1 }
 0x40b   :  { %14038 = vst [vmem:[#allocation53_spill] sm:$0xff] %v10984_v9  ;;  %v2065_v4 = vmul.f32 0.2, %v1803_v8  ;;  %v1807_v26 = vadd.f32 %v1806_v52, %v10781_v39  ;;  %v1808_v44 = vpop.f32.mrb[183].mxu1  ;;  %4202 = vmatprep.mubr.bf16.mxu0 %v10984_v9  ;;  %5046 = vmatpush1.bf16.msra.mxu1 %v8212_v48  ;;  %vm1937_vm4 = vcmp.gt.f32.partialorder %v1803_v8, 0.0 }
 0x40c   :  { %v2066_v63 = vmul.f32 0.2, %v1805_v13  ;;  %v1809_v11 = vadd.f32 %v1808_v44, %v10786_v38  ;;  %4203 = vmatmul.mubr.bf16.gmra.mrb[80].mxu0 %v10982_v3  ;;  %vm1938_vm5 = vcmp.gt.f32.partialorder %v1805_v13, 0.0  ;;  %5208 = vmatprep.subr.bf16.mxu1 %v8221_v1 }
 0x40d   :  { %vm1941_vm6 = vcmp.gt.f32.partialorder %v1807_v26, 0.0  ;;  %v2069_v50 = vmul.f32 0.2, %v1807_v26  ;;  %4549 = vmatmul.mubr.bf16.gmra.mrb[224].mxu1 %v10934_v7  ;;  %v2193_v59 = vsel %vm1937_vm4, %v1803_v8, %v2065_v4 }
 0x40e   :  { %vm1942_vm7 = vcmp.gt.f32.partialorder %v1809_v11, 0.0  ;;  %v2070_v16 = vmul.f32 0.2, %v1809_v11  ;;  %4558 = vmatprep.mubr.bf16.mxu1 %v10948_v14  ;;  %v2194_v53 = vsel %vm1938_vm5, %v1805_v13, %v2066_v63 }
 0x40f   :  { %v2197_v41 = vsel %vm1941_vm6, %v1807_v26, %v2069_v50 }
 0x410   :  { %v11002_v31 = vpack.c.bf16 %v2197_v41, %v2193_v59  ;;  %v2198_v6 = vsel %vm1942_vm7, %v1809_v11, %v2070_v16  ;;  %v1812_v48 = vpop.f32.mrb[184].mxu1 }
 0x411   :  { %v11004_v36 = vpack.c.bf16 %v2198_v6, %v2194_v53  ;;  %v1813_v61 = vadd.f32 %v1812_v48, %v10781_v39  ;;  %v1814_v62 = vpop.f32.mrb[185].mxu1 }
 0x412   :  { %14039 = vst [vmem:[#allocation54_spill] sm:$0xff] %v11002_v31  ;;  %v1815_v19 = vadd.f32 %v1814_v62, %v10786_v38  ;;  %v1816_v52 = vpop.f32.mrb[186].mxu1 }
 0x413   :  { %14040 = vst [vmem:[#allocation55_spill] sm:$0xff] %v11004_v36  ;;  %v2073_v44 = vmul.f32 0.2, %v1813_v61  ;;  %v1817_v47 = vadd.f32 %v1816_v52, %v10781_v39  ;;  %v1818_v14 = vpop.f32.mrb[187].mxu1  ;;  %4212 = vmatprep.mubr.bf16.mxu0 %v11004_v36  ;;  %vm1945_vm8 = vcmp.gt.f32.partialorder %v1813_v61, 0.0 }
 0x414   :  { %v2074_v8 = vmul.f32 0.2, %v1815_v19  ;;  %v1819_v13 = vadd.f32 %v1818_v14, %v10786_v38  ;;  %4213 = vmatmul.mubr.bf16.gmra.mrb[84].mxu0 %v11002_v31  ;;  %vm1946_vm9 = vcmp.gt.f32.partialorder %v1815_v19, 0.0 }
 0x415   :  { %vm1949_vm10 = vcmp.gt.f32.partialorder %v1817_v47, 0.0  ;;  %v2077_v4 = vmul.f32 0.2, %v1817_v47  ;;  %4559 = vmatmul.mubr.bf16.gmra.mrb[228].mxu1 %v10946_v25  ;;  %v2201_v63 = vsel %vm1945_vm8, %v1813_v61, %v2073_v44 }
 0x416   :  { %vm1950_vm11 = vcmp.gt.f32.partialorder %v1819_v13, 0.0  ;;  %v2078_v26 = vmul.f32 0.2, %v1819_v13  ;;  %4568 = vmatprep.mubr.bf16.mxu1 %v10960_v27  ;;  %v2202_v1 = vsel %vm1946_vm9, %v1815_v19, %v2074_v8 }
 0x417   :  { %v2205_v11 = vsel %vm1949_vm10, %v1817_v47, %v2077_v4 }
 0x418   :  { %v11014_v50 = vpack.c.bf16 %v2205_v11, %v2201_v63  ;;  %v2206_v16 = vsel %vm1950_vm11, %v1819_v13, %v2078_v26  ;;  %v1822_v59 = vpop.f32.mrb[188].mxu1 }
 0x419   :  { %v11016_v41 = vpack.c.bf16 %v2206_v16, %v2202_v1  ;;  %v1823_v14 = vadd.f32 %v1822_v59, %v10781_v39  ;;  %v1824_v53 = vpop.f32.mrb[189].mxu1  ;;  %v2425_v1 = vld [vmem:[#allocation10 + $0x490] sm:$0xff]  ;;  %v14045_v59 = vcombine.low %v10800_v15, %v10802_v32 }
 0x41a   :  { %14041 = vst [vmem:[#allocation56_spill] sm:$0xff] %v11014_v50  ;;  %v1825_v6 = vadd.f32 %v1824_v53, %v10786_v38  ;;  %v1826_v48 = vpop.f32.mrb[190].mxu1  ;;  %v2429_v16 = vld [vmem:[#allocation10 + $0x4b0] sm:$0xff] }
 0x41b   :  { %14042 = vst [vmem:[#allocation57_spill] sm:$0xff] %v11016_v41  ;;  %v2081_v62 = vmul.f32 0.2, %v1823_v14  ;;  %v1827_v52 = vadd.f32 %v1826_v48, %v10781_v39  ;;  %v1828_v25 = vpop.f32.mrb[191].mxu1  ;;  %4222 = vmatprep.mubr.bf16.mxu0 %v11016_v41  ;;  %vm1953_vm12 = vcmp.gt.f32.partialorder %v1823_v14, 0.0  ;;  %v8235_v53 = vcombine.high %v2425_v1, %v2429_v16  ;;  %v2437_v48 = vld [vmem:[#allocation10 + $0x4f0] sm:$0xff] }
 0x41c   :  { %v2082_v47 = vmul.f32 0.2, %v1825_v6  ;;  %v1829_v61 = vadd.f32 %v1828_v25, %v10786_v38  ;;  %4223 = vmatmul.mubr.bf16.gmra.mrb[88].mxu0 %v11014_v50  ;;  %vm1954_vm13 = vcmp.gt.f32.partialorder %v1825_v6, 0.0  ;;  %v2417_v38 = vld [vmem:[#allocation10 + $0x450] sm:$0xff] }
 0x41d   :  { %vm1957_vm14 = vcmp.gt.f32.partialorder %v1827_v52, 0.0  ;;  %v2085_v19 = vmul.f32 0.2, %v1827_v52  ;;  %4569 = vmatmul.mubr.bf16.gmra.mrb[232].mxu1 %v10958_v23  ;;  %v2209_v8 = vsel %vm1953_vm12, %v1823_v14, %v2081_v62  ;;  %v2421_v25 = vld [vmem:[#allocation10 + $0x470] sm:$0xff]  ;;  %v8234_v62 = vcombine.low %v2425_v1, %v2429_v16 }
 0x41e   :  { %vm1958_vm15 = vcmp.gt.f32.partialorder %v1829_v61, 0.0  ;;  %v2086_v44 = vmul.f32 0.2, %v1829_v61  ;;  %4578 = vmatprep.mubr.bf16.mxu1 %v10972_v2  ;;  %v2210_v13 = vsel %vm1954_vm13, %v1825_v6, %v2082_v47  ;;  %v8227_v11 = vcombine.high %v2417_v38, %v2421_v25  ;;  %v2433_v6 = vld [vmem:[#allocation10 + $0x4d0] sm:$0xff] }
 0x41f   :  { %v2213_v39 = vsel %vm1957_vm14, %v1827_v52, %v2085_v19  ;;  %v8226_v14 = vcombine.low %v2417_v38, %v2421_v25  ;;  %v8243_v52 = vcombine.high %v2433_v6, %v2437_v48  ;;  %v2441_v47 = vld [vmem:[#allocation10 + $0x510] sm:$0xff]  ;;  %v8242_v32 = vcombine.low %v2433_v6, %v2437_v48 }
 0x420   :  { %v11026_v4 = vpack.c.bf16 %v2213_v39, %v2209_v8  ;;  %v2214_v26 = vsel %vm1958_vm15, %v1829_v61, %v2086_v44  ;;  %v2445_v15 = vld [vmem:[#allocation10 + $0x530] sm:$0xff] }
 0x421   :  { %v11028_v63 = vpack.c.bf16 %v2214_v26, %v2210_v13  ;;  %v8251_v61 = vcombine.high %v2441_v47, %v2445_v15  ;;  %v2449_v19 = vld [vmem:[#allocation10 + $0x550] sm:$0xff]  ;;  %v8250_v8 = vcombine.low %v2441_v47, %v2445_v15  ;;  %v2418_v47 = vld [vmem:[#allocation10 + $0x458] sm:$0xff] }
 0x422   :  { %14043 = vst [vmem:[#allocation58_spill] sm:$0xff] %v11026_v4  ;;  %v2453_v44 = vld [vmem:[#allocation10 + $0x570] sm:$0xff]  ;;  %v2422_v15 = vld [vmem:[#allocation10 + $0x478] sm:$0xff] }
 0x423   :  { %14044 = vst [vmem:[#allocation59_spill] sm:$0xff] %v11028_v63  ;;  %4232 = vmatprep.mubr.bf16.mxu0 %v11028_v63  ;;  %v8259_v39 = vcombine.high %v2449_v19, %v2453_v44  ;;  %v2457_v13 = vld [vmem:[#allocation10 + $0x590] sm:$0xff]  ;;  %v8258_v38 = vcombine.low %v2449_v19, %v2453_v44 }
 0x424   :  { %4233 = vmatmul.mubr.bf16.gmra.mrb[92].mxu0 %v11026_v4  ;;  %v2461_v26 = vld [vmem:[#allocation10 + $0x5b0] sm:$0xff] }
 0x425   :  { %4579 = vmatmul.mubr.bf16.gmra.mrb[236].mxu1 %v10970_v60  ;;  %4661 = vmatprep.mubr.bf16.mxu0 %v10552_v37  ;;  %v8267_v25 = vcombine.high %v2457_v13, %v2461_v26  ;;  %v2469_v1 = vld [vmem:[#allocation10 + $0x5f0] sm:$0xff]  ;;  %v8266_v16 = vcombine.low %v2457_v13, %v2461_v26 }
 0x426   :  { %4588 = vmatprep.mubr.bf16.mxu1 %v10984_v9  ;;  %v2489_v19 = vld [vmem:[#allocation10 + $0x690] sm:$0xff]  ;;  %v9530_v9 = vld [vmem:[#allocation11 + $0xe4] ss:$8 sps:$4 sm:$0xff]  }
 0x427   :  { %v2493_v44 = vld [vmem:[#allocation10 + $0x6b0] sm:$0xff] }
 0x428   :  { %v8299_v26 = vcombine.high %v2489_v19, %v2493_v44 }
 0x42c   :  { %4662 = vmatmul.mubr.bf16.vlgmr.msra.gmra.mrb[96].mxu0 %v10549_v30 }
 0x42d   :  { %4823 = vmatpush1.bf16.msra.mxu0 %v14045_v59  ;;  %4589 = vmatmul.mubr.bf16.gmra.mrb[240].mxu1 %v10982_v3 }
 0x42e   :  { %4671 = vmatprep.mubr.bf16.mxu0 %v10567_v22  ;;  %4598 = vmatprep.mubr.bf16.mxu1 %v11004_v36 }
 0x42f   :  { %4824 = vmatprep.subr.bf16.mxu0 %v8227_v11  ;;  %v2465_v11 = vld [vmem:[#allocation10 + $0x5d0] sm:$0xff] }
 0x430   :  { %v8275_v59 = vcombine.high %v2465_v11, %v2469_v1  ;;  %v8274_v6 = vcombine.low %v2465_v11, %v2469_v1  ;;  %v2497_v11 = vld [vmem:[#allocation10 + $0x6d0] sm:$0xff] }
 0x431   :  { %4825 = vmatpush1.bf16.msra.mxu0 %v8226_v14  ;;  %v2473_v14 = vld [vmem:[#allocation10 + $0x610] sm:$0xff] }
 0x432   :  { %4826 = vmatprep.subr.bf16.mxu0 %v8235_v53  ;;  %v2477_v53 = vld [vmem:[#allocation10 + $0x630] sm:$0xff] }
 0x433   :  { %v8283_v48 = vcombine.high %v2473_v14, %v2477_v53  ;;  %v2501_v1 = vld [vmem:[#allocation10 + $0x6f0] sm:$0xff] }
 0x434   :  { %4672 = vmatmul.mubr.bf16.gmra.mrb[100].mxu0 %v10564_v56 }
 0x435   :  { %4599 = vmatmul.mubr.bf16.gmra.mrb[244].mxu1 %v11002_v31  ;;  %4681 = vmatprep.mubr.bf16.mxu0 %v10585_v43 }
 0x436   :  { %4608 = vmatprep.mubr.bf16.mxu1 %v11016_v41  ;;  %4827 = vmatpush1.bf16.msra.mxu0 %v8234_v62  ;;  %v2481_v62 = vld [vmem:[#allocation10 + $0x650] sm:$0xff] }
 0x437   :  { %4828 = vmatprep.subr.bf16.mxu0 %v8243_v52  ;;  %v2485_v52 = vld [vmem:[#allocation10 + $0x670] sm:$0xff] }
 0x438   :  { %v8290_v13 = vcombine.low %v2481_v62, %v2485_v52 }
 0x43a   :  { %4829 = vmatpush1.bf16.msra.mxu0 %v8242_v32  ;;  %v8282_v32 = vcombine.low %v2473_v14, %v2477_v53  ;;  %v2438_v14 = vld [vmem:[#allocation10 + $0x4f8] sm:$0xff]  ;;  %v8307_v53 = vcombine.high %v2497_v11, %v2501_v1 }
 0x43b   :  { %4830 = vmatprep.subr.bf16.mxu0 %v8251_v61  ;;  %v8291_v61 = vcombine.high %v2481_v62, %v2485_v52  ;;  %v2446_v62 = vld [vmem:[#allocation10 + $0x538] sm:$0xff]  ;;  %v8306_v52 = vcombine.low %v2497_v11, %v2501_v1 }
 0x43c   :  { %4682 = vmatmul.mubr.bf16.gmra.mrb[104].mxu0 %v10582_v5 }
 0x43d   :  { %4609 = vmatmul.mubr.bf16.gmra.mrb[248].mxu1 %v11014_v50  ;;  %4691 = vmatprep.mubr.bf16.mxu0 %v10597_v51 }
 0x43e   :  { %4618 = vmatprep.mubr.bf16.mxu1 %v11028_v63  ;;  %4831 = vmatpush1.bf16.msra.mxu0 %v8250_v8  ;;  %v8229_v8 = vcombine.high %v2418_v47, %v2422_v15 }
 0x43f   :  { %4832 = vmatprep.subr.bf16.mxu0 %v8259_v39  ;;  %v2430_v39 = vld [vmem:[#allocation10 + $0x4b8] sm:$0xff] }
 0x442   :  { %4833 = vmatpush1.bf16.msra.mxu0 %v8258_v38  ;;  %v14046_v38 = vcombine.low %v10990_v57, %v10992_v12  ;;  %v2442_v12 = vld [vmem:[#allocation10 + $0x518] sm:$0xff] }
 0x443   :  { %4834 = vmatprep.subr.bf16.mxu0 %v8267_v25  ;;  %v8228_v25 = vcombine.low %v2418_v47, %v2422_v15 }
 0x444   :  { %4692 = vmatmul.mubr.bf16.gmra.mrb[108].mxu0 %v10594_v20 }
 0x445   :  { %4619 = vmatmul.mubr.bf16.gmra.mrb[252].mxu1 %v11026_v4  ;;  %4701 = vmatprep.mubr.bf16.mxu0 %v10609_v46 }
 0x446   :  { %5047 = vmatprep.mubr.bf16.mxu1 %v10552_v37  ;;  %4835 = vmatpush1.bf16.msra.mxu0 %v8266_v16  ;;  %v2426_v37 = vld [vmem:[#allocation10 + $0x498] sm:$0xff] }
 0x447   :  { %4836 = vmatprep.subr.bf16.mxu0 %v8275_v59  ;;  %v8237_v16 = vcombine.high %v2426_v37, %v2430_v39  ;;  %v2434_v59 = vld [vmem:[#allocation10 + $0x4d8] sm:$0xff] }
 0x448   :  { %v8245_v57 = vcombine.high %v2434_v59, %v2438_v14  ;;  %v8244_v15 = vcombine.low %v2434_v59, %v2438_v14  ;;  %v2529_v59 = vld [vmem:[#allocation10 + $0x7d0] sm:$0xff] }
 0x449   :  { %v2533_v14 = vld [vmem:[#allocation10 + $0x7f0] sm:$0xff] }
 0x44a   :  { %4837 = vmatpush1.bf16.msra.mxu0 %v8274_v6  ;;  %v2505_v6 = vld [vmem:[#allocation10 + $0x710] sm:$0xff] }
 0x44b   :  { %4838 = vmatprep.subr.bf16.mxu0 %v8283_v48  ;;  %v2509_v48 = vld [vmem:[#allocation10 + $0x730] sm:$0xff] }
 0x44c   :  { %4702 = vmatmul.mubr.bf16.gmra.mrb[112].mxu0 %v10606_v34  ;;  %v8315_v47 = vcombine.high %v2505_v6, %v2509_v48 }
 0x44d   :  { %4711 = vmatprep.mubr.bf16.mxu0 %v10628_v33  ;;  %5048 = vmatmul.mubr.bf16.vlgmr.msra.gmra.mrb[0].mxu1 %v10549_v30  ;;  %v8298_v30 = vcombine.low %v2489_v19, %v2493_v44  ;;  %v8253_v19 = vcombine.high %v2442_v12, %v2446_v62  ;;  %v2450_v44 = vld [vmem:[#allocation10 + $0x558] sm:$0xff] }
 0x44e   :  { %5057 = vmatprep.mubr.bf16.mxu1 %v10567_v22  ;;  %4839 = vmatpush1.bf16.msra.mxu0 %v8282_v32  ;;  %v8236_v22 = vcombine.low %v2426_v37, %v2430_v39  ;;  %v2513_v32 = vld [vmem:[#allocation10 + $0x750] sm:$0xff]  ;;  %v8314_v37 = vcombine.low %v2505_v6, %v2509_v48  ;;  %v8252_v39 = vcombine.low %v2442_v12, %v2446_v62  ;;  %v2478_v12 = vld [vmem:[#allocation10 + $0x638] sm:$0xff] }
 0x44f   :  { %4840 = vmatprep.subr.bf16.mxu0 %v8291_v61  ;;  %5209 = vmatpush1.bf16.msra.mxu1 %v14046_v38  ;;  %v2517_v61 = vld [vmem:[#allocation10 + $0x770] sm:$0xff]  ;;  %v2458_v38 = vld [vmem:[#allocation10 + $0x598] sm:$0xff]  ;;  %v8338_v62 = vcombine.low %v2529_v59, %v2533_v14 }
 0x450   :  { %5210 = vmatprep.subr.bf16.mxu1 %v8229_v8  ;;  %v2454_v8 = vld [vmem:[#allocation10 + $0x578] sm:$0xff]  ;;  %v8322_v11 = vcombine.low %v2513_v32, %v2517_v61 }
 0x452   :  { %4841 = vmatpush1.bf16.msra.mxu0 %v8290_v13  ;;  %v2525_v13 = vld [vmem:[#allocation10 + $0x7b0] sm:$0xff] }
 0x453   :  { %4842 = vmatprep.subr.bf16.mxu0 %v8299_v26  ;;  %5211 = vmatpush1.bf16.msra.mxu1 %v8228_v25  ;;  %v8261_v26 = vcombine.high %v2450_v44, %v2454_v8  ;;  %v2462_v25 = vld [vmem:[#allocation10 + $0x5b8] sm:$0xff] }
 0x454   :  { %4712 = vmatmul.mubr.bf16.gmra.mrb[116].mxu0 %v10625_v18  ;;  %5212 = vmatprep.subr.bf16.mxu1 %v8237_v16  ;;  %v8260_v16 = vcombine.low %v2450_v44, %v2454_v8  ;;  %v8268_v48 = vcombine.low %v2458_v38, %v2462_v25  ;;  %v2494_v44 = vld [vmem:[#allocation10 + $0x6b8] sm:$0xff] }
 0x455   :  { %4721 = vmatprep.mubr.bf16.mxu0 %v10652_v24  ;;  %5058 = vmatmul.mubr.bf16.gmra.mrb[4].mxu1 %v10564_v56  ;;  %v8323_v56 = vcombine.high %v2513_v32, %v2517_v61  ;;  %v2482_v32 = vld [vmem:[#allocation10 + $0x658] sm:$0xff] }
 0x456   :  { %5067 = vmatprep.mubr.bf16.mxu1 %v10585_v43  ;;  %4843 = vmatpush1.bf16.msra.mxu0 %v8298_v30  ;;  %v2521_v43 = vld [vmem:[#allocation10 + $0x790] sm:$0xff]  ;;  %v8269_v30 = vcombine.high %v2458_v38, %v2462_v25  ;;  %v2486_v61 = vld [vmem:[#allocation10 + $0x678] sm:$0xff]  ;;  %v11084_v25 = vld [vmem:[%s13750_s8] sm:$0xff] }
 0x457   :  { %4844 = vmatprep.subr.bf16.mxu0 %v8307_v53  ;;  %5213 = vmatpush1.bf16.msra.mxu1 %v8236_v22  ;;  %v8331_v1 = vcombine.high %v2521_v43, %v2525_v13  ;;  %v2466_v53 = vld [vmem:[#allocation10 + $0x5d8] sm:$0xff]  ;;  %v8330_v6 = vcombine.low %v2521_v43, %v2525_v13  ;;  %v8292_v8 = vcombine.low %v2482_v32, %v2486_v61 }
 0x458   :  { %5214 = vmatprep.subr.bf16.mxu1 %v8245_v57  ;;  %v2470_v22 = vld [vmem:[#allocation10 + $0x5f8] sm:$0xff] }
 0x459   :  { %v2474_v57 = vld [vmem:[#allocation10 + $0x618] sm:$0xff] }
 0x45a   :  { %4845 = vmatpush1.bf16.msra.mxu0 %v8306_v52  ;;  %v8276_v52 = vcombine.low %v2466_v53, %v2470_v22 }
 0x45b   :  { %4846 = vmatprep.subr.bf16.mxu0 %v8315_v47  ;;  %5215 = vmatpush1.bf16.msra.mxu1 %v8244_v15  ;;  %v9488_v47 = vld [vmem:[#allocation11 + $0x4] ss:$8 sps:$4 sm:$0xff]   ;;  %v8285_v15 = vcombine.high %v2474_v57, %v2478_v12 }
 0x45c   :  { %4722 = vmatmul.mubr.bf16.gmra.mrb[120].mxu0 %v10649_v29  ;;  %5216 = vmatprep.subr.bf16.mxu1 %v8253_v19  ;;  %v8284_v19 = vcombine.low %v2474_v57, %v2478_v12 }
 0x45d   :  { %4731 = vmatprep.mubr.bf16.mxu0 %v10670_v35  ;;  %5068 = vmatmul.mubr.bf16.gmra.mrb[8].mxu1 %v10582_v5  ;;  %v8339_v5 = vcombine.high %v2529_v59, %v2533_v14  ;;  %v14047_v59 = vld [vmem:[#allocation22_spill] sm:$0xff] }
 0x45e   :  { %5077 = vmatprep.mubr.bf16.mxu1 %v10597_v51  ;;  %4847 = vmatpush1.bf16.msra.mxu0 %v8314_v37  ;;  %v8277_v51 = vcombine.high %v2466_v53, %v2470_v22  ;;  %v14050_v53 = vld [vmem:[#allocation21_spill] sm:$0xff] }
 0x45f   :  { %4848 = vmatprep.subr.bf16.mxu0 %v8323_v56  ;;  %5217 = vmatpush1.bf16.msra.mxu1 %v8252_v39  ;;  %v2498_v56 = vld [vmem:[#allocation10 + $0x6d8] sm:$0xff]  ;;  %v11095_v22 = vrot.slane %v11084_v25, %v14050_v53 }
 0x460   :  { %5218 = vmatprep.subr.bf16.mxu1 %v8261_v26  ;;  %v2502_v39 = vld [vmem:[#allocation10 + $0x6f8] sm:$0xff] }
 0x461   :  { %v8309_v13 = vcombine.high %v2498_v56, %v2502_v39  ;;  %v2510_v26 = vld [vmem:[#allocation10 + $0x738] sm:$0xff] }
 0x462   :  { %4849 = vmatpush1.bf16.msra.mxu0 %v8322_v11  ;;  %v2514_v11 = vld [vmem:[#allocation10 + $0x758] sm:$0xff] }
 0x463   :  { %4850 = vmatprep.subr.bf16.mxu0 %v8331_v1  ;;  %5219 = vmatpush1.bf16.msra.mxu1 %v8260_v16  ;;  %v2518_v1 = vld [vmem:[#allocation10 + $0x778] sm:$0xff] }
 0x464   :  { %4732 = vmatmul.mubr.bf16.gmra.mrb[124].mxu0 %v10667_v42  ;;  %5220 = vmatprep.subr.bf16.mxu1 %v8269_v30  ;;  %v14049_v30 = vld [vmem:[#allocation24_spill] sm:$0xff] }
 0x465   :  { %4741 = vmatprep.mubr.bf16.mxu0 %v10686_v10  ;;  %5078 = vmatmul.mubr.bf16.gmra.mrb[12].mxu1 %v10594_v20  ;;  %v8293_v20 = vcombine.high %v2482_v32, %v2486_v61 }
 0x466   :  { %5087 = vmatprep.mubr.bf16.mxu1 %v10609_v46  ;;  %4851 = vmatpush1.bf16.msra.mxu0 %v8330_v6  ;;  %v2490_v46 = vld [vmem:[#allocation10 + $0x698] sm:$0xff] }
 0x467   :  { %4852 = vmatprep.subr.bf16.mxu0 %v8339_v5  ;;  %5221 = vmatpush1.bf16.msra.mxu1 %v8268_v48  ;;  %v8301_v37 = vcombine.high %v2490_v46, %v2494_v44  ;;  %v8300_v43 = vcombine.low %v2490_v46, %v2494_v44  ;;  %v2522_v6 = vld [vmem:[#allocation10 + $0x798] sm:$0xff] }
 0x468   :  { %5222 = vmatprep.subr.bf16.mxu1 %v8277_v51  ;;  %v2526_v5 = vld [vmem:[#allocation10 + $0x7b8] sm:$0xff]  ;;  %v8324_v51 = vcombine.low %v2514_v11, %v2518_v1 }
 0x469   :  { %v8332_v46 = vcombine.low %v2522_v6, %v2526_v5 }
 0x46a   :  { %4853 = vmatpush1.bf16.msra.mxu0 %v8338_v62  ;;  %v8333_v62 = vcombine.high %v2522_v6, %v2526_v5 }
 0x46b   :  { %5223 = vmatpush1.bf16.msra.mxu1 %v8276_v52  ;;  %7077 = vmatprep.subr.bf16.mxu0 %v9488_v47 }
 0x46c   :  { %4742 = vmatmul.mubr.bf16.gmra.mrb[128].mxu0 %v10683_v40  ;;  %5224 = vmatprep.subr.bf16.mxu1 %v8285_v15  ;;  %v2534_v15 = vld [vmem:[#allocation10 + $0x7f8] sm:$0xff] }
 0x46d   :  { %4751 = vmatprep.mubr.bf16.mxu0 %v10698_v21  ;;  %5088 = vmatmul.mubr.bf16.gmra.mrb[16].mxu1 %v10606_v34  ;;  %v2506_v34 = vld [vmem:[#allocation10 + $0x718] sm:$0xff] }
 0x46e   :  { %5097 = vmatprep.mubr.bf16.mxu1 %v10628_v33  ;;  %v8308_v33 = vcombine.low %v2498_v56, %v2502_v39  ;;  %v8317_v38 = vcombine.high %v2506_v34, %v2510_v26  ;;  %v8316_v16 = vcombine.low %v2506_v34, %v2510_v26  ;;  %v14052_v39 = vld [vmem:[#allocation26_spill] sm:$0xff] }
 0x46f   :  { %5225 = vmatpush1.bf16.msra.mxu1 %v8284_v19 }
 0x470   :  { %5226 = vmatprep.subr.bf16.mxu1 %v8293_v20 }
 0x473   :  { %5227 = vmatpush1.bf16.msra.mxu1 %v8292_v8  ;;  %v14051_v8 = vld [vmem:[#allocation23_spill] sm:$0xff] }
 0x474   :  { %4752 = vmatmul.mubr.bf16.gmra.mrb[132].mxu0 %v10695_v17  ;;  %5228 = vmatprep.subr.bf16.mxu1 %v8301_v37 }
 0x475   :  { %4761 = vmatprep.mubr.bf16.mxu0 %v10710_v0  ;;  %5098 = vmatmul.mubr.bf16.gmra.mrb[20].mxu1 %v10625_v18  ;;  %v14048_v18 = vld [vmem:[#allocation20_spill] sm:$0xff] }
 0x476   :  { %5107 = vmatprep.mubr.bf16.mxu1 %v10652_v24  ;;  %v11089_v14 = vrot.slane %v11084_v25, %v14048_v18  ;;  %v8325_v24 = vcombine.high %v2514_v11, %v2518_v1  ;;  %v14078_v18 = vld [vmem:[#allocation31_spill] sm:$0xff] }
 0x477   :  { %5229 = vmatpush1.bf16.msra.mxu1 %v8300_v43 }
 0x478   :  { %5230 = vmatprep.subr.bf16.mxu1 %v8309_v13 }
 0x47b   :  { %5231 = vmatpush1.bf16.msra.mxu1 %v8308_v33 }
 0x47c   :  { %4762 = vmatmul.mubr.bf16.gmra.mrb[136].mxu0 %v14047_v59  ;;  %5232 = vmatprep.subr.bf16.mxu1 %v8317_v38 }
 0x47d   :  { %4771 = vmatprep.mubr.bf16.mxu0 %v14049_v30  ;;  %5108 = vmatmul.mubr.bf16.gmra.mrb[24].mxu1 %v10649_v29  ;;  %v2530_v29 = vld [vmem:[#allocation10 + $0x7d8] sm:$0xff] }
 0x47e   :  { %5117 = vmatprep.mubr.bf16.mxu1 %v10670_v35  ;;  %v8341_v37 = vcombine.high %v2530_v29, %v2534_v15  ;;  %v8340_v33 = vcombine.low %v2530_v29, %v2534_v15 }
 0x47f   :  { %v4084_v48 = vpop.f32.mrb[32].mxu0  ;;  %5233 = vmatpush1.bf16.msra.mxu1 %v8316_v16 }
 0x480   :  { %v8574_v57 = vadd.f32 %v4084_v48, %v11089_v14  ;;  %v4086_v12 = vpop.f32.mrb[33].mxu0  ;;  %5234 = vmatprep.subr.bf16.mxu1 %v8325_v24 }
 0x481   :  { %v8575_v52 = vadd.f32 %v4086_v12, %v11095_v22  ;;  %v4088_v47 = vpop.f32.mrb[34].mxu0 }
 0x482   :  { %v5657_v32 = vmul.f32 0.2, %v8574_v57  ;;  %v8576_v61 = vadd.f32 %v4088_v47, %v11089_v14  ;;  %v4090_v19 = vpop.f32.mrb[35].mxu0  ;;  %vm5401_vm0 = vcmp.gt.f32.partialorder %v8574_v57, 0.0  ;;  %v14058_v47 = vld [vmem:[#allocation28_spill] sm:$0xff] }
 0x483   :  { %v5658_v20 = vmul.f32 0.2, %v8575_v52  ;;  %v8577_v35 = vadd.f32 %v4090_v19, %v11095_v22  ;;  %5235 = vmatpush1.bf16.msra.mxu1 %v8324_v51  ;;  %vm5402_vm1 = vcmp.gt.f32.partialorder %v8575_v52, 0.0 }
 0x484   :  { %vm5409_vm2 = vcmp.gt.f32.partialorder %v8576_v61, 0.0  ;;  %v5665_v44 = vmul.f32 0.2, %v8576_v61  ;;  %4772 = vmatmul.mubr.bf16.gmra.mrb[140].mxu0 %v14051_v8  ;;  %5236 = vmatprep.subr.bf16.mxu1 %v8333_v62  ;;  %v11105_v43 = vsel %vm5401_vm0, %v8574_v57, %v5657_v32  ;;  %v14057_v62 = vld [vmem:[#allocation25_spill] sm:$0xff] }
 0x485   :  { %vm5410_vm3 = vcmp.gt.f32.partialorder %v8577_v35, 0.0  ;;  %v5666_v56 = vmul.f32 0.2, %v8577_v35  ;;  %4781 = vmatprep.mubr.bf16.mxu0 %v14052_v39  ;;  %5118 = vmatmul.mubr.bf16.gmra.mrb[28].mxu1 %v10667_v42  ;;  %14053 = vst [vmem:[#allocation22_spill] sm:$0xff] %v11105_v43  ;;  %v11113_v38 = vsel %vm5402_vm1, %v8575_v52, %v5658_v20 }
 0x486   :  { %v11107_v13 = vsel %vm5409_vm2, %v8576_v61, %v5665_v44  ;;  %5127 = vmatprep.mubr.bf16.mxu1 %v10686_v10  ;;  %14055 = vst [vmem:[#allocation23_spill] sm:$0xff] %v11113_v38 }
 0x487   :  { %14054 = vst [vmem:[#allocation24_spill] sm:$0xff] %v11107_v13  ;;  %v4094_v26 = vpop.f32.mrb[36].mxu0  ;;  %5237 = vmatpush1.bf16.msra.mxu1 %v8332_v46  ;;  %v11115_v11 = vsel %vm5410_vm3, %v8577_v35, %v5666_v56 }
 0x488   :  { %14056 = vst [vmem:[#allocation26_spill] sm:$0xff] %v11115_v11  ;;  %v8578_v1 = vadd.f32 %v4094_v26, %v11089_v14  ;;  %v4096_v42 = vpop.f32.mrb[37].mxu0  ;;  %5238 = vmatprep.subr.bf16.mxu1 %v8341_v37 }
 0x489   :  { %v8579_v10 = vadd.f32 %v4096_v42, %v11095_v22  ;;  %v4098_v24 = vpop.f32.mrb[38].mxu0 }
 0x48a   :  { %v5673_v6 = vmul.f32 0.2, %v8578_v1  ;;  %v8580_v5 = vadd.f32 %v4098_v24, %v11089_v14  ;;  %v4100_v48 = vpop.f32.mrb[39].mxu0  ;;  %vm5417_vm4 = vcmp.gt.f32.partialorder %v8578_v1, 0.0 }
 0x48b   :  { %v5674_v51 = vmul.f32 0.2, %v8579_v10  ;;  %v8581_v57 = vadd.f32 %v4100_v48, %v11095_v22  ;;  %5239 = vmatpush1.bf16.msra.mxu1 %v8340_v33  ;;  %vm5418_vm5 = vcmp.gt.f32.partialorder %v8579_v10, 0.0 }
 0x48c   :  { %vm5425_vm6 = vcmp.gt.f32.partialorder %v8580_v5, 0.0  ;;  %v5681_v12 = vmul.f32 0.2, %v8580_v5  ;;  %4782 = vmatmul.mubr.bf16.gmra.mrb[144].mxu0 %v14057_v62  ;;  %v11127_v29 = vsel %vm5417_vm4, %v8578_v1, %v5673_v6  ;;  %v14064_v6 = vld [vmem:[#allocation30_spill] sm:$0xff] }
 0x48d   :  { %vm5426_vm7 = vcmp.gt.f32.partialorder %v8581_v57, 0.0  ;;  %v5682_v52 = vmul.f32 0.2, %v8581_v57  ;;  %4791 = vmatprep.mubr.bf16.mxu0 %v14058_v47  ;;  %5128 = vmatmul.mubr.bf16.gmra.mrb[32].mxu1 %v10683_v40  ;;  %14059 = vst [vmem:[#allocation25_spill] sm:$0xff] %v11127_v29  ;;  %v11131_v61 = vsel %vm5418_vm5, %v8579_v10, %v5674_v51  ;;  %v14063_v10 = vld [vmem:[#allocation27_spill] sm:$0xff] }
 0x48e   :  { %5137 = vmatprep.mubr.bf16.mxu1 %v10698_v21  ;;  %v11129_v15 = vsel %vm5425_vm6, %v8580_v5, %v5681_v12  ;;  %14061 = vst [vmem:[#allocation60_spill] sm:$0xff] %v11131_v61 }
 0x48f   :  { %14060 = vst [vmem:[#allocation28_spill] sm:$0xff] %v11129_v15  ;;  %v4104_v32 = vpop.f32.mrb[40].mxu0  ;;  %v11133_v19 = vsel %vm5426_vm7, %v8581_v57, %v5682_v52 }
 0x490   :  { %14062 = vst [vmem:[#allocation61_spill] sm:$0xff] %v11133_v19  ;;  %v8582_v35 = vadd.f32 %v4104_v32, %v11089_v14  ;;  %v4106_v46 = vpop.f32.mrb[41].mxu0 }
 0x491   :  { %v8583_v21 = vadd.f32 %v4106_v46, %v11095_v22  ;;  %v4108_v44 = vpop.f32.mrb[42].mxu0 }
 0x492   :  { %v5689_v37 = vmul.f32 0.2, %v8582_v35  ;;  %v8584_v56 = vadd.f32 %v4108_v44, %v11089_v14  ;;  %v4110_v26 = vpop.f32.mrb[43].mxu0  ;;  %vm5433_vm8 = vcmp.gt.f32.partialorder %v8582_v35, 0.0 }
 0x493   :  { %v5690_v33 = vmul.f32 0.2, %v8583_v21  ;;  %v8585_v1 = vadd.f32 %v4110_v26, %v11095_v22  ;;  %vm5434_vm9 = vcmp.gt.f32.partialorder %v8583_v21, 0.0 }
 0x494   :  { %vm5441_vm10 = vcmp.gt.f32.partialorder %v8584_v56, 0.0  ;;  %v5697_v42 = vmul.f32 0.2, %v8584_v56  ;;  %4792 = vmatmul.mubr.bf16.gmra.mrb[148].mxu0 %v14063_v10  ;;  %v11147_v5 = vsel %vm5433_vm8, %v8582_v35, %v5689_v37 }
 0x495   :  { %vm5442_vm11 = vcmp.gt.f32.partialorder %v8585_v1, 0.0  ;;  %v5698_v24 = vmul.f32 0.2, %v8585_v1  ;;  %4801 = vmatprep.mubr.bf16.mxu0 %v14064_v6  ;;  %5138 = vmatmul.mubr.bf16.gmra.mrb[36].mxu1 %v10695_v17  ;;  %14065 = vst [vmem:[#allocation27_spill] sm:$0xff] %v11147_v5  ;;  %v11151_v57 = vsel %vm5434_vm9, %v8583_v21, %v5690_v33 }
 0x496   :  { %5147 = vmatprep.mubr.bf16.mxu1 %v10710_v0  ;;  %v11149_v48 = vsel %vm5441_vm10, %v8584_v56, %v5697_v42  ;;  %14067 = vst [vmem:[#allocation62_spill] sm:$0xff] %v11151_v57 }
 0x497   :  { %14066 = vst [vmem:[#allocation30_spill] sm:$0xff] %v11149_v48  ;;  %v4114_v51 = vpop.f32.mrb[44].mxu0  ;;  %v11153_v12 = vsel %vm5442_vm11, %v8585_v1, %v5698_v24  ;;  %v14069_v1 = vld [vmem:[#allocation29_spill] sm:$0xff]  ;;  %v14070_v24 = vld [vmem:[#allocation32_spill] sm:$0xff] }
 0x498   :  { %14068 = vst [vmem:[#allocation63_spill] sm:$0xff] %v11153_v12  ;;  %v8586_v32 = vadd.f32 %v4114_v51, %v11089_v14  ;;  %v4116_v46 = vpop.f32.mrb[45].mxu0  ;;  %v14071_v51 = vld [vmem:[#allocation19_spill] sm:$0xff] }
 0x499   :  { %v8587_v0 = vadd.f32 %v4116_v46, %v11095_v22  ;;  %v4118_v35 = vpop.f32.mrb[46].mxu0  ;;  %v14072_v46 = vsub.s32 2, %v14071_v51 }
 0x49a   :  { %v5705_v44 = vmul.f32 0.2, %v8586_v32  ;;  %v8588_v37 = vadd.f32 %v4118_v35, %v11089_v14  ;;  %v4120_v56 = vpop.f32.mrb[47].mxu0  ;;  %vm5449_vm12 = vcmp.gt.f32.partialorder %v8586_v32, 0.0 }
 0x49b   :  { %v5706_v21 = vmul.f32 0.2, %v8587_v0  ;;  %v8589_v26 = vadd.f32 %v4120_v56, %v11095_v22  ;;  %vm5450_vm13 = vcmp.gt.f32.partialorder %v8587_v0, 0.0  ;;  %v11169_v35 = vrot.slane %v11084_v25, %v14072_v46 }
 0x49c   :  { %vm5457_vm14 = vcmp.gt.f32.partialorder %v8588_v37, 0.0  ;;  %v5713_v33 = vmul.f32 0.2, %v8588_v37  ;;  %4802 = vmatmul.mubr.bf16.gmra.mrb[152].mxu0 %v14069_v1  ;;  %v11172_v52 = vsel %vm5449_vm12, %v8586_v32, %v5705_v44 }
 0x49d   :  { %vm5458_vm15 = vcmp.gt.f32.partialorder %v8589_v26, 0.0  ;;  %v5714_v42 = vmul.f32 0.2, %v8589_v26  ;;  %4811 = vmatprep.mubr.bf16.mxu0 %v14070_v24  ;;  %5148 = vmatmul.mubr.bf16.gmra.mrb[40].mxu1 %v14047_v59  ;;  %14073 = vst [vmem:[#allocation29_spill] sm:$0xff] %v11172_v52  ;;  %v11176_v20 = vsel %vm5450_vm13, %v8587_v0, %v5706_v21 }
 0x49e   :  { %5157 = vmatprep.mubr.bf16.mxu1 %v14049_v30  ;;  %v11174_v56 = vsel %vm5457_vm14, %v8588_v37, %v5713_v33  ;;  %14075 = vst [vmem:[#allocation64_spill] sm:$0xff] %v11176_v20 }
 0x49f   :  { %14074 = vst [vmem:[#allocation32_spill] sm:$0xff] %v11174_v56  ;;  %v4124_v17 = vpop.f32.mrb[48].mxu0  ;;  %v11178_v40 = vsel %vm5458_vm15, %v8589_v26, %v5714_v42  ;;  %v14077_v26 = vsub.s32 3, %v14071_v51  ;;  %v14079_v56 = vld [vmem:[#allocation34_spill] sm:$0xff] }
 0x4a0   :  { %14076 = vst [vmem:[#allocation65_spill] sm:$0xff] %v11178_v40  ;;  %v8590_v59 = vadd.f32 %v4124_v17, %v11089_v14  ;;  %v4126_v16 = vpop.f32.mrb[49].mxu0  ;;  %v4470_v53 = vpop.f32.mrb[192].mxu1 }
 0x4a1   :  { %v8591_v30 = vadd.f32 %v4126_v16, %v11095_v22  ;;  %v8638_v32 = vadd.f32 %v4470_v53, %v11169_v35  ;;  %v4128_v44 = vpop.f32.mrb[50].mxu0  ;;  %v4472_v37 = vpop.f32.mrb[193].mxu1  ;;  %v11191_v33 = vrot.slane %v11084_v25, %v14077_v26 }
 0x4a2   :  { %v5721_v0 = vmul.f32 0.2, %v8590_v59  ;;  %v8592_v21 = vadd.f32 %v4128_v44, %v11089_v14  ;;  %v4130_v17 = vpop.f32.mrb[51].mxu0  ;;  %v4474_v42 = vpop.f32.mrb[194].mxu1  ;;  %vm5465_vm0 = vcmp.gt.f32.partialorder %v8590_v59, 0.0 }
 0x4a3   :  { %v5659_v34 = vmul.f32 0.2, %v8638_v32  ;;  %v5722_v16 = vmul.f32 0.2, %v8591_v30  ;;  %vm5403_vm2 = vcmp.gt.f32.partialorder %v8638_v32, 0.0  ;;  %v8593_v53 = vadd.f32 %v4130_v17, %v11095_v22  ;;  %v4476_v44 = vpop.f32.mrb[195].mxu1 }
 0x4a4   :  { %vm5473_vm1 = vcmp.gt.f32.partialorder %v8592_v21, 0.0  ;;  %v5729_v46 = vmul.f32 0.2, %v8592_v21  ;;  %4812 = vmatmul.mubr.bf16.gmra.mrb[156].mxu0 %v14078_v18  ;;  %v8640_v52 = vadd.f32 %v4474_v42, %v11169_v35  ;;  %vm5466_vm3 = vcmp.gt.f32.partialorder %v8591_v30, 0.0 }
 0x4a5   :  { %4854 = vmatprep.mubr.bf16.mxu0 %v14079_v56  ;;  %5158 = vmatmul.mubr.bf16.gmra.mrb[44].mxu1 %v14051_v8  ;;  %v8639_v25 = vadd.f32 %v4472_v37, %v11191_v33  ;;  %v11200_v26 = vsel %vm5465_vm0, %v8590_v59, %v5721_v0  ;;  %vm5474_vm4 = vcmp.gt.f32.partialorder %v8593_v53, 0.0  ;;  %v5730_v20 = vmul.f32 0.2, %v8593_v53  ;;  %v9486_v0 = vld [vmem:[#allocation11] ss:$8 sps:$4 sm:$0xff]  }
 0x4a6   :  { %5167 = vmatprep.mubr.bf16.mxu1 %v14052_v39  ;;  %14080 = vst [vmem:[#allocation31_spill] sm:$0xff] %v11200_v26  ;;  %v11202_v51 = vsel %vm5473_vm1, %v8592_v21, %v5729_v46  ;;  %vm5411_vm5 = vcmp.gt.f32.partialorder %v8640_v52, 0.0  ;;  %v5667_v17 = vmul.f32 0.2, %v8640_v52  ;;  %v11204_v40 = vsel %vm5403_vm2, %v8638_v32, %v5659_v34 }
 0x4a7   :  { %14081 = vst [vmem:[#allocation34_spill] sm:$0xff] %v11202_v51  ;;  %14082 = vst [vmem:[#allocation66_spill] sm:$0xff] %v11204_v40  ;;  %v8641_v42 = vadd.f32 %v4476_v44, %v11191_v33  ;;  %v4134_v5 = vpop.f32.mrb[52].mxu0  ;;  %v11217_v21 = vsel %vm5466_vm3, %v8591_v30, %v5722_v16  ;;  %v11219_v34 = vsel %vm5474_vm4, %v8593_v53, %v5730_v20  ;;  %vm5404_vm6 = vcmp.gt.f32.partialorder %v8639_v25, 0.0  ;;  %v14086_v53 = vld [vmem:[#allocation33_spill] sm:$0xff]  ;;  %v14087_v40 = vld [vmem:[#allocation35_spill] sm:$0xff] }
 0x4a8   :  { %v11207_v48 = vpop.f32.mrb[196].mxu1  ;;  %v11211_v37 = vsel %vm5411_vm5, %v8640_v52, %v5667_v17  ;;  %v8594_v39 = vadd.f32 %v4134_v5, %v11089_v14  ;;  %v4136_v59 = vpop.f32.mrb[53].mxu0  ;;  %14084 = vst [vmem:[#allocation68_spill] sm:$0xff] %v11217_v21  ;;  %14085 = vst [vmem:[#allocation69_spill] sm:$0xff] %v11219_v34  ;;  %v9491_v52 = vld [vmem:[#allocation11 + $0x14] ss:$8 sps:$4 sm:$0xff]  }
 0x4a9   :  { %14083 = vst [vmem:[#allocation67_spill] sm:$0xff] %v11211_v37  ;;  %v11214_v46 = vpop.f32.mrb[197].mxu1  ;;  %v8595_v44 = vadd.f32 %v4136_v59, %v11095_v22  ;;  %v4138_v57 = vpop.f32.mrb[54].mxu0  ;;  %v5660_v17 = vmul.f32 0.2, %v8639_v25  ;;  %vm5412_vm7 = vcmp.gt.f32.partialorder %v8641_v42, 0.0 }
 0x4aa   :  { %v11224_v8 = vpop.f32.mrb[198].mxu1  ;;  %v5668_v26 = vmul.f32 0.2, %v8641_v42  ;;  %v5737_v51 = vmul.f32 0.2, %v8594_v39  ;;  %v8596_v30 = vadd.f32 %v4138_v57, %v11089_v14  ;;  %v4140_v20 = vpop.f32.mrb[55].mxu0 }
 0x4ab   :  { %v4486_v16 = vpop.f32.mrb[199].mxu1  ;;  %vm5481_vm8 = vcmp.gt.f32.partialorder %v8594_v39, 0.0  ;;  %v5738_v59 = vmul.f32 0.2, %v8595_v44  ;;  %v8597_v32 = vadd.f32 %v4140_v20, %v11095_v22  ;;  %v9489_v37 = vld [vmem:[#allocation11 + $0x10] ss:$8 sps:$4 sm:$0xff]   ;;  %v11242_v29 = vsel %vm5404_vm6, %v8639_v25, %v5660_v17 }
 0x4ac   :  { %4855 = vmatmul.mubr.bf16.vlgmr.msra.gmra.mrb[96].mxu0 %v14086_v53  ;;  %vm5482_vm9 = vcmp.gt.f32.partialorder %v8595_v44, 0.0  ;;  %vm5489_vm10 = vcmp.gt.f32.partialorder %v8596_v30, 0.0  ;;  %v5745_v5 = vmul.f32 0.2, %v8596_v30  ;;  %v9494_v57 = vld [vmem:[#allocation11 + $0x24] ss:$8 sps:$4 sm:$0xff]   ;;  %v11237_v20 = vsel %vm5481_vm8, %v8594_v39, %v5737_v51 }
 0x4ad   :  { %7078 = vmatpush1.bf16.msra.mxu0 %v9486_v0  ;;  %4864 = vmatprep.mubr.bf16.mxu0 %v14087_v40  ;;  %vm5490_vm11 = vcmp.gt.f32.partialorder %v8597_v32, 0.0  ;;  %v5746_v21 = vmul.f32 0.2, %v8597_v32  ;;  %14088 = vst [vmem:[#allocation33_spill] sm:$0xff] %v11237_v20  ;;  %14090 = vst [vmem:[#allocation70_spill] sm:$0xff] %v11242_v29  ;;  %v11245_v15 = vsel %vm5412_vm7, %v8641_v42, %v5668_v26 }
 0x4ae   :  { %5168 = vmatmul.mubr.bf16.gmra.mrb[48].mxu1 %v14057_v62  ;;  %7079 = vmatprep.subr.bf16.mxu0 %v9491_v52  ;;  %v11239_v0 = vsel %vm5489_vm10, %v8596_v30, %v5745_v5  ;;  %14091 = vst [vmem:[#allocation71_spill] sm:$0xff] %v11245_v15  ;;  %v11251_v19 = vsel %vm5482_vm9, %v8595_v44, %v5738_v59  ;;  %v9497_v42 = vld [vmem:[#allocation11 + $0x34] ss:$8 sps:$4 sm:$0xff]   ;;  %v9495_v39 = vld [vmem:[#allocation11 + $0x30] ss:$8 sps:$4 sm:$0xff]  }
 0x4af   :  { %5177 = vmatprep.mubr.bf16.mxu1 %v14058_v47  ;;  %v4144_v34 = vpop.f32.mrb[56].mxu0  ;;  %14089 = vst [vmem:[#allocation35_spill] sm:$0xff] %v11239_v0  ;;  %v9492_v47 = vld [vmem:[#allocation11 + $0x20] ss:$8 sps:$4 sm:$0xff]   ;;  %14092 = vst [vmem:[#allocation72_spill] sm:$0xff] %v11251_v19  ;;  %v11253_v51 = vsel %vm5490_vm11, %v8597_v32, %v5746_v21  ;;  %v8645_v44 = vadd.f32 %v4486_v16, %v11191_v33 }
 0x4b0   :  { %v11234_v12 = vpop.f32.mrb[200].mxu1  ;;  %v8598_v62 = vadd.f32 %v4144_v34, %v11089_v14  ;;  %v4146_v52 = vpop.f32.mrb[57].mxu0  ;;  %14093 = vst [vmem:[#allocation73_spill] sm:$0xff] %v11253_v51  ;;  %v9500_v16 = vld [vmem:[#allocation11 + $0x44] ss:$8 sps:$4 sm:$0xff]  }
 0x4b1   :  { %v11248_v61 = vpop.f32.mrb[201].mxu1  ;;  %7080 = vmatpush1.bf16.msra.mxu0 %v9489_v37  ;;  %v8599_v25 = vadd.f32 %v4146_v52, %v11095_v22  ;;  %v4148_v5 = vpop.f32.mrb[58].mxu0  ;;  %v14094_v52 = vld [vmem:[#allocation37_spill] sm:$0xff]  ;;  %v5684_v29 = vmul.f32 0.2, %v8645_v44  ;;  %vm5428_vm0 = vcmp.gt.f32.partialorder %v8645_v44, 0.0 }
 0x4b2   :  { %v11258_v26 = vpop.f32.mrb[202].mxu1  ;;  %7081 = vmatprep.subr.bf16.mxu0 %v9494_v57  ;;  %v5753_v21 = vmul.f32 0.2, %v8598_v62  ;;  %v8600_v32 = vadd.f32 %v4148_v5, %v11089_v14  ;;  %v4150_v17 = vpop.f32.mrb[59].mxu0  ;;  %vm5497_vm12 = vcmp.gt.f32.partialorder %v8598_v62, 0.0  ;;  %v8643_v5 = vadd.f32 %v11214_v46, %v11191_v33  ;;  %v14099_v51 = vld [vmem:[#allocation36_spill] sm:$0xff] }
 0x4b3   :  { %v11266_v30 = vpop.f32.mrb[203].mxu1  ;;  %v5754_v59 = vmul.f32 0.2, %v8599_v25  ;;  %v8601_v57 = vadd.f32 %v4150_v17, %v11095_v22  ;;  %vm5498_vm13 = vcmp.gt.f32.partialorder %v8599_v25, 0.0  ;;  %v9498_v46 = vld [vmem:[#allocation11 + $0x40] ss:$8 sps:$4 sm:$0xff]  }
 0x4b4   :  { %4865 = vmatmul.mubr.bf16.gmra.mrb[100].mxu0 %v10821_v55  ;;  %vm5505_vm14 = vcmp.gt.f32.partialorder %v8600_v32, 0.0  ;;  %v5761_v37 = vmul.f32 0.2, %v8600_v32  ;;  %vm5420_vm1 = vcmp.gt.f32.partialorder %v8643_v5, 0.0 }
 0x4b5   :  { %4874 = vmatprep.mubr.bf16.mxu0 %v14094_v52  ;;  %7082 = vmatpush1.bf16.msra.mxu0 %v9492_v47  ;;  %vm5506_vm15 = vcmp.gt.f32.partialorder %v8601_v57, 0.0  ;;  %v5762_v34 = vmul.f32 0.2, %v8601_v57  ;;  %v11278_v47 = vsel %vm5497_vm12, %v8598_v62, %v5753_v21  ;;  %v11286_v19 = vsel %vm5498_vm13, %v8599_v25, %v5754_v59 }
 0x4b6   :  { %5178 = vmatmul.mubr.bf16.gmra.mrb[52].mxu1 %v14063_v10  ;;  %7083 = vmatprep.subr.bf16.mxu0 %v9497_v42  ;;  %14095 = vst [vmem:[#allocation37_spill] sm:$0xff] %v11278_v47  ;;  %v11280_v20 = vsel %vm5505_vm14, %v8600_v32, %v5761_v37  ;;  %14097 = vst [vmem:[#allocation75_spill] sm:$0xff] %v11286_v19  ;;  %v9503_v32 = vld [vmem:[#allocation11 + $0x54] ss:$8 sps:$4 sm:$0xff]  }
 0x4b7   :  { %5187 = vmatprep.mubr.bf16.mxu1 %v14064_v6  ;;  %v4154_v17 = vpop.f32.mrb[60].mxu0  ;;  %14096 = vst [vmem:[#allocation74_spill] sm:$0xff] %v11280_v20  ;;  %v11288_v6 = vsel %vm5506_vm15, %v8601_v57, %v5762_v34  ;;  %v14100_v20 = vld [vmem:[#allocation38_spill] sm:$0xff] }
 0x4b8   :  { %v11275_v15 = vpop.f32.mrb[204].mxu1  ;;  %v8602_v10 = vadd.f32 %v4154_v17, %v11089_v14  ;;  %v4156_v42 = vpop.f32.mrb[61].mxu0  ;;  %14098 = vst [vmem:[#allocation76_spill] sm:$0xff] %v11288_v6  ;;  %v5676_v17 = vmul.f32 0.2, %v8643_v5  ;;  %v8642_v6 = vadd.f32 %v11207_v48, %v11169_v35 }
 0x4b9   :  { %v11283_v0 = vpop.f32.mrb[205].mxu1  ;;  %7084 = vmatpush1.bf16.msra.mxu0 %v9495_v39  ;;  %v8603_v62 = vadd.f32 %v4156_v42, %v11095_v22  ;;  %v4158_v37 = vpop.f32.mrb[62].mxu0  ;;  %v11304_v39 = vsel %vm5428_vm0, %v8645_v44, %v5684_v29  ;;  %v8644_v29 = vadd.f32 %v11224_v8, %v11169_v35 }
 0x4ba   :  { %v11293_v21 = vpop.f32.mrb[206].mxu1  ;;  %7085 = vmatprep.subr.bf16.mxu0 %v9500_v16  ;;  %v5769_v25 = vmul.f32 0.2, %v8602_v10  ;;  %v8604_v34 = vadd.f32 %v4158_v37, %v11089_v14  ;;  %v4160_v59 = vpop.f32.mrb[63].mxu0  ;;  %vm5513_vm2 = vcmp.gt.f32.partialorder %v8602_v10, 0.0  ;;  %14101 = vst [vmem:[#allocation36_spill] sm:$0xff] %v11304_v39 }
 0x4bb   :  { %v11298_v57 = vpop.f32.mrb[207].mxu1  ;;  %v5770_v42 = vmul.f32 0.2, %v8603_v62  ;;  %v8605_v47 = vadd.f32 %v4160_v59, %v11095_v22  ;;  %v9501_v16 = vld [vmem:[#allocation11 + $0x50] ss:$8 sps:$4 sm:$0xff]   ;;  %vm5514_vm3 = vcmp.gt.f32.partialorder %v8603_v62, 0.0 }
 0x4bc   :  { %4875 = vmatmul.mubr.bf16.gmra.mrb[104].mxu0 %v14099_v51  ;;  %vm5521_vm4 = vcmp.gt.f32.partialorder %v8604_v34, 0.0  ;;  %v5777_v19 = vmul.f32 0.2, %v8604_v34  ;;  %v9506_v37 = vld [vmem:[#allocation11 + $0x64] ss:$8 sps:$4 sm:$0xff]   ;;  %vm5419_vm6 = vcmp.gt.f32.partialorder %v8642_v6, 0.0 }
 0x4bd   :  { %4884 = vmatprep.mubr.bf16.mxu0 %v14100_v20  ;;  %7086 = vmatpush1.bf16.msra.mxu0 %v9498_v46  ;;  %vm5522_vm5 = vcmp.gt.f32.partialorder %v8605_v47, 0.0  ;;  %v5778_v43 = vmul.f32 0.2, %v8605_v47  ;;  %v11311_v46 = vsel %vm5420_vm1, %v8643_v5, %v5676_v17  ;;  %v9504_v5 = vld [vmem:[#allocation11 + $0x60] ss:$8 sps:$4 sm:$0xff]   ;;  %v11328_v8 = vsel %vm5514_vm3, %v8603_v62, %v5770_v42 }
 0x4be   :  { %5188 = vmatmul.mubr.bf16.gmra.mrb[56].mxu1 %v14069_v1  ;;  %7087 = vmatprep.subr.bf16.mxu0 %v9503_v32  ;;  %14102 = vst [vmem:[#allocation38_spill] sm:$0xff] %v11311_v46  ;;  %v11318_v1 = vsel %vm5513_vm2, %v8602_v10, %v5769_v25  ;;  %v11320_v32 = vsel %vm5521_vm4, %v8604_v34, %v5777_v19  ;;  %14105 = vst [vmem:[#allocation79_spill] sm:$0xff] %v11328_v8  ;;  %v5675_v48 = vmul.f32 0.2, %v8642_v6  ;;  %v9507_v19 = vld [vmem:[#allocation11 + $0x70] ss:$8 sps:$4 sm:$0xff]  }
 0x4bf   :  { %5197 = vmatprep.mubr.bf16.mxu1 %v14070_v24  ;;  %v4164_v44 = vpop.f32.mrb[64].mxu0  ;;  %14103 = vst [vmem:[#allocation77_spill] sm:$0xff] %v11318_v1  ;;  %14104 = vst [vmem:[#allocation78_spill] sm:$0xff] %v11320_v32  ;;  %v11331_v17 = vsel %vm5522_vm5, %v8605_v47, %v5778_v43  ;;  %v5683_v62 = vmul.f32 0.2, %v8644_v29  ;;  %vm5427_vm7 = vcmp.gt.f32.partialorder %v8644_v29, 0.0 }
 0x4c0   :  { %v11315_v59 = vpop.f32.mrb[208].mxu1  ;;  %v8606_v13 = vadd.f32 %v4164_v44, %v11089_v14  ;;  %v4166_v24 = vpop.f32.mrb[65].mxu0  ;;  %14106 = vst [vmem:[#allocation80_spill] sm:$0xff] %v11331_v17  ;;  %v9509_v44 = vld [vmem:[#allocation11 + $0x74] ss:$8 sps:$4 sm:$0xff]  }
 0x4c1   :  { %v11325_v38 = vpop.f32.mrb[209].mxu1  ;;  %7088 = vmatpush1.bf16.msra.mxu0 %v9501_v16  ;;  %v8607_v10 = vadd.f32 %v4166_v24, %v11095_v22  ;;  %v4168_v25 = vpop.f32.mrb[66].mxu0  ;;  %v11359_v17 = vsel %vm5427_vm7, %v8644_v29, %v5683_v62  ;;  %v11399_v62 = vadd.f32 %v11258_v26, %v11169_v35 }
 0x4c2   :  { %v11336_v34 = vpop.f32.mrb[210].mxu1  ;;  %7089 = vmatprep.subr.bf16.mxu0 %v9506_v37  ;;  %v5785_v42 = vmul.f32 0.2, %v8606_v13  ;;  %v8608_v43 = vadd.f32 %v4168_v25, %v11089_v14  ;;  %v4170_v47 = vpop.f32.mrb[67].mxu0  ;;  %vm5529_vm8 = vcmp.gt.f32.partialorder %v8606_v13, 0.0  ;;  %14110 = vst [vmem:[#allocation84_spill] sm:$0xff] %v11359_v17 }
 0x4c3   :  { %v11341_v46 = vpop.f32.mrb[211].mxu1  ;;  %v5786_v24 = vmul.f32 0.2, %v8607_v10  ;;  %v8609_v37 = vadd.f32 %v4170_v47, %v11095_v22  ;;  %vm5530_vm9 = vcmp.gt.f32.partialorder %v8607_v10, 0.0  ;;  %v9512_v25 = vld [vmem:[#allocation11 + $0x84] ss:$8 sps:$4 sm:$0xff]  }
 0x4c4   :  { %4885 = vmatmul.mubr.bf16.gmra.mrb[108].mxu0 %v10845_v49  ;;  %vm5537_vm10 = vcmp.gt.f32.partialorder %v8608_v43, 0.0  ;;  %v5793_v16 = vmul.f32 0.2, %v8608_v43  ;;  %v11351_v47 = vsel %vm5529_vm8, %v8606_v13, %v5785_v42  ;;  %vm5443_vm3 = vcmp.gt.f32.partialorder %v11399_v62, 0.0 }
 0x4c5   :  { %4894 = vmatprep.mubr.bf16.mxu0 %v10859_v54  ;;  %7090 = vmatpush1.bf16.msra.mxu0 %v9504_v5  ;;  %vm5538_vm11 = vcmp.gt.f32.partialorder %v8609_v37, 0.0  ;;  %v5794_v39 = vmul.f32 0.2, %v8609_v37  ;;  %14107 = vst [vmem:[#allocation81_spill] sm:$0xff] %v11351_v47  ;;  %v11356_v5 = vsel %vm5419_vm6, %v8642_v6, %v5675_v48  ;;  %v11365_v4 = vsel %vm5530_vm9, %v8607_v10, %v5786_v24 }
 0x4c6   :  { %5198 = vmatmul.mubr.bf16.gmra.mrb[60].mxu1 %v14078_v18  ;;  %7091 = vmatprep.subr.bf16.mxu0 %v9509_v44  ;;  %v11353_v8 = vsel %vm5537_vm10, %v8608_v43, %v5793_v16  ;;  %14109 = vst [vmem:[#allocation83_spill] sm:$0xff] %v11356_v5  ;;  %14111 = vst [vmem:[#allocation85_spill] sm:$0xff] %v11365_v4  ;;  %v11384_v10 = vadd.f32 %v11266_v30, %v11191_v33  ;;  %v9518_v16 = vld [vmem:[#allocation11 + $0xa4] ss:$8 sps:$4 sm:$0xff]  }
 0x4c7   :  { %5240 = vmatprep.mubr.bf16.mxu1 %v14079_v56  ;;  %v4174_v1 = vpop.f32.mrb[68].mxu0  ;;  %14108 = vst [vmem:[#allocation82_spill] sm:$0xff] %v11353_v8  ;;  %v9510_v56 = vld [vmem:[#allocation11 + $0x80] ss:$8 sps:$4 sm:$0xff]   ;;  %v11367_v13 = vsel %vm5538_vm11, %v8609_v37, %v5794_v39  ;;  %v11380_v39 = vadd.f32 %v11234_v12, %v11169_v35  ;;  %v9513_v12 = vld [vmem:[#allocation11 + $0x90] ss:$8 sps:$4 sm:$0xff]   ;;  %v11394_v30 = vadd.f32 %v11248_v61, %v11191_v33 }
 0x4c8   :  { %v11348_v32 = vpop.f32.mrb[212].mxu1  ;;  %v8610_v18 = vadd.f32 %v4174_v1, %v11089_v14  ;;  %v4176_v44 = vpop.f32.mrb[69].mxu0  ;;  %14112 = vst [vmem:[#allocation86_spill] sm:$0xff] %v11367_v13  ;;  %v9515_v1 = vld [vmem:[#allocation11 + $0x94] ss:$8 sps:$4 sm:$0xff]   ;;  %vm5444_vm1 = vcmp.gt.f32.partialorder %v11384_v10, 0.0 }
 0x4c9   :  { %v11362_v11 = vpop.f32.mrb[213].mxu1  ;;  %7092 = vmatpush1.bf16.msra.mxu0 %v9507_v19  ;;  %v8611_v6 = vadd.f32 %v4176_v44, %v11095_v22  ;;  %v4178_v48 = vpop.f32.mrb[70].mxu0  ;;  %v14113_v19 = vld [vmem:[#allocation40_spill] sm:$0xff]  ;;  %v5700_v61 = vmul.f32 0.2, %v11384_v10  ;;  %vm5436_vm0 = vcmp.gt.f32.partialorder %v11394_v30, 0.0 }
 0x4ca   :  { %v11372_v29 = vpop.f32.mrb[214].mxu1  ;;  %7093 = vmatprep.subr.bf16.mxu0 %v9512_v25  ;;  %v5801_v42 = vmul.f32 0.2, %v8610_v18  ;;  %v8612_v43 = vadd.f32 %v4178_v48, %v11089_v14  ;;  %v4180_v24 = vpop.f32.mrb[71].mxu0  ;;  %vm5545_vm12 = vcmp.gt.f32.partialorder %v8610_v18, 0.0  ;;  %vm5435_vm2 = vcmp.gt.f32.partialorder %v11380_v39, 0.0 }
 0x4cb   :  { %v11387_v37 = vpop.f32.mrb[215].mxu1  ;;  %v5802_v25 = vmul.f32 0.2, %v8611_v6  ;;  %v8613_v44 = vadd.f32 %v4180_v24, %v11095_v22  ;;  %vm5546_vm13 = vcmp.gt.f32.partialorder %v8611_v6, 0.0 }
 0x4cc   :  { %4895 = vmatmul.mubr.bf16.gmra.mrb[112].mxu0 %v10857_v58  ;;  %vm5553_vm14 = vcmp.gt.f32.partialorder %v8612_v43, 0.0  ;;  %v5809_v48 = vmul.f32 0.2, %v8612_v43 }
 0x4cd   :  { %4904 = vmatprep.mubr.bf16.mxu0 %v14113_v19  ;;  %7094 = vmatpush1.bf16.msra.mxu0 %v9510_v56  ;;  %vm5554_vm15 = vcmp.gt.f32.partialorder %v8613_v44, 0.0  ;;  %v5810_v24 = vmul.f32 0.2, %v8613_v44  ;;  %v11403_v56 = vmul.f32 0.2, %v11380_v39  ;;  %v11417_v4 = vsel %vm5546_vm13, %v8611_v6, %v5802_v25 }
 0x4ce   :  { %5241 = vmatmul.mubr.bf16.vlgmr.msra.gmra.mrb[0].mxu1 %v14086_v53  ;;  %7095 = vmatprep.subr.bf16.mxu0 %v9515_v1  ;;  %v11409_v53 = vsel %vm5545_vm12, %v8610_v18, %v5801_v42  ;;  %v11411_v1 = vsel %vm5553_vm14, %v8612_v43, %v5809_v48  ;;  %14116 = vst [vmem:[#allocation88_spill] sm:$0xff] %v11417_v4  ;;  %v9521_v43 = vld [vmem:[#allocation11 + $0xb4] ss:$8 sps:$4 sm:$0xff]   ;;  %v5692_v25 = vmul.f32 0.2, %v11394_v30 }
 0x4cf   :  { %5250 = vmatprep.mubr.bf16.mxu1 %v14087_v40  ;;  %v4184_v5 = vpop.f32.mrb[72].mxu0  ;;  %14114 = vst [vmem:[#allocation40_spill] sm:$0xff] %v11409_v53  ;;  %14115 = vst [vmem:[#allocation87_spill] sm:$0xff] %v11411_v1  ;;  %v9516_v40 = vld [vmem:[#allocation11 + $0xa0] ss:$8 sps:$4 sm:$0xff]   ;;  %v11419_v13 = vsel %vm5554_vm15, %v8613_v44, %v5810_v24  ;;  %v11448_v48 = vadd.f32 %v11298_v57, %v11191_v33  ;;  %v14119_v1 = vld [vmem:[#allocation42_spill] sm:$0xff]  ;;  %v11465_v4 = vadd.f32 %v11315_v59, %v11169_v35 }
 0x4d0   :  { %v11406_v17 = vpop.f32.mrb[216].mxu1  ;;  %v8614_v26 = vadd.f32 %v4184_v5, %v11089_v14  ;;  %v4186_v47 = vpop.f32.mrb[73].mxu0  ;;  %14117 = vst [vmem:[#allocation89_spill] sm:$0xff] %v11419_v13  ;;  %v11432_v44 = vmul.f32 0.2, %v11399_v62  ;;  %v11476_v59 = vsel %vm5436_vm0, %v11394_v30, %v5692_v25 }
 0x4d1   :  { %v11414_v8 = vpop.f32.mrb[217].mxu1  ;;  %7096 = vmatpush1.bf16.msra.mxu0 %v9513_v12  ;;  %v8615_v18 = vadd.f32 %v4186_v47, %v11095_v22  ;;  %v4188_v5 = vpop.f32.mrb[74].mxu0  ;;  %v11436_v12 = vadd.f32 %v11275_v15, %v11169_v35  ;;  %v11440_v47 = vadd.f32 %v11283_v0, %v11191_v33  ;;  %v14118_v15 = vld [vmem:[#allocation39_spill] sm:$0xff]  ;;  %v9519_v57 = vld [vmem:[#allocation11 + $0xb0] ss:$8 sps:$4 sm:$0xff]   ;;  %14121 = vst [vmem:[#allocation42_spill] sm:$0xff] %v11476_v59 }
 0x4d2   :  { %v11426_v42 = vpop.f32.mrb[218].mxu1  ;;  %7097 = vmatprep.subr.bf16.mxu0 %v9518_v16  ;;  %v11444_v16 = vadd.f32 %v11293_v21, %v11169_v35  ;;  %v5817_v24 = vmul.f32 0.2, %v8614_v26  ;;  %v8616_v63 = vadd.f32 %v4188_v5, %v11089_v14  ;;  %v4190_v6 = vpop.f32.mrb[75].mxu0  ;;  %vm5561_vm4 = vcmp.gt.f32.partialorder %v8614_v26, 0.0 }
 0x4d3   :  { %v11451_v53 = vpop.f32.mrb[219].mxu1  ;;  %v5818_v0 = vmul.f32 0.2, %v8615_v18  ;;  %v8617_v21 = vadd.f32 %v4190_v6, %v11095_v22  ;;  %v11461_v5 = vsel %vm5444_vm1, %v11384_v10, %v5700_v61  ;;  %vm5562_vm5 = vcmp.gt.f32.partialorder %v8615_v18, 0.0  ;;  %v9524_v6 = vld [vmem:[#allocation11 + $0xc4] ss:$8 sps:$4 sm:$0xff]  }
 0x4d4   :  { %4905 = vmatmul.mubr.bf16.gmra.mrb[116].mxu0 %v14118_v15  ;;  %14120 = vst [vmem:[#allocation39_spill] sm:$0xff] %v11461_v5  ;;  %vm5569_vm6 = vcmp.gt.f32.partialorder %v8616_v63, 0.0  ;;  %v5825_v13 = vmul.f32 0.2, %v8616_v63  ;;  %v11480_v10 = vadd.f32 %v11336_v34, %v11169_v35  ;;  %v9522_v25 = vld [vmem:[#allocation11 + $0xc0] ss:$8 sps:$4 sm:$0xff]  }
 0x4d5   :  { %4914 = vmatprep.mubr.bf16.mxu0 %v14119_v1  ;;  %7098 = vmatpush1.bf16.msra.mxu0 %v9516_v40  ;;  %v11470_v40 = vadd.f32 %v11325_v38, %v11191_v33  ;;  %vm5570_vm7 = vcmp.gt.f32.partialorder %v8617_v21, 0.0  ;;  %v5826_v50 = vmul.f32 0.2, %v8617_v21  ;;  %v9527_v34 = vld [vmem:[#allocation11 + $0xd4] ss:$8 sps:$4 sm:$0xff]   ;;  %v11495_v36 = vsel %vm5562_vm5, %v8615_v18, %v5818_v0 }
 0x4d6   :  { %5251 = vmatmul.mubr.bf16.gmra.mrb[4].mxu1 %v10821_v55  ;;  %7099 = vmatprep.subr.bf16.mxu0 %v9521_v43  ;;  %v11485_v43 = vsel %vm5561_vm4, %v8614_v26, %v5817_v24  ;;  %v11487_v38 = vsel %vm5569_vm6, %v8616_v63, %v5825_v13  ;;  %14124 = vst [vmem:[#allocation92_spill] sm:$0xff] %v11495_v36  ;;  %v11503_v13 = vmul.f32 0.2, %v11436_v12  ;;  %v11506_v26 = vmul.f32 0.2, %v11440_v47 }
 0x4d7   :  { %5260 = vmatprep.mubr.bf16.mxu1 %v14094_v52  ;;  %v4194_v55 = vpop.f32.mrb[76].mxu0  ;;  %14122 = vst [vmem:[#allocation90_spill] sm:$0xff] %v11485_v43  ;;  %14123 = vst [vmem:[#allocation91_spill] sm:$0xff] %v11487_v38  ;;  %v11498_v3 = vsel %vm5570_vm7, %v8617_v21, %v5826_v50  ;;  %v11514_v50 = vmul.f32 0.2, %v11444_v16  ;;  %v14128_v43 = vld [vmem:[#allocation41_spill] sm:$0xff] }
 0x4d8   :  { %v11482_v61 = vpop.f32.mrb[220].mxu1  ;;  %v8618_v41 = vadd.f32 %v4194_v55, %v11089_v14  ;;  %v4196_v31 = vpop.f32.mrb[77].mxu0  ;;  %14125 = vst [vmem:[#allocation93_spill] sm:$0xff] %v11498_v3  ;;  %v11517_v0 = vmul.f32 0.2, %v11448_v48  ;;  %vm5460_vm12 = vcmp.gt.f32.partialorder %v11448_v48, 0.0 }
 0x4d9   :  { %v11492_v30 = vpop.f32.mrb[221].mxu1  ;;  %7100 = vmatpush1.bf16.msra.mxu0 %v9519_v57  ;;  %v8619_v24 = vadd.f32 %v4196_v31, %v11095_v22  ;;  %v4198_v57 = vpop.f32.mrb[78].mxu0  ;;  %v11520_v21 = vmul.f32 0.2, %v11465_v4  ;;  %v9525_v52 = vld [vmem:[#allocation11 + $0xd0] ss:$8 sps:$4 sm:$0xff]   ;;  %v11527_v31 = vadd.f32 %v11341_v46, %v11191_v33  ;;  %v11540_v46 = vadd.f32 %v11348_v32, %v11169_v35 }
 0x4da   :  { %v11509_v55 = vpop.f32.mrb[222].mxu1  ;;  %7101 = vmatprep.subr.bf16.mxu0 %v9524_v6  ;;  %v11523_v63 = vmul.f32 0.2, %v11470_v40  ;;  %v5833_v6 = vmul.f32 0.2, %v8618_v41  ;;  %v8620_v18 = vadd.f32 %v4198_v57, %v11089_v14  ;;  %v4200_v59 = vpop.f32.mrb[79].mxu0 }
 0x4db   :  { %14126 = vst [vmem:[#allocation94_spill] sm:$0xff] %v11520_v21  ;;  %v11530_v5 = vpop.f32.mrb[223].mxu1  ;;  %v11534_v38 = vmul.f32 0.2, %v11480_v10  ;;  %vm5577_vm8 = vcmp.gt.f32.partialorder %v8618_v41, 0.0  ;;  %v8621_v3 = vadd.f32 %v4200_v59, %v11095_v22  ;;  %v14130_v21 = vld [vmem:[#allocation43_spill] sm:$0xff]  ;;  %v11549_v59 = vadd.f32 %v11372_v29, %v11169_v35 }
 0x4dc   :  { %14127 = vst [vmem:[#allocation95_spill] sm:$0xff] %v11523_v63  ;;  %4915 = vmatmul.mubr.bf16.gmra.mrb[120].mxu0 %v14128_v43  ;;  %v5834_v36 = vmul.f32 0.2, %v8619_v24  ;;  %vm5578_vm9 = vcmp.gt.f32.partialorder %v8619_v24, 0.0  ;;  %vm5585_vm10 = vcmp.gt.f32.partialorder %v8620_v18, 0.0  ;;  %v11555_v60 = vsel %vm5577_vm8, %v8618_v41, %v5833_v6 }
 0x4dd   :  { %14129 = vst [vmem:[#allocation41_spill] sm:$0xff] %v11534_v38  ;;  %4924 = vmatprep.mubr.bf16.mxu0 %v14130_v21  ;;  %7102 = vmatpush1.bf16.msra.mxu0 %v9522_v25  ;;  %v5841_v57 = vmul.f32 0.2, %v8620_v18  ;;  %v11545_v38 = vadd.f32 %v11362_v11, %v11191_v33  ;;  %vm5586_vm11 = vcmp.gt.f32.partialorder %v8621_v3, 0.0  ;;  %v5842_v25 = vmul.f32 0.2, %v8621_v3 }
 0x4de   :  { %5261 = vmatmul.mubr.bf16.gmra.mrb[8].mxu1 %v14099_v51  ;;  %7103 = vmatprep.subr.bf16.mxu0 %v9527_v34  ;;  %14131 = vst [vmem:[#allocation96_spill] sm:$0xff] %v11555_v60  ;;  %v11563_v11 = vsel %vm5435_vm2, %v11380_v39, %v11403_v56  ;;  %v11569_v29 = vsel %vm5443_vm3, %v11399_v62, %v11432_v44  ;;  %v9528_v41 = vld [vmem:[#allocation11 + $0xe0] ss:$8 sps:$4 sm:$0xff]   ;;  %v11583_v62 = vmul.f32 0.2, %v11527_v31  ;;  %vm5452_vm13 = vcmp.gt.f32.partialorder %v11440_v47, 0.0 }
 0x4df   :  { %5270 = vmatprep.mubr.bf16.mxu1 %v14100_v20  ;;  %v4204_v32 = vpop.f32.mrb[80].mxu0  ;;  %v11557_v51 = vsel %vm5585_vm10, %v8620_v18, %v5841_v57  ;;  %14133 = vst [vmem:[#allocation98_spill] sm:$0xff] %v11563_v11  ;;  %14134 = vst [vmem:[#allocation99_spill] sm:$0xff] %v11569_v29  ;;  %v11575_v18 = vsel %vm5578_vm9, %v8619_v24, %v5834_v36  ;;  %v11577_v6 = vsel %vm5586_vm11, %v8621_v3, %v5842_v25 }
 0x4e0   :  { %v11552_v63 = vpop.f32.mrb[224].mxu1  ;;  %14132 = vst [vmem:[#allocation97_spill] sm:$0xff] %v11557_v51  ;;  %v8622_v20 = vadd.f32 %v4204_v32, %v11089_v14  ;;  %v4206_v34 = vpop.f32.mrb[81].mxu0  ;;  %14135 = vst [vmem:[#allocation100_spill] sm:$0xff] %v11575_v18  ;;  %v11593_v24 = vmul.f32 0.2, %v11540_v46  ;;  %v11612_v3 = vadd.f32 %v11414_v8, %v11191_v33  ;;  %v11631_v18 = vadd.f32 %v11482_v61, %v11169_v35 }
 0x4e1   :  { %v11572_v21 = vpop.f32.mrb[225].mxu1  ;;  %7104 = vmatpush1.bf16.msra.mxu0 %v9525_v52  ;;  %14136 = vst [vmem:[#allocation101_spill] sm:$0xff] %v11577_v6  ;;  %v8623_v56 = vadd.f32 %v4206_v34, %v11095_v22  ;;  %v4208_v44 = vpop.f32.mrb[82].mxu0  ;;  %v9533_v52 = vld [vmem:[#allocation11 + $0xf4] ss:$8 sps:$4 sm:$0xff]   ;;  %v11603_v34 = vadd.f32 %v11387_v37, %v11191_v33  ;;  %v11620_v37 = vadd.f32 %v11426_v42, %v11169_v35  ;;  %vm5451_vm2 = vcmp.gt.f32.partialorder %v11436_v12, 0.0 }
 0x4e2   :  { %v11586_v57 = vpop.f32.mrb[226].mxu1  ;;  %7105 = vmatprep.subr.bf16.mxu0 %v9530_v9  ;;  %14137 = vst [vmem:[#allocation102_spill] sm:$0xff] %v11593_v24  ;;  %v11596_v25 = vmul.f32 0.2, %v11545_v38  ;;  %v11599_v32 = vmul.f32 0.2, %v11549_v59  ;;  %v11608_v9 = vadd.f32 %v11406_v17, %v11169_v35  ;;  %v8624_v36 = vadd.f32 %v4208_v44, %v11089_v14 }
 0x4e3   :  { %v5849_v39 = vmul.f32 0.2, %v8622_v20  ;;  %v4210_v11 = vpop.f32.mrb[83].mxu0  ;;  %v11615_v29 = vpop.f32.mrb[227].mxu1  ;;  %vm5593_vm14 = vcmp.gt.f32.partialorder %v8622_v20, 0.0  ;;  %v11626_v44 = vadd.f32 %v11451_v53, %v11191_v33  ;;  %vm5594_vm15 = vcmp.gt.f32.partialorder %v8623_v56, 0.0 }
 0x4e4   :  { %14138 = vst [vmem:[#allocation103_spill] sm:$0xff] %v11596_v25  ;;  %14139 = vst [vmem:[#allocation104_spill] sm:$0xff] %v11599_v32  ;;  %4925 = vmatmul.mubr.bf16.gmra.mrb[124].mxu0 %v10918_v45  ;;  %v5850_v60 = vmul.f32 0.2, %v8623_v56  ;;  %v8625_v17 = vadd.f32 %v4210_v11, %v11095_v22  ;;  %v9531_v8 = vld [vmem:[#allocation11 + $0xf0] ss:$8 sps:$4 sm:$0xff]   ;;  %v11635_v11 = vadd.f32 %v11492_v30, %v11191_v33 }
 0x4e5   :  { %4934 = vmatprep.mubr.bf16.mxu0 %v10936_v28  ;;  %7106 = vmatpush1.bf16.msra.mxu0 %v9528_v41  ;;  %vm5601_vm0 = vcmp.gt.f32.partialorder %v8624_v36, 0.0  ;;  %v5857_v51 = vmul.f32 0.2, %v8624_v36  ;;  %v9536_v42 = vld [vmem:[#allocation11 + $0x104] ss:$8 sps:$4 sm:$0xff]   ;;  %v11647_v61 = vsel %vm5593_vm14, %v8622_v20, %v5849_v39  ;;  %vm5459_vm3 = vcmp.gt.f32.partialorder %v11444_v16, 0.0 }
 0x4e6   :  { %5271 = vmatmul.mubr.bf16.gmra.mrb[12].mxu1 %v10845_v49  ;;  %7107 = vmatprep.subr.bf16.mxu0 %v9533_v52  ;;  %vm5602_vm1 = vcmp.gt.f32.partialorder %v8625_v17, 0.0  ;;  %v5858_v41 = vmul.f32 0.2, %v8625_v17  ;;  %v11639_v53 = vmul.f32 0.2, %v11603_v34  ;;  %14142 = vst [vmem:[#allocation107_spill] sm:$0xff] %v11647_v61 }
 0x4e7   :  { %5280 = vmatprep.mubr.bf16.mxu1 %v10859_v54  ;;  %v11642_v6 = vmul.f32 0.2, %v11608_v9  ;;  %v4214_v49 = vpop.f32.mrb[84].mxu0  ;;  %v11649_v32 = vsel %vm5601_vm0, %v8624_v36, %v5857_v51  ;;  %v11655_v54 = vsel %vm5594_vm15, %v8623_v56, %v5850_v60  ;;  %v11662_v25 = vmul.f32 0.2, %v11612_v3 }
 0x4e8   :  { %14140 = vst [vmem:[#allocation105_spill] sm:$0xff] %v11639_v53  ;;  %v11644_v52 = vpop.f32.mrb[228].mxu1  ;;  %14143 = vst [vmem:[#allocation108_spill] sm:$0xff] %v11649_v32  ;;  %v8626_v30 = vadd.f32 %v4214_v49, %v11089_v14  ;;  %v4216_v24 = vpop.f32.mrb[85].mxu0  ;;  %v11657_v53 = vsel %vm5602_vm1, %v8625_v17, %v5858_v41  ;;  %v11665_v51 = vmul.f32 0.2, %v11620_v37  ;;  %v11683_v41 = vadd.f32 %v11509_v55, %v11169_v35 }
 0x4e9   :  { %14141 = vst [vmem:[#allocation106_spill] sm:$0xff] %v11642_v6  ;;  %v11652_v28 = vpop.f32.mrb[229].mxu1  ;;  %7108 = vmatpush1.bf16.msra.mxu0 %v9531_v8  ;;  %14144 = vst [vmem:[#allocation109_spill] sm:$0xff] %v11655_v54  ;;  %v8627_v20 = vadd.f32 %v4216_v24, %v11095_v22  ;;  %v4218_v39 = vpop.f32.mrb[86].mxu0  ;;  %v11673_v56 = vmul.f32 0.2, %v11626_v44  ;;  %v11687_v24 = vadd.f32 %v11530_v5, %v11191_v33 }
 0x4ea   :  { %14145 = vst [vmem:[#allocation110_spill] sm:$0xff] %v11657_v53  ;;  %v11668_v36 = vpop.f32.mrb[230].mxu1  ;;  %7270 = vmatprep.subr.bf16.mxu0 %v9536_v42  ;;  %v11676_v17 = vmul.f32 0.2, %v11631_v18  ;;  %v11679_v8 = vmul.f32 0.2, %v11635_v11  ;;  %v11691_v42 = vadd.f32 %v11552_v63, %v11169_v35  ;;  %v8628_v6 = vadd.f32 %v4218_v39, %v11089_v14 }
 0x4eb   :  { %v5865_v49 = vmul.f32 0.2, %v8626_v30  ;;  %v4220_v60 = vpop.f32.mrb[87].mxu0  ;;  %v4566_v61 = vpop.f32.mrb[231].mxu1  ;;  %vm5609_vm4 = vcmp.gt.f32.partialorder %v8626_v30, 0.0  ;;  %v14148_v32 = vld [vmem:[#allocation47_spill] sm:$0xff]  ;;  %v11703_v63 = vsel %vm5460_vm12, %v11448_v48, %v11517_v0  ;;  %v11707_v39 = vadd.f32 %v11572_v21, %v11191_v33 }
 0x4ec   :  { %14146 = vst [vmem:[#allocation111_spill] sm:$0xff] %v11676_v17  ;;  %14147 = vst [vmem:[#allocation112_spill] sm:$0xff] %v11679_v8  ;;  %4935 = vmatmul.mubr.bf16.gmra.mrb[128].mxu0 %v10934_v7  ;;  %v5866_v55 = vmul.f32 0.2, %v8627_v20  ;;  %v8629_v5 = vadd.f32 %v4220_v60, %v11095_v22  ;;  %vm5610_vm5 = vcmp.gt.f32.partialorder %v8627_v20, 0.0  ;;  %vm5617_vm6 = vcmp.gt.f32.partialorder %v8628_v6, 0.0 }
 0x4ed   :  { %4944 = vmatprep.mubr.bf16.mxu0 %v14148_v32  ;;  %14149 = vst [vmem:[#allocation113_spill] sm:$0xff] %v11703_v63  ;;  %v5873_v54 = vmul.f32 0.2, %v8628_v6  ;;  %v11712_v60 = vadd.f32 %v11586_v57, %v11169_v35  ;;  %v11719_v48 = vsel %vm5452_vm13, %v11440_v47, %v11506_v26  ;;  %v11723_v0 = vadd.f32 %v11615_v29, %v11191_v33 }
 0x4ee   :  { %5281 = vmatmul.mubr.bf16.gmra.mrb[16].mxu1 %v10857_v58  ;;  %vm5618_vm7 = vcmp.gt.f32.partialorder %v8629_v5, 0.0  ;;  %v5874_v53 = vmul.f32 0.2, %v8629_v5  ;;  %14150 = vst [vmem:[#allocation114_spill] sm:$0xff] %v11719_v48  ;;  %v11726_v32 = vsel %vm5609_vm4, %v8626_v30, %v5865_v49  ;;  %v11736_v47 = vsel %vm5610_vm5, %v8627_v20, %v5866_v55 }
 0x4ef   :  { %5290 = vmatprep.mubr.bf16.mxu1 %v14113_v19  ;;  %v4224_v21 = vpop.f32.mrb[88].mxu0  ;;  %14151 = vst [vmem:[#allocation115_spill] sm:$0xff] %v11726_v32  ;;  %v11728_v57 = vsel %vm5617_vm6, %v8628_v6, %v5873_v54  ;;  %14153 = vst [vmem:[#allocation117_spill] sm:$0xff] %v11736_v47  ;;  %v11743_v30 = vmul.f32 0.2, %v11683_v41  ;;  %v14158_v32 = vld [vmem:[#allocation46_spill] sm:$0xff] }
 0x4f0   :  { %v4570_v58 = vpop.f32.mrb[232].mxu1  ;;  %14152 = vst [vmem:[#allocation116_spill] sm:$0xff] %v11728_v57  ;;  %v8630_v7 = vadd.f32 %v4224_v21, %v11089_v14  ;;  %v4226_v17 = vpop.f32.mrb[89].mxu0  ;;  %v11738_v26 = vsel %vm5618_vm7, %v8629_v5, %v5874_v53  ;;  %v11746_v6 = vmul.f32 0.2, %v11687_v24  ;;  %v11773_v57 = vadd.f32 %v11652_v28, %v11191_v33 }
 0x4f1   :  { %v11733_v8 = vpop.f32.mrb[233].mxu1  ;;  %14154 = vst [vmem:[#allocation118_spill] sm:$0xff] %v11738_v26  ;;  %v8631_v54 = vadd.f32 %v4226_v17, %v11095_v22  ;;  %v4228_v49 = vpop.f32.mrb[90].mxu0  ;;  %v11754_v53 = vmul.f32 0.2, %v11691_v42  ;;  %v11767_v17 = vadd.f32 %v11644_v52, %v11169_v35  ;;  %v11779_v52 = vadd.f32 %v11668_v36, %v11169_v35 }
 0x4f2   :  { %v11749_v21 = vpop.f32.mrb[234].mxu1  ;;  %v11757_v55 = vmul.f32 0.2, %v11707_v39  ;;  %v11760_v5 = vmul.f32 0.2, %v11712_v60  ;;  %v8632_v48 = vadd.f32 %v4228_v49, %v11089_v14  ;;  %v4230_v20 = vpop.f32.mrb[91].mxu0  ;;  %v11786_v28 = vadd.f32 %v4570_v58, %v11169_v35 }
 0x4f3   :  { %14155 = vst [vmem:[#allocation119_spill] sm:$0xff] %v11754_v53  ;;  %v11763_v19 = vmul.f32 0.2, %v11723_v0  ;;  %v5881_v29 = vmul.f32 0.2, %v8630_v7  ;;  %v4576_v63 = vpop.f32.mrb[235].mxu1  ;;  %v8633_v26 = vadd.f32 %v4230_v20, %v11095_v22 }
 0x4f4   :  { %14156 = vst [vmem:[#allocation120_spill] sm:$0xff] %v11760_v5  ;;  %4945 = vmatmul.mubr.bf16.gmra.mrb[132].mxu0 %v14158_v32  ;;  %vm5625_vm8 = vcmp.gt.f32.partialorder %v8630_v7, 0.0  ;;  %v5882_v47 = vmul.f32 0.2, %v8631_v54  ;;  %vm5626_vm9 = vcmp.gt.f32.partialorder %v8631_v54, 0.0  ;;  %vm5633_vm10 = vcmp.gt.f32.partialorder %v8632_v48, 0.0 }
 0x4f5   :  { %14157 = vst [vmem:[#allocation121_spill] sm:$0xff] %v11763_v19  ;;  %4954 = vmatprep.mubr.bf16.mxu0 %v10960_v27  ;;  %v5889_v49 = vmul.f32 0.2, %v8632_v48  ;;  %v11783_v32 = vadd.f32 %v4566_v61, %v11191_v33  ;;  %vm5634_vm11 = vcmp.gt.f32.partialorder %v8633_v26, 0.0  ;;  %v5890_v5 = vmul.f32 0.2, %v8633_v26 }
 0x4f6   :  { %5291 = vmatmul.mubr.bf16.gmra.mrb[20].mxu1 %v14118_v15  ;;  %v11790_v36 = vsel %vm5625_vm8, %v8630_v7, %v5881_v29  ;;  %v11798_v15 = vsel %vm5451_vm2, %v11436_v12, %v11503_v13  ;;  %v11804_v61 = vsel %vm5459_vm3, %v11444_v16, %v11514_v50  ;;  %vm5468_vm12 = vcmp.gt.f32.partialorder %v11470_v40, 0.0 }
 0x4f7   :  { %5300 = vmatprep.mubr.bf16.mxu1 %v14119_v1  ;;  %v4234_v20 = vpop.f32.mrb[92].mxu0  ;;  %14159 = vst [vmem:[#allocation122_spill] sm:$0xff] %v11790_v36  ;;  %v11792_v53 = vsel %vm5633_vm10, %v8632_v48, %v5889_v49  ;;  %14161 = vst [vmem:[#allocation124_spill] sm:$0xff] %v11798_v15  ;;  %vm5476_vm13 = vcmp.gt.f32.partialorder %v11527_v31, 0.0  ;;  %v11810_v58 = vsel %vm5626_vm9, %v8631_v54, %v5882_v47  ;;  %v11817_v13 = vmul.f32 0.2, %v11767_v17 }
 0x4f8   :  { %v4580_v27 = vpop.f32.mrb[236].mxu1  ;;  %14160 = vst [vmem:[#allocation123_spill] sm:$0xff] %v11792_v53  ;;  %14162 = vst [vmem:[#allocation125_spill] sm:$0xff] %v11804_v61  ;;  %v8634_v7 = vadd.f32 %v4234_v20, %v11089_v14  ;;  %v4236_v1 = vpop.f32.mrb[93].mxu0  ;;  %v11812_v29 = vsel %vm5634_vm11, %v8633_v26, %v5890_v5  ;;  %vm5467_vm14 = vcmp.gt.f32.partialorder %v11465_v4, 0.0  ;;  %vm5475_vm15 = vcmp.gt.f32.partialorder %v11480_v10, 0.0 }
 0x4f9   :  { %v4582_v48 = vpop.f32.mrb[237].mxu1  ;;  %14163 = vst [vmem:[#allocation126_spill] sm:$0xff] %v11810_v58  ;;  %14164 = vst [vmem:[#allocation127_spill] sm:$0xff] %v11812_v29  ;;  %v8635_v16 = vadd.f32 %v4236_v1, %v11095_v22  ;;  %v4238_v50 = vpop.f32.mrb[94].mxu0  ;;  %vm5484_vm0 = vcmp.gt.f32.partialorder %v11545_v38, 0.0  ;;  %vm5483_vm1 = vcmp.gt.f32.partialorder %v11540_v46, 0.0  ;;  %v11844_v1 = vadd.f32 %v11733_v8, %v11191_v33 }
 0x4fa   :  { %v4584_v49 = vpop.f32.mrb[238].mxu1  ;;  %v11828_v47 = vmul.f32 0.2, %v11773_v57  ;;  %v11831_v26 = vmul.f32 0.2, %v11779_v52  ;;  %vm5491_vm2 = vcmp.gt.f32.partialorder %v11549_v59, 0.0  ;;  %v8636_v12 = vadd.f32 %v4238_v50, %v11089_v14 }
 0x4fb   :  { %v11834_v54 = vmul.f32 0.2, %v11783_v32  ;;  %vm5492_vm3 = vcmp.gt.f32.partialorder %v11603_v34, 0.0  ;;  %v11840_v5 = vmul.f32 0.2, %v11786_v28  ;;  %v4240_v20 = vpop.f32.mrb[95].mxu0  ;;  %v11852_v61 = vadd.f32 %v11749_v21, %v11169_v35 }
 0x4fc   :  { %v5898_v19 = vmul.f32 0.2, %v8635_v16  ;;  %v4586_v15 = vpop.f32.mrb[239].mxu1  ;;  %4955 = vmatmul.mubr.bf16.gmra.mrb[136].mxu0 %v10958_v23  ;;  %vm5500_vm4 = vcmp.gt.f32.partialorder %v11612_v3, 0.0  ;;  %v5897_v36 = vmul.f32 0.2, %v8634_v7  ;;  %v8637_v8 = vadd.f32 %v4240_v20, %v11095_v22 }
 0x4fd   :  { %14165 = vst [vmem:[#allocation128_spill] sm:$0xff] %v11840_v5  ;;  %vm5642_vm6 = vcmp.gt.f32.partialorder %v8635_v16, 0.0  ;;  %4964 = vmatprep.mubr.bf16.mxu0 %v10972_v2  ;;  %vm5507_vm8 = vcmp.gt.f32.partialorder %v11620_v37, 0.0  ;;  %v11859_v14 = vadd.f32 %v4576_v63, %v11191_v33  ;;  %vm5641_vm9 = vcmp.gt.f32.partialorder %v8634_v7, 0.0  ;;  %v14166_v53 = vld [vmem:[#allocation43_spill] sm:$0xff] }
 0x4fe   :  { %vm5649_vm10 = vcmp.gt.f32.partialorder %v8636_v12, 0.0  ;;  %v5905_v50 = vmul.f32 0.2, %v8636_v12  ;;  %5301 = vmatmul.mubr.bf16.gmra.mrb[24].mxu1 %v14128_v43  ;;  %v11865_v22 = vadd.f32 %v4580_v27, %v11169_v35  ;;  %v11868_v21 = vadd.f32 %v4582_v48, %v11191_v33 }
 0x4ff   :  { %vm5650_vm7 = vcmp.gt.f32.partialorder %v8637_v8, 0.0  ;;  %v5906_v20 = vmul.f32 0.2, %v8637_v8  ;;  %5310 = vmatprep.mubr.bf16.mxu1 %v14166_v53  ;;  %v11872_v63 = vmul.f32 0.2, %v11844_v1  ;;  %v11875_v58 = vadd.f32 %v4584_v49, %v11169_v35 }
 0x500   :  { %v11878_v43 = vadd.f32 %v4586_v15, %v11191_v33  ;;  %v4590_v29 = vpop.f32.mrb[240].mxu1  ;;  %v11881_v27 = vsel %vm5642_vm6, %v8635_v16, %v5898_v19  ;;  %v11889_v53 = vsel %vm5641_vm9, %v8634_v7, %v5897_v36  ;;  %v11892_v5 = vsel %vm5649_vm10, %v8636_v12, %v5905_v50  ;;  %v14172_v36 = vld [vmem:[#allocation95_spill] sm:$0xff] }
 0x501   :  { %14167 = vst [vmem:[#allocation43_spill] sm:$0xff] %v11881_v27  ;;  %v11884_v48 = vadd.f32 %v4590_v29, %v11169_v35  ;;  %v4592_v2 = vpop.f32.mrb[241].mxu1  ;;  %v11886_v23 = vsel %vm5650_vm7, %v8637_v8, %v5906_v20  ;;  %14169 = vst [vmem:[#allocation130_spill] sm:$0xff] %v11889_v53  ;;  %vm5515_vm5 = vcmp.gt.f32.partialorder %v11631_v18, 0.0  ;;  %v11897_v15 = vmul.f32 0.2, %v11852_v61 }
 0x502   :  { %14168 = vst [vmem:[#allocation129_spill] sm:$0xff] %v11886_v23  ;;  %14170 = vst [vmem:[#allocation131_spill] sm:$0xff] %v11892_v5  ;;  %v11900_v19 = vmul.f32 0.2, %v11859_v14  ;;  %v4594_v29 = vpop.f32.mrb[242].mxu1  ;;  %vm5532_vm6 = vcmp.gt.f32.partialorder %v11707_v39, 0.0  ;;  %v11928_v16 = vsel %vm5468_vm12, %v11470_v40, %v14172_v36  ;;  %v11934_v53 = vsel %vm5476_vm13, %v11527_v31, %v11583_v62 }
 0x503   :  { %vm5540_vm7 = vcmp.gt.f32.partialorder %v11723_v0, 0.0  ;;  %v11909_v7 = vmul.f32 0.2, %v11865_v22  ;;  %v11912_v12 = vmul.f32 0.2, %v11868_v21  ;;  %v4596_v49 = vpop.f32.mrb[243].mxu1  ;;  %v11943_v27 = vadd.f32 %v4592_v2, %v11191_v33 }
 0x504   :  { %v11918_v8 = vmul.f32 0.2, %v11875_v58  ;;  %v11921_v50 = vmul.f32 0.2, %v11878_v43  ;;  %v14171_v20 = vld [vmem:[#allocation50_spill] sm:$0xff]  ;;  %vm5547_vm11 = vcmp.gt.f32.partialorder %v11767_v17, 0.0  ;;  %v11946_v40 = vadd.f32 %v4594_v29, %v11169_v35 }
 0x505   :  { %4965 = vmatmul.mubr.bf16.gmra.mrb[140].mxu0 %v14171_v20  ;;  %vm5556_vm9 = vcmp.gt.f32.partialorder %v11783_v32, 0.0  ;;  %v11940_v5 = vmul.f32 0.2, %v11884_v48  ;;  %v14173_v36 = vld [vmem:[#allocation53_spill] sm:$0xff]  ;;  %v11952_v62 = vadd.f32 %v4596_v49, %v11191_v33  ;;  %v14174_v23 = vld [vmem:[#allocation94_spill] sm:$0xff]  ;;  %vm5564_vm12 = vcmp.gt.f32.partialorder %v11844_v1, 0.0 }
 0x506   :  { %4974 = vmatprep.mubr.bf16.mxu0 %v14173_v36  ;;  %5311 = vmatmul.mubr.bf16.gmra.mrb[28].mxu1 %v10918_v45  ;;  %v11959_v20 = vsel %vm5467_vm14, %v11465_v4, %v14174_v23  ;;  %v14175_v2 = vld [vmem:[#allocation41_spill] sm:$0xff]  ;;  %v14176_v36 = vld [vmem:[#allocation103_spill] sm:$0xff]  ;;  %vm5571_vm13 = vcmp.gt.f32.partialorder %v11852_v61, 0.0  ;;  %vm5572_vm10 = vcmp.gt.f32.partialorder %v11859_v14, 0.0  ;;  %vm5563_vm14 = vcmp.gt.f32.partialorder %v11786_v28, 0.0 }
 0x507   :  { %v11965_v29 = vsel %vm5475_vm15, %v11480_v10, %v14175_v2  ;;  %v11971_v49 = vsel %vm5484_vm0, %v11545_v38, %v14176_v36  ;;  %v14177_v45 = vld [vmem:[#allocation45_spill] sm:$0xff]  ;;  %v14179_v2 = vld [vmem:[#allocation102_spill] sm:$0xff]  ;;  %v14180_v36 = vld [vmem:[#allocation104_spill] sm:$0xff]  ;;  %vm14182_vm15 = vcmp.gt.f32.partialorder %v11626_v44, 0.0  ;;  %vm14185_vm0 = vcmp.gt.f32.partialorder %v11608_v9, 0.0 }
 0x508   :  { %5320 = vmatprep.mubr.bf16.mxu1 %v14177_v45  ;;  %v14178_v4 = vld [vmem:[#allocation105_spill] sm:$0xff]  ;;  %v11989_v38 = vsel %vm5483_vm1, %v11540_v46, %v14179_v2  ;;  %v11995_v45 = vsel %vm5491_vm2, %v11549_v59, %v14180_v36  ;;  %v4600_v23 = vpop.f32.mrb[244].mxu1  ;;  %v12006_v46 = vsel %vm5500_vm4, %v11612_v3, %v11662_v25  ;;  %v12012_v59 = vsel %vm14182_vm15, %v11626_v44, %v11673_v56 }
 0x509   :  { %v11983_v10 = vsel %vm5492_vm3, %v11603_v34, %v14178_v4  ;;  %14181 = vst [vmem:[#allocation95_spill] sm:$0xff] %v12006_v46  ;;  %14183 = vst [vmem:[#allocation94_spill] sm:$0xff] %v12012_v59  ;;  %v12015_v4 = vadd.f32 %v4600_v23, %v11169_v35  ;;  %v4602_v2 = vpop.f32.mrb[245].mxu1  ;;  %v14184_v34 = vld [vmem:[#allocation106_spill] sm:$0xff]  ;;  %v12029_v3 = vsel %vm5507_vm8, %v11620_v37, %v11665_v51  ;;  %vm5580_vm1 = vcmp.gt.f32.partialorder %v11868_v21, 0.0  ;;  %v14188_v23 = vld [vmem:[#allocation112_spill] sm:$0xff] }
 0x50a   :  { %v12023_v31 = vsel %vm14185_vm0, %v11608_v9, %v14184_v34  ;;  %14187 = vst [vmem:[#allocation103_spill] sm:$0xff] %v12029_v3  ;;  %vm5588_vm2 = vcmp.gt.f32.partialorder %v11878_v43, 0.0  ;;  %v12034_v25 = vadd.f32 %v4602_v2, %v11191_v33  ;;  %v4604_v44 = vpop.f32.mrb[246].mxu1  ;;  %vm14189_vm3 = vcmp.gt.f32.partialorder %v11635_v11, 0.0  ;;  %v14197_v46 = vld [vmem:[#allocation44_spill] sm:$0xff]  ;;  %v14201_v59 = vld [vmem:[#allocation119_spill] sm:$0xff] }
 0x50b   :  { %14186 = vst [vmem:[#allocation41_spill] sm:$0xff] %v12023_v31  ;;  %v12042_v9 = vsel %vm14189_vm3, %v11635_v11, %v14188_v23  ;;  %vm14191_vm4 = vcmp.gt.f32.partialorder %v11687_v24, 0.0  ;;  %v12051_v51 = vmul.f32 0.2, %v11943_v27  ;;  %v12054_v34 = vmul.f32 0.2, %v11946_v40 }
 0x50c   :  { %14190 = vst [vmem:[#allocation45_spill] sm:$0xff] %v12042_v9  ;;  %v12048_v37 = vsel %vm14191_vm4, %v11687_v24, %v11746_v6  ;;  %v12057_v2 = vadd.f32 %v4604_v44, %v11169_v35  ;;  %v4606_v56 = vpop.f32.mrb[247].mxu1  ;;  %vm5579_vm8 = vcmp.gt.f32.partialorder %v11865_v22, 0.0  ;;  %vm5596_vm0 = vcmp.gt.f32.partialorder %v11943_v27, 0.0  ;;  %v14193_v23 = vld [vmem:[#allocation52_spill] sm:$0xff]  ;;  %v14195_v31 = vld [vmem:[#allocation111_spill] sm:$0xff] }
 0x50d   :  { %14192 = vst [vmem:[#allocation105_spill] sm:$0xff] %v12048_v37  ;;  %v12066_v24 = vmul.f32 0.2, %v11952_v62  ;;  %v12069_v6 = vmul.f32 0.2, %v12015_v4  ;;  %v12072_v44 = vadd.f32 %v4606_v56, %v11191_v33  ;;  %4975 = vmatmul.mubr.bf16.gmra.mrb[144].mxu0 %v14193_v23  ;;  %v14194_v37 = vld [vmem:[#allocation55_spill] sm:$0xff]  ;;  %v12088_v56 = vsel %vm5515_vm5, %v11631_v18, %v14195_v31 }
 0x50e   :  { %v9575_v11 = vld [vmem:[#allocation11 + $0x304] ss:$8 sps:$4 sm:$0xff]   ;;  %v12078_v36 = vmul.f32 0.2, %v12034_v25  ;;  %v12081_v9 = vmul.f32 0.2, %v12057_v2  ;;  %4984 = vmatprep.mubr.bf16.mxu0 %v14194_v37  ;;  %5321 = vmatmul.mubr.bf16.gmra.mrb[32].mxu1 %v14197_v46  ;;  %v12105_v18 = vsel %vm5532_vm6, %v11707_v39, %v11757_v55 }
 0x50f   :  { %vm14196_vm4 = vcmp.gt.f32.partialorder %v11683_v41, 0.0  ;;  %vm5612_vm15 = vcmp.gt.f32.partialorder %v12034_v25, 0.0  ;;  %vm5620_vm3 = vcmp.gt.f32.partialorder %v12072_v44, 0.0  ;;  %8542 = vmatprep.subr.bf16.mxu1 %v9575_v11  ;;  %14198 = vst [vmem:[#allocation102_spill] sm:$0xff] %v12105_v18  ;;  %v14199_v31 = vld [vmem:[#allocation121_spill] sm:$0xff]  ;;  %vm5611_vm5 = vcmp.gt.f32.partialorder %v12015_v4, 0.0 }
 0x510   :  { %v12094_v3 = vsel %vm14196_vm4, %v11683_v41, %v11743_v30  ;;  %v12111_v41 = vsel %vm5540_vm7, %v11723_v0, %v14199_v31  ;;  %v14200_v30 = vld [vmem:[#allocation47_spill] sm:$0xff]  ;;  %vm14202_vm6 = vcmp.gt.f32.partialorder %v11691_v42, 0.0  ;;  %v14203_v55 = vld [vmem:[#allocation120_spill] sm:$0xff]  ;;  %vm14204_vm7 = vcmp.gt.f32.partialorder %v11712_v60, 0.0  ;;  %v9578_v11 = vld [vmem:[#allocation11 + $0x314] ss:$8 sps:$4 sm:$0xff]  }
 0x511   :  { %5330 = vmatprep.mubr.bf16.mxu1 %v14200_v30  ;;  %v9573_v46 = vld [vmem:[#allocation11 + $0x300] ss:$8 sps:$4 sm:$0xff]   ;;  %v12122_v39 = vsel %vm14202_vm6, %v11691_v42, %v14201_v59  ;;  %v12128_v0 = vsel %vm14204_vm7, %v11712_v60, %v14203_v55  ;;  %vm14205_vm4 = vcmp.gt.f32.partialorder %v11773_v57, 0.0  ;;  %v4610_v30 = vpop.f32.mrb[248].mxu1  ;;  %v12142_v42 = vsel %vm5556_vm9, %v11783_v32, %v11834_v54  ;;  %v9576_v32 = vld [vmem:[#allocation11 + $0x310] ss:$8 sps:$4 sm:$0xff]  }
 0x512   :  { %v12134_v31 = vsel %vm14205_vm4, %v11773_v57, %v11828_v47  ;;  %v12148_v60 = vsel %vm5547_vm11, %v11767_v17, %v11817_v13  ;;  %vm14206_vm4 = vcmp.gt.f32.partialorder %v11779_v52, 0.0  ;;  %v5876_v47 = vmul.f32 0.2, %v12072_v44  ;;  %v4612_v55 = vpop.f32.mrb[249].mxu1  ;;  %8558 = vmatpush1.bf16.msra.mxu1 %v9573_v46  ;;  %v14211_v54 = vld [vmem:[#allocation46_spill] sm:$0xff] }
 0x513   :  { %v12154_v57 = vsel %vm14206_vm4, %v11779_v52, %v11831_v26  ;;  %v12158_v59 = vadd.f32 %v4610_v30, %v11169_v35  ;;  %v8695_v13 = vadd.f32 %v4612_v55, %v11191_v33  ;;  %v4614_v18 = vpop.f32.mrb[250].mxu1  ;;  %8543 = vmatprep.subr.bf16.mxu1 %v9578_v11  ;;  %v12169_v52 = vsel %vm5564_vm12, %v11844_v1, %v11872_v63  ;;  %v14207_v63 = vld [vmem:[#allocation128_spill] sm:$0xff]  ;;  %v14210_v1 = vld [vmem:[#allocation57_spill] sm:$0xff] }
 0x514   :  { %v12175_v26 = vsel %vm5572_vm10, %v11859_v14, %v11900_v19  ;;  %v12181_v46 = vsel %vm5571_vm13, %v11852_v61, %v11897_v15  ;;  %v12185_v11 = vadd.f32 %v4614_v18, %v11169_v35  ;;  %v4616_v30 = vpop.f32.mrb[251].mxu1  ;;  %v12193_v14 = vsel %vm5563_vm14, %v11786_v28, %v14207_v63  ;;  %v14209_v15 = vld [vmem:[#allocation54_spill] sm:$0xff]  ;;  %v9584_v18 = vld [vmem:[#allocation11 + $0x324] ss:$8 sps:$4 sm:$0xff]  }
 0x515   :  { %vm5627_vm11 = vcmp.gt.f32.partialorder %v12158_v59, 0.0  ;;  %14208 = vst [vmem:[#allocation104_spill] sm:$0xff] %v12193_v14  ;;  %v12196_v19 = vmul.f32 0.2, %v12158_v59  ;;  %vm5628_vm9 = vcmp.gt.f32.partialorder %v8695_v13, 0.0  ;;  %v8697_v61 = vadd.f32 %v4616_v30, %v11191_v33  ;;  %4985 = vmatmul.mubr.bf16.gmra.mrb[148].mxu0 %v14209_v15  ;;  %v14212_v14 = vld [vmem:[#allocation49_spill] sm:$0xff] }
 0x516   :  { %v5884_v17 = vmul.f32 0.2, %v8695_v13  ;;  %vm5635_vm10 = vcmp.gt.f32.partialorder %v12185_v11, 0.0  ;;  %4994 = vmatprep.mubr.bf16.mxu0 %v14210_v1  ;;  %8559 = vmatpush1.bf16.msra.mxu1 %v9576_v32  ;;  %v12208_v28 = vsel %vm5580_vm1, %v11868_v21, %v11912_v12  ;;  %v12214_v30 = vsel %vm5588_vm2, %v11878_v43, %v11921_v50  ;;  %v9582_v21 = vld [vmem:[#allocation11 + $0x320] ss:$8 sps:$4 sm:$0xff]  }
 0x517   :  { %v5891_v63 = vmul.f32 0.2, %v12185_v11  ;;  %vm5636_vm12 = vcmp.gt.f32.partialorder %v8697_v61, 0.0  ;;  %v5892_v55 = vmul.f32 0.2, %v8697_v61  ;;  %5331 = vmatmul.mubr.bf16.gmra.mrb[36].mxu1 %v14211_v54  ;;  %8544 = vmatprep.subr.bf16.mxu1 %v9584_v18  ;;  %v12225_v12 = vsel %vm5579_vm8, %v11865_v22, %v11909_v7 }
 0x518   :  { %5340 = vmatprep.mubr.bf16.mxu1 %v14212_v14  ;;  %vm14213_vm13 = vcmp.gt.f32.partialorder %v11875_v58, 0.0  ;;  %v12237_v50 = vsel %vm5596_vm0, %v11943_v27, %v12051_v51  ;;  %vm14215_vm14 = vcmp.gt.f32.partialorder %v11952_v62, 0.0  ;;  %v4620_v22 = vpop.f32.mrb[252].mxu1  ;;  %v9587_v7 = vld [vmem:[#allocation11 + $0x334] ss:$8 sps:$4 sm:$0xff]   ;;  %vm14217_vm1 = vcmp.gt.f32.partialorder %v11884_v48, 0.0 }
 0x519   :  { %v12231_v43 = vsel %vm14213_vm13, %v11875_v58, %v11918_v8  ;;  %14214 = vst [vmem:[#allocation106_spill] sm:$0xff] %v12237_v50  ;;  %v12243_v54 = vsel %vm14215_vm14, %v11952_v62, %v12066_v24  ;;  %v12253_v27 = vsel %vm14217_vm1, %v11884_v48, %v11940_v5  ;;  %vm14219_vm2 = vcmp.gt.f32.partialorder %v11946_v40, 0.0  ;;  %v4622_v51 = vpop.f32.mrb[253].mxu1  ;;  %v9585_v24 = vld [vmem:[#allocation11 + $0x330] ss:$8 sps:$4 sm:$0xff]  }
 0x51a   :  { %14216 = vst [vmem:[#allocation112_spill] sm:$0xff] %v12243_v54  ;;  %14218 = vst [vmem:[#allocation52_spill] sm:$0xff] %v12253_v27  ;;  %v12259_v8 = vsel %vm14219_vm2, %v11946_v40, %v12054_v34  ;;  %v8698_v62 = vadd.f32 %v4620_v22, %v11169_v35  ;;  %8560 = vmatpush1.bf16.msra.mxu1 %v9582_v21  ;;  %v12268_v5 = vsel %vm5612_vm15, %v12034_v25, %v12078_v36  ;;  %v4624_v34 = vpop.f32.mrb[254].mxu1  ;;  %v9593_v18 = vld [vmem:[#allocation11 + $0x344] ss:$8 sps:$4 sm:$0xff]  }
 0x51b   :  { %14220 = vst [vmem:[#allocation55_spill] sm:$0xff] %v12259_v8  ;;  %14221 = vst [vmem:[#allocation111_spill] sm:$0xff] %v12268_v5  ;;  %v12273_v48 = vsel %vm5620_vm3, %v12072_v44, %v5876_v47  ;;  %v8699_v40 = vadd.f32 %v4622_v51, %v11191_v33  ;;  %8545 = vmatprep.subr.bf16.mxu1 %v9587_v7  ;;  %v12282_v22 = vsel %vm5611_vm5, %v12015_v4, %v12069_v6  ;;  %v4626_v47 = vpop.f32.mrb[255].mxu1  ;;  %v14227_v6 = vld [vmem:[#allocation56_spill] sm:$0xff]  ;;  %v9603_v7 = vld [vmem:[#allocation11 + $0x370] ss:$8 sps:$4 sm:$0xff]  }
 0x51c   :  { %14222 = vst [vmem:[#allocation44_spill] sm:$0xff] %v12273_v48  ;;  %14223 = vst [vmem:[#allocation121_spill] sm:$0xff] %v12282_v22  ;;  %vm14224_vm8 = vcmp.gt.f32.partialorder %v12057_v2, 0.0  ;;  %v5899_v25 = vmul.f32 0.2, %v8698_v62  ;;  %v8700_v44 = vadd.f32 %v4624_v34, %v11169_v35  ;;  %v12294_v51 = vsel %vm5628_vm9, %v8695_v13, %v5884_v17  ;;  %v14230_v34 = vld [vmem:[#allocation48_spill] sm:$0xff] }
 0x51d   :  { %v12288_v36 = vsel %vm14224_vm8, %v12057_v2, %v12081_v9  ;;  %14226 = vst [vmem:[#allocation119_spill] sm:$0xff] %v12294_v51  ;;  %vm5643_vm15 = vcmp.gt.f32.partialorder %v8698_v62, 0.0  ;;  %v5900_v21 = vmul.f32 0.2, %v8699_v40  ;;  %v8701_v4 = vadd.f32 %v4626_v47, %v11191_v33  ;;  %4995 = vmatmul.mubr.bf16.gmra.mrb[152].mxu0 %v14227_v6  ;;  %v14229_v2 = vld [vmem:[#allocation59_spill] sm:$0xff]  ;;  %v14238_v47 = vld [vmem:[#allocation58_spill] sm:$0xff] }
 0x51e   :  { %14225 = vst [vmem:[#allocation47_spill] sm:$0xff] %v12288_v36  ;;  %v12299_v9 = vsel %vm5636_vm12, %v8697_v61, %v5892_v55  ;;  %vm5644_vm0 = vcmp.gt.f32.partialorder %v8699_v40, 0.0  ;;  %vm5651_vm3 = vcmp.gt.f32.partialorder %v8700_v44, 0.0  ;;  %v5907_v35 = vmul.f32 0.2, %v8700_v44  ;;  %5004 = vmatprep.mubr.bf16.mxu0 %v14229_v2  ;;  %8561 = vmatpush1.bf16.msra.mxu1 %v9585_v24  ;;  %v14233_v55 = vld [vmem:[#allocation51_spill] sm:$0xff] }
 0x51f   :  { %14228 = vst [vmem:[#allocation120_spill] sm:$0xff] %v12299_v9  ;;  %vm5652_vm5 = vcmp.gt.f32.partialorder %v8701_v4, 0.0  ;;  %v5908_v13 = vmul.f32 0.2, %v8701_v4  ;;  %5341 = vmatmul.mubr.bf16.gmra.mrb[40].mxu1 %v14230_v34  ;;  %8546 = vmatprep.subr.bf16.mxu1 %v9593_v18  ;;  %v12309_v33 = vsel %vm5627_vm11, %v12158_v59, %v12196_v19  ;;  %v12314_v61 = vsel %vm5635_vm10, %v12185_v11, %v5891_v63  ;;  %v9591_v24 = vld [vmem:[#allocation11 + $0x340] ss:$8 sps:$4 sm:$0xff]  }
 0x520   :  { %14231 = vst [vmem:[#allocation128_spill] sm:$0xff] %v12309_v33  ;;  %14232 = vst [vmem:[#allocation54_spill] sm:$0xff] %v12314_v61  ;;  %5350 = vmatprep.mubr.bf16.mxu1 %v14233_v55  ;;  %v12320_v34 = vsel %vm5643_vm15, %v8698_v62, %v5899_v25  ;;  %v12322_v18 = vsel %vm5651_vm3, %v8700_v44, %v5907_v35  ;;  %v9596_v17 = vld [vmem:[#allocation11 + $0x354] ss:$8 sps:$4 sm:$0xff]   ;;  %v12325_v59 = vsel %vm5644_vm0, %v8699_v40, %v5900_v21  ;;  %v9594_v63 = vld [vmem:[#allocation11 + $0x350] ss:$8 sps:$4 sm:$0xff]  }
 0x521   :  { %14234 = vst [vmem:[#allocation57_spill] sm:$0xff] %v12320_v34  ;;  %14235 = vst [vmem:[#allocation46_spill] sm:$0xff] %v12322_v18  ;;  %v12327_v19 = vsel %vm5652_vm5, %v8701_v4, %v5908_v13  ;;  %v14239_v62 = vld [vmem:[#allocation26_spill] sm:$0xff]  ;;  %v14240_v25 = vld [vmem:[#allocation23_spill] sm:$0xff]  ;;  %v14413_v50 = vpack.c.bf16 %v11983_v10, %v11971_v49 }
 0x522   :  { %14236 = vst [vmem:[#allocation49_spill] sm:$0xff] %v12325_v59  ;;  %14237 = vst [vmem:[#allocation56_spill] sm:$0xff] %v12327_v19  ;;  %8562 = vmatpush1.bf16.msra.mxu1 %v9591_v24  ;;  %v14241_v44 = vpack.c.bf16 %v14239_v62, %v14240_v25  ;;  %v14242_v40 = vld [vmem:[#allocation50_spill] sm:$0xff]  ;;  %v14243_v21 = vld [vmem:[#allocation53_spill] sm:$0xff] }
 0x523   :  { %8547 = vmatprep.subr.bf16.mxu1 %v9596_v17  ;;  %v9602_v4 = vld [vmem:[#allocation11 + $0x364] ss:$8 sps:$4 sm:$0xff]   ;;  %v9600_v35 = vld [vmem:[#allocation11 + $0x360] ss:$8 sps:$4 sm:$0xff]   ;;  %v9539_v24 = vld [vmem:[#allocation11 + $0x114] ss:$8 sps:$4 sm:$0xff]  }
 0x524   :  { %v9534_v13 = vld [vmem:[#allocation11 + $0x100] ss:$8 sps:$4 sm:$0xff]   ;;  %v14245_v55 = vld [vmem:[#allocation22_spill] sm:$0xff]  ;;  %v14247_v62 = vld [vmem:[#allocation61_spill] sm:$0xff] }
 0x525   :  { %5005 = vmatmul.mubr.bf16.gmra.mrb[156].mxu0 %v14238_v47  ;;  %v14244_v11 = vld [vmem:[#allocation24_spill] sm:$0xff]  ;;  %v9605_v58 = vld [vmem:[#allocation11 + $0x374] ss:$8 sps:$4 sm:$0xff]   ;;  %v9615_v33 = vld [vmem:[#allocation11 + $0x210] ss:$8 sps:$4 sm:$0xff]  }
 0x526   :  { %7109 = vmatprep.mubr.bf16.mxu0 %v14241_v44  ;;  %8563 = vmatpush1.bf16.msra.mxu1 %v9594_v63  ;;  %v14246_v17 = vpack.c.bf16 %v14244_v11, %v14245_v55  ;;  %v14248_v25 = vld [vmem:[#allocation60_spill] sm:$0xff]  ;;  %v9537_v44 = vld [vmem:[#allocation11 + $0x110] ss:$8 sps:$4 sm:$0xff]   ;;  %v9545_v55 = vld [vmem:[#allocation11 + $0x134] ss:$8 sps:$4 sm:$0xff]  }
 0x527   :  { %5351 = vmatmul.mubr.bf16.gmra.mrb[44].mxu1 %v14242_v40  ;;  %8548 = vmatprep.subr.bf16.mxu1 %v9602_v4  ;;  %v14249_v63 = vpack.c.bf16 %v14247_v62, %v14248_v25  ;;  %v9542_v40 = vld [vmem:[#allocation11 + $0x124] ss:$8 sps:$4 sm:$0xff]   ;;  %v9540_v11 = vld [vmem:[#allocation11 + $0x120] ss:$8 sps:$4 sm:$0xff]   ;;  %v9612_v62 = vld [vmem:[#allocation11 + $0x390] ss:$8 sps:$4 sm:$0xff]  }
 0x528   :  { %5360 = vmatprep.mubr.bf16.mxu1 %v14243_v21  ;;  %v9609_v21 = vld [vmem:[#allocation11 + $0x380] ss:$8 sps:$4 sm:$0xff]   ;;  %v9611_v4 = vld [vmem:[#allocation11 + $0x384] ss:$8 sps:$4 sm:$0xff]   ;;  %v14254_v25 = vld [vmem:[#allocation62_spill] sm:$0xff] }
 0x529   :  { %v9626_v51 = vld [vmem:[#allocation11 + $0x224] ss:$8 sps:$4 sm:$0xff]  }
 0x52a   :  { %8564 = vmatpush1.bf16.msra.mxu1 %v9600_v35  ;;  %v14250_v35 = vld [vmem:[#allocation28_spill] sm:$0xff] }
 0x52b   :  { %8549 = vmatprep.subr.bf16.mxu1 %v9605_v58  ;;  %v9548_v58 = vld [vmem:[#allocation11 + $0x144] ss:$8 sps:$4 sm:$0xff]  }
 0x52c   :  { %v9662_v49 = vld [vmem:[#allocation11 + $0x2a4] ss:$8 sps:$4 sm:$0xff]  }
 0x52d   :  { %7110 = vmatmul.mubr.bf16.vlgmr.msra.gmra.mrb[160].mxu0 %v14246_v17 }
 0x52e   :  { %7271 = vmatpush1.bf16.msra.mxu0 %v9534_v13  ;;  %7119 = vmatprep.mubr.bf16.mxu0 %v14249_v63  ;;  %v14251_v13 = vld [vmem:[#allocation25_spill] sm:$0xff] }
 0x52f   :  { %5361 = vmatmul.mubr.bf16.gmra.mrb[48].mxu1 %v14193_v23  ;;  %7272 = vmatprep.subr.bf16.mxu0 %v9539_v24  ;;  %v14252_v17 = vpack.c.bf16 %v14250_v35, %v14251_v13  ;;  %v9614_v23 = vld [vmem:[#allocation11 + $0x394] ss:$8 sps:$4 sm:$0xff]   ;;  %v14253_v24 = vld [vmem:[#allocation63_spill] sm:$0xff] }
 0x530   :  { %5370 = vmatprep.mubr.bf16.mxu1 %v14194_v37  ;;  %8565 = vmatpush1.bf16.msra.mxu1 %v9603_v7  ;;  %v14255_v63 = vpack.c.bf16 %v14253_v24, %v14254_v25  ;;  %v9543_v37 = vld [vmem:[#allocation11 + $0x130] ss:$8 sps:$4 sm:$0xff]   ;;  %v9546_v7 = vld [vmem:[#allocation11 + $0x140] ss:$8 sps:$4 sm:$0xff]   ;;  %v9557_v25 = vld [vmem:[#allocation11 + $0x174] ss:$8 sps:$4 sm:$0xff]  }
 0x531   :  { %8550 = vmatprep.subr.bf16.mxu1 %v9611_v4  ;;  %v14256_v4 = vld [vmem:[#allocation30_spill] sm:$0xff]  ;;  %v14257_v35 = vld [vmem:[#allocation27_spill] sm:$0xff] }
 0x532   :  { %7273 = vmatpush1.bf16.msra.mxu0 %v9537_v44  ;;  %v9551_v44 = vld [vmem:[#allocation11 + $0x154] ss:$8 sps:$4 sm:$0xff]   ;;  %v14258_v13 = vpack.c.bf16 %v14256_v4, %v14257_v35  ;;  %v9552_v24 = vld [vmem:[#allocation11 + $0x160] ss:$8 sps:$4 sm:$0xff]  }
 0x533   :  { %7274 = vmatprep.subr.bf16.mxu0 %v9542_v40  ;;  %v9620_v40 = vld [vmem:[#allocation11 + $0x3a4] ss:$8 sps:$4 sm:$0xff]   ;;  %v9632_v35 = vld [vmem:[#allocation11 + $0x3d4] ss:$8 sps:$4 sm:$0xff]  }
 0x534   :  { %8566 = vmatpush1.bf16.msra.mxu1 %v9609_v21  ;;  %v9618_v21 = vld [vmem:[#allocation11 + $0x3a0] ss:$8 sps:$4 sm:$0xff]  }
 0x535   :  { %7120 = vmatmul.mubr.bf16.gmra.mrb[164].mxu0 %v14252_v17  ;;  %8551 = vmatprep.subr.bf16.mxu1 %v9614_v23  ;;  %v14259_v17 = vld [vmem:[#allocation65_spill] sm:$0xff] }
 0x536   :  { %7129 = vmatprep.mubr.bf16.mxu0 %v14255_v63  ;;  %7275 = vmatpush1.bf16.msra.mxu0 %v9540_v11  ;;  %v9623_v11 = vld [vmem:[#allocation11 + $0x3b4] ss:$8 sps:$4 sm:$0xff]   ;;  %v9621_v23 = vld [vmem:[#allocation11 + $0x3b0] ss:$8 sps:$4 sm:$0xff]   ;;  %v9629_v63 = vld [vmem:[#allocation11 + $0x3c4] ss:$8 sps:$4 sm:$0xff]  }
 0x537   :  { %5371 = vmatmul.mubr.bf16.gmra.mrb[52].mxu1 %v14209_v15  ;;  %7276 = vmatprep.subr.bf16.mxu0 %v9545_v55  ;;  %v14260_v15 = vld [vmem:[#allocation64_spill] sm:$0xff] }
 0x538   :  { %5380 = vmatprep.mubr.bf16.mxu1 %v14210_v1  ;;  %8567 = vmatpush1.bf16.msra.mxu1 %v9612_v62  ;;  %v14261_v55 = vpack.c.bf16 %v14259_v17, %v14260_v15  ;;  %v9549_v1 = vld [vmem:[#allocation11 + $0x150] ss:$8 sps:$4 sm:$0xff]   ;;  %v9554_v62 = vld [vmem:[#allocation11 + $0x164] ss:$8 sps:$4 sm:$0xff]   ;;  %v9563_v17 = vld [vmem:[#allocation11 + $0x194] ss:$8 sps:$4 sm:$0xff]  }
 0x539   :  { %8552 = vmatprep.subr.bf16.mxu1 %v9620_v40  ;;  %v14263_v40 = vld [vmem:[#allocation29_spill] sm:$0xff]  ;;  %v9636_v15 = vld [vmem:[#allocation11 + $0x3e0] ss:$8 sps:$4 sm:$0xff]  }
 0x53a   :  { %7277 = vmatpush1.bf16.msra.mxu0 %v9543_v37  ;;  %v9627_v37 = vld [vmem:[#allocation11 + $0x3c0] ss:$8 sps:$4 sm:$0xff]  }
 0x53b   :  { %7278 = vmatprep.subr.bf16.mxu0 %v9548_v58  ;;  %v14262_v58 = vld [vmem:[#allocation32_spill] sm:$0xff] }
 0x53c   :  { %8568 = vmatpush1.bf16.msra.mxu1 %v9618_v21  ;;  %v9560_v21 = vld [vmem:[#allocation11 + $0x184] ss:$8 sps:$4 sm:$0xff]  }
 0x53d   :  { %7130 = vmatmul.mubr.bf16.gmra.mrb[168].mxu0 %v14258_v13  ;;  %8553 = vmatprep.subr.bf16.mxu1 %v9623_v11  ;;  %v9630_v13 = vld [vmem:[#allocation11 + $0x3d0] ss:$8 sps:$4 sm:$0xff]   ;;  %v9558_v11 = vld [vmem:[#allocation11 + $0x180] ss:$8 sps:$4 sm:$0xff]  }
 0x53e   :  { %7139 = vmatprep.mubr.bf16.mxu0 %v14261_v55  ;;  %7279 = vmatpush1.bf16.msra.mxu0 %v9546_v7  ;;  %v14264_v7 = vpack.c.bf16 %v14262_v58, %v14263_v40  ;;  %v14268_v55 = vld [vmem:[#allocation34_spill] sm:$0xff] }
 0x53f   :  { %5381 = vmatmul.mubr.bf16.gmra.mrb[56].mxu1 %v14227_v6  ;;  %7280 = vmatprep.subr.bf16.mxu0 %v9551_v44  ;;  %v14265_v6 = vld [vmem:[#allocation69_spill] sm:$0xff]  ;;  %v14266_v44 = vld [vmem:[#allocation68_spill] sm:$0xff] }
 0x540   :  { %5390 = vmatprep.mubr.bf16.mxu1 %v14229_v2  ;;  %8569 = vmatpush1.bf16.msra.mxu1 %v9621_v23  ;;  %v14267_v4 = vpack.c.bf16 %v14265_v6, %v14266_v44  ;;  %v9555_v2 = vld [vmem:[#allocation11 + $0x170] ss:$8 sps:$4 sm:$0xff]   ;;  %v9638_v23 = vld [vmem:[#allocation11 + $0x3e4] ss:$8 sps:$4 sm:$0xff]   ;;  %v9641_v58 = vld [vmem:[#allocation11 + $0x3f4] ss:$8 sps:$4 sm:$0xff]  }
 0x541   :  { %8554 = vmatprep.subr.bf16.mxu1 %v9629_v63  ;;  %v14272_v63 = vld [vmem:[#allocation72_spill] sm:$0xff]  ;;  %v9639_v40 = vld [vmem:[#allocation11 + $0x3f0] ss:$8 sps:$4 sm:$0xff]   ;;  %v9569_v6 = vld [vmem:[#allocation11 + $0x1b4] ss:$8 sps:$4 sm:$0xff]  }
 0x542   :  { %7281 = vmatpush1.bf16.msra.mxu0 %v9549_v1  ;;  %v14269_v1 = vld [vmem:[#allocation31_spill] sm:$0xff] }
 0x543   :  { %7282 = vmatprep.subr.bf16.mxu0 %v9554_v62  ;;  %v14270_v62 = vpack.c.bf16 %v14268_v55, %v14269_v1  ;;  %v14274_v44 = vld [vmem:[#allocation35_spill] sm:$0xff]  ;;  %v9581_v55 = vld [vmem:[#allocation11 + $0x1d4] ss:$8 sps:$4 sm:$0xff]  }
 0x544   :  { %8570 = vmatpush1.bf16.msra.mxu1 %v9627_v37  ;;  %v9566_v37 = vld [vmem:[#allocation11 + $0x1a4] ss:$8 sps:$4 sm:$0xff]   ;;  %v14280_v1 = vld [vmem:[#allocation74_spill] sm:$0xff] }
 0x545   :  { %7140 = vmatmul.mubr.bf16.gmra.mrb[172].mxu0 %v14264_v7  ;;  %8555 = vmatprep.subr.bf16.mxu1 %v9632_v35  ;;  %v9564_v7 = vld [vmem:[#allocation11 + $0x1a0] ss:$8 sps:$4 sm:$0xff]  }
 0x546   :  { %7149 = vmatprep.mubr.bf16.mxu0 %v14267_v4  ;;  %7283 = vmatpush1.bf16.msra.mxu0 %v9552_v24  ;;  %v14271_v24 = vld [vmem:[#allocation73_spill] sm:$0xff]  ;;  %v14278_v35 = vld [vmem:[#allocation75_spill] sm:$0xff] }
 0x547   :  { %5391 = vmatmul.mubr.bf16.gmra.mrb[60].mxu1 %v14238_v47  ;;  %7284 = vmatprep.subr.bf16.mxu0 %v9557_v25  ;;  %v14273_v47 = vpack.c.bf16 %v14271_v24, %v14272_v63  ;;  %v9561_v25 = vld [vmem:[#allocation11 + $0x190] ss:$8 sps:$4 sm:$0xff]   ;;  %v14283_v24 = vld [vmem:[#allocation80_spill] sm:$0xff]  ;;  %v14284_v63 = vld [vmem:[#allocation79_spill] sm:$0xff] }
 0x548   :  { %8571 = vmatpush1.bf16.msra.mxu1 %v9630_v13  ;;  %v14275_v4 = vld [vmem:[#allocation33_spill] sm:$0xff] }
 0x549   :  { %8556 = vmatprep.subr.bf16.mxu1 %v9638_v23 }
 0x54a   :  { %7285 = vmatpush1.bf16.msra.mxu0 %v9555_v2  ;;  %v14276_v2 = vpack.c.bf16 %v14274_v44, %v14275_v4  ;;  %v14289_v4 = vld [vmem:[#allocation86_spill] sm:$0xff] }
 0x54b   :  { %7286 = vmatprep.subr.bf16.mxu0 %v9560_v21  ;;  %v14277_v21 = vld [vmem:[#allocation76_spill] sm:$0xff] }
 0x54c   :  { %8572 = vmatpush1.bf16.msra.mxu1 %v9636_v15  ;;  %v14279_v13 = vpack.c.bf16 %v14277_v21, %v14278_v35  ;;  %v9570_v15 = vld [vmem:[#allocation11 + $0x1c0] ss:$8 sps:$4 sm:$0xff]   ;;  %v9597_v35 = vld [vmem:[#allocation11 + $0x1f0] ss:$8 sps:$4 sm:$0xff]  }
 0x54d   :  { %7150 = vmatmul.mubr.bf16.gmra.mrb[176].mxu0 %v14270_v62  ;;  %8557 = vmatprep.subr.bf16.mxu1 %v9641_v58  ;;  %v14281_v62 = vld [vmem:[#allocation37_spill] sm:$0xff]  ;;  %v9588_v58 = vld [vmem:[#allocation11 + $0x1e0] ss:$8 sps:$4 sm:$0xff]  }
 0x54e   :  { %7159 = vmatprep.mubr.bf16.mxu0 %v14273_v47  ;;  %7287 = vmatpush1.bf16.msra.mxu0 %v9558_v11  ;;  %v9567_v11 = vld [vmem:[#allocation11 + $0x1b0] ss:$8 sps:$4 sm:$0xff]   ;;  %v14282_v23 = vpack.c.bf16 %v14280_v1, %v14281_v62  ;;  %v14285_v47 = vpack.c.bf16 %v14283_v24, %v14284_v63  ;;  %v14296_v1 = vld [vmem:[#allocation88_spill] sm:$0xff] }
 0x54f   :  { %7288 = vmatprep.subr.bf16.mxu0 %v9563_v17  ;;  %v9572_v17 = vld [vmem:[#allocation11 + $0x1c4] ss:$8 sps:$4 sm:$0xff]  }
 0x550   :  { %8573 = vmatpush1.bf16.msra.mxu1 %v9639_v40  ;;  %v9599_v40 = vld [vmem:[#allocation11 + $0x1f4] ss:$8 sps:$4 sm:$0xff]   ;;  %v14299_v24 = vld [vmem:[#allocation40_spill] sm:$0xff] }
 0x552   :  { %7289 = vmatpush1.bf16.msra.mxu0 %v9561_v25  ;;  %v9579_v25 = vld [vmem:[#allocation11 + $0x1d0] ss:$8 sps:$4 sm:$0xff]  }
 0x553   :  { %7290 = vmatprep.subr.bf16.mxu0 %v9566_v37  ;;  %v9590_v37 = vld [vmem:[#allocation11 + $0x1e4] ss:$8 sps:$4 sm:$0xff]  }
 0x555   :  { %7160 = vmatmul.mubr.bf16.gmra.mrb[180].mxu0 %v14276_v2  ;;  %v14290_v2 = vld [vmem:[#allocation85_spill] sm:$0xff] }
 0x556   :  { %7169 = vmatprep.mubr.bf16.mxu0 %v14279_v13  ;;  %7291 = vmatpush1.bf16.msra.mxu0 %v9564_v7  ;;  %v14286_v7 = vld [vmem:[#allocation78_spill] sm:$0xff]  ;;  %v14291_v21 = vpack.c.bf16 %v14289_v4, %v14290_v2  ;;  %v9608_v13 = vld [vmem:[#allocation11 + $0x204] ss:$8 sps:$4 sm:$0xff]  }
 0x557   :  { %7292 = vmatprep.subr.bf16.mxu0 %v9569_v6  ;;  %v14287_v6 = vld [vmem:[#allocation77_spill] sm:$0xff]  ;;  %v12414_v2 = vld [vmem:[%s13750_s8] sm:$0xff] }
 0x558   :  { %v14288_v44 = vpack.c.bf16 %v14286_v7, %v14287_v6  ;;  %v14305_v6 = vld [vmem:[#allocation91_spill] sm:$0xff] }
 0x55a   :  { %7293 = vmatpush1.bf16.msra.mxu0 %v9567_v11  ;;  %v14292_v11 = vld [vmem:[#allocation82_spill] sm:$0xff] }
 0x55b   :  { %7294 = vmatprep.subr.bf16.mxu0 %v9572_v17  ;;  %v14293_v17 = vld [vmem:[#allocation81_spill] sm:$0xff] }
 0x55d   :  { %7170 = vmatmul.mubr.bf16.gmra.mrb[184].mxu0 %v14282_v23  ;;  %v14298_v23 = vld [vmem:[#allocation87_spill] sm:$0xff] }
 0x55e   :  { %7179 = vmatprep.mubr.bf16.mxu0 %v14285_v47  ;;  %7295 = vmatpush1.bf16.msra.mxu0 %v9570_v15  ;;  %v14294_v15 = vpack.c.bf16 %v14292_v11, %v14293_v17  ;;  %v14300_v63 = vpack.c.bf16 %v14298_v23, %v14299_v24  ;;  %v14301_v47 = vld [vmem:[#allocation93_spill] sm:$0xff] }
 0x55f   :  { %7296 = vmatprep.subr.bf16.mxu0 %v9581_v55  ;;  %v14295_v55 = vld [vmem:[#allocation89_spill] sm:$0xff] }
 0x560   :  { %v14297_v62 = vpack.c.bf16 %v14295_v55, %v14296_v1 }
 0x562   :  { %7297 = vmatpush1.bf16.msra.mxu0 %v9579_v25  ;;  %v14302_v25 = vld [vmem:[#allocation92_spill] sm:$0xff] }
 0x563   :  { %7298 = vmatprep.subr.bf16.mxu0 %v9590_v37  ;;  %v14303_v37 = vpack.c.bf16 %v14301_v47, %v14302_v25 }
 0x565   :  { %7180 = vmatmul.mubr.bf16.gmra.mrb[188].mxu0 %v14288_v44  ;;  %v14306_v44 = vld [vmem:[#allocation90_spill] sm:$0xff] }
 0x566   :  { %7189 = vmatprep.mubr.bf16.mxu0 %v14291_v21  ;;  %7299 = vmatpush1.bf16.msra.mxu0 %v9588_v58  ;;  %v14304_v58 = vld [vmem:[#allocation19_spill] sm:$0xff]  ;;  %v14307_v4 = vpack.c.bf16 %v14305_v6, %v14306_v44  ;;  %v14312_v6 = vld [vmem:[#allocation96_spill] sm:$0xff] }
 0x567   :  { %7300 = vmatprep.subr.bf16.mxu0 %v9599_v40  ;;  %v2555_v40 = vsub.s32 4, %v14304_v58  ;;  %v2559_v7 = vsub.s32 5, %v14304_v58 }
 0x569   :  { %v12417_v21 = vrot.slane %v12414_v2, %v2555_v40  ;;  %v12423_v17 = vrot.slane %v12414_v2, %v2559_v7  ;;  %v14311_v7 = vld [vmem:[#allocation97_spill] sm:$0xff] }
 0x56a   :  { %7301 = vmatpush1.bf16.msra.mxu0 %v9597_v35  ;;  %v14308_v35 = vld [vmem:[#allocation101_spill] sm:$0xff]  ;;  %v14313_v44 = vpack.c.bf16 %v14311_v7, %v14312_v6 }
 0x56b   :  { %7463 = vmatprep.subr.bf16.mxu0 %v9608_v13  ;;  %v14309_v13 = vld [vmem:[#allocation100_spill] sm:$0xff] }
 0x56c   :  { %v14310_v11 = vpack.c.bf16 %v14308_v35, %v14309_v13  ;;  %v14314_v35 = vld [vmem:[#allocation110_spill] sm:$0xff]  ;;  %v14315_v13 = vld [vmem:[#allocation109_spill] sm:$0xff] }
 0x56d   :  { %7190 = vmatmul.mubr.bf16.gmra.mrb[192].mxu0 %v14294_v15 }
 0x56e   :  { %7199 = vmatprep.mubr.bf16.mxu0 %v14297_v62 }
 0x575   :  { %7200 = vmatmul.mubr.bf16.gmra.mrb[196].mxu0 %v14300_v63 }
 0x576   :  { %7209 = vmatprep.mubr.bf16.mxu0 %v14303_v37 }
 0x57d   :  { %7210 = vmatmul.mubr.bf16.gmra.mrb[200].mxu0 %v14307_v4 }
 0x57e   :  { %7219 = vmatprep.mubr.bf16.mxu0 %v14310_v11  ;;  %v14316_v11 = vpack.c.bf16 %v14314_v35, %v14315_v13 }
 0x57f   :  { %v4856_v15 = vpop.f32.mrb[96].mxu0 }
 0x580   :  { %v8702_v55 = vadd.f32 %v4856_v15, %v12417_v21  ;;  %v4858_v1 = vpop.f32.mrb[97].mxu0 }
 0x581   :  { %v8703_v62 = vadd.f32 %v4858_v1, %v12423_v17  ;;  %v4860_v23 = vpop.f32.mrb[98].mxu0 }
 0x582   :  { %v5661_v24 = vmul.f32 0.2, %v8702_v55  ;;  %v8704_v63 = vadd.f32 %v4860_v23, %v12417_v21  ;;  %v4862_v47 = vpop.f32.mrb[99].mxu0  ;;  %vm5405_vm6 = vcmp.gt.f32.partialorder %v8702_v55, 0.0  ;;  %v14324_v23 = vld [vmem:[#allocation118_spill] sm:$0xff] }
 0x583   :  { %v5662_v25 = vmul.f32 0.2, %v8703_v62  ;;  %v8705_v37 = vadd.f32 %v4862_v47, %v12423_v17  ;;  %vm5406_vm7 = vcmp.gt.f32.partialorder %v8703_v62, 0.0 }
 0x584   :  { %vm5413_vm4 = vcmp.gt.f32.partialorder %v8704_v63, 0.0  ;;  %v5669_v40 = vmul.f32 0.2, %v8704_v63  ;;  %v12435_v15 = vsel %vm5405_vm6, %v8702_v55, %v5661_v24 }
 0x585   :  { %7220 = vmatmul.mubr.bf16.gmra.mrb[204].mxu0 %v14313_v44  ;;  %vm5414_vm11 = vcmp.gt.f32.partialorder %v8705_v37, 0.0  ;;  %v5670_v4 = vmul.f32 0.2, %v8705_v37  ;;  %14317 = vst [vmem:[#allocation59_spill] sm:$0xff] %v12435_v15  ;;  %v12441_v14 = vsel %vm5406_vm7, %v8703_v62, %v5662_v25 }
 0x586   :  { %7229 = vmatprep.mubr.bf16.mxu0 %v14316_v11  ;;  %v12437_v1 = vsel %vm5413_vm4, %v8704_v63, %v5669_v40  ;;  %14319 = vst [vmem:[#allocation51_spill] sm:$0xff] %v12441_v14 }
 0x587   :  { %14318 = vst [vmem:[#allocation48_spill] sm:$0xff] %v12437_v1  ;;  %v4866_v47 = vpop.f32.mrb[100].mxu0  ;;  %v12443_v32 = vsel %vm5414_vm11, %v8705_v37, %v5670_v4  ;;  %v14321_v37 = vld [vmem:[#allocation108_spill] sm:$0xff]  ;;  %v14322_v4 = vld [vmem:[#allocation107_spill] sm:$0xff] }
 0x588   :  { %14320 = vst [vmem:[#allocation58_spill] sm:$0xff] %v12443_v32  ;;  %v8706_v7 = vadd.f32 %v4866_v47, %v12417_v21  ;;  %v4868_v6 = vpop.f32.mrb[101].mxu0  ;;  %v14323_v11 = vpack.c.bf16 %v14321_v37, %v14322_v4  ;;  %v14334_v32 = vld [vmem:[#allocation127_spill] sm:$0xff] }
 0x589   :  { %v8707_v35 = vadd.f32 %v4868_v6, %v12423_v17  ;;  %v4870_v55 = vpop.f32.mrb[102].mxu0  ;;  %v14325_v6 = vld [vmem:[#allocation117_spill] sm:$0xff] }
 0x58a   :  { %v5677_v24 = vmul.f32 0.2, %v8706_v7  ;;  %v8708_v63 = vadd.f32 %v4870_v55, %v12417_v21  ;;  %v4872_v40 = vpop.f32.mrb[103].mxu0  ;;  %vm5421_vm9 = vcmp.gt.f32.partialorder %v8706_v7, 0.0  ;;  %v14326_v44 = vpack.c.bf16 %v14324_v23, %v14325_v6 }
 0x58b   :  { %v5678_v13 = vmul.f32 0.2, %v8707_v35  ;;  %v8709_v62 = vadd.f32 %v4872_v40, %v12423_v17  ;;  %vm5422_vm10 = vcmp.gt.f32.partialorder %v8707_v35, 0.0 }
 0x58c   :  { %vm5429_vm12 = vcmp.gt.f32.partialorder %v8708_v63, 0.0  ;;  %v5685_v25 = vmul.f32 0.2, %v8708_v63  ;;  %v12457_v15 = vsel %vm5421_vm9, %v8706_v7, %v5677_v24 }
 0x58d   :  { %7230 = vmatmul.mubr.bf16.gmra.mrb[208].mxu0 %v14323_v11  ;;  %vm5430_vm13 = vcmp.gt.f32.partialorder %v8709_v62, 0.0  ;;  %v5686_v47 = vmul.f32 0.2, %v8709_v62  ;;  %14327 = vst [vmem:[#allocation26_spill] sm:$0xff] %v12457_v15  ;;  %v12461_v14 = vsel %vm5422_vm10, %v8707_v35, %v5678_v13 }
 0x58e   :  { %7239 = vmatprep.mubr.bf16.mxu0 %v14326_v44  ;;  %v12459_v55 = vsel %vm5429_vm12, %v8708_v63, %v5685_v25  ;;  %14329 = vst [vmem:[#allocation50_spill] sm:$0xff] %v12461_v14  ;;  %v14331_v25 = vld [vmem:[#allocation116_spill] sm:$0xff] }
 0x58f   :  { %14328 = vst [vmem:[#allocation23_spill] sm:$0xff] %v12459_v55  ;;  %v4876_v1 = vpop.f32.mrb[104].mxu0  ;;  %v12463_v40 = vsel %vm5430_vm13, %v8709_v62, %v5686_v47 }
 0x590   :  { %14330 = vst [vmem:[#allocation53_spill] sm:$0xff] %v12463_v40  ;;  %v8710_v37 = vadd.f32 %v4876_v1, %v12417_v21  ;;  %v4878_v4 = vpop.f32.mrb[105].mxu0  ;;  %v14332_v1 = vld [vmem:[#allocation115_spill] sm:$0xff]  ;;  %v14344_v40 = vld [vmem:[#allocation129_spill] sm:$0xff] }
 0x591   :  { %v8711_v23 = vadd.f32 %v4878_v4, %v12423_v17  ;;  %v4880_v7 = vpop.f32.mrb[106].mxu0  ;;  %v14333_v47 = vpack.c.bf16 %v14331_v25, %v14332_v1  ;;  %v14335_v4 = vld [vmem:[#allocation126_spill] sm:$0xff] }
 0x592   :  { %v5693_v44 = vmul.f32 0.2, %v8710_v37  ;;  %v8712_v24 = vadd.f32 %v4880_v7, %v12417_v21  ;;  %v4882_v63 = vpop.f32.mrb[107].mxu0  ;;  %vm5437_vm14 = vcmp.gt.f32.partialorder %v8710_v37, 0.0  ;;  %v14336_v11 = vpack.c.bf16 %v14334_v32, %v14335_v4 }
 0x593   :  { %v5694_v35 = vmul.f32 0.2, %v8711_v23  ;;  %v8713_v13 = vadd.f32 %v4882_v63, %v12423_v17  ;;  %vm5438_vm1 = vcmp.gt.f32.partialorder %v8711_v23, 0.0 }
 0x594   :  { %vm5445_vm2 = vcmp.gt.f32.partialorder %v8712_v24, 0.0  ;;  %v5701_v62 = vmul.f32 0.2, %v8712_v24  ;;  %v12479_v15 = vsel %vm5437_vm14, %v8710_v37, %v5693_v44 }
 0x595   :  { %7240 = vmatmul.mubr.bf16.gmra.mrb[212].mxu0 %v14333_v47  ;;  %vm5446_vm8 = vcmp.gt.f32.partialorder %v8713_v13, 0.0  ;;  %v5702_v6 = vmul.f32 0.2, %v8713_v13  ;;  %14337 = vst [vmem:[#allocation24_spill] sm:$0xff] %v12479_v15  ;;  %v12483_v14 = vsel %vm5438_vm1, %v8711_v23, %v5694_v35  ;;  %v2563_v23 = vsub.s32 6, %v14304_v58  ;;  %v14345_v47 = vld [vmem:[#allocation43_spill] sm:$0xff] }
 0x596   :  { %7249 = vmatprep.mubr.bf16.mxu0 %v14336_v11  ;;  %v12481_v7 = vsel %vm5445_vm2, %v8712_v24, %v5701_v62  ;;  %14339 = vst [vmem:[#allocation61_spill] sm:$0xff] %v12483_v14  ;;  %v14341_v62 = vld [vmem:[#allocation123_spill] sm:$0xff]  ;;  %v14346_v15 = vpack.c.bf16 %v14344_v40, %v14345_v47 }
 0x597   :  { %14338 = vst [vmem:[#allocation22_spill] sm:$0xff] %v12481_v7  ;;  %v4886_v55 = vpop.f32.mrb[108].mxu0  ;;  %v12485_v63 = vsel %vm5446_vm8, %v8713_v13, %v5702_v6  ;;  %v14342_v6 = vld [vmem:[#allocation122_spill] sm:$0xff]  ;;  %v12504_v7 = vrot.slane %v12414_v2, %v2563_v23 }
 0x598   :  { %14340 = vst [vmem:[#allocation60_spill] sm:$0xff] %v12485_v63  ;;  %v8714_v25 = vadd.f32 %v4886_v55, %v12417_v21  ;;  %v4888_v1 = vpop.f32.mrb[109].mxu0  ;;  %v14343_v4 = vpack.c.bf16 %v14341_v62, %v14342_v6  ;;  %v14351_v6 = vld [vmem:[#allocation131_spill] sm:$0xff] }
 0x599   :  { %v8715_v32 = vadd.f32 %v4888_v1, %v12423_v17  ;;  %v4890_v37 = vpop.f32.mrb[110].mxu0 }
 0x59a   :  { %v5709_v11 = vmul.f32 0.2, %v8714_v25  ;;  %v8716_v44 = vadd.f32 %v4890_v37, %v12417_v21  ;;  %v4892_v24 = vpop.f32.mrb[111].mxu0  ;;  %vm5453_vm15 = vcmp.gt.f32.partialorder %v8714_v25, 0.0  ;;  %v2567_v37 = vsub.s32 7, %v14304_v58  ;;  %v14352_v58 = vld [vmem:[#allocation130_spill] sm:$0xff] }
 0x59b   :  { %v5710_v35 = vmul.f32 0.2, %v8715_v32  ;;  %v8717_v13 = vadd.f32 %v4892_v24, %v12423_v17  ;;  %vm5454_vm0 = vcmp.gt.f32.partialorder %v8715_v32, 0.0 }
 0x59c   :  { %vm5461_vm3 = vcmp.gt.f32.partialorder %v8716_v44, 0.0  ;;  %v5717_v55 = vmul.f32 0.2, %v8716_v44  ;;  %v12506_v14 = vsel %vm5453_vm15, %v8714_v25, %v5709_v11 }
 0x59d   :  { %7250 = vmatmul.mubr.bf16.gmra.mrb[216].mxu0 %v14343_v4  ;;  %vm5462_vm5 = vcmp.gt.f32.partialorder %v8717_v13, 0.0  ;;  %v5718_v1 = vmul.f32 0.2, %v8717_v13  ;;  %14347 = vst [vmem:[#allocation28_spill] sm:$0xff] %v12506_v14  ;;  %v12510_v34 = vsel %vm5454_vm0, %v8715_v32, %v5710_v35  ;;  %v14353_v14 = vpack.c.bf16 %v14351_v6, %v14352_v58 }
 0x59e   :  { %7259 = vmatprep.mubr.bf16.mxu0 %v14346_v15  ;;  %v12508_v24 = vsel %vm5461_vm3, %v8716_v44, %v5717_v55  ;;  %14349 = vst [vmem:[#allocation63_spill] sm:$0xff] %v12510_v34  ;;  %v12521_v44 = vrot.slane %v12414_v2, %v2567_v37 }
 0x59f   :  { %14348 = vst [vmem:[#allocation25_spill] sm:$0xff] %v12508_v24  ;;  %v4896_v63 = vpop.f32.mrb[112].mxu0  ;;  %v12512_v62 = vsel %vm5462_vm5, %v8717_v13, %v5718_v1 }
 0x5a0   :  { %14350 = vst [vmem:[#allocation62_spill] sm:$0xff] %v12512_v62  ;;  %v8718_v40 = vadd.f32 %v4896_v63, %v12417_v21  ;;  %v4898_v15 = vpop.f32.mrb[113].mxu0 }
 0x5a1   :  { %v8719_v47 = vadd.f32 %v4898_v15, %v12423_v17  ;;  %v5242_v25 = vpop.f32.mrb[0].mxu1  ;;  %v4900_v11 = vpop.f32.mrb[114].mxu0 }
 0x5a2   :  { %v8766_v32 = vadd.f32 %v5242_v25, %v12504_v7  ;;  %v8720_v23 = vadd.f32 %v4900_v11, %v12417_v21  ;;  %v5244_v35 = vpop.f32.mrb[1].mxu1  ;;  %v4902_v13 = vpop.f32.mrb[115].mxu0  ;;  %v5725_v55 = vmul.f32 0.2, %v8718_v40  ;;  %vm5469_vm7 = vcmp.gt.f32.partialorder %v8718_v40, 0.0  ;;  %v14354_v25 = vld [vmem:[#allocation71_spill] sm:$0xff] }
 0x5a3   :  { %vm5470_vm6 = vcmp.gt.f32.partialorder %v8719_v47, 0.0  ;;  %v5726_v63 = vmul.f32 0.2, %v8719_v47  ;;  %v8721_v4 = vadd.f32 %v4902_v13, %v12423_v17  ;;  %v5246_v1 = vpop.f32.mrb[2].mxu1  ;;  %v8767_v2 = vadd.f32 %v5244_v35, %v12521_v44  ;;  %v14355_v11 = vld [vmem:[#allocation70_spill] sm:$0xff] }
 0x5a4   :  { %vm5477_vm4 = vcmp.gt.f32.partialorder %v8720_v23, 0.0  ;;  %v5733_v15 = vmul.f32 0.2, %v8720_v23  ;;  %v14356_v24 = vpack.c.bf16 %v14354_v25, %v14355_v11  ;;  %vm5407_vm9 = vcmp.gt.f32.partialorder %v8766_v32, 0.0  ;;  %v5248_v62 = vpop.f32.mrb[3].mxu1 }
 0x5a5   :  { %7260 = vmatmul.mubr.bf16.gmra.mrb[220].mxu0 %v14353_v14  ;;  %vm5478_vm11 = vcmp.gt.f32.partialorder %v8721_v4, 0.0  ;;  %v5734_v37 = vmul.f32 0.2, %v8721_v4  ;;  %v5663_v34 = vmul.f32 0.2, %v8766_v32  ;;  %v8768_v13 = vadd.f32 %v5246_v1, %v12504_v7 }
 0x5a6   :  { %7302 = vmatprep.mubr.bf16.mxu0 %v14356_v24  ;;  %v12535_v18 = vsel %vm5470_vm6, %v8719_v47, %v5726_v63  ;;  %v8769_v59 = vadd.f32 %v5248_v62, %v12521_v44  ;;  %v12541_v58 = vsel %vm5469_vm7, %v8718_v40, %v5725_v55  ;;  %v12544_v35 = vsel %vm5477_vm4, %v8720_v23, %v5733_v15  ;;  %v14366_v47 = vld [vmem:[#allocation36_spill] sm:$0xff] }
 0x5a7   :  { %14357 = vst [vmem:[#allocation30_spill] sm:$0xff] %v12535_v18  ;;  %v4906_v6 = vpop.f32.mrb[116].mxu0  ;;  %v12538_v14 = vsel %vm5478_vm11, %v8721_v4, %v5734_v37  ;;  %14359 = vst [vmem:[#allocation65_spill] sm:$0xff] %v12541_v58  ;;  %vm5415_vm10 = vcmp.gt.f32.partialorder %v8768_v13, 0.0  ;;  %v5671_v24 = vmul.f32 0.2, %v8768_v13  ;;  %v12555_v23 = vsel %vm5407_vm9, %v8766_v32, %v5663_v34 }
 0x5a8   :  { %14358 = vst [vmem:[#allocation27_spill] sm:$0xff] %v12538_v14  ;;  %14360 = vst [vmem:[#allocation64_spill] sm:$0xff] %v12544_v35  ;;  %v8722_v25 = vadd.f32 %v4906_v6, %v12417_v21  ;;  %v4908_v1 = vpop.f32.mrb[117].mxu0  ;;  %v9606_v37 = vld [vmem:[#allocation11 + $0x200] ss:$8 sps:$4 sm:$0xff]   ;;  %vm5408_vm12 = vcmp.gt.f32.partialorder %v8767_v2, 0.0 }
 0x5a9   :  { %v8723_v63 = vadd.f32 %v4908_v1, %v12423_v17  ;;  %v12550_v62 = vpop.f32.mrb[4].mxu1  ;;  %v4910_v4 = vpop.f32.mrb[118].mxu0  ;;  %14361 = vst [vmem:[#allocation32_spill] sm:$0xff] %v12555_v23  ;;  %v12557_v55 = vsel %vm5415_vm10, %v8768_v13, %v5671_v24  ;;  %v9617_v6 = vld [vmem:[#allocation11 + $0x214] ss:$8 sps:$4 sm:$0xff]   ;;  %v14363_v13 = vld [vmem:[#allocation67_spill] sm:$0xff] }
 0x5aa   :  { %14362 = vst [vmem:[#allocation29_spill] sm:$0xff] %v12557_v55  ;;  %v5254_v15 = vpop.f32.mrb[5].mxu1  ;;  %v4912_v11 = vpop.f32.mrb[119].mxu0  ;;  %v5664_v19 = vmul.f32 0.2, %v8767_v2  ;;  %v8724_v18 = vadd.f32 %v4910_v4, %v12417_v21  ;;  %v14364_v24 = vld [vmem:[#allocation66_spill] sm:$0xff] }
 0x5ab   :  { %v5672_v1 = vmul.f32 0.2, %v8769_v59  ;;  %v5256_v14 = vpop.f32.mrb[6].mxu1  ;;  %v5741_v61 = vmul.f32 0.2, %v8722_v25  ;;  %v8725_v34 = vadd.f32 %v4912_v11, %v12423_v17  ;;  %v14365_v58 = vpack.c.bf16 %v14363_v13, %v14364_v24  ;;  %v14367_v23 = vld [vmem:[#allocation38_spill] sm:$0xff] }
 0x5ac   :  { %v5742_v40 = vmul.f32 0.2, %v8723_v63  ;;  %v5258_v32 = vpop.f32.mrb[7].mxu1  ;;  %vm5485_vm13 = vcmp.gt.f32.partialorder %v8722_v25, 0.0  ;;  %vm5486_vm14 = vcmp.gt.f32.partialorder %v8723_v63, 0.0  ;;  %vm5493_vm1 = vcmp.gt.f32.partialorder %v8724_v18, 0.0 }
 0x5ad   :  { %7303 = vmatmul.mubr.bf16.vlgmr.msra.gmra.mrb[160].mxu0 %v14365_v58  ;;  %v5749_v35 = vmul.f32 0.2, %v8724_v18  ;;  %v14368_v4 = vpack.c.bf16 %v14366_v47, %v14367_v23  ;;  %vm5416_vm2 = vcmp.gt.f32.partialorder %v8769_v59, 0.0  ;;  %vm5494_vm8 = vcmp.gt.f32.partialorder %v8725_v34, 0.0 }
 0x5ae   :  { %7464 = vmatpush1.bf16.msra.mxu0 %v9606_v37  ;;  %v5750_v55 = vmul.f32 0.2, %v8725_v34  ;;  %v8771_v11 = vadd.f32 %v5254_v15, %v12521_v44  ;;  %v8773_v9 = vadd.f32 %v5258_v32, %v12521_v44  ;;  %v12572_v58 = vsel %vm5408_vm12, %v8767_v2, %v5664_v19  ;;  %v9624_v32 = vld [vmem:[#allocation11 + $0x220] ss:$8 sps:$4 sm:$0xff]  }
 0x5af   :  { %7312 = vmatprep.mubr.bf16.mxu0 %v14368_v4  ;;  %7465 = vmatprep.subr.bf16.mxu0 %v9617_v6  ;;  %14369 = vst [vmem:[#allocation69_spill] sm:$0xff] %v12572_v58  ;;  %v4916_v13 = vpop.f32.mrb[120].mxu0  ;;  %v12574_v24 = vsel %vm5486_vm14, %v8723_v63, %v5742_v40  ;;  %v12579_v47 = vsel %vm5485_vm13, %v8722_v25, %v5741_v61  ;;  %v14379_v58 = vld [vmem:[#allocation42_spill] sm:$0xff] }
 0x5b0   :  { %14370 = vst [vmem:[#allocation68_spill] sm:$0xff] %v12574_v24  ;;  %v12576_v37 = vsel %vm5494_vm8, %v8725_v34, %v5750_v55  ;;  %14372 = vst [vmem:[#allocation31_spill] sm:$0xff] %v12579_v47  ;;  %v12582_v23 = vsel %vm5493_vm1, %v8724_v18, %v5749_v35  ;;  %v8726_v6 = vadd.f32 %v4916_v13, %v12417_v21  ;;  %v4918_v4 = vpop.f32.mrb[121].mxu0  ;;  %v9635_v18 = vld [vmem:[#allocation11 + $0x234] ss:$8 sps:$4 sm:$0xff]   ;;  %vm5432_vm15 = vcmp.gt.f32.partialorder %v8773_v9, 0.0 }
 0x5b1   :  { %14371 = vst [vmem:[#allocation34_spill] sm:$0xff] %v12576_v37  ;;  %14373 = vst [vmem:[#allocation73_spill] sm:$0xff] %v12582_v23  ;;  %v12585_v15 = vpop.f32.mrb[8].mxu1  ;;  %v12592_v63 = vsel %vm5416_vm2, %v8769_v59, %v5672_v1  ;;  %v4920_v61 = vpop.f32.mrb[122].mxu0  ;;  %v5688_v40 = vmul.f32 0.2, %v8773_v9  ;;  %v8727_v2 = vadd.f32 %v4918_v4, %v12423_v17 }
 0x5b2   :  { %7466 = vmatpush1.bf16.msra.mxu0 %v9615_v33  ;;  %14374 = vst [vmem:[#allocation72_spill] sm:$0xff] %v12592_v63  ;;  %v12594_v25 = vpop.f32.mrb[9].mxu1  ;;  %v8728_v33 = vadd.f32 %v4920_v61, %v12417_v21  ;;  %v4922_v55 = vpop.f32.mrb[123].mxu0  ;;  %v5757_v13 = vmul.f32 0.2, %v8726_v6  ;;  %v14375_v59 = vld [vmem:[#allocation84_spill] sm:$0xff] }
 0x5b3   :  { %7467 = vmatprep.subr.bf16.mxu0 %v9626_v51  ;;  %v12599_v34 = vpop.f32.mrb[10].mxu1  ;;  %v14376_v1 = vld [vmem:[#allocation83_spill] sm:$0xff]  ;;  %v9633_v47 = vld [vmem:[#allocation11 + $0x230] ss:$8 sps:$4 sm:$0xff]   ;;  %v5680_v51 = vmul.f32 0.2, %v8771_v11  ;;  %v8729_v61 = vadd.f32 %v4922_v55, %v12423_v17  ;;  %v12617_v22 = vsel %vm5432_vm15, %v8773_v9, %v5688_v40 }
 0x5b4   :  { %v14377_v19 = vpack.c.bf16 %v14375_v59, %v14376_v1  ;;  %vm5501_vm0 = vcmp.gt.f32.partialorder %v8726_v6, 0.0  ;;  %vm5509_vm3 = vcmp.gt.f32.partialorder %v8728_v33, 0.0  ;;  %v5765_v23 = vmul.f32 0.2, %v8728_v33  ;;  %v14378_v35 = vld [vmem:[#allocation39_spill] sm:$0xff]  ;;  %v12609_v24 = vpop.f32.mrb[11].mxu1 }
 0x5b5   :  { %v14380_v63 = vpack.c.bf16 %v14378_v35, %v14379_v58  ;;  %vm5424_vm5 = vcmp.gt.f32.partialorder %v8771_v11, 0.0  ;;  %v9644_v4 = vld [vmem:[#allocation11 + $0x244] ss:$8 sps:$4 sm:$0xff]   ;;  %v8772_v59 = vadd.f32 %v5256_v14, %v12504_v7  ;;  %14382 = vst [vmem:[#allocation33_spill] sm:$0xff] %v12617_v22  ;;  %v5758_v58 = vmul.f32 0.2, %v8727_v2 }
 0x5b6   :  { %7313 = vmatmul.mubr.bf16.gmra.mrb[164].mxu0 %v14377_v19  ;;  %v8770_v19 = vadd.f32 %v12550_v62, %v12504_v7  ;;  %v12614_v37 = vsel %vm5509_vm3, %v8728_v33, %v5765_v23  ;;  %vm5510_vm6 = vcmp.gt.f32.partialorder %v8729_v61, 0.0  ;;  %vm5502_vm7 = vcmp.gt.f32.partialorder %v8727_v2, 0.0  ;;  %v9642_v14 = vld [vmem:[#allocation11 + $0x240] ss:$8 sps:$4 sm:$0xff]   ;;  %v9647_v33 = vld [vmem:[#allocation11 + $0x254] ss:$8 sps:$4 sm:$0xff]  }
 0x5b7   :  { %7322 = vmatprep.mubr.bf16.mxu0 %v14380_v63  ;;  %7468 = vmatpush1.bf16.msra.mxu0 %v9624_v32  ;;  %v4926_v1 = vpop.f32.mrb[124].mxu0  ;;  %14381 = vst [vmem:[#allocation35_spill] sm:$0xff] %v12614_v37  ;;  %v5766_v32 = vmul.f32 0.2, %v8729_v61  ;;  %v12620_v63 = vsel %vm5501_vm0, %v8726_v6, %v5757_v13  ;;  %v12628_v9 = vsel %vm5424_vm5, %v8771_v11, %v5680_v51  ;;  %v5687_v13 = vmul.f32 0.2, %v8772_v59 }
 0x5b8   :  { %7469 = vmatprep.subr.bf16.mxu0 %v9635_v18  ;;  %14383 = vst [vmem:[#allocation76_spill] sm:$0xff] %v12620_v63  ;;  %v8730_v18 = vadd.f32 %v4926_v1, %v12417_v21  ;;  %v4928_v35 = vpop.f32.mrb[125].mxu0  ;;  %14384 = vst [vmem:[#allocation75_spill] sm:$0xff] %v12628_v9  ;;  %v5679_v62 = vmul.f32 0.2, %v8770_v19  ;;  %vm5431_vm4 = vcmp.gt.f32.partialorder %v8772_v59, 0.0 }
 0x5b9   :  { %v12623_v55 = vpop.f32.mrb[12].mxu1  ;;  %v4930_v23 = vpop.f32.mrb[126].mxu0  ;;  %v14386_v51 = vld [vmem:[#allocation99_spill] sm:$0xff]  ;;  %v14387_v63 = vld [vmem:[#allocation98_spill] sm:$0xff]  ;;  %v8731_v6 = vadd.f32 %v4928_v35, %v12423_v17  ;;  %v14390_v9 = vld [vmem:[#allocation113_spill] sm:$0xff]  ;;  %vm5423_vm10 = vcmp.gt.f32.partialorder %v8770_v19, 0.0  ;;  %v12656_v35 = vsel %vm5431_vm4, %v8772_v59, %v5687_v13 }
 0x5ba   :  { %v5274_v40 = vpop.f32.mrb[13].mxu1  ;;  %v8732_v1 = vadd.f32 %v4930_v23, %v12417_v21  ;;  %v4932_v36 = vpop.f32.mrb[127].mxu0  ;;  %v5773_v11 = vmul.f32 0.2, %v8730_v18  ;;  %v14388_v37 = vpack.c.bf16 %v14386_v51, %v14387_v63  ;;  %vm5517_vm11 = vcmp.gt.f32.partialorder %v8730_v18, 0.0  ;;  %v14391_v22 = vld [vmem:[#allocation114_spill] sm:$0xff] }
 0x5bb   :  { %7470 = vmatpush1.bf16.msra.mxu0 %v9633_v47  ;;  %v12633_v5 = vpop.f32.mrb[14].mxu1  ;;  %v12636_v47 = vsel %vm5510_vm6, %v8729_v61, %v5766_v32  ;;  %v14392_v48 = vpack.c.bf16 %v14390_v9, %v14391_v22  ;;  %v9645_v61 = vld [vmem:[#allocation11 + $0x250] ss:$8 sps:$4 sm:$0xff]   ;;  %v8733_v32 = vadd.f32 %v4932_v36, %v12423_v17  ;;  %14394 = vst [vmem:[#allocation79_spill] sm:$0xff] %v12656_v35  ;;  %v9648_v51 = vld [vmem:[#allocation11 + $0x260] ss:$8 sps:$4 sm:$0xff]  }
 0x5bc   :  { %7471 = vmatprep.subr.bf16.mxu0 %v9644_v4  ;;  %14385 = vst [vmem:[#allocation74_spill] sm:$0xff] %v12636_v47  ;;  %v12642_v4 = vsel %vm5502_vm7, %v8727_v2, %v5758_v58  ;;  %vm5525_vm9 = vcmp.gt.f32.partialorder %v8732_v1, 0.0  ;;  %v5781_v23 = vmul.f32 0.2, %v8732_v1  ;;  %v12649_v27 = vpop.f32.mrb[15].mxu1  ;;  %v12663_v36 = vsel %vm5517_vm11, %v8730_v18, %v5773_v11 }
 0x5bd   :  { %14389 = vst [vmem:[#allocation37_spill] sm:$0xff] %v12642_v4  ;;  %vm5526_vm12 = vcmp.gt.f32.partialorder %v8733_v32, 0.0  ;;  %v5782_v22 = vmul.f32 0.2, %v8733_v32  ;;  %14396 = vst [vmem:[#allocation77_spill] sm:$0xff] %v12663_v36  ;;  %v12668_v59 = vsel %vm5423_vm10, %v8770_v19, %v5679_v62  ;;  %vm5518_vm13 = vcmp.gt.f32.partialorder %v8731_v6, 0.0 }
 0x5be   :  { %7323 = vmatmul.mubr.bf16.gmra.mrb[168].mxu0 %v14388_v37  ;;  %v9650_v37 = vld [vmem:[#allocation11 + $0x264] ss:$8 sps:$4 sm:$0xff]   ;;  %v12653_v63 = vsel %vm5525_vm9, %v8732_v1, %v5781_v23  ;;  %14397 = vst [vmem:[#allocation86_spill] sm:$0xff] %v12668_v59  ;;  %v9653_v2 = vld [vmem:[#allocation11 + $0x274] ss:$8 sps:$4 sm:$0xff]   ;;  %v12675_v11 = vadd.f32 %v12594_v25, %v12521_v44  ;;  %v12689_v18 = vadd.f32 %v12599_v34, %v12504_v7 }
 0x5bf   :  { %7332 = vmatprep.mubr.bf16.mxu0 %v14392_v48  ;;  %7472 = vmatpush1.bf16.msra.mxu0 %v9642_v14  ;;  %v4936_v58 = vpop.f32.mrb[128].mxu0  ;;  %14393 = vst [vmem:[#allocation80_spill] sm:$0xff] %v12653_v63  ;;  %v12660_v48 = vadd.f32 %v12585_v15, %v12504_v7  ;;  %v5774_v14 = vmul.f32 0.2, %v8731_v6  ;;  %v12693_v25 = vadd.f32 %v12609_v24, %v12521_v44  ;;  %v14403_v59 = vld [vmem:[#allocation124_spill] sm:$0xff] }
 0x5c0   :  { %7473 = vmatprep.subr.bf16.mxu0 %v9647_v33  ;;  %v4938_v9 = vpop.f32.mrb[129].mxu0  ;;  %14400 = vst [vmem:[#allocation81_spill] sm:$0xff] %v12689_v18  ;;  %v14407_v34 = vpack.c.bf16 %v11934_v53, %v11928_v16  ;;  %v9651_v24 = vld [vmem:[#allocation11 + $0x270] ss:$8 sps:$4 sm:$0xff]   ;;  %v8734_v63 = vadd.f32 %v4936_v58, %v12417_v21 }
 0x5c1   :  { %14395 = vst [vmem:[#allocation78_spill] sm:$0xff] %v12660_v48  ;;  %v5282_v33 = vpop.f32.mrb[16].mxu1  ;;  %v4940_v13 = vpop.f32.mrb[130].mxu0  ;;  %14401 = vst [vmem:[#allocation89_spill] sm:$0xff] %v12693_v25 }
 0x5c2   :  { %v8782_v15 = vadd.f32 %v5282_v33, %v12504_v7  ;;  %v5284_v23 = vpop.f32.mrb[17].mxu1  ;;  %v12679_v1 = vadd.f32 %v4940_v13, %v12417_v21  ;;  %v4942_v19 = vpop.f32.mrb[131].mxu0  ;;  %v12682_v33 = vsel %vm5526_vm12, %v8733_v32, %v5782_v22  ;;  %v14402_v13 = vld [vmem:[#allocation125_spill] sm:$0xff]  ;;  %v12701_v32 = vadd.f32 %v12623_v55, %v12504_v7 }
 0x5c3   :  { %7474 = vmatpush1.bf16.msra.mxu0 %v9645_v61  ;;  %v8735_v61 = vadd.f32 %v4938_v9, %v12423_v17  ;;  %v5286_v62 = vpop.f32.mrb[18].mxu1  ;;  %14398 = vst [vmem:[#allocation85_spill] sm:$0xff] %v12682_v33  ;;  %v8783_v9 = vadd.f32 %v5284_v23, %v12521_v44  ;;  %v14404_v35 = vpack.c.bf16 %v14402_v13, %v14403_v59  ;;  %v9656_v13 = vld [vmem:[#allocation11 + $0x284] ss:$8 sps:$4 sm:$0xff]   ;;  %vm5533_vm5 = vcmp.gt.f32.partialorder %v8734_v63, 0.0 }
 0x5c4   :  { %7475 = vmatprep.subr.bf16.mxu0 %v9650_v37  ;;  %v12685_v37 = vmul.f32 0.2, %v12660_v48  ;;  %14405 = vst [vmem:[#allocation88_spill] sm:$0xff] %v12701_v32  ;;  %v12704_v22 = vadd.f32 %v5274_v40, %v12521_v44  ;;  %v5727_v36 = vmul.f32 0.2, %v8782_v15  ;;  %v12710_v23 = vsel %vm5518_vm13, %v8731_v6, %v5774_v14  ;;  %v5288_v55 = vpop.f32.mrb[19].mxu1 }
 0x5c5   :  { %14408 = vst [vmem:[#allocation40_spill] sm:$0xff] %v12710_v23  ;;  %vm5471_vm14 = vcmp.gt.f32.partialorder %v8782_v15, 0.0  ;;  %v8784_v59 = vadd.f32 %v5286_v62, %v12504_v7  ;;  %v5790_v53 = vmul.f32 0.2, %v8735_v61  ;;  %v5797_v16 = vmul.f32 0.2, %v12679_v1 }
 0x5c6   :  { %14399 = vst [vmem:[#allocation82_spill] sm:$0xff] %v12685_v37  ;;  %7333 = vmatmul.mubr.bf16.gmra.mrb[172].mxu0 %v14404_v35  ;;  %14406 = vst [vmem:[#allocation87_spill] sm:$0xff] %v12704_v22  ;;  %v8737_v35 = vadd.f32 %v4942_v19, %v12423_v17  ;;  %v9654_v14 = vld [vmem:[#allocation11 + $0x280] ss:$8 sps:$4 sm:$0xff]   ;;  %vm5534_vm1 = vcmp.gt.f32.partialorder %v8735_v61, 0.0  ;;  %vm5541_vm8 = vcmp.gt.f32.partialorder %v12679_v1, 0.0 }
 0x5c7   :  { %7342 = vmatprep.mubr.bf16.mxu0 %v14407_v34  ;;  %7476 = vmatpush1.bf16.msra.mxu0 %v9648_v51  ;;  %v8785_v51 = vadd.f32 %v5288_v55, %v12521_v44  ;;  %v4946_v6 = vpop.f32.mrb[132].mxu0  ;;  %v5728_v34 = vmul.f32 0.2, %v8783_v9  ;;  %vm5479_vm2 = vcmp.gt.f32.partialorder %v8784_v59, 0.0  ;;  %v5735_v19 = vmul.f32 0.2, %v8784_v59 }
 0x5c8   :  { %7477 = vmatprep.subr.bf16.mxu0 %v9653_v2  ;;  %v9659_v62 = vld [vmem:[#allocation11 + $0x294] ss:$8 sps:$4 sm:$0xff]   ;;  %v12720_v2 = vsel %vm5471_vm14, %v8782_v15, %v5727_v36  ;;  %vm5472_vm15 = vcmp.gt.f32.partialorder %v8783_v9, 0.0  ;;  %v5798_v40 = vmul.f32 0.2, %v8737_v35  ;;  %v4948_v58 = vpop.f32.mrb[133].mxu0  ;;  %v12730_v36 = vadd.f32 %v12633_v5, %v12504_v7 }
 0x5c9   :  { %v5292_v23 = vpop.f32.mrb[20].mxu1  ;;  %vm5542_vm0 = vcmp.gt.f32.partialorder %v8737_v35, 0.0  ;;  %v12723_v33 = vsel %vm5479_vm2, %v8784_v59, %v5735_v19  ;;  %v5736_v55 = vmul.f32 0.2, %v8785_v51  ;;  %v12726_v47 = vpop.f32.mrb[134].mxu0  ;;  %vm5480_vm3 = vcmp.gt.f32.partialorder %v8785_v51, 0.0 }
 0x5ca   :  { %v8786_v4 = vadd.f32 %v5292_v23, %v12504_v7  ;;  %v5294_v37 = vpop.f32.mrb[21].mxu1  ;;  %14409 = vst [vmem:[#allocation93_spill] sm:$0xff] %v12730_v36  ;;  %v5789_v15 = vmul.f32 0.2, %v8734_v63  ;;  %v6207_v8 = vpack.c.bf16 %v12723_v33, %v12720_v2  ;;  %v12736_v59 = vadd.f32 %v12649_v27, %v12521_v44  ;;  %v9657_v27 = vld [vmem:[#allocation11 + $0x290] ss:$8 sps:$4 sm:$0xff]  }
 0x5cb   :  { %7478 = vmatpush1.bf16.msra.mxu0 %v9651_v24  ;;  %v4952_v24 = vpop.f32.mrb[135].mxu0  ;;  %v5296_v48 = vpop.f32.mrb[22].mxu1  ;;  %v5984_v23 = vsel %vm5472_vm15, %v8783_v9, %v5728_v34  ;;  %v12743_v5 = vsel %vm5534_vm1, %v8735_v61, %v5790_v53  ;;  %v8787_v33 = vadd.f32 %v5294_v37, %v12521_v44  ;;  %v12750_v54 = vsel %vm5542_vm0, %v8737_v35, %v5798_v40 }
 0x5cc   :  { %7479 = vmatprep.subr.bf16.mxu0 %v9656_v13  ;;  %14410 = vst [vmem:[#allocation92_spill] sm:$0xff] %v12736_v59  ;;  %v14411_v13 = vpack.c.bf16 %v11965_v29, %v11959_v20  ;;  %14412 = vst [vmem:[#allocation19_spill] sm:$0xff] %v12743_v5  ;;  %v5743_v19 = vmul.f32 0.2, %v8786_v4  ;;  %v5298_v2 = vpop.f32.mrb[23].mxu1  ;;  %v12755_v20 = vsel %vm5541_vm8, %v12679_v1, %v5797_v16  ;;  %vm5487_vm6 = vcmp.gt.f32.partialorder %v8786_v4, 0.0 }
 0x5cd   :  { %14414 = vst [vmem:[#allocation91_spill] sm:$0xff] %v12750_v54  ;;  %14415 = vst [vmem:[#allocation90_spill] sm:$0xff] %v12755_v20  ;;  %v8788_v29 = vadd.f32 %v5296_v48, %v12504_v7  ;;  %v8789_v61 = vadd.f32 %v5298_v2, %v12521_v44  ;;  %v5992_v37 = vsel %vm5480_vm3, %v8785_v51, %v5736_v55  ;;  %vm5488_vm7 = vcmp.gt.f32.partialorder %v8787_v33, 0.0 }
 0x5ce   :  { %7343 = vmatmul.mubr.bf16.gmra.mrb[176].mxu0 %v14411_v13  ;;  %v12761_v10 = vadd.f32 %v4946_v6, %v12417_v21  ;;  %v12764_v9 = vsel %vm5533_vm5, %v8734_v63, %v5789_v15  ;;  %v12766_v40 = vsel %vm5487_vm6, %v8786_v4, %v5743_v19  ;;  %v6208_v48 = vpack.c.bf16 %v5992_v37, %v5984_v23  ;;  %v9660_v15 = vld [vmem:[#allocation11 + $0x2a0] ss:$8 sps:$4 sm:$0xff]   ;;  %v9665_v37 = vld [vmem:[#allocation11 + $0x2b4] ss:$8 sps:$4 sm:$0xff]  }
 0x5cf   :  { %7352 = vmatprep.mubr.bf16.mxu0 %v14413_v50  ;;  %7480 = vmatpush1.bf16.msra.mxu0 %v9654_v14  ;;  %v5744_v50 = vmul.f32 0.2, %v8787_v33  ;;  %14416 = vst [vmem:[#allocation101_spill] sm:$0xff] %v12764_v9  ;;  %vm5495_vm4 = vcmp.gt.f32.partialorder %v8788_v29, 0.0  ;;  %v5751_v1 = vmul.f32 0.2, %v8788_v29  ;;  %v12780_v13 = vadd.f32 %v4948_v58, %v12423_v17 }
 0x5d0   :  { %7481 = vmatprep.subr.bf16.mxu0 %v9659_v62  ;;  %vm5496_vm11 = vcmp.gt.f32.partialorder %v8789_v61, 0.0  ;;  %v5752_v35 = vmul.f32 0.2, %v8789_v61  ;;  %v4956_v53 = vpop.f32.mrb[136].mxu0  ;;  %v12777_v23 = vmul.f32 0.2, %v12675_v11  ;;  %7728 = vmatprep.mubr.bf16.mxu1 %v6208_v48  ;;  %v8741_v58 = vadd.f32 %v4952_v24, %v12423_v17 }
 0x5d1   :  { %v5302_v16 = vpop.f32.mrb[24].mxu1  ;;  %v12772_v14 = vsel %vm5495_vm4, %v8788_v29, %v5751_v1  ;;  %v4958_v63 = vpop.f32.mrb[137].mxu0  ;;  %v6000_v55 = vsel %vm5488_vm7, %v8787_v33, %v5744_v50  ;;  %v12785_v1 = vmul.f32 0.2, %v12689_v18  ;;  %v12788_v33 = vmul.f32 0.2, %v12693_v25  ;;  %7729 = vmatmul.mubr.bf16.vlgmr.msra.gmra.mrb[64].mxu1 %v6207_v8 }
 0x5d2   :  { %v8790_v34 = vadd.f32 %v5302_v16, %v12504_v7  ;;  %v5304_v62 = vpop.f32.mrb[25].mxu1  ;;  %v6008_v4 = vsel %vm5496_vm11, %v8789_v61, %v5752_v35  ;;  %14417 = vst [vmem:[#allocation100_spill] sm:$0xff] %v12777_v23  ;;  %v6215_v19 = vpack.c.bf16 %v12772_v14, %v12766_v40  ;;  %v4960_v2 = vpop.f32.mrb[138].mxu0  ;;  %v12791_v61 = vmul.f32 0.2, %v12701_v32  ;;  %v14432_v23 = vld [vmem:[#allocation105_spill] sm:$0xff] }
 0x5d3   :  { %7482 = vmatpush1.bf16.msra.mxu0 %v9657_v27  ;;  %v5306_v27 = vpop.f32.mrb[26].mxu1  ;;  %v6216_v29 = vpack.c.bf16 %v6008_v4, %v6000_v55  ;;  %14418 = vst [vmem:[#allocation97_spill] sm:$0xff] %v12785_v1  ;;  %14419 = vst [vmem:[#allocation96_spill] sm:$0xff] %v12788_v33  ;;  %v9663_v50 = vld [vmem:[#allocation11 + $0x2b0] ss:$8 sps:$4 sm:$0xff]   ;;  %v8791_v48 = vadd.f32 %v5304_v62, %v12521_v44  ;;  %v4962_v16 = vpop.f32.mrb[139].mxu0  ;;  %v12817_v62 = vadd.f32 %v12726_v47, %v12417_v21 }
 0x5d4   :  { %7483 = vmatprep.subr.bf16.mxu0 %v9662_v49  ;;  %14420 = vst [vmem:[#allocation110_spill] sm:$0xff] %v12791_v61  ;;  %v14421_v49 = vpack.c.bf16 %v11995_v45, %v11989_v38  ;;  %v12798_v35 = vmul.f32 0.2, %v12704_v22  ;;  %v12801_v40 = vmul.f32 0.2, %v12730_v36  ;;  %v5308_v14 = vpop.f32.mrb[27].mxu1  ;;  %v14444_v22 = vpack.c.bf16 %v12142_v42, %v12134_v31 }
 0x5d5   :  { %7738 = vmatprep.mubr.bf16.mxu1 %v6216_v29  ;;  %v14424_v55 = vld [vmem:[#allocation94_spill] sm:$0xff]  ;;  %v14425_v4 = vld [vmem:[#allocation95_spill] sm:$0xff]  ;;  %v12808_v8 = vmul.f32 0.2, %v12736_v59  ;;  %v12811_v38 = vmul.f32 0.2, %v12761_v10  ;;  %v8793_v29 = vadd.f32 %v5308_v14, %v12521_v44 }
 0x5d6   :  { %7353 = vmatmul.mubr.bf16.gmra.mrb[180].mxu0 %v14421_v49  ;;  %14422 = vst [vmem:[#allocation109_spill] sm:$0xff] %v12798_v35  ;;  %14423 = vst [vmem:[#allocation108_spill] sm:$0xff] %v12801_v40  ;;  %v14426_v24 = vpack.c.bf16 %v14424_v55, %v14425_v4  ;;  %v5759_v45 = vmul.f32 0.2, %v8790_v34  ;;  %v8792_v49 = vadd.f32 %v5306_v27, %v12504_v7  ;;  %v5806_v6 = vmul.f32 0.2, %v12780_v13 }
 0x5d7   :  { %14427 = vst [vmem:[#allocation107_spill] sm:$0xff] %v12808_v8  ;;  %7484 = vmatpush1.bf16.msra.mxu0 %v9660_v15  ;;  %vm5503_vm9 = vcmp.gt.f32.partialorder %v8790_v34, 0.0  ;;  %v9668_v4 = vld [vmem:[#allocation11 + $0x2c4] ss:$8 sps:$4 sm:$0xff]   ;;  %vm5550_vm10 = vcmp.gt.f32.partialorder %v12780_v13, 0.0  ;;  %vm5558_vm13 = vcmp.gt.f32.partialorder %v8741_v58, 0.0  ;;  %v12822_v15 = vadd.f32 %v4956_v53, %v12417_v21 }
 0x5d8   :  { %7362 = vmatprep.mubr.bf16.mxu0 %v14426_v24  ;;  %v4966_v55 = vpop.f32.mrb[140].mxu0  ;;  %7485 = vmatprep.subr.bf16.mxu0 %v9665_v37  ;;  %v5814_v24 = vmul.f32 0.2, %v8741_v58  ;;  %vm5511_vm12 = vcmp.gt.f32.partialorder %v8792_v49, 0.0  ;;  %v5767_v51 = vmul.f32 0.2, %v8792_v49  ;;  %v12824_v20 = vsel %vm5503_vm9, %v8790_v34, %v5759_v45 }
 0x5d9   :  { %vm5504_vm14 = vcmp.gt.f32.partialorder %v8791_v48, 0.0  ;;  %v5760_v27 = vmul.f32 0.2, %v8791_v48  ;;  %v4968_v9 = vpop.f32.mrb[141].mxu0  ;;  %v5312_v47 = vpop.f32.mrb[28].mxu1  ;;  %v12830_v8 = vadd.f32 %v4958_v63, %v12423_v17  ;;  %v12833_v53 = vadd.f32 %v4960_v2, %v12417_v21  ;;  %7739 = vmatmul.mubr.bf16.gmra.mrb[68].mxu1 %v6215_v19  ;;  %v14428_v2 = vld [vmem:[#allocation103_spill] sm:$0xff] }
 0x5da   :  { %v12826_v5 = vsel %vm5511_vm12, %v8792_v49, %v5767_v51  ;;  %v5768_v14 = vmul.f32 0.2, %v8793_v29  ;;  %v8794_v37 = vadd.f32 %v5312_v47, %v12504_v7  ;;  %v4970_v54 = vpop.f32.mrb[142].mxu0  ;;  %v5314_v40 = vpop.f32.mrb[29].mxu1  ;;  %v9666_v61 = vld [vmem:[#allocation11 + $0x2c0] ss:$8 sps:$4 sm:$0xff]   ;;  %v12845_v63 = vadd.f32 %v4966_v55, %v12417_v21 }
 0x5db   :  { %7486 = vmatpush1.bf16.msra.mxu0 %v9663_v50  ;;  %v6223_v35 = vpack.c.bf16 %v12826_v5, %v12824_v20  ;;  %vm5512_vm1 = vcmp.gt.f32.partialorder %v8793_v29, 0.0  ;;  %v4972_v34 = vpop.f32.mrb[143].mxu0  ;;  %v5316_v51 = vpop.f32.mrb[30].mxu1  ;;  %v9671_v45 = vld [vmem:[#allocation11 + $0x2d4] ss:$8 sps:$4 sm:$0xff]   ;;  %vm5557_vm2 = vcmp.gt.f32.partialorder %v12817_v62, 0.0  ;;  %v12842_v50 = vadd.f32 %v4962_v16, %v12423_v17 }
 0x5dc   :  { %7487 = vmatprep.subr.bf16.mxu0 %v9668_v4  ;;  %v12839_v49 = vmul.f32 0.2, %v12817_v62  ;;  %v14429_v47 = vld [vmem:[#allocation41_spill] sm:$0xff]  ;;  %v12853_v20 = vsel %vm5550_vm10, %v12780_v13, %v5806_v6  ;;  %v5775_v4 = vmul.f32 0.2, %v8794_v37  ;;  %v8795_v1 = vadd.f32 %v5314_v40, %v12521_v44  ;;  %v5318_v33 = vpop.f32.mrb[31].mxu1 }
 0x5dd   :  { %v14430_v5 = vpack.c.bf16 %v14428_v2, %v14429_v47  ;;  %14431 = vst [vmem:[#allocation118_spill] sm:$0xff] %v12853_v20  ;;  %v6016_v16 = vsel %vm5504_vm14, %v8791_v48, %v5760_v27  ;;  %v14433_v19 = vld [vmem:[#allocation45_spill] sm:$0xff]  ;;  %v12861_v55 = vsel %vm5558_vm13, %v8741_v58, %v5814_v24  ;;  %vm5549_vm8 = vcmp.gt.f32.partialorder %v12761_v10, 0.0  ;;  %v9808_v18 = vld [vmem:[#allocation11 + $0x304] ss:$8 sps:$4 sm:$0xff]  }
 0x5de   :  { %v14434_v36 = vpack.c.bf16 %v14432_v23, %v14433_v19  ;;  %14435 = vst [vmem:[#allocation117_spill] sm:$0xff] %v12861_v55  ;;  %vm5519_vm15 = vcmp.gt.f32.partialorder %v8794_v37, 0.0  ;;  %v8796_v2 = vadd.f32 %v5316_v51, %v12504_v7  ;;  %v8797_v6 = vadd.f32 %v5318_v33, %v12521_v44  ;;  %v9669_v40 = vld [vmem:[#allocation11 + $0x2d0] ss:$8 sps:$4 sm:$0xff]  }
 0x5df   :  { %7363 = vmatmul.mubr.bf16.gmra.mrb[184].mxu0 %v14430_v5  ;;  %v6024_v13 = vsel %vm5512_vm1, %v8793_v29, %v5768_v14  ;;  %v12868_v48 = vadd.f32 %v4968_v9, %v12423_v17  ;;  %v12871_v23 = vadd.f32 %v4970_v54, %v12417_v21  ;;  %vm5520_vm0 = vcmp.gt.f32.partialorder %v8795_v1, 0.0  ;;  %v9672_v9 = vld [vmem:[#allocation11 + $0x2e0] ss:$8 sps:$4 sm:$0xff]  }
 0x5e0   :  { %7372 = vmatprep.mubr.bf16.mxu0 %v14434_v36  ;;  %7488 = vmatpush1.bf16.msra.mxu0 %v9666_v61  ;;  %v5776_v36 = vmul.f32 0.2, %v8795_v1  ;;  %vm5527_vm3 = vcmp.gt.f32.partialorder %v8796_v2, 0.0  ;;  %v5783_v58 = vmul.f32 0.2, %v8796_v2  ;;  %vm5528_vm5 = vcmp.gt.f32.partialorder %v8797_v6, 0.0 }
 0x5e1   :  { %7489 = vmatprep.subr.bf16.mxu0 %v9671_v45  ;;  %v5784_v24 = vmul.f32 0.2, %v8797_v6  ;;  %v12873_v27 = vsel %vm5519_vm15, %v8794_v37, %v5775_v4  ;;  %v12876_v33 = vadd.f32 %v4972_v34, %v12423_v17  ;;  %v6224_v61 = vpack.c.bf16 %v6024_v13, %v6016_v16  ;;  %v4976_v29 = vpop.f32.mrb[144].mxu0  ;;  %v5322_v14 = vpop.f32.mrb[32].mxu1  ;;  %v9674_v4 = vld [vmem:[#allocation11 + $0x2e4] ss:$8 sps:$4 sm:$0xff]  }
 0x5e2   :  { %v12880_v51 = vsel %vm5527_vm3, %v8796_v2, %v5783_v58  ;;  %v4978_v47 = vpop.f32.mrb[145].mxu0  ;;  %v8798_v45 = vadd.f32 %v5322_v14, %v12504_v7  ;;  %v5324_v5 = vpop.f32.mrb[33].mxu1  ;;  %v6032_v19 = vsel %vm5520_vm0, %v8795_v1, %v5776_v36  ;;  %v9677_v34 = vld [vmem:[#allocation11 + $0x2f4] ss:$8 sps:$4 sm:$0xff]   ;;  %v12885_v16 = vmul.f32 0.2, %v12822_v15 }
 0x5e3   :  { %v6040_v37 = vsel %vm5528_vm5, %v8797_v6, %v5784_v24  ;;  %v12888_v13 = vmul.f32 0.2, %v12830_v8  ;;  %v6231_v2 = vpack.c.bf16 %v12880_v51, %v12873_v27  ;;  %7748 = vmatprep.mubr.bf16.mxu1 %v6224_v61  ;;  %v4980_v58 = vpop.f32.mrb[146].mxu0  ;;  %v5326_v54 = vpop.f32.mrb[34].mxu1  ;;  %v12893_v20 = vmul.f32 0.2, %v12833_v53 }
 0x5e4   :  { %7490 = vmatpush1.bf16.msra.mxu0 %v9669_v40  ;;  %v6232_v14 = vpack.c.bf16 %v6040_v37, %v6032_v19  ;;  %v12896_v1 = vmul.f32 0.2, %v12842_v50  ;;  %v12899_v6 = vmul.f32 0.2, %v12845_v63  ;;  %7749 = vmatmul.mubr.bf16.gmra.mrb[72].mxu1 %v6223_v35  ;;  %v14436_v40 = vpack.c.bf16 %v12094_v3, %v12088_v56  ;;  %v4982_v61 = vpop.f32.mrb[147].mxu0  ;;  %v5328_v51 = vpop.f32.mrb[35].mxu1 }
 0x5e5   :  { %v12905_v36 = vmul.f32 0.2, %v12868_v48  ;;  %v5791_v24 = vmul.f32 0.2, %v8798_v45  ;;  %v8799_v27 = vadd.f32 %v5324_v5, %v12521_v44  ;;  %v14437_v19 = vld [vmem:[#allocation102_spill] sm:$0xff]  ;;  %vm5535_vm6 = vcmp.gt.f32.partialorder %v8798_v45, 0.0  ;;  %7491 = vmatprep.subr.bf16.mxu0 %v9674_v4 }
 0x5e6   :  { %7758 = vmatprep.mubr.bf16.mxu1 %v6232_v14  ;;  %v14438_v37 = vpack.c.bf16 %v12111_v41, %v14437_v19  ;;  %v12912_v55 = vmul.f32 0.2, %v12871_v23  ;;  %v12915_v35 = vmul.f32 0.2, %v12876_v33  ;;  %v8800_v3 = vadd.f32 %v5326_v54, %v12504_v7 }
 0x5e7   :  { %7373 = vmatmul.mubr.bf16.gmra.mrb[188].mxu0 %v14436_v40  ;;  %v12919_v56 = vadd.f32 %v4976_v29, %v12417_v21  ;;  %v12922_v5 = vadd.f32 %v4978_v47, %v12423_v17  ;;  %v8801_v14 = vadd.f32 %v5328_v51, %v12521_v44  ;;  %v9675_v40 = vld [vmem:[#allocation11 + $0x2f0] ss:$8 sps:$4 sm:$0xff]   ;;  %v12929_v19 = vsel %vm5557_vm2, %v12817_v62, %v12839_v49 }
 0x5e8   :  { %7382 = vmatprep.mubr.bf16.mxu0 %v14438_v37  ;;  %v4986_v41 = vpop.f32.mrb[148].mxu0  ;;  %7492 = vmatpush1.bf16.msra.mxu0 %v9672_v9  ;;  %14439 = vst [vmem:[#allocation116_spill] sm:$0xff] %v12929_v19  ;;  %v12932_v54 = vadd.f32 %v4980_v58, %v12417_v21  ;;  %v12935_v29 = vadd.f32 %v4982_v61, %v12423_v17  ;;  %vm5543_vm7 = vcmp.gt.f32.partialorder %v8800_v3, 0.0  ;;  %v5799_v47 = vmul.f32 0.2, %v8800_v3 }
 0x5e9   :  { %7493 = vmatprep.subr.bf16.mxu0 %v9677_v34  ;;  %v12937_v4 = vsel %vm5535_vm6, %v8798_v45, %v5791_v24  ;;  %vm5536_vm4 = vcmp.gt.f32.partialorder %v8799_v27, 0.0  ;;  %v5792_v9 = vmul.f32 0.2, %v8799_v27  ;;  %v4988_v51 = vpop.f32.mrb[149].mxu0  ;;  %v12943_v62 = vsel %vm5549_vm8, %v12761_v10, %v12811_v38 }
 0x5ea   :  { %v5332_v37 = vpop.f32.mrb[36].mxu1  ;;  %14440 = vst [vmem:[#allocation115_spill] sm:$0xff] %v12943_v62  ;;  %v6055_v49 = vsel %vm5543_vm7, %v8800_v3, %v5799_v47  ;;  %v5800_v58 = vmul.f32 0.2, %v8801_v14  ;;  %v4990_v32 = vpop.f32.mrb[150].mxu0  ;;  %vm5566_vm11 = vcmp.gt.f32.partialorder %v12830_v8, 0.0  ;;  %v14443_v45 = vpack.c.bf16 %v12128_v0, %v12122_v39 }
 0x5eb   :  { %v8802_v61 = vadd.f32 %v5332_v37, %v12504_v7  ;;  %v5334_v59 = vpop.f32.mrb[37].mxu1  ;;  %vm5574_vm9 = vcmp.gt.f32.partialorder %v12842_v50, 0.0  ;;  %v12951_v34 = vmul.f32 0.2, %v12919_v56  ;;  %v6239_v24 = vpack.c.bf16 %v6055_v49, %v12937_v4  ;;  %v4992_v10 = vpop.f32.mrb[151].mxu0 }
 0x5ec   :  { %vm5544_vm10 = vcmp.gt.f32.partialorder %v8801_v14, 0.0  ;;  %v5336_v38 = vpop.f32.mrb[38].mxu1  ;;  %7494 = vmatpush1.bf16.msra.mxu0 %v9675_v40  ;;  %v12955_v3 = vmul.f32 0.2, %v12922_v5  ;;  %v12958_v47 = vmul.f32 0.2, %v12932_v54  ;;  %7759 = vmatmul.mubr.bf16.gmra.mrb[76].mxu1 %v6231_v2  ;;  %v12967_v4 = vadd.f32 %v4986_v41, %v12417_v21 }
 0x5ed   :  { %14441 = vst [vmem:[#allocation127_spill] sm:$0xff] %v12951_v34  ;;  %v12961_v37 = vmul.f32 0.2, %v12935_v29  ;;  %v5807_v49 = vmul.f32 0.2, %v8802_v61  ;;  %v8803_v40 = vadd.f32 %v5334_v59, %v12521_v44  ;;  %v5338_v62 = vpop.f32.mrb[39].mxu1  ;;  %v6048_v19 = vsel %vm5536_vm4, %v8799_v27, %v5792_v9  ;;  %7656 = vmatprep.subr.bf16.mxu0 %v9808_v18 }
 0x5ee   :  { %14442 = vst [vmem:[#allocation126_spill] sm:$0xff] %v12958_v47  ;;  %vm5551_vm12 = vcmp.gt.f32.partialorder %v8802_v61, 0.0  ;;  %v8804_v2 = vadd.f32 %v5336_v38, %v12504_v7  ;;  %v8805_v39 = vadd.f32 %v5338_v62, %v12521_v44  ;;  %v6056_v0 = vsel %vm5544_vm10, %v8801_v14, %v5800_v58 }
 0x5ef   :  { %7383 = vmatmul.mubr.bf16.gmra.mrb[192].mxu0 %v14443_v45  ;;  %v12978_v41 = vadd.f32 %v4988_v51, %v12423_v17  ;;  %v12981_v59 = vadd.f32 %v4990_v32, %v12417_v21  ;;  %vm5552_vm13 = vcmp.gt.f32.partialorder %v8803_v40, 0.0  ;;  %v5808_v27 = vmul.f32 0.2, %v8803_v40 }
 0x5f0   :  { %7392 = vmatprep.mubr.bf16.mxu0 %v14444_v22  ;;  %vm5559_vm14 = vcmp.gt.f32.partialorder %v8804_v2, 0.0  ;;  %v5815_v31 = vmul.f32 0.2, %v8804_v2  ;;  %vm5560_vm1 = vcmp.gt.f32.partialorder %v8805_v39, 0.0  ;;  %v5816_v42 = vmul.f32 0.2, %v8805_v39 }
 0x5f1   :  { %vm5565_vm2 = vcmp.gt.f32.partialorder %v12822_v15, 0.0  ;;  %v12984_v18 = vsel %vm5551_vm12, %v8802_v61, %v5807_v49  ;;  %v12987_v22 = vadd.f32 %v4992_v10, %v12423_v17  ;;  %v6240_v14 = vpack.c.bf16 %v6056_v0, %v6048_v19  ;;  %v4996_v9 = vpop.f32.mrb[152].mxu0 }
 0x5f2   :  { %v5342_v51 = vpop.f32.mrb[40].mxu1  ;;  %v6064_v62 = vsel %vm5552_vm13, %v8803_v40, %v5808_v27  ;;  %v6071_v58 = vsel %vm5559_vm14, %v8804_v2, %v5815_v31  ;;  %v12990_v32 = vadd.f32 %v4996_v9, %v12417_v21  ;;  %v4998_v45 = vpop.f32.mrb[153].mxu0  ;;  %v6072_v47 = vsel %vm5560_vm1, %v8805_v39, %v5816_v42 }
 0x5f3   :  { %v8806_v38 = vadd.f32 %v5342_v51, %v12504_v7  ;;  %v5344_v25 = vpop.f32.mrb[41].mxu1  ;;  %v12994_v34 = vmul.f32 0.2, %v12967_v4  ;;  %v6247_v61 = vpack.c.bf16 %v6071_v58, %v12984_v18  ;;  %7768 = vmatprep.mubr.bf16.mxu1 %v6240_v14  ;;  %v12998_v19 = vadd.f32 %v4998_v45, %v12423_v17  ;;  %v5000_v10 = vpop.f32.mrb[154].mxu0 }
 0x5f4   :  { %v5346_v49 = vpop.f32.mrb[42].mxu1  ;;  %v6248_v40 = vpack.c.bf16 %v6072_v47, %v6064_v62  ;;  %v13001_v2 = vmul.f32 0.2, %v12978_v41  ;;  %v13004_v0 = vmul.f32 0.2, %v12981_v59  ;;  %7769 = vmatmul.mubr.bf16.gmra.mrb[80].mxu1 %v6239_v24  ;;  %v8807_v39 = vadd.f32 %v5344_v25, %v12521_v44  ;;  %v5002_v24 = vpop.f32.mrb[155].mxu0 }
 0x5f5   :  { %v14445_v27 = vpack.c.bf16 %v12154_v57, %v12148_v60  ;;  %v13014_v31 = vsel %vm5574_vm9, %v12842_v50, %v12896_v1  ;;  %v13017_v47 = vmul.f32 0.2, %v12987_v22  ;;  %v5823_v42 = vmul.f32 0.2, %v8806_v38  ;;  %v5348_v14 = vpop.f32.mrb[43].mxu1 }
 0x5f6   :  { %14446 = vst [vmem:[#allocation123_spill] sm:$0xff] %v13014_v31  ;;  %v13020_v18 = vadd.f32 %v5000_v10, %v12417_v21  ;;  %7778 = vmatprep.mubr.bf16.mxu1 %v6248_v40  ;;  %v14447_v60 = vpack.c.bf16 %v12175_v26, %v12169_v52  ;;  %vm5573_vm8 = vcmp.gt.f32.partialorder %v12833_v53, 0.0  ;;  %vm5582_vm15 = vcmp.gt.f32.partialorder %v12868_v48, 0.0 }
 0x5f7   :  { %7393 = vmatmul.mubr.bf16.gmra.mrb[196].mxu0 %v14445_v27  ;;  %v13028_v57 = vmul.f32 0.2, %v12990_v32  ;;  %vm5567_vm0 = vcmp.gt.f32.partialorder %v8806_v38, 0.0  ;;  %v8808_v25 = vadd.f32 %v5346_v49, %v12504_v7  ;;  %v13035_v50 = vsel %vm5566_vm11, %v12830_v8, %v12888_v13 }
 0x5f8   :  { %7402 = vmatprep.mubr.bf16.mxu0 %v14447_v60  ;;  %14448 = vst [vmem:[#allocation122_spill] sm:$0xff] %v13035_v50  ;;  %v13038_v1 = vmul.f32 0.2, %v12998_v19  ;;  %v13041_v52 = vadd.f32 %v5002_v24, %v12423_v17  ;;  %v8809_v26 = vadd.f32 %v5348_v14, %v12521_v44  ;;  %v5006_v9 = vpop.f32.mrb[156].mxu0  ;;  %vm5590_vm3 = vcmp.gt.f32.partialorder %v12876_v33, 0.0  ;;  %v14449_v50 = vld [vmem:[#allocation104_spill] sm:$0xff] }
 0x5f9   :  { %v5824_v62 = vmul.f32 0.2, %v8807_v39  ;;  %vm5575_vm5 = vcmp.gt.f32.partialorder %v8808_v25, 0.0  ;;  %v5831_v58 = vmul.f32 0.2, %v8808_v25  ;;  %v13047_v45 = vsel %vm5567_vm0, %v8806_v38, %v5823_v42  ;;  %v5008_v10 = vpop.f32.mrb[157].mxu0 }
 0x5fa   :  { %v13050_v8 = vmul.f32 0.2, %v13020_v18  ;;  %vm5568_vm6 = vcmp.gt.f32.partialorder %v8807_v39, 0.0  ;;  %v13053_v13 = vadd.f32 %v5006_v9, %v12417_v21  ;;  %v5352_v49 = vpop.f32.mrb[44].mxu1  ;;  %vm5581_vm7 = vcmp.gt.f32.partialorder %v12845_v63, 0.0  ;;  %v5010_v42 = vpop.f32.mrb[158].mxu0 }
 0x5fb   :  { %v13056_v40 = vsel %vm5575_vm5, %v8808_v25, %v5831_v58  ;;  %v5832_v27 = vmul.f32 0.2, %v8809_v26  ;;  %v13059_v24 = vadd.f32 %v5008_v10, %v12423_v17  ;;  %v8810_v38 = vadd.f32 %v5352_v49, %v12504_v7  ;;  %v5354_v14 = vpop.f32.mrb[45].mxu1  ;;  %v5012_v58 = vpop.f32.mrb[159].mxu0 }
 0x5fc   :  { %vm5589_vm4 = vcmp.gt.f32.partialorder %v12871_v23, 0.0  ;;  %v13064_v60 = vmul.f32 0.2, %v13041_v52  ;;  %v6255_v9 = vpack.c.bf16 %v13056_v40, %v13047_v45  ;;  %vm5576_vm11 = vcmp.gt.f32.partialorder %v8809_v26, 0.0  ;;  %v5356_v51 = vpop.f32.mrb[46].mxu1  ;;  %7779 = vmatmul.mubr.bf16.gmra.mrb[84].mxu1 %v6247_v61 }
 0x5fd   :  { %v13069_v25 = vadd.f32 %v5010_v42, %v12417_v21  ;;  %vm5583_vm9 = vcmp.gt.f32.partialorder %v8810_v38, 0.0  ;;  %v5839_v10 = vmul.f32 0.2, %v8810_v38  ;;  %v6080_v49 = vsel %vm5568_vm6, %v8807_v39, %v5824_v62 }
 0x5fe   :  { %v14450_v31 = vpack.c.bf16 %v12181_v46, %v14449_v50  ;;  %v13079_v45 = vsel %vm5565_vm2, %v12822_v15, %v12885_v16  ;;  %vm5598_vm12 = vcmp.gt.f32.partialorder %v12922_v5, 0.0  ;;  %vm5606_vm13 = vcmp.gt.f32.partialorder %v12935_v29, 0.0 }
 0x5ff   :  { %v13085_v21 = vmul.f32 0.2, %v13053_v13  ;;  %v13088_v61 = vmul.f32 0.2, %v13059_v24  ;;  %v8811_v46 = vadd.f32 %v5354_v14, %v12521_v44  ;;  %v13092_v39 = vadd.f32 %v5012_v58, %v12423_v17 }
 0x600   :  { %7403 = vmatmul.mubr.bf16.gmra.mrb[200].mxu0 %v14450_v31  ;;  %v5358_v31 = vpop.f32.mrb[47].mxu1  ;;  %v14451_v15 = vpack.c.bf16 %v12214_v30, %v12208_v28  ;;  %v13099_v16 = vmul.f32 0.2, %v13069_v25  ;;  %v8812_v50 = vadd.f32 %v5356_v51, %v12504_v7  ;;  %v6088_v40 = vsel %vm5576_vm11, %v8809_v26, %v5832_v27 }
 0x601   :  { %v8813_v62 = vadd.f32 %v5358_v31, %v12521_v44  ;;  %vm5614_vm1 = vcmp.gt.f32.partialorder %v12978_v41, 0.0  ;;  %v13106_v17 = vsel %vm5583_vm9, %v8810_v38, %v5839_v10  ;;  %vm5584_vm2 = vcmp.gt.f32.partialorder %v8811_v46, 0.0 }
 0x602   :  { %7412 = vmatprep.mubr.bf16.mxu0 %v14451_v15  ;;  %14452 = vst [vmem:[#allocation129_spill] sm:$0xff] %v13099_v16  ;;  %v5840_v42 = vmul.f32 0.2, %v8811_v46  ;;  %v13109_v28 = vmul.f32 0.2, %v13092_v39  ;;  %vm5613_vm0 = vcmp.gt.f32.partialorder %v12967_v4, 0.0  ;;  %v6256_v51 = vpack.c.bf16 %v6088_v40, %v6080_v49 }
 0x603   :  { %vm5621_vm5 = vcmp.gt.f32.partialorder %v12981_v59, 0.0  ;;  %vm5622_vm6 = vcmp.gt.f32.partialorder %v12987_v22, 0.0  ;;  %vm5591_vm14 = vcmp.gt.f32.partialorder %v8812_v50, 0.0  ;;  %v5847_v30 = vmul.f32 0.2, %v8812_v50  ;;  %v5362_v27 = vpop.f32.mrb[48].mxu1 }
 0x604   :  { %vm5592_vm10 = vcmp.gt.f32.partialorder %v8813_v62, 0.0  ;;  %v5848_v26 = vmul.f32 0.2, %v8813_v62  ;;  %v6096_v14 = vsel %vm5584_vm2, %v8811_v46, %v5840_v42  ;;  %v13118_v38 = vsel %vm5573_vm8, %v12833_v53, %v12893_v20  ;;  %v5364_v15 = vpop.f32.mrb[49].mxu1  ;;  %7788 = vmatprep.mubr.bf16.mxu1 %v6256_v51  ;;  %v14455_v42 = vld [vmem:[#allocation106_spill] sm:$0xff] }
 0x605   :  { %v13124_v58 = vsel %vm5582_vm15, %v12868_v48, %v12905_v36  ;;  %v6103_v10 = vsel %vm5591_vm14, %v8812_v50, %v5847_v30  ;;  %v8814_v31 = vadd.f32 %v5362_v27, %v12504_v7  ;;  %v6253_v49 = vpack.c.bf16 %v13118_v38, %v13079_v45  ;;  %v5366_v20 = vpop.f32.mrb[50].mxu1  ;;  %7789 = vmatmul.mubr.bf16.gmra.mrb[88].mxu1 %v6255_v9  ;;  %v14454_v9 = vld [vmem:[#allocation112_spill] sm:$0xff] }
 0x606   :  { %v6104_v16 = vsel %vm5592_vm10, %v8813_v62, %v5848_v26  ;;  %vm5630_vm11 = vcmp.gt.f32.partialorder %v12998_v19, 0.0  ;;  %v6263_v46 = vpack.c.bf16 %v6103_v10, %v13106_v17  ;;  %v8815_v53 = vadd.f32 %v5364_v15, %v12521_v44  ;;  %v5368_v62 = vpop.f32.mrb[51].mxu1  ;;  %v14457_v10 = vld [vmem:[#allocation127_spill] sm:$0xff]  ;;  %v14566_v38 = vld [vmem:[#allocation72_spill] sm:$0xff] }
 0x607   :  { %v6264_v40 = vpack.c.bf16 %v6104_v16, %v6096_v14  ;;  %v13136_v48 = vsel %vm5590_vm3, %v12876_v33, %v12915_v35  ;;  %vm5599_vm15 = vcmp.gt.f32.partialorder %v8814_v31, 0.0  ;;  %v5855_v36 = vmul.f32 0.2, %v8814_v31 }
 0x608   :  { %v8816_v50 = vadd.f32 %v5366_v20, %v12504_v7  ;;  %v14453_v17 = vpack.c.bf16 %v12231_v43, %v12225_v12  ;;  %v6262_v16 = vpack.c.bf16 %v13136_v48, %v13124_v58  ;;  %vm5600_vm10 = vcmp.gt.f32.partialorder %v8815_v53, 0.0  ;;  %v14567_v58 = vld [vmem:[#allocation69_spill] sm:$0xff] }
 0x609   :  { %v5856_v33 = vmul.f32 0.2, %v8815_v53  ;;  %v8817_v35 = vadd.f32 %v5368_v62, %v12521_v44  ;;  %7798 = vmatprep.mubr.bf16.mxu1 %v6264_v40  ;;  %v14456_v30 = vpack.c.bf16 %v14454_v9, %v14455_v42  ;;  %v13155_v12 = vsel %vm5581_vm7, %v12845_v63, %v12899_v6  ;;  %v14463_v42 = vld [vmem:[#allocation55_spill] sm:$0xff] }
 0x60a   :  { %7413 = vmatmul.mubr.bf16.gmra.mrb[204].mxu0 %v14453_v17  ;;  %vm5646_vm14 = vcmp.gt.f32.partialorder %v13059_v24, 0.0  ;;  %v13158_v43 = vsel %vm5599_vm15, %v8814_v31, %v5855_v36  ;;  %vm5607_vm2 = vcmp.gt.f32.partialorder %v8816_v50, 0.0  ;;  %v5863_v26 = vmul.f32 0.2, %v8816_v50 }
 0x60b   :  { %7422 = vmatprep.mubr.bf16.mxu0 %v14456_v30  ;;  %v13164_v51 = vsel %vm5589_vm4, %v12871_v23, %v12912_v55  ;;  %vm5645_vm3 = vcmp.gt.f32.partialorder %v13053_v13, 0.0  ;;  %vm5654_vm9 = vcmp.gt.f32.partialorder %v13092_v39, 0.0  ;;  %vm5608_vm8 = vcmp.gt.f32.partialorder %v8817_v35, 0.0  ;;  %v14464_v30 = vld [vmem:[#allocation52_spill] sm:$0xff] }
 0x60c   :  { %v5864_v27 = vmul.f32 0.2, %v8817_v35  ;;  %v6112_v63 = vsel %vm5600_vm10, %v8815_v53, %v5856_v33  ;;  %v6261_v6 = vpack.c.bf16 %v13164_v51, %v13155_v12  ;;  %vm5440_vm7 = vcmp.gt.f32.partialorder %v12675_v11, 0.0  ;;  %v5372_v53 = vpop.f32.mrb[52].mxu1 }
 0x60d   :  { %vm5653_vm15 = vcmp.gt.f32.partialorder %v13069_v25, 0.0  ;;  %v13172_v14 = vsel %vm5607_vm2, %v8816_v50, %v5863_v26  ;;  %v13178_v55 = vsel %vm5598_vm12, %v12922_v5, %v12955_v3  ;;  %v13184_v23 = vsel %vm5606_vm13, %v12935_v29, %v12961_v37  ;;  %v14459_v3 = vld [vmem:[#allocation126_spill] sm:$0xff]  ;;  %v14461_v37 = vld [vmem:[#allocation89_spill] sm:$0xff]  ;;  %7799 = vmatmul.mubr.bf16.gmra.mrb[92].mxu1 %v6263_v46 }
 0x60e   :  { %vm14458_vm4 = vcmp.gt.f32.partialorder %v12919_v56, 0.0  ;;  %v6271_v15 = vpack.c.bf16 %v13172_v14, %v13158_v43  ;;  %v6120_v20 = vsel %vm5608_vm8, %v8817_v35, %v5864_v27  ;;  %v6270_v5 = vpack.c.bf16 %v13184_v23, %v13178_v55  ;;  %v14467_v27 = vld [vmem:[#allocation87_spill] sm:$0xff]  ;;  %v14570_v55 = vld [vmem:[#allocation32_spill] sm:$0xff] }
 0x60f   :  { %v13190_v31 = vsel %vm14458_vm4, %v12919_v56, %v14457_v10  ;;  %vm14460_vm12 = vcmp.gt.f32.partialorder %v12932_v54, 0.0  ;;  %vm5448_vm13 = vcmp.gt.f32.partialorder %v14461_v37, 0.0  ;;  %v8818_v40 = vadd.f32 %v5372_v53, %v12504_v7  ;;  %v5374_v56 = vpop.f32.mrb[53].mxu1  ;;  %v14470_v10 = vld [vmem:[#allocation111_spill] sm:$0xff] }
 0x610   :  { %v13200_v29 = vsel %vm14460_vm12, %v12932_v54, %v14459_v3  ;;  %v6272_v36 = vpack.c.bf16 %v6120_v20, %v6112_v63  ;;  %v13210_v62 = vsel %vm5614_vm1, %v12978_v41, %v13001_v2  ;;  %v8819_v17 = vadd.f32 %v5374_v56, %v12521_v44  ;;  %v5376_v33 = vpop.f32.mrb[54].mxu1  ;;  %v14462_v2 = vld [vmem:[#allocation78_spill] sm:$0xff]  ;;  %v14469_v63 = vld [vmem:[#allocation44_spill] sm:$0xff]  ;;  %v14483_v43 = vld [vmem:[#allocation119_spill] sm:$0xff] }
 0x611   :  { %v6269_v50 = vpack.c.bf16 %v13200_v29, %v13190_v31  ;;  %v13217_v54 = vsel %vm5622_vm6, %v12987_v22, %v13017_v47  ;;  %v13223_v35 = vsel %vm5613_vm0, %v12967_v4, %v12994_v34  ;;  %v13229_v41 = vsel %vm5621_vm5, %v12981_v59, %v13004_v0  ;;  %v5378_v47 = vpop.f32.mrb[55].mxu1  ;;  %v14466_v4 = vld [vmem:[#allocation81_spill] sm:$0xff]  ;;  %v14468_v59 = vld [vmem:[#allocation92_spill] sm:$0xff] }
 0x612   :  { %vm5439_vm1 = vcmp.gt.f32.partialorder %v14462_v2, 0.0  ;;  %vm5615_vm8 = vcmp.gt.f32.partialorder %v8818_v40, 0.0  ;;  %v5871_v9 = vmul.f32 0.2, %v8818_v40  ;;  %v8820_v22 = vadd.f32 %v5376_v33, %v12504_v7  ;;  %7808 = vmatprep.mubr.bf16.mxu1 %v6272_v36  ;;  %v14473_v36 = vld [vmem:[#allocation93_spill] sm:$0xff] }
 0x613   :  { %v14465_v26 = vpack.c.bf16 %v14463_v42, %v14464_v30  ;;  %v6278_v34 = vpack.c.bf16 %v13217_v54, %v13210_v62  ;;  %vm5447_vm0 = vcmp.gt.f32.partialorder %v14466_v4, 0.0  ;;  %vm5456_vm5 = vcmp.gt.f32.partialorder %v14467_v27, 0.0  ;;  %v14472_v42 = vld [vmem:[#allocation88_spill] sm:$0xff]  ;;  %v14572_v31 = vld [vmem:[#allocation33_spill] sm:$0xff] }
 0x614   :  { %vm5616_vm10 = vcmp.gt.f32.partialorder %v8819_v17, 0.0  ;;  %v5872_v0 = vmul.f32 0.2, %v8819_v17  ;;  %v8821_v46 = vadd.f32 %v5378_v47, %v12521_v44  ;;  %v14471_v53 = vpack.c.bf16 %v14469_v63, %v14470_v10  ;;  %v14477_v10 = vld [vmem:[#allocation129_spill] sm:$0xff] }
 0x615   :  { %7423 = vmatmul.mubr.bf16.gmra.mrb[208].mxu0 %v14465_v26  ;;  %v6277_v20 = vpack.c.bf16 %v13229_v41, %v13223_v35  ;;  %v13247_v3 = vsel %vm5615_vm8, %v8818_v40, %v5871_v9  ;;  %vm5623_vm2 = vcmp.gt.f32.partialorder %v8820_v22, 0.0  ;;  %v5879_v56 = vmul.f32 0.2, %v8820_v22  ;;  %7809 = vmatmul.mubr.bf16.gmra.mrb[96].mxu1 %v6271_v15  ;;  %v14485_v15 = vld [vmem:[#allocation96_spill] sm:$0xff]  ;;  %v14575_v41 = vld [vmem:[#allocation79_spill] sm:$0xff] }
 0x616   :  { %7432 = vmatprep.mubr.bf16.mxu0 %v14471_v53  ;;  %v13253_v33 = vsel %vm5630_vm11, %v12998_v19, %v13038_v1  ;;  %vm5455_vm4 = vcmp.gt.f32.partialorder %v14472_v42, 0.0  ;;  %vm5463_vm12 = vcmp.gt.f32.partialorder %v14473_v36, 0.0  ;;  %vm5624_vm6 = vcmp.gt.f32.partialorder %v8821_v46, 0.0 }
 0x617   :  { %v5880_v47 = vmul.f32 0.2, %v8821_v46  ;;  %v6128_v30 = vsel %vm5616_vm10, %v8819_v17, %v5872_v0  ;;  %vm14474_vm8 = vcmp.gt.f32.partialorder %v13041_v52, 0.0  ;;  %v6135_v9 = vsel %vm5623_vm2, %v8820_v22, %v5879_v56  ;;  %v14479_v56 = vld [vmem:[#allocation47_spill] sm:$0xff] }
 0x618   :  { %v13261_v40 = vsel %vm14474_vm8, %v13041_v52, %v13064_v60  ;;  %vm14475_vm11 = vcmp.gt.f32.partialorder %v12990_v32, 0.0  ;;  %vm14476_vm10 = vcmp.gt.f32.partialorder %v13020_v18, 0.0  ;;  %v6279_v17 = vpack.c.bf16 %v6135_v9, %v13247_v3  ;;  %v5382_v52 = vpop.f32.mrb[56].mxu1 }
 0x619   :  { %v6286_v26 = vpack.c.bf16 %v13261_v40, %v13253_v33  ;;  %v13269_v19 = vsel %vm14475_vm11, %v12990_v32, %v13028_v57  ;;  %v13275_v1 = vsel %vm14476_vm10, %v13020_v18, %v13050_v8  ;;  %v6136_v60 = vsel %vm5624_vm6, %v8821_v46, %v5880_v47  ;;  %v5384_v57 = vpop.f32.mrb[57].mxu1  ;;  %v14480_v47 = vld [vmem:[#allocation121_spill] sm:$0xff] }
 0x61a   :  { %v6285_v22 = vpack.c.bf16 %v13275_v1, %v13269_v19  ;;  %v13284_v0 = vsel %vm5646_vm14, %v13059_v24, %v13088_v61  ;;  %v8822_v32 = vadd.f32 %v5382_v52, %v12504_v7  ;;  %v6280_v63 = vpack.c.bf16 %v6136_v60, %v6128_v30  ;;  %v5386_v24 = vpop.f32.mrb[58].mxu1  ;;  %v14482_v52 = vld [vmem:[#allocation120_spill] sm:$0xff] }
 0x61b   :  { %v13291_v18 = vsel %vm5654_vm9, %v13092_v39, %v13109_v28  ;;  %v13297_v8 = vsel %vm5645_vm3, %v13053_v13, %v13085_v21  ;;  %v8823_v46 = vadd.f32 %v5384_v57, %v12521_v44  ;;  %v13306_v53 = vsel %vm5653_vm15, %v13069_v25, %v14477_v10  ;;  %v14478_v39 = vld [vmem:[#allocation100_spill] sm:$0xff]  ;;  %v5388_v3 = vpop.f32.mrb[59].mxu1  ;;  %v14500_v10 = vld [vmem:[#allocation57_spill] sm:$0xff] }
 0x61c   :  { %v6294_v61 = vpack.c.bf16 %v13291_v18, %v13284_v0  ;;  %v13312_v28 = vsel %vm5440_vm7, %v12675_v11, %v14478_v39  ;;  %vm5631_vm9 = vcmp.gt.f32.partialorder %v8822_v32, 0.0  ;;  %v5887_v13 = vmul.f32 0.2, %v8822_v32  ;;  %7818 = vmatprep.mubr.bf16.mxu1 %v6280_v63  ;;  %v14486_v63 = vld [vmem:[#allocation82_spill] sm:$0xff] }
 0x61d   :  { %v8824_v21 = vadd.f32 %v5386_v24, %v12504_v7  ;;  %v14481_v30 = vpack.c.bf16 %v14479_v56, %v14480_v47  ;;  %vm5632_vm3 = vcmp.gt.f32.partialorder %v8823_v46, 0.0  ;;  %v5888_v9 = vmul.f32 0.2, %v8823_v46  ;;  %7819 = vmatmul.mubr.bf16.gmra.mrb[100].mxu1 %v6279_v17 }
 0x61e   :  { %v8825_v11 = vadd.f32 %v5388_v3, %v12521_v44  ;;  %v14484_v14 = vpack.c.bf16 %v14482_v52, %v14483_v43  ;;  %v13331_v60 = vsel %vm5448_vm13, %v14461_v37, %v14485_v15  ;;  %v6143_v57 = vsel %vm5631_vm9, %v8822_v32, %v5887_v13  ;;  %v14488_v32 = vld [vmem:[#allocation109_spill] sm:$0xff] }
 0x61f   :  { %7433 = vmatmul.mubr.bf16.gmra.mrb[212].mxu0 %v14481_v30  ;;  %vm5639_vm14 = vcmp.gt.f32.partialorder %v8824_v21, 0.0  ;;  %v5895_v24 = vmul.f32 0.2, %v8824_v21  ;;  %v6144_v3 = vsel %vm5632_vm3, %v8823_v46, %v5888_v9  ;;  %v13339_v56 = vsel %vm5439_vm1, %v14462_v2, %v14486_v63  ;;  %v14487_v30 = vld [vmem:[#allocation97_spill] sm:$0xff]  ;;  %v14489_v46 = vld [vmem:[#allocation107_spill] sm:$0xff] }
 0x620   :  { %7442 = vmatprep.mubr.bf16.mxu0 %v14484_v14  ;;  %vm5640_vm7 = vcmp.gt.f32.partialorder %v8825_v11, 0.0  ;;  %v5896_v39 = vmul.f32 0.2, %v8825_v11  ;;  %v13345_v37 = vsel %vm5447_vm0, %v14466_v4, %v14487_v30  ;;  %v13351_v13 = vsel %vm5456_vm5, %v14467_v27, %v14488_v32 }
 0x621   :  { %v6151_v47 = vsel %vm5639_vm14, %v8824_v21, %v5895_v24  ;;  %vm14490_vm15 = vcmp.gt.f32.partialorder %v14468_v59, 0.0  ;;  %v5392_v21 = vpop.f32.mrb[60].mxu1  ;;  %v14491_v24 = vld [vmem:[#allocation110_spill] sm:$0xff]  ;;  %v14565_v45 = vpack.c.bf16 %v13306_v53, %v13297_v8  ;;  %v14578_v33 = vpack.c.bf16 %v13331_v60, %v13312_v28 }
 0x622   :  { %v13357_v9 = vsel %vm14490_vm15, %v14468_v59, %v14489_v46  ;;  %v6287_v2 = vpack.c.bf16 %v6151_v47, %v6143_v57  ;;  %v6152_v52 = vsel %vm5640_vm7, %v8825_v11, %v5896_v39  ;;  %v8826_v14 = vadd.f32 %v5392_v21, %v12504_v7  ;;  %v5394_v15 = vpop.f32.mrb[61].mxu1  ;;  %v14492_v59 = vld [vmem:[#allocation108_spill] sm:$0xff]  ;;  %v14493_v46 = vld [vmem:[#allocation54_spill] sm:$0xff] }
 0x623   :  { %v6288_v27 = vpack.c.bf16 %v6152_v52, %v6144_v3  ;;  %v13368_v63 = vsel %vm5455_vm4, %v14472_v42, %v14491_v24  ;;  %v13374_v11 = vsel %vm5463_vm12, %v14473_v36, %v14492_v59  ;;  %v8827_v57 = vadd.f32 %v5394_v15, %v12521_v44  ;;  %v5396_v39 = vpop.f32.mrb[62].mxu1  ;;  %v14494_v42 = vld [vmem:[#allocation128_spill] sm:$0xff]  ;;  %v14497_v15 = vld [vmem:[#allocation49_spill] sm:$0xff] }
 0x624   :  { %v5903_v3 = vmul.f32 0.2, %v8826_v14  ;;  %v8828_v30 = vadd.f32 %v5396_v39, %v12504_v7  ;;  %v5398_v32 = vpop.f32.mrb[63].mxu1  ;;  %v14495_v21 = vpack.c.bf16 %v14493_v46, %v14494_v42  ;;  %vm5647_vm13 = vcmp.gt.f32.partialorder %v8826_v14, 0.0  ;;  %v14496_v24 = vld [vmem:[#allocation56_spill] sm:$0xff] }
 0x625   :  { %v5904_v52 = vmul.f32 0.2, %v8827_v57  ;;  %v8829_v36 = vadd.f32 %v5398_v32, %v12521_v44  ;;  %7828 = vmatprep.mubr.bf16.mxu1 %v6288_v27  ;;  %v14498_v59 = vpack.c.bf16 %v14496_v24, %v14497_v15  ;;  %vm5648_vm1 = vcmp.gt.f32.partialorder %v8827_v57, 0.0  ;;  %v14502_v27 = vld [vmem:[#allocation58_spill] sm:$0xff]  ;;  %v14503_v32 = vld [vmem:[#allocation51_spill] sm:$0xff]  ;;  %v14505_v15 = vld [vmem:[#allocation48_spill] sm:$0xff] }
 0x626   :  { %vm5655_vm0 = vcmp.gt.f32.partialorder %v8828_v30, 0.0  ;;  %v5911_v17 = vmul.f32 0.2, %v8828_v30  ;;  %v6159_v7 = vsel %vm5647_vm13, %v8826_v14, %v5903_v3  ;;  %7829 = vmatmul.mubr.bf16.gmra.mrb[104].mxu1 %v6287_v2  ;;  %v14504_v24 = vpack.c.bf16 %v14502_v27, %v14503_v32  ;;  %v9809_v14 = vld [vmem:[#allocation11 + $0x300] ss:$8 sps:$4 sm:$0xff]   ;;  %v14520_v32 = vld [vmem:[#allocation62_spill] sm:$0xff] }
 0x627   :  { %7443 = vmatmul.mubr.bf16.gmra.mrb[216].mxu0 %v14495_v21  ;;  %vm5656_vm5 = vcmp.gt.f32.partialorder %v8829_v36, 0.0  ;;  %v5912_v47 = vmul.f32 0.2, %v8829_v36  ;;  %v6160_v43 = vsel %vm5648_vm1, %v8827_v57, %v5904_v52  ;;  %v14499_v21 = vld [vmem:[#allocation46_spill] sm:$0xff]  ;;  %v14508_v57 = vld [vmem:[#allocation53_spill] sm:$0xff]  ;;  %v14580_v0 = vpack.c.bf16 %v13357_v9, %v13351_v13 }
 0x628   :  { %7452 = vmatprep.mubr.bf16.mxu0 %v14498_v59  ;;  %v6167_v39 = vsel %vm5655_vm0, %v8828_v30, %v5911_v17  ;;  %v14501_v44 = vpack.c.bf16 %v14499_v21, %v14500_v10  ;;  %v14506_v59 = vld [vmem:[#allocation59_spill] sm:$0xff]  ;;  %v9810_v2 = vld [vmem:[#allocation11 + $0x314] ss:$8 sps:$4 sm:$0xff]   ;;  %v9811_v10 = vld [vmem:[#allocation11 + $0x310] ss:$8 sps:$4 sm:$0xff]   ;;  %v14581_v28 = vpack.c.bf16 %v13374_v11, %v13368_v63 }
 0x629   :  { %v6295_v4 = vpack.c.bf16 %v6167_v39, %v6159_v7  ;;  %v6168_v46 = vsel %vm5656_vm5, %v8829_v36, %v5912_v47  ;;  %v14507_v25 = vpack.c.bf16 %v14505_v15, %v14506_v59  ;;  %v14509_v47 = vld [vmem:[#allocation50_spill] sm:$0xff]  ;;  %v9812_v3 = vld [vmem:[#allocation11 + $0x324] ss:$8 sps:$4 sm:$0xff]   ;;  %v14515_v17 = vld [vmem:[#allocation61_spill] sm:$0xff] }
 0x62a   :  { %v6296_v42 = vpack.c.bf16 %v6168_v46, %v6160_v43  ;;  %v14510_v43 = vpack.c.bf16 %v14508_v57, %v14509_v47  ;;  %v14511_v30 = vld [vmem:[#allocation23_spill] sm:$0xff]  ;;  %v14512_v52 = vld [vmem:[#allocation26_spill] sm:$0xff] }
 0x62b   :  { %v14513_v36 = vpack.c.bf16 %v14511_v30, %v14512_v52  ;;  %v9814_v39 = vld [vmem:[#allocation11 + $0x334] ss:$8 sps:$4 sm:$0xff]   ;;  %v9815_v46 = vld [vmem:[#allocation11 + $0x330] ss:$8 sps:$4 sm:$0xff]   ;;  %v9817_v59 = vld [vmem:[#allocation11 + $0x340] ss:$8 sps:$4 sm:$0xff]  }
 0x62c   :  { %7838 = vmatprep.mubr.bf16.mxu1 %v6296_v42  ;;  %v9816_v42 = vld [vmem:[#allocation11 + $0x344] ss:$8 sps:$4 sm:$0xff]   ;;  %v14517_v21 = vld [vmem:[#allocation22_spill] sm:$0xff] }
 0x62d   :  { %v9819_v57 = vld [vmem:[#allocation11 + $0x350] ss:$8 sps:$4 sm:$0xff]   ;;  %v9820_v47 = vld [vmem:[#allocation11 + $0x364] ss:$8 sps:$4 sm:$0xff]  }
 0x62e   :  { %7839 = vmatmul.mubr.bf16.gmra.mrb[108].mxu1 %v6295_v4  ;;  %v14514_v4 = vld [vmem:[#allocation60_spill] sm:$0xff]  ;;  %v14527_v30 = vld [vmem:[#allocation30_spill] sm:$0xff] }
 0x62f   :  { %7453 = vmatmul.mubr.bf16.gmra.mrb[220].mxu0 %v14501_v44  ;;  %v14516_v7 = vpack.c.bf16 %v14514_v4, %v14515_v17  ;;  %v14518_v44 = vld [vmem:[#allocation24_spill] sm:$0xff]  ;;  %v9822_v4 = vld [vmem:[#allocation11 + $0x374] ss:$8 sps:$4 sm:$0xff]   ;;  %v9823_v17 = vld [vmem:[#allocation11 + $0x370] ss:$8 sps:$4 sm:$0xff]  }
 0x630   :  { %7495 = vmatprep.mubr.bf16.mxu0 %v14504_v24  ;;  %v14519_v27 = vpack.c.bf16 %v14517_v21, %v14518_v44  ;;  %v14521_v24 = vld [vmem:[#allocation63_spill] sm:$0xff]  ;;  %v14533_v21 = vld [vmem:[#allocation68_spill] sm:$0xff] }
 0x631   :  { %v14522_v15 = vpack.c.bf16 %v14520_v32, %v14521_v24  ;;  %v9826_v32 = vld [vmem:[#allocation11 + $0x394] ss:$8 sps:$4 sm:$0xff]   ;;  %v9827_v24 = vld [vmem:[#allocation11 + $0x390] ss:$8 sps:$4 sm:$0xff]  }
 0x637   :  { %7496 = vmatmul.mubr.bf16.vlgmr.msra.gmra.mrb[160].mxu0 %v14507_v25  ;;  %v9813_v25 = vld [vmem:[#allocation11 + $0x320] ss:$8 sps:$4 sm:$0xff]  }
 0x638   :  { %7657 = vmatpush1.bf16.msra.mxu0 %v9809_v14  ;;  %7505 = vmatprep.mubr.bf16.mxu0 %v14510_v43  ;;  %v9818_v14 = vld [vmem:[#allocation11 + $0x354] ss:$8 sps:$4 sm:$0xff]  }
 0x639   :  { %7658 = vmatprep.subr.bf16.mxu0 %v9810_v2  ;;  %v14523_v43 = vld [vmem:[#allocation25_spill] sm:$0xff]  ;;  %v14524_v2 = vld [vmem:[#allocation28_spill] sm:$0xff] }
 0x63c   :  { %7659 = vmatpush1.bf16.msra.mxu0 %v9811_v10  ;;  %v14525_v10 = vpack.c.bf16 %v14523_v43, %v14524_v2  ;;  %v14539_v43 = vld [vmem:[#allocation37_spill] sm:$0xff] }
 0x63d   :  { %7660 = vmatprep.subr.bf16.mxu0 %v9812_v3  ;;  %v14526_v3 = vld [vmem:[#allocation27_spill] sm:$0xff] }
 0x63e   :  { %v14528_v52 = vpack.c.bf16 %v14526_v3, %v14527_v30  ;;  %v9830_v3 = vld [vmem:[#allocation11 + $0x3b4] ss:$8 sps:$4 sm:$0xff]   ;;  %v9831_v30 = vld [vmem:[#allocation11 + $0x3b0] ss:$8 sps:$4 sm:$0xff]  }
 0x63f   :  { %7506 = vmatmul.mubr.bf16.gmra.mrb[164].mxu0 %v14513_v36  ;;  %v9821_v36 = vld [vmem:[#allocation11 + $0x360] ss:$8 sps:$4 sm:$0xff]  }
 0x640   :  { %7515 = vmatprep.mubr.bf16.mxu0 %v14516_v7  ;;  %7661 = vmatpush1.bf16.msra.mxu0 %v9813_v25  ;;  %v9824_v7 = vld [vmem:[#allocation11 + $0x384] ss:$8 sps:$4 sm:$0xff]  }
 0x641   :  { %7662 = vmatprep.subr.bf16.mxu0 %v9814_v39  ;;  %v14529_v25 = vld [vmem:[#allocation64_spill] sm:$0xff]  ;;  %v14530_v39 = vld [vmem:[#allocation65_spill] sm:$0xff] }
 0x644   :  { %7663 = vmatpush1.bf16.msra.mxu0 %v9815_v46  ;;  %v14531_v46 = vpack.c.bf16 %v14529_v25, %v14530_v39  ;;  %v14545_v25 = vld [vmem:[#allocation40_spill] sm:$0xff] }
 0x645   :  { %7664 = vmatprep.subr.bf16.mxu0 %v9816_v42  ;;  %v14532_v42 = vld [vmem:[#allocation34_spill] sm:$0xff] }
 0x646   :  { %v14534_v44 = vpack.c.bf16 %v14532_v42, %v14533_v21  ;;  %v9834_v42 = vld [vmem:[#allocation11 + $0x3d4] ss:$8 sps:$4 sm:$0xff]   ;;  %v9835_v21 = vld [vmem:[#allocation11 + $0x3d0] ss:$8 sps:$4 sm:$0xff]  }
 0x647   :  { %7516 = vmatmul.mubr.bf16.gmra.mrb[168].mxu0 %v14519_v27  ;;  %v9825_v27 = vld [vmem:[#allocation11 + $0x380] ss:$8 sps:$4 sm:$0xff]  }
 0x648   :  { %7525 = vmatprep.mubr.bf16.mxu0 %v14522_v15  ;;  %7665 = vmatpush1.bf16.msra.mxu0 %v9817_v59  ;;  %v9828_v15 = vld [vmem:[#allocation11 + $0x3a4] ss:$8 sps:$4 sm:$0xff]   ;;  %v14535_v59 = vld [vmem:[#allocation73_spill] sm:$0xff] }
 0x649   :  { %7666 = vmatprep.subr.bf16.mxu0 %v9818_v14  ;;  %v14536_v14 = vld [vmem:[#allocation31_spill] sm:$0xff] }
 0x64c   :  { %7667 = vmatpush1.bf16.msra.mxu0 %v9819_v57  ;;  %v14537_v57 = vpack.c.bf16 %v14535_v59, %v14536_v14  ;;  %v14551_v59 = vld [vmem:[#allocation19_spill] sm:$0xff] }
 0x64d   :  { %7668 = vmatprep.subr.bf16.mxu0 %v9820_v47  ;;  %v14538_v47 = vld [vmem:[#allocation74_spill] sm:$0xff] }
 0x64e   :  { %v14540_v2 = vpack.c.bf16 %v14538_v47, %v14539_v43  ;;  %v9838_v47 = vld [vmem:[#allocation11 + $0x3f4] ss:$8 sps:$4 sm:$0xff]   ;;  %v9839_v43 = vld [vmem:[#allocation11 + $0x3f0] ss:$8 sps:$4 sm:$0xff]  }
 0x64f   :  { %7526 = vmatmul.mubr.bf16.gmra.mrb[172].mxu0 %v14525_v10  ;;  %v9829_v10 = vld [vmem:[#allocation11 + $0x3a0] ss:$8 sps:$4 sm:$0xff]  }
 0x650   :  { %7535 = vmatprep.mubr.bf16.mxu0 %v14528_v52  ;;  %7669 = vmatpush1.bf16.msra.mxu0 %v9821_v36  ;;  %v9832_v52 = vld [vmem:[#allocation11 + $0x3c4] ss:$8 sps:$4 sm:$0xff]  }
 0x651   :  { %7670 = vmatprep.subr.bf16.mxu0 %v9822_v4  ;;  %v14541_v36 = vld [vmem:[#allocation35_spill] sm:$0xff]  ;;  %v14542_v4 = vld [vmem:[#allocation76_spill] sm:$0xff] }
 0x654   :  { %7671 = vmatpush1.bf16.msra.mxu0 %v9823_v17  ;;  %v14543_v17 = vpack.c.bf16 %v14541_v36, %v14542_v4  ;;  %v14559_v4 = vld [vmem:[#allocation116_spill] sm:$0xff] }
 0x655   :  { %7672 = vmatprep.subr.bf16.mxu0 %v9824_v7  ;;  %v14544_v7 = vld [vmem:[#allocation85_spill] sm:$0xff] }
 0x656   :  { %v14546_v39 = vpack.c.bf16 %v14544_v7, %v14545_v25  ;;  %v14562_v25 = vld [vmem:[#allocation123_spill] sm:$0xff] }
 0x657   :  { %7536 = vmatmul.mubr.bf16.gmra.mrb[176].mxu0 %v14531_v46  ;;  %v9833_v46 = vld [vmem:[#allocation11 + $0x3c0] ss:$8 sps:$4 sm:$0xff]  }
 0x658   :  { %7545 = vmatprep.mubr.bf16.mxu0 %v14534_v44  ;;  %7673 = vmatpush1.bf16.msra.mxu0 %v9825_v27  ;;  %v9836_v44 = vld [vmem:[#allocation11 + $0x3e4] ss:$8 sps:$4 sm:$0xff]  }
 0x659   :  { %7674 = vmatprep.subr.bf16.mxu0 %v9826_v32  ;;  %v14547_v27 = vld [vmem:[#allocation80_spill] sm:$0xff]  ;;  %v14548_v32 = vld [vmem:[#allocation77_spill] sm:$0xff] }
 0x65c   :  { %7675 = vmatpush1.bf16.msra.mxu0 %v9827_v24  ;;  %v14549_v24 = vpack.c.bf16 %v14547_v27, %v14548_v32 }
 0x65d   :  { %7676 = vmatprep.subr.bf16.mxu0 %v9828_v15  ;;  %v14550_v15 = vld [vmem:[#allocation91_spill] sm:$0xff] }
 0x65e   :  { %v14552_v14 = vpack.c.bf16 %v14550_v15, %v14551_v59 }
 0x65f   :  { %7546 = vmatmul.mubr.bf16.gmra.mrb[180].mxu0 %v14537_v57  ;;  %v9837_v57 = vld [vmem:[#allocation11 + $0x3e0] ss:$8 sps:$4 sm:$0xff]  }
 0x660   :  { %7555 = vmatprep.mubr.bf16.mxu0 %v14540_v2  ;;  %7677 = vmatpush1.bf16.msra.mxu0 %v9829_v10  ;;  %v14553_v2 = vld [vmem:[#allocation90_spill] sm:$0xff]  ;;  %v14554_v10 = vld [vmem:[#allocation101_spill] sm:$0xff] }
 0x661   :  { %7678 = vmatprep.subr.bf16.mxu0 %v9830_v3  ;;  %v14555_v3 = vpack.c.bf16 %v14553_v2, %v14554_v10 }
 0x664   :  { %7679 = vmatpush1.bf16.msra.mxu0 %v9831_v30  ;;  %v14556_v30 = vld [vmem:[#allocation117_spill] sm:$0xff] }
 0x665   :  { %7680 = vmatprep.subr.bf16.mxu0 %v9832_v52  ;;  %v14557_v52 = vld [vmem:[#allocation118_spill] sm:$0xff] }
 0x666   :  { %v14558_v36 = vpack.c.bf16 %v14556_v30, %v14557_v52 }
 0x667   :  { %7556 = vmatmul.mubr.bf16.gmra.mrb[184].mxu0 %v14543_v17  ;;  %v14560_v17 = vld [vmem:[#allocation115_spill] sm:$0xff] }
 0x668   :  { %7565 = vmatprep.mubr.bf16.mxu0 %v14546_v39  ;;  %7681 = vmatpush1.bf16.msra.mxu0 %v9833_v46  ;;  %v14561_v7 = vpack.c.bf16 %v14559_v4, %v14560_v17  ;;  %v14563_v39 = vld [vmem:[#allocation122_spill] sm:$0xff] }
 0x669   :  { %7682 = vmatprep.subr.bf16.mxu0 %v9834_v42  ;;  %v14564_v46 = vpack.c.bf16 %v14562_v25, %v14563_v39 }
 0x66c   :  { %7683 = vmatpush1.bf16.msra.mxu0 %v9835_v21 }
 0x66d   :  { %7684 = vmatprep.subr.bf16.mxu0 %v9836_v44 }
 0x66f   :  { %7566 = vmatmul.mubr.bf16.gmra.mrb[188].mxu0 %v14549_v24 }
 0x670   :  { %7575 = vmatprep.mubr.bf16.mxu0 %v14552_v14  ;;  %7685 = vmatpush1.bf16.msra.mxu0 %v9837_v57 }
 0x671   :  { %7686 = vmatprep.subr.bf16.mxu0 %v9838_v47 }
 0x674   :  { %7687 = vmatpush1.bf16.msra.mxu0 %v9839_v43 }
 0x677   :  { %7576 = vmatmul.mubr.bf16.gmra.mrb[192].mxu0 %v14555_v3 }
 0x678   :  { %7585 = vmatprep.mubr.bf16.mxu0 %v14558_v36 }
 0x67f   :  { %7586 = vmatmul.mubr.bf16.gmra.mrb[196].mxu0 %v14561_v7 }
 0x680   :  { %7595 = vmatprep.mubr.bf16.mxu0 %v14564_v46 }
 0x687   :  { %7596 = vmatmul.mubr.bf16.gmra.mrb[200].mxu0 %v6253_v49  ;;  %v14568_v49 = vpack.c.bf16 %v14566_v38, %v14567_v58  ;;  %v6425_v38 = vld [vmem:[%s13752_s10] sm:$0x3]  ;;  %v14582_v58 = vld [vmem:[#allocation20_spill] sm:$0xff]  ;;  %s10019_s10 = smov [#allocation13]  }
 0x688   :  { %7605 = vmatprep.mubr.bf16.mxu0 %v6262_v16  ;;  %s7982_s28 = sshll.u32 %s10019_s10, 4  ;;  %s7983_s28 = int_to_ptr.vmem [resolvable:$true] %s7982_s28 }
 0x689   :  { %s9972_s29 = scalar_lea.vmem %s7983_s28, 8192  ;;  %p9977_p7 = scmp.lt.s32.totalorder %s7983_s28, %s7983_s28 }
 0x68a   :  { %p9973_p6 = scmp.ne.s32.totalorder %s7983_s28, %s9972_s29  ;;  %p9978_p8 = scmp.lt.s32.totalorder %s9972_s29, %s9972_s29 }
 0x68c   :  { %p9979_p9 = por %p9978_p8, %p9977_p7 }
 0x68e   :  { %p9980_p10 = pnand %p9979_p9, %p9973_p6 }
 0x68f   :  { %7606 = vmatmul.mubr.bf16.gmra.mrb[204].mxu0 %v6261_v6  ;;  %v14569_v6 = vld [vmem:[#allocation29_spill] sm:$0xff] }
 0x690   :  { %7615 = vmatprep.mubr.bf16.mxu0 %v6270_v5  ;;  %v14571_v23 = vpack.c.bf16 %v14569_v6, %v14570_v55  ;;  %v14573_v5 = vld [vmem:[#allocation75_spill] sm:$0xff]  ;;  %v14583_v6 = vld [vmem:[#allocation21_spill] sm:$0xff] }
 0x691   :  { %v14574_v29 = vpack.c.bf16 %v14572_v31, %v14573_v5  ;;  %v13613_v55 = vrot.slane %v6425_v38, %v14583_v6 }
 0x697   :  { %7616 = vmatmul.mubr.bf16.gmra.mrb[208].mxu0 %v6269_v50 }
 0x698   :  { %7625 = vmatprep.mubr.bf16.mxu0 %v6278_v34  ;;  %v14576_v34 = vld [vmem:[#allocation86_spill] sm:$0xff] }
 0x69f   :  { %7626 = vmatmul.mubr.bf16.gmra.mrb[212].mxu0 %v6277_v20  ;;  %v14577_v20 = vpack.c.bf16 %v14575_v41, %v14576_v34 }
 0x6a0   :  { %7635 = vmatprep.mubr.bf16.mxu0 %v6286_v26 }
 0x6a4   :  { %v13489_v48 = vpop.f32.mrb[64].mxu1 }
 0x6a5   :  { %v13491_v16 = vpop.f32.mrb[65].mxu1 }
 0x6a6   :  { %v13493_v12 = vpop.f32.mrb[66].mxu1 }
 0x6a7   :  { %7636 = vmatmul.mubr.bf16.gmra.mrb[216].mxu0 %v6285_v22  ;;  %v13495_v51 = vpop.f32.mrb[67].mxu1  ;;  %v14579_v22 = vpack.c.bf16 %v13345_v37, %v13339_v56 }
 0x6a8   :  { %7645 = vmatprep.mubr.bf16.mxu0 %v6294_v61 }
 0x6ac   :  { %v13503_v50 = vpop.f32.mrb[68].mxu1 }
 0x6ad   :  { %v13505_v62 = vpop.f32.mrb[69].mxu1 }
 0x6ae   :  { %v13507_v54 = vpop.f32.mrb[70].mxu1 }
 0x6af   :  { %7646 = vmatmul.mubr.bf16.gmra.mrb[220].mxu0 %v14565_v45  ;;  %v13509_v35 = vpop.f32.mrb[71].mxu1 }
 0x6b0   :  { %7688 = vmatprep.mubr.bf16.mxu0 %v14568_v49  ;;  %v13610_v49 = vrot.slane %v6425_v38, %v14582_v58 }
 0x6b7   :  { %7689 = vmatmul.mubr.bf16.vlgmr.msra.gmra.mrb[160].mxu0 %v14571_v23  ;;  %v13517_v40 = vpop.f32.mrb[72].mxu1 }
 0x6b8   :  { %7698 = vmatprep.mubr.bf16.mxu0 %v14574_v29  ;;  %v13519_v26 = vpop.f32.mrb[73].mxu1 }
 0x6b9   :  { %v13521_v19 = vpop.f32.mrb[74].mxu1 }
 0x6ba   :  { %v13523_v1 = vpop.f32.mrb[75].mxu1 }
 0x6bf   :  { %7699 = vmatmul.mubr.bf16.gmra.mrb[164].mxu0 %v14577_v20  ;;  %v13531_v18 = vpop.f32.mrb[76].mxu1 }
 0x6c0   :  { %7708 = vmatprep.mubr.bf16.mxu0 %v14578_v33  ;;  %v13533_v8 = vpop.f32.mrb[77].mxu1 }
 0x6c1   :  { %v13535_v61 = vpop.f32.mrb[78].mxu1 }
 0x6c2   :  { %v13537_v53 = vpop.f32.mrb[79].mxu1 }
 0x6c7   :  { %7709 = vmatmul.mubr.bf16.gmra.mrb[168].mxu0 %v14579_v22  ;;  %v13542_v60 = vpop.f32.mrb[80].mxu1 }
 0x6c8   :  { %7718 = vmatprep.mubr.bf16.mxu0 %v14580_v0  ;;  %v13544_v56 = vpop.f32.mrb[81].mxu1 }
 0x6c9   :  { %v13546_v37 = vpop.f32.mrb[82].mxu1 }
 0x6ca   :  { %v13548_v13 = vpop.f32.mrb[83].mxu1 }
 0x6cf   :  { %7719 = vmatmul.mubr.bf16.gmra.mrb[172].mxu0 %v14581_v28  ;;  %v13550_v9 = vpop.f32.mrb[84].mxu1 }
 0x6d0   :  { %v13552_v42 = vpop.f32.mrb[85].mxu1 }
 0x6d1   :  { %v13554_v21 = vpop.f32.mrb[86].mxu1 }
 0x6d2   :  { %v13556_v44 = vpop.f32.mrb[87].mxu1 }
 0x6d8   :  { %v13558_v27 = vpop.f32.mrb[88].mxu1 }
 0x6d9   :  { %v13560_v63 = vpop.f32.mrb[89].mxu1 }
 0x6da   :  { %v13562_v11 = vpop.f32.mrb[90].mxu1 }
 0x6db   :  { %v13564_v32 = vpop.f32.mrb[91].mxu1 }
 0x6e0   :  { %v13566_v24 = vpop.f32.mrb[92].mxu1 }
 0x6e1   :  { %v13568_v15 = vpop.f32.mrb[93].mxu1 }
 0x6e2   :  { %v13570_v59 = vpop.f32.mrb[94].mxu1 }
 0x6e3   :  { %v13572_v14 = vpop.f32.mrb[95].mxu1 }
 0x6e8   :  { %v13574_v57 = vpop.f32.mrb[96].mxu1 }
 0x6e9   :  { %v13576_v47 = vpop.f32.mrb[97].mxu1 }
 0x6ea   :  { %v13578_v43 = vpop.f32.mrb[98].mxu1 }
 0x6eb   :  { %v13580_v2 = vpop.f32.mrb[99].mxu1 }
 0x6f0   :  { %v13582_v10 = vpop.f32.mrb[100].mxu1 }
 0x6f1   :  { %v13584_v3 = vpop.f32.mrb[101].mxu1 }
 0x6f2   :  { %v13586_v30 = vpop.f32.mrb[102].mxu1 }
 0x6f3   :  { %v13588_v52 = vpop.f32.mrb[103].mxu1 }
 0x6f9   :  { %v13590_v36 = vpop.f32.mrb[104].mxu1 }
 0x6fa   :  { %v13592_v4 = vpop.f32.mrb[105].mxu1 }
 0x6fb   :  { %v13594_v17 = vpop.f32.mrb[106].mxu1 }
 0x6fc   :  { %v13596_v7 = vpop.f32.mrb[107].mxu1 }
 0x701   :  { %v13598_v25 = vpop.f32.mrb[108].mxu1 }
 0x702   :  { %v13600_v39 = vpop.f32.mrb[109].mxu1 }
 0x703   :  { %v13602_v46 = vpop.f32.mrb[110].mxu1 }
 0x704   :  { %v13604_v45 = vpop.f32.mrb[111].mxu1 }
 0x72a   :  { %v7537_v23 = vpop.f32.mrb[176].mxu0 }
 0x72b   :  { %v8846_v31 = vadd.f32 %v7537_v23, %v13610_v49  ;;  %v7539_v5 = vpop.f32.mrb[177].mxu0 }
 0x72c   :  { %v8848_v29 = vadd.f32 %v7539_v5, %v13613_v55  ;;  %v7541_v41 = vpop.f32.mrb[178].mxu0 }
 0x72d   :  { %v8847_v34 = vadd.f32 %v8846_v31, %v13489_v48  ;;  %v8850_v20 = vadd.f32 %v7541_v41, %v13610_v49  ;;  %v7543_v33 = vpop.f32.mrb[179].mxu0 }
 0x72e   :  { %v8849_v22 = vadd.f32 %v8848_v29, %v13491_v16  ;;  %v8852_v0 = vadd.f32 %v7543_v33, %v13613_v55 }
 0x72f   :  { %9678 = vtanh.f32 %v8847_v34  ;;  %v8851_v28 = vadd.f32 %v8850_v20, %v13493_v12 }
 0x730   :  { %9680 = vtanh.f32 %v8849_v22  ;;  %v8853_v38 = vadd.f32 %v8852_v0, %v13495_v51 }
 0x731   :  { %9682 = vtanh.f32 %v8851_v28 }
 0x732   :  { %9684 = vtanh.f32 %v8853_v38  ;;  %v7547_v58 = vpop.f32.mrb[180].mxu0 }
 0x733   :  { %v8854_v6 = vadd.f32 %v7547_v58, %v13610_v49  ;;  %v7549_v23 = vpop.f32.mrb[181].mxu0 }
 0x734   :  { %v8856_v48 = vadd.f32 %v7549_v23, %v13613_v55  ;;  %v7551_v31 = vpop.f32.mrb[182].mxu0 }
 0x735   :  { %v8855_v5 = vadd.f32 %v8854_v6, %v13503_v50  ;;  %v8858_v16 = vadd.f32 %v7551_v31, %v13610_v49  ;;  %v7553_v29 = vpop.f32.mrb[183].mxu0 }
 0x736   :  { %v8857_v41 = vadd.f32 %v8856_v48, %v13505_v62  ;;  %v8860_v12 = vadd.f32 %v7553_v29, %v13613_v55 }
 0x737   :  { %9686 = vtanh.f32 %v8855_v5  ;;  %v8859_v51 = vadd.f32 %v8858_v16, %v13507_v54 }
 0x738   :  { %9688 = vtanh.f32 %v8857_v41  ;;  %v8861_v34 = vadd.f32 %v8860_v12, %v13509_v35 }
 0x739   :  { %v9679_v20 = vpop.eup %9678  ;;  %9690 = vtanh.f32 %v8859_v51 }
 0x73a   :  { %v9681_v33 = vpop.eup %9680  ;;  %7929 = vst [vmem:[#allocation13 + $0x80] sm:$0xff] %v9679_v20  ;;  %9692 = vtanh.f32 %v8861_v34  ;;  %v7557_v22 = vpop.f32.mrb[184].mxu0 }
 0x73b   :  { %v9683_v50 = vpop.eup %9682  ;;  %7930 = vst [vmem:[#allocation13 + $0x88] sm:$0xff] %v9681_v33  ;;  %v8862_v0 = vadd.f32 %v7557_v22, %v13610_v49  ;;  %v7559_v28 = vpop.f32.mrb[185].mxu0 }
 0x73c   :  { %v9685_v62 = vpop.eup %9684  ;;  %7931 = vst [vmem:[#allocation13 + $0x90] sm:$0xff] %v9683_v50  ;;  %v8864_v38 = vadd.f32 %v7559_v28, %v13613_v55  ;;  %v7561_v58 = vpop.f32.mrb[186].mxu0 }
 0x73d   :  { %7932 = vst [vmem:[#allocation13 + $0x98] sm:$0xff] %v9685_v62  ;;  %v8863_v54 = vadd.f32 %v8862_v0, %v13517_v40  ;;  %v8866_v35 = vadd.f32 %v7561_v58, %v13610_v49  ;;  %v7563_v6 = vpop.f32.mrb[187].mxu0 }
 0x73e   :  { %v8865_v23 = vadd.f32 %v8864_v38, %v13519_v26  ;;  %v8868_v48 = vadd.f32 %v7563_v6, %v13613_v55 }
 0x73f   :  { %9694 = vtanh.f32 %v8863_v54  ;;  %v8867_v31 = vadd.f32 %v8866_v35, %v13521_v19 }
 0x740   :  { %9696 = vtanh.f32 %v8865_v23  ;;  %v8869_v5 = vadd.f32 %v8868_v48, %v13523_v1 }
 0x741   :  { %v9687_v16 = vpop.eup %9686  ;;  %9698 = vtanh.f32 %v8867_v31 }
 0x742   :  { %v9689_v29 = vpop.eup %9688  ;;  %7933 = vst [vmem:[#allocation13 + $0xa0] sm:$0xff] %v9687_v16  ;;  %9700 = vtanh.f32 %v8869_v5  ;;  %v7567_v41 = vpop.f32.mrb[188].mxu0 }
 0x743   :  { %v9691_v40 = vpop.eup %9690  ;;  %7934 = vst [vmem:[#allocation13 + $0xa8] sm:$0xff] %v9689_v29  ;;  %v8870_v12 = vadd.f32 %v7567_v41, %v13610_v49  ;;  %v7569_v51 = vpop.f32.mrb[189].mxu0 }
 0x744   :  { %v9693_v26 = vpop.eup %9692  ;;  %7935 = vst [vmem:[#allocation13 + $0xb0] sm:$0xff] %v9691_v40  ;;  %v8872_v34 = vadd.f32 %v7569_v51, %v13613_v55  ;;  %v7571_v20 = vpop.f32.mrb[190].mxu0 }
 0x745   :  { %7936 = vst [vmem:[#allocation13 + $0xb8] sm:$0xff] %v9693_v26  ;;  %v8871_v19 = vadd.f32 %v8870_v12, %v13531_v18  ;;  %v8874_v1 = vadd.f32 %v7571_v20, %v13610_v49  ;;  %v7573_v33 = vpop.f32.mrb[191].mxu0 }
 0x746   :  { %v8873_v22 = vadd.f32 %v8872_v34, %v13533_v8  ;;  %v8876_v50 = vadd.f32 %v7573_v33, %v13613_v55 }
 0x747   :  { %9702 = vtanh.f32 %v8871_v19  ;;  %v8875_v0 = vadd.f32 %v8874_v1, %v13535_v61 }
 0x748   :  { %9704 = vtanh.f32 %v8873_v22  ;;  %v8877_v28 = vadd.f32 %v8876_v50, %v13537_v53 }
 0x749   :  { %v9695_v62 = vpop.eup %9694  ;;  %9706 = vtanh.f32 %v8875_v0 }
 0x74a   :  { %v9697_v38 = vpop.eup %9696  ;;  %7937 = vst [vmem:[#allocation13 + $0xc0] sm:$0xff] %v9695_v62  ;;  %9708 = vtanh.f32 %v8877_v28  ;;  %v7577_v58 = vpop.f32.mrb[192].mxu0 }
 0x74b   :  { %v9699_v18 = vpop.eup %9698  ;;  %7938 = vst [vmem:[#allocation13 + $0xc8] sm:$0xff] %v9697_v38  ;;  %v8878_v54 = vadd.f32 %v7577_v58, %v13610_v49  ;;  %v7579_v35 = vpop.f32.mrb[193].mxu0 }
 0x74c   :  { %v9701_v8 = vpop.eup %9700  ;;  %7939 = vst [vmem:[#allocation13 + $0xd0] sm:$0xff] %v9699_v18  ;;  %v8880_v6 = vadd.f32 %v7579_v35, %v13613_v55  ;;  %v7581_v23 = vpop.f32.mrb[194].mxu0 }
 0x74d   :  { %7940 = vst [vmem:[#allocation13 + $0xd8] sm:$0xff] %v9701_v8  ;;  %v8879_v61 = vadd.f32 %v8878_v54, %v13542_v60  ;;  %v8882_v53 = vadd.f32 %v7581_v23, %v13610_v49  ;;  %v7583_v48 = vpop.f32.mrb[195].mxu0 }
 0x74e   :  { %v8881_v31 = vadd.f32 %v8880_v6, %v13544_v56  ;;  %v8884_v5 = vadd.f32 %v7583_v48, %v13613_v55 }
 0x74f   :  { %9710 = vtanh.f32 %v8879_v61  ;;  %v8883_v16 = vadd.f32 %v8882_v53, %v13546_v37 }
 0x750   :  { %9712 = vtanh.f32 %v8881_v31  ;;  %v8885_v29 = vadd.f32 %v8884_v5, %v13548_v13 }
 0x751   :  { %v9703_v41 = vpop.eup %9702  ;;  %9714 = vtanh.f32 %v8883_v16 }
 0x752   :  { %v9705_v40 = vpop.eup %9704  ;;  %7941 = vst [vmem:[#allocation13 + $0xe0] sm:$0xff] %v9703_v41  ;;  %9716 = vtanh.f32 %v8885_v29  ;;  %v7587_v12 = vpop.f32.mrb[196].mxu0 }
 0x753   :  { %v9707_v60 = vpop.eup %9706  ;;  %7942 = vst [vmem:[#allocation13 + $0xe8] sm:$0xff] %v9705_v40  ;;  %v8886_v51 = vadd.f32 %v7587_v12, %v13610_v49  ;;  %v7589_v26 = vpop.f32.mrb[197].mxu0 }
 0x754   :  { %v9709_v56 = vpop.eup %9708  ;;  %7943 = vst [vmem:[#allocation13 + $0xf0] sm:$0xff] %v9707_v60  ;;  %v8888_v34 = vadd.f32 %v7589_v26, %v13613_v55  ;;  %v7591_v20 = vpop.f32.mrb[198].mxu0 }
 0x755   :  { %7944 = vst [vmem:[#allocation13 + $0xf8] sm:$0xff] %v9709_v56  ;;  %v8887_v37 = vadd.f32 %v8886_v51, %v13550_v9  ;;  %v8890_v13 = vadd.f32 %v7591_v20, %v13610_v49  ;;  %v7593_v19 = vpop.f32.mrb[199].mxu0 }
 0x756   :  { %v8889_v1 = vadd.f32 %v8888_v34, %v13552_v42  ;;  %v8892_v33 = vadd.f32 %v7593_v19, %v13613_v55 }
 0x757   :  { %9718 = vtanh.f32 %v8887_v37  ;;  %v8891_v22 = vadd.f32 %v8890_v13, %v13554_v21 }
 0x758   :  { %9720 = vtanh.f32 %v8889_v1  ;;  %v8893_v50 = vadd.f32 %v8892_v33, %v13556_v44 }
 0x759   :  { %v9711_v0 = vpop.eup %9710  ;;  %9722 = vtanh.f32 %v8891_v22 }
 0x75a   :  { %v9713_v28 = vpop.eup %9712  ;;  %7945 = vst [vmem:[#allocation13 + $0x100] sm:$0xff] %v9711_v0  ;;  %9724 = vtanh.f32 %v8893_v50  ;;  %v7597_v62 = vpop.f32.mrb[200].mxu0 }
 0x75b   :  { %v9715_v9 = vpop.eup %9714  ;;  %7946 = vst [vmem:[#allocation13 + $0x108] sm:$0xff] %v9713_v28  ;;  %v8894_v38 = vadd.f32 %v7597_v62, %v13610_v49  ;;  %v7599_v58 = vpop.f32.mrb[201].mxu0 }
 0x75c   :  { %v9717_v42 = vpop.eup %9716  ;;  %7947 = vst [vmem:[#allocation13 + $0x110] sm:$0xff] %v9715_v9  ;;  %v8896_v18 = vadd.f32 %v7599_v58, %v13613_v55  ;;  %v7601_v54 = vpop.f32.mrb[202].mxu0 }
 0x75d   :  { %7948 = vst [vmem:[#allocation13 + $0x118] sm:$0xff] %v9717_v42  ;;  %v8895_v21 = vadd.f32 %v8894_v38, %v13558_v27  ;;  %v8898_v44 = vadd.f32 %v7601_v54, %v13610_v49  ;;  %v7603_v35 = vpop.f32.mrb[203].mxu0 }
 0x75e   :  { %v8897_v8 = vadd.f32 %v8896_v18, %v13560_v63  ;;  %v8900_v6 = vadd.f32 %v7603_v35, %v13613_v55 }
 0x75f   :  { %9726 = vtanh.f32 %v8895_v21  ;;  %v8899_v23 = vadd.f32 %v8898_v44, %v13562_v11 }
 0x760   :  { %9728 = vtanh.f32 %v8897_v8  ;;  %v8901_v61 = vadd.f32 %v8900_v6, %v13564_v32 }
 0x761   :  { %v9719_v53 = vpop.eup %9718  ;;  %9730 = vtanh.f32 %v8899_v23 }
 0x762   :  { %v9721_v48 = vpop.eup %9720  ;;  %7949 = vst [vmem:[#allocation13 + $0x120] sm:$0xff] %v9719_v53  ;;  %9732 = vtanh.f32 %v8901_v61  ;;  %v7607_v31 = vpop.f32.mrb[204].mxu0 }
 0x763   :  { %v9723_v27 = vpop.eup %9722  ;;  %7950 = vst [vmem:[#allocation13 + $0x128] sm:$0xff] %v9721_v48  ;;  %v8902_v5 = vadd.f32 %v7607_v31, %v13610_v49  ;;  %v7609_v16 = vpop.f32.mrb[205].mxu0 }
 0x764   :  { %v9725_v63 = vpop.eup %9724  ;;  %7951 = vst [vmem:[#allocation13 + $0x130] sm:$0xff] %v9723_v27  ;;  %v8904_v29 = vadd.f32 %v7609_v16, %v13613_v55  ;;  %v7611_v41 = vpop.f32.mrb[206].mxu0 }
 0x765   :  { %7952 = vst [vmem:[#allocation13 + $0x138] sm:$0xff] %v9725_v63  ;;  %v8903_v11 = vadd.f32 %v8902_v5, %v13566_v24  ;;  %v8906_v32 = vadd.f32 %v7611_v41, %v13610_v49  ;;  %v7613_v40 = vpop.f32.mrb[207].mxu0 }
 0x766   :  { %v8905_v12 = vadd.f32 %v8904_v29, %v13568_v15  ;;  %v8908_v60 = vadd.f32 %v7613_v40, %v13613_v55 }
 0x767   :  { %9734 = vtanh.f32 %v8903_v11  ;;  %v8907_v51 = vadd.f32 %v8906_v32, %v13570_v59 }
 0x768   :  { %9736 = vtanh.f32 %v8905_v12  ;;  %v8909_v26 = vadd.f32 %v8908_v60, %v13572_v14 }
 0x769   :  { %v9727_v56 = vpop.eup %9726  ;;  %9738 = vtanh.f32 %v8907_v51 }
 0x76a   :  { %v9729_v34 = vpop.eup %9728  ;;  %7953 = vst [vmem:[#allocation13 + $0x140] sm:$0xff] %v9727_v56  ;;  %9740 = vtanh.f32 %v8909_v26  ;;  %v7617_v20 = vpop.f32.mrb[208].mxu0 }
 0x76b   :  { %v9731_v24 = vpop.eup %9730  ;;  %7954 = vst [vmem:[#allocation13 + $0x148] sm:$0xff] %v9729_v34  ;;  %v8910_v37 = vadd.f32 %v7617_v20, %v13610_v49  ;;  %v7619_v13 = vpop.f32.mrb[209].mxu0 }
 0x76c   :  { %v9733_v15 = vpop.eup %9732  ;;  %7955 = vst [vmem:[#allocation13 + $0x150] sm:$0xff] %v9731_v24  ;;  %v8912_v19 = vadd.f32 %v7619_v13, %v13613_v55  ;;  %v7621_v1 = vpop.f32.mrb[210].mxu0 }
 0x76d   :  { %7956 = vst [vmem:[#allocation13 + $0x158] sm:$0xff] %v9733_v15  ;;  %v8911_v59 = vadd.f32 %v8910_v37, %v13574_v57  ;;  %v8914_v14 = vadd.f32 %v7621_v1, %v13610_v49  ;;  %v7623_v33 = vpop.f32.mrb[211].mxu0 }
 0x76e   :  { %v8913_v22 = vadd.f32 %v8912_v19, %v13576_v47  ;;  %v8916_v50 = vadd.f32 %v7623_v33, %v13613_v55 }
 0x76f   :  { %9742 = vtanh.f32 %v8911_v59  ;;  %v8915_v0 = vadd.f32 %v8914_v14, %v13578_v43 }
 0x770   :  { %9744 = vtanh.f32 %v8913_v22  ;;  %v8917_v28 = vadd.f32 %v8916_v50, %v13580_v2 }
 0x771   :  { %v9735_v62 = vpop.eup %9734  ;;  %9746 = vtanh.f32 %v8915_v0 }
 0x772   :  { %v9737_v9 = vpop.eup %9736  ;;  %7957 = vst [vmem:[#allocation13 + $0x160] sm:$0xff] %v9735_v62  ;;  %9748 = vtanh.f32 %v8917_v28  ;;  %v7627_v38 = vpop.f32.mrb[212].mxu0 }
 0x773   :  { %v9739_v57 = vpop.eup %9738  ;;  %7958 = vst [vmem:[#allocation13 + $0x168] sm:$0xff] %v9737_v9  ;;  %v8918_v58 = vadd.f32 %v7627_v38, %v13610_v49  ;;  %v7629_v42 = vpop.f32.mrb[213].mxu0 }
 0x774   :  { %v9741_v47 = vpop.eup %9740  ;;  %7959 = vst [vmem:[#allocation13 + $0x170] sm:$0xff] %v9739_v57  ;;  %v8920_v18 = vadd.f32 %v7629_v42, %v13613_v55  ;;  %v7631_v54 = vpop.f32.mrb[214].mxu0 }
 0x775   :  { %7960 = vst [vmem:[#allocation13 + $0x178] sm:$0xff] %v9741_v47  ;;  %v8919_v43 = vadd.f32 %v8918_v58, %v13582_v10  ;;  %v8922_v2 = vadd.f32 %v7631_v54, %v13610_v49  ;;  %v7633_v21 = vpop.f32.mrb[215].mxu0 }
 0x776   :  { %v8921_v44 = vadd.f32 %v8920_v18, %v13584_v3  ;;  %v8924_v35 = vadd.f32 %v7633_v21, %v13613_v55 }
 0x777   :  { %9750 = vtanh.f32 %v8919_v43  ;;  %v8923_v8 = vadd.f32 %v8922_v2, %v13586_v30 }
 0x778   :  { %9752 = vtanh.f32 %v8921_v44  ;;  %v8925_v6 = vadd.f32 %v8924_v35, %v13588_v52 }
 0x779   :  { %v9743_v23 = vpop.eup %9742  ;;  %9754 = vtanh.f32 %v8923_v8 }
 0x77a   :  { %v9745_v61 = vpop.eup %9744  ;;  %7961 = vst [vmem:[#allocation13 + $0x180] sm:$0xff] %v9743_v23  ;;  %9756 = vtanh.f32 %v8925_v6  ;;  %v7637_v53 = vpop.f32.mrb[216].mxu0 }
 0x77b   :  { %v9747_v10 = vpop.eup %9746  ;;  %7962 = vst [vmem:[#allocation13 + $0x188] sm:$0xff] %v9745_v61  ;;  %v8926_v48 = vadd.f32 %v7637_v53, %v13610_v49  ;;  %v7639_v31 = vpop.f32.mrb[217].mxu0 }
 0x77c   :  { %v9749_v3 = vpop.eup %9748  ;;  %7963 = vst [vmem:[#allocation13 + $0x190] sm:$0xff] %v9747_v10  ;;  %v8928_v27 = vadd.f32 %v7639_v31, %v13613_v55  ;;  %v7641_v5 = vpop.f32.mrb[218].mxu0 }
 0x77d   :  { %7964 = vst [vmem:[#allocation13 + $0x198] sm:$0xff] %v9749_v3  ;;  %v8927_v30 = vadd.f32 %v8926_v48, %v13590_v36  ;;  %v8930_v52 = vadd.f32 %v7641_v5, %v13610_v49  ;;  %v7643_v16 = vpop.f32.mrb[219].mxu0 }
 0x77e   :  { %v8929_v63 = vadd.f32 %v8928_v27, %v13592_v4  ;;  %v8932_v29 = vadd.f32 %v7643_v16, %v13613_v55 }
 0x77f   :  { %9758 = vtanh.f32 %v8927_v30  ;;  %v8931_v41 = vadd.f32 %v8930_v52, %v13594_v17 }
 0x780   :  { %9760 = vtanh.f32 %v8929_v63  ;;  %v8933_v11 = vadd.f32 %v8932_v29, %v13596_v7 }
 0x781   :  { %v9751_v32 = vpop.eup %9750  ;;  %9762 = vtanh.f32 %v8931_v41 }
 0x782   :  { %v9753_v40 = vpop.eup %9752  ;;  %7965 = vst [vmem:[#allocation13 + $0x1a0] sm:$0xff] %v9751_v32  ;;  %9764 = vtanh.f32 %v8933_v11  ;;  %v7647_v12 = vpop.f32.mrb[220].mxu0 }
 0x783   :  { %v9755_v36 = vpop.eup %9754  ;;  %7966 = vst [vmem:[#allocation13 + $0x1a8] sm:$0xff] %v9753_v40  ;;  %v8934_v60 = vadd.f32 %v7647_v12, %v13610_v49  ;;  %v7649_v51 = vpop.f32.mrb[221].mxu0 }
 0x784   :  { %v9757_v4 = vpop.eup %9756  ;;  %7967 = vst [vmem:[#allocation13 + $0x1b0] sm:$0xff] %v9755_v36  ;;  %v8936_v26 = vadd.f32 %v7649_v51, %v13613_v55  ;;  %v7651_v56 = vpop.f32.mrb[222].mxu0 }
 0x785   :  { %7968 = vst [vmem:[#allocation13 + $0x1b8] sm:$0xff] %v9757_v4  ;;  %v8935_v17 = vadd.f32 %v8934_v60, %v13598_v25  ;;  %v8938_v7 = vadd.f32 %v7651_v56, %v13610_v49  ;;  %v7653_v34 = vpop.f32.mrb[223].mxu0 }
 0x786   :  { %v8937_v20 = vadd.f32 %v8936_v26, %v13600_v39  ;;  %v8940_v24 = vadd.f32 %v7653_v34, %v13613_v55 }
 0x787   :  { %9766 = vtanh.f32 %v8935_v17  ;;  %v8939_v37 = vadd.f32 %v8938_v7, %v13602_v46 }
 0x788   :  { %9768 = vtanh.f32 %v8937_v20  ;;  %v8941_v13 = vadd.f32 %v8940_v24, %v13604_v45 }
 0x789   :  { %v9759_v15 = vpop.eup %9758  ;;  %9770 = vtanh.f32 %v8939_v37 }
 0x78a   :  { %v9761_v19 = vpop.eup %9760  ;;  %7969 = vst [vmem:[#allocation13 + $0x1c0] sm:$0xff] %v9759_v15  ;;  %9772 = vtanh.f32 %v8941_v13  ;;  %v7690_v1 = vpop.f32.mrb[160].mxu0 }
 0x78b   :  { %v9763_v25 = vpop.eup %9762  ;;  %7970 = vst [vmem:[#allocation13 + $0x1c8] sm:$0xff] %v9761_v19  ;;  %v8830_v59 = vadd.f32 %v7690_v1, %v13610_v49  ;;  %v7692_v14 = vpop.f32.mrb[161].mxu0 }
 0x78c   :  { %v9765_v39 = vpop.eup %9764  ;;  %7971 = vst [vmem:[#allocation13 + $0x1d0] sm:$0xff] %v9763_v25  ;;  %v8831_v33 = vadd.f32 %v7692_v14, %v13613_v55  ;;  %v7694_v22 = vpop.f32.mrb[162].mxu0 }
 0x78d   :  { %7972 = vst [vmem:[#allocation13 + $0x1d8] sm:$0xff] %v9765_v39  ;;  %9774 = vtanh.f32 %v8830_v59  ;;  %v8832_v46 = vadd.f32 %v7694_v22, %v13610_v49  ;;  %v7696_v45 = vpop.f32.mrb[163].mxu0 }
 0x78e   :  { %9776 = vtanh.f32 %v8831_v33  ;;  %v8833_v50 = vadd.f32 %v7696_v45, %v13613_v55 }
 0x78f   :  { %9778 = vtanh.f32 %v8832_v46 }
 0x790   :  { %9780 = vtanh.f32 %v8833_v50 }
 0x791   :  { %v9767_v0 = vpop.eup %9766 }
 0x792   :  { %v9769_v28 = vpop.eup %9768  ;;  %7973 = vst [vmem:[#allocation13 + $0x1e0] sm:$0xff] %v9767_v0  ;;  %v7700_v62 = vpop.f32.mrb[164].mxu0 }
 0x793   :  { %v9771_v9 = vpop.eup %9770  ;;  %7974 = vst [vmem:[#allocation13 + $0x1e8] sm:$0xff] %v9769_v28  ;;  %v8834_v38 = vadd.f32 %v7700_v62, %v13610_v49  ;;  %v7702_v57 = vpop.f32.mrb[165].mxu0 }
 0x794   :  { %v9773_v58 = vpop.eup %9772  ;;  %7975 = vst [vmem:[#allocation13 + $0x1f0] sm:$0xff] %v9771_v9  ;;  %v8835_v42 = vadd.f32 %v7702_v57, %v13613_v55  ;;  %v7704_v47 = vpop.f32.mrb[166].mxu0 }
 0x795   :  { %7976 = vst [vmem:[#allocation13 + $0x1f8] sm:$0xff] %v9773_v58  ;;  %9782 = vtanh.f32 %v8834_v38  ;;  %v8836_v18 = vadd.f32 %v7704_v47, %v13610_v49  ;;  %v7706_v54 = vpop.f32.mrb[167].mxu0 }
 0x796   :  { %9784 = vtanh.f32 %v8835_v42  ;;  %v8837_v43 = vadd.f32 %v7706_v54, %v13613_v55 }
 0x797   :  { %v9775_v2 = vpop.eup %9774  ;;  %9786 = vtanh.f32 %v8836_v18 }
 0x798   :  { %v9777_v21 = vpop.eup %9776  ;;  %7913 = vst [vmem:[#allocation13] sm:$0xff] %v9775_v2  ;;  %9788 = vtanh.f32 %v8837_v43 }
 0x799   :  { %v9779_v44 = vpop.eup %9778  ;;  %7914 = vst [vmem:[#allocation13 + $0x8] sm:$0xff] %v9777_v21 }
 0x79a   :  { %v9781_v35 = vpop.eup %9780  ;;  %7915 = vst [vmem:[#allocation13 + $0x10] sm:$0xff] %v9779_v44  ;;  %v7710_v8 = vpop.f32.mrb[168].mxu0 }
 0x79b   :  { %7916 = vst [vmem:[#allocation13 + $0x18] sm:$0xff] %v9781_v35  ;;  %v8838_v6 = vadd.f32 %v7710_v8, %v13610_v49  ;;  %v7712_v23 = vpop.f32.mrb[169].mxu0 }
 0x79c   :  { %v8839_v61 = vadd.f32 %v7712_v23, %v13613_v55  ;;  %v7714_v53 = vpop.f32.mrb[170].mxu0 }
 0x79d   :  { %9790 = vtanh.f32 %v8838_v6  ;;  %v8840_v10 = vadd.f32 %v7714_v53, %v13610_v49  ;;  %v7716_v48 = vpop.f32.mrb[171].mxu0 }
 0x79e   :  { %9792 = vtanh.f32 %v8839_v61  ;;  %v8841_v31 = vadd.f32 %v7716_v48, %v13613_v55 }
 0x79f   :  { %v9783_v3 = vpop.eup %9782  ;;  %9794 = vtanh.f32 %v8840_v10 }
 0x7a0   :  { %v9785_v27 = vpop.eup %9784  ;;  %7917 = vst [vmem:[#allocation13 + $0x20] sm:$0xff] %v9783_v3  ;;  %9796 = vtanh.f32 %v8841_v31 }
 0x7a1   :  { %v9787_v5 = vpop.eup %9786  ;;  %7918 = vst [vmem:[#allocation13 + $0x28] sm:$0xff] %v9785_v27 }
 0x7a2   :  { %v9789_v30 = vpop.eup %9788  ;;  %7919 = vst [vmem:[#allocation13 + $0x30] sm:$0xff] %v9787_v5  ;;  %v7720_v52 = vpop.f32.mrb[172].mxu0 }
 0x7a3   :  { %7920 = vst [vmem:[#allocation13 + $0x38] sm:$0xff] %v9789_v30  ;;  %v8842_v16 = vadd.f32 %v7720_v52, %v13610_v49  ;;  %v7722_v63 = vpop.f32.mrb[173].mxu0 }
 0x7a4   :  { %v8843_v29 = vadd.f32 %v7722_v63, %v13613_v55  ;;  %v7724_v41 = vpop.f32.mrb[174].mxu0 }
 0x7a5   :  { %9798 = vtanh.f32 %v8842_v16  ;;  %v8844_v11 = vadd.f32 %v7724_v41, %v13610_v49  ;;  %v7726_v32 = vpop.f32.mrb[175].mxu0 }
 0x7a6   :  { %9800 = vtanh.f32 %v8843_v29  ;;  %v8845_v40 = vadd.f32 %v7726_v32, %v13613_v55 }
 0x7a7   :  { %v9791_v12 = vpop.eup %9790  ;;  %9802 = vtanh.f32 %v8844_v11 }
 0x7a8   :  { %v9793_v36 = vpop.eup %9792  ;;  %7921 = vst [vmem:[#allocation13 + $0x40] sm:$0xff] %v9791_v12  ;;  %9804 = vtanh.f32 %v8845_v40 }
 0x7a9   :  { %v9795_v60 = vpop.eup %9794  ;;  %7922 = vst [vmem:[#allocation13 + $0x48] sm:$0xff] %v9793_v36 }
 0x7aa   :  { %v9797_v51 = vpop.eup %9796  ;;  %7923 = vst [vmem:[#allocation13 + $0x50] sm:$0xff] %v9795_v60 }
 0x7ab   :  { %7924 = vst [vmem:[#allocation13 + $0x58] sm:$0xff] %v9797_v51 }
 0x7af   :  { %v9799_v4 = vpop.eup %9798 }
 0x7b0   :  { %v9801_v26 = vpop.eup %9800  ;;  %7925 = vst [vmem:[#allocation13 + $0x60] sm:$0xff] %v9799_v4 }
 0x7b1   :  { %v9803_v49 = vpop.eup %9802  ;;  %7926 = vst [vmem:[#allocation13 + $0x68] sm:$0xff] %v9801_v26 }
 0x7b2   :  { %v9805_v56 = vpop.eup %9804  ;;  %7927 = vst [vmem:[#allocation13 + $0x70] sm:$0xff] %v9803_v49 }
 0x7b3   :  { %7928 = vst [vmem:[#allocation13 + $0x78] sm:$0xff] %v9805_v56 }
 0x7b4   :  { %9983 = shalt.err (!%p9980_p10)
}
 0x7b5   :  { %s9984_s0 = scalar_lea.hbm %s13753_s11, 8192 }
 0x7b6   :  { %p9985_p11 = scmp.ne.s32.totalorder %s13753_s11, %s9984_s0  ;;  %p9988_p12 = scmp.lt.u32.totalorder %s9984_s0, %s13753_s11 }
 0x7b8   :  { %p9990_p13 = pnand %p9988_p12, %p9985_p11 }
 0x7ba   :  { %9993 = shalt.err (!%p9990_p13)
}
 0x7bb   :  { %7988 = dma.vmem_to_hbm [thread:$0]  %s7983_s28, 8192, %s13753_s11, [#allocation4], %s10008_s1, %s10008_s1, %s10009_s18  }
 0x7bc   :  { %10002 = dma.done.wait [#allocation4], 8192  }
 0x7bd   :  { %10003 = vsyncadd [#allocation4], 4294959104 }
 0x7be   :  { %7992 = vsyncpa [#allocation3], 1 }
 0x7bf   :  { %7993 = vsyncpa [#allocation6], 1 }
 0x7c0   :  { %7994 = vsyncpa [#allocation9], 1 }
 0x7c1   :  { %7995 = vsyncpa [#allocation12], 1 }
 0x7c2   :  { %7996 = vsyncpa [#allocation4], 1 }

</bundles_post_ra>
